<compile_context>
chip_gen: v6e
topology: v6e:2x2x1
jax: 0.10.0
libtpu: 0.0.40
codegen_flags: <defaults>
</compile_context>

<pallas_src>
import jax
import jax.numpy as jnp
from jax.experimental import pallas as pl
from jax.experimental.pallas import tpu as pltpu

KSIZE = 7   # spatial-attention conv kernel size
PAD = 3     # padding for kernel_size=7


def _make_cbam_kernel(H, W):
    HW = H * W

    def kernel(x_ref, w1_ref, w2_ref, wsp_ref, o_ref,
               pad_scr, row_scr, rolled_scr, acc_scr):
        Nb, C, _ = x_ref.shape
        xb = x_ref[...].astype(jnp.float32)               # (Nb, C, HW)

        # ---------------- Channel attention ----------------
        # single-pass lane reductions over the dense HW axis
        avg = jnp.sum(xb, axis=2) * (1.0 / HW)            # (Nb, C)
        mx = jnp.max(xb, axis=2)                          # (Nb, C)
        pooled = jnp.concatenate([avg, mx], axis=0)       # (2Nb, C)

        # shared MLP on the VPU (dims are tiny; the MXU would be mostly drain)
        w1 = w1_ref[...].astype(jnp.float32)              # (Cr, C)
        w2 = w2_ref[...].astype(jnp.float32)              # (C, Cr)
        hid = jnp.maximum(
            jnp.sum(pooled[:, None, :] * w1[None, :, :], axis=2), 0.0)   # (2Nb, Cr)
        mlp = jnp.sum(hid[:, None, :] * w2[None, :, :], axis=2)          # (2Nb, C)
        ca = jax.nn.sigmoid(mlp[:Nb] + mlp[Nb:])          # (Nb, C)

        # channel-attended activations, only used to form the two spatial maps
        y = xb * ca[:, :, None]                           # (Nb, C, HW)
        row_scr[0] = jnp.mean(y, axis=1)                  # channel-mean map (Nb, HW)
        row_scr[1] = jnp.max(y, axis=1)                   # channel-max  map (Nb, HW)

        # ---------------- Spatial attention ----------------
        # Scatter the two flat maps into a zeroed, tile-aligned padded scratch
        # (2, Nb, Hp, 128): interior at rows PAD..PAD+H-1, lanes PAD..PAD+W-1.
        pad_scr[...] = jnp.zeros_like(pad_scr)
        for c in range(2):
            for n in range(Nb):
                for i in range(H):
                    pad_scr[c, n, PAD + i, PAD:PAD + W] = \
                        row_scr[c, n, i * W:(i + 1) * W]

        # 7x7 cross-correlation (PyTorch Conv2d semantics), fully unrolled.
        # One lane roll per (channel, dj) moves the column shift off the per-tap
        # path; row shifts (di) are cheap sublane-offset window loads from VMEM.
        accs = [jnp.zeros((Nb, H, 128), jnp.float32) for _ in range(4)]
        t = 0
        for c in range(2):
            for dj in range(KSIZE):
                if dj > 0:
                    # shift columns left by dj; the wrapped lanes land in columns
                    # >= W + 2*PAD that are never read back.
                    rolled_scr[...] = pltpu.roll(pad_scr[c], 128 - dj, 2)
                for di in range(KSIZE):
                    w = wsp_ref[c * KSIZE * KSIZE + di * KSIZE + dj]   # SMEM scalar
                    win = (pad_scr[c, :, di:di + H, :] if dj == 0
                           else rolled_scr[:, di:di + H, :])           # (Nb, H, 128)
                    accs[t % 4] = accs[t % 4] + w * win
                    t += 1
        acc_scr[...] = (accs[0] + accs[1]) + (accs[2] + accs[3])       # (Nb, H, 128)

        # Gather the valid (H, W) window back into the lane-dense flat layout.
        for n in range(Nb):
            for i in range(H):
                row_scr[0, n, i * W:(i + 1) * W] = acc_scr[n, i, :W]
        sa = jax.nn.sigmoid(row_scr[0])                   # (Nb, HW)

        # Final fused pass: out = x * ca * sa (y is not kept live across the conv).
        o_ref[...] = (x_ref[...].astype(jnp.float32)
                      * ca[:, :, None]
                      * sa[:, None, :]).astype(o_ref.dtype)

    return kernel


def cbam(x, w1, w2, wsp, *, block_n=None):
    """x: (N,C,H,W); w1: (C//r, C); w2: (C, C//r); wsp: (1, 2, 7, 7)."""
    N, C, H, W = x.shape
    Cr = w1.shape[0]
    HW = H * W
    assert W + 2 * PAD <= 128, "spatial width too large for single-tile conv rows"
    if block_n is None:
        # Small default; size up for real workloads, bounded by VMEM
        # (~128 MiB on v5e/v6e, 64 MiB on v7x).
        block_n = 2 if N % 2 == 0 else 1
    assert N % block_n == 0
    Hp = ((H + 2 * PAD + 7) // 8) * 8                     # sublane-aligned pad height

    x_flat = x.reshape(N, C, HW)                          # lane-dense layout
    wsp_flat = wsp.reshape(-1)                            # (2*7*7,) for SMEM

    out_flat = pl.pallas_call(
        _make_cbam_kernel(H, W),
        out_shape=jax.ShapeDtypeStruct((N, C, HW), x.dtype),
        grid=(N // block_n,),
        in_specs=[
            pl.BlockSpec((block_n, C, HW), lambda n: (n, 0, 0)),
            pl.BlockSpec((Cr, C), lambda n: (0, 0)),
            pl.BlockSpec((C, Cr), lambda n: (0, 0)),
            pl.BlockSpec(memory_space=pltpu.MemorySpace.SMEM),
        ],
        out_specs=pl.BlockSpec((block_n, C, HW), lambda n: (n, 0, 0)),
        scratch_shapes=[
            pltpu.VMEM((2, block_n, Hp, 128), jnp.float32),   # padded conv inputs
            pltpu.VMEM((2, block_n, HW), jnp.float32),        # flat avg/max + sa maps
            pltpu.VMEM((block_n, Hp, 128), jnp.float32),      # lane-rolled copy
            pltpu.VMEM((block_n, H, 128), jnp.float32),       # conv result
        ],
        compiler_params=pltpu.CompilerParams(
            dimension_semantics=("parallel",)),
    )(x_flat, w1, w2, wsp_flat)
    return out_flat.reshape(N, C, H, W)


def cbam_ref(x, w1, w2, wsp):
    """Pure-JAX reference matching the PyTorch module."""
    avg = jnp.mean(x, axis=(2, 3), keepdims=True)
    mx = jnp.max(x, axis=(2, 3), keepdims=True)

    def mlp(v):
        h = jax.nn.relu(jnp.einsum('oc,nchw->nohw', w1, v))
        return jnp.einsum('co,nohw->nchw', w2, h)

    ca = jax.nn.sigmoid(mlp(avg) + mlp(mx))
    y = x * ca
    avg_c = jnp.mean(y, axis=1, keepdims=True)
    max_c = jnp.max(y, axis=1, keepdims=True)
    s = jnp.concatenate([avg_c, max_c], axis=1)
    conv = jax.lax.conv_general_dilated(
        s, wsp, window_strides=(1, 1), padding=[(PAD, PAD), (PAD, PAD)],
        dimension_numbers=('NCHW', 'OIHW', 'NCHW'))
    sa = jax.nn.sigmoid(conv)
    return y * sa


if __name__ == "__main__":
    key = jax.random.PRNGKey(0)
    kx, k1, k2, k3 = jax.random.split(key, 4)

    N, C, H, W = 4, 32, 16, 16
    ratio = 8
    Cr = C // ratio

    x = jax.random.normal(kx, (N, C, H, W), dtype=jnp.float32)
    # deterministic synthetic parameters (shapes from the module __init__)
    w1 = jax.random.normal(k1, (Cr, C), dtype=jnp.float32) * 0.2      # fc1 weight
    w2 = jax.random.normal(k2, (C, Cr), dtype=jnp.float32) * 0.2      # fc2 weight
    wsp = jax.random.normal(k3, (1, 2, KSIZE, KSIZE), dtype=jnp.float32) * 0.1  # conv1

    out = jax.block_until_ready(cbam(x, w1, w2, wsp))

    ref = cbam_ref(x, w1, w2, wsp)
    assert out.shape == ref.shape
    err = float(jnp.max(jnp.abs(out - ref)))
    assert jnp.allclose(out, ref, atol=1e-4, rtol=1e-4), err

    print("KERNEL_OK")
</pallas_src>

<mosaic_0001>
module attributes {stable_mosaic.version = 11 : i64} {
  func.func @kernel(%arg0: i32, %arg1: memref<2x32x256xf32, #tpu.memory_space<vmem>>, %arg2: memref<4x32xf32, #tpu.memory_space<vmem>>, %arg3: memref<32x4xf32, #tpu.memory_space<vmem>>, %arg4: memref<98xf32, #tpu.memory_space<smem>>, %arg5: memref<2x32x256xf32, #tpu.memory_space<vmem>>, %arg6: memref<2x2x24x128xf32, #tpu.memory_space<vmem>>, %arg7: memref<2x2x256xf32, #tpu.memory_space<vmem>>, %arg8: memref<2x24x128xf32, #tpu.memory_space<vmem>>, %arg9: memref<2x16x128xf32, #tpu.memory_space<vmem>>) attributes {dimension_semantics = [#tpu.dimension_semantics<parallel>], iteration_bounds = array<i64: 2>, scalar_prefetch = 0 : i64, scratch_operands = 4 : i64, tpu.core_type = #tpu.core_type<tc>, window_params = [{transform_indices = @transform_0, window_bounds = array<i64: 2, 32, 256>}, {pipeline_mode = #tpu.pipeline_mode<synchronous>, transform_indices = @transform_1, window_bounds = array<i64: 4, 32>}, {pipeline_mode = #tpu.pipeline_mode<synchronous>, transform_indices = @transform_2, window_bounds = array<i64: 32, 4>}, {transform_indices = @transform_3, window_bounds = array<i64: 98>}, {transform_indices = @transform_4, window_bounds = array<i64: 2, 32, 256>}]} {
    %c0 = arith.constant 0 : index
    %c0_0 = arith.constant 0 : index
    %c0_1 = arith.constant 0 : index
    %0 = vector.load %arg1[%c0, %c0_0, %c0_1] : memref<2x32x256xf32, #tpu.memory_space<vmem>>, vector<2x32x256xf32>
    %cst = arith.constant dense<0.000000e+00> : vector<2x32xf32>
    %1 = vector.multi_reduction <add>, %0, %cst [2] : vector<2x32x256xf32> to vector<2x32xf32>
    %cst_2 = arith.constant 3.906250e-03 : f32
    %2 = vector.broadcast %cst_2 : f32 to vector<2x32xf32>
    %3 = arith.mulf %1, %2 : vector<2x32xf32>
    %cst_3 = arith.constant dense<0xFF800000> : vector<2x32xf32>
    %4 = vector.multi_reduction <maximumf>, %0, %cst_3 [2] : vector<2x32x256xf32> to vector<2x32xf32>
    %5 = tpu.concatenate %3, %4 in 0 : vector<2x32xf32>, vector<2x32xf32> -> vector<4x32xf32>
    %c0_4 = arith.constant 0 : index
    %c0_5 = arith.constant 0 : index
    %6 = vector.load %arg2[%c0_4, %c0_5] : memref<4x32xf32, #tpu.memory_space<vmem>>, vector<4x32xf32>
    %c0_6 = arith.constant 0 : index
    %c0_7 = arith.constant 0 : index
    %7 = vector.load %arg3[%c0_6, %c0_7] : memref<32x4xf32, #tpu.memory_space<vmem>>, vector<32x4xf32>
    %8 = vector.shape_cast %5 : vector<4x32xf32> to vector<4x1x32xf32>
    %9 = vector.shape_cast %6 : vector<4x32xf32> to vector<1x4x32xf32>
    %10 = vector.broadcast %8 : vector<4x1x32xf32> to vector<4x4x32xf32>
    %11 = vector.broadcast %9 : vector<1x4x32xf32> to vector<4x4x32xf32>
    %12 = arith.mulf %10, %11 : vector<4x4x32xf32>
    %cst_8 = arith.constant dense<0.000000e+00> : vector<4x4xf32>
    %13 = vector.multi_reduction <add>, %12, %cst_8 [2] : vector<4x4x32xf32> to vector<4x4xf32>
    %cst_9 = arith.constant 0.000000e+00 : f32
    %14 = vector.broadcast %cst_9 : f32 to vector<4x4xf32>
    %15 = arith.maximumf %13, %14 : vector<4x4xf32>
    %16 = vector.shape_cast %15 : vector<4x4xf32> to vector<4x1x4xf32>
    %17 = vector.shape_cast %7 : vector<32x4xf32> to vector<1x32x4xf32>
    %18 = vector.broadcast %16 : vector<4x1x4xf32> to vector<4x32x4xf32>
    %19 = vector.broadcast %17 : vector<1x32x4xf32> to vector<4x32x4xf32>
    %20 = arith.mulf %18, %19 : vector<4x32x4xf32>
    %cst_10 = arith.constant dense<0.000000e+00> : vector<4x32xf32>
    %21 = vector.multi_reduction <add>, %20, %cst_10 [2] : vector<4x32x4xf32> to vector<4x32xf32>
    %22 = vector.extract_strided_slice %21 {offsets = [0, 0], sizes = [2, 32], strides = [1, 1]} : vector<4x32xf32> to vector<2x32xf32>
    %23 = vector.extract_strided_slice %21 {offsets = [2, 0], sizes = [2, 32], strides = [1, 1]} : vector<4x32xf32> to vector<2x32xf32>
    %24 = arith.addf %22, %23 : vector<2x32xf32>
    %25 = arith.negf %24 : vector<2x32xf32>
    %26 = math.exp %25 : vector<2x32xf32>
    %cst_11 = arith.constant 1.000000e+00 : f32
    %27 = vector.broadcast %cst_11 : f32 to vector<2x32xf32>
    %28 = arith.addf %27, %26 : vector<2x32xf32>
    %29 = arith.divf %27, %28 : vector<2x32xf32>
    %30 = vector.shape_cast %29 : vector<2x32xf32> to vector<2x32x1xf32>
    %31 = vector.broadcast %30 : vector<2x32x1xf32> to vector<2x32x256xf32>
    %32 = arith.mulf %0, %31 : vector<2x32x256xf32>
    %cst_12 = arith.constant dense<0.000000e+00> : vector<2x256xf32>
    %33 = vector.multi_reduction <add>, %32, %cst_12 [1] : vector<2x32x256xf32> to vector<2x256xf32>
    %cst_13 = arith.constant 3.200000e+01 : f32
    %34 = vector.broadcast %cst_13 : f32 to vector<2x256xf32>
    %35 = arith.divf %33, %34 : vector<2x256xf32>
    %c0_14 = arith.constant 0 : index
    %c0_15 = arith.constant 0 : index
    %c0_16 = arith.constant 0 : index
    %36 = vector.load %arg7[%c0_14, %c0_15, %c0_16] : memref<2x2x256xf32, #tpu.memory_space<vmem>>, vector<1x2x256xf32>
    %37 = vector.shape_cast %36 : vector<1x2x256xf32> to vector<2x256xf32>
    %38 = vector.shape_cast %35 : vector<2x256xf32> to vector<1x2x256xf32>
    tpu.vector_store %arg7[%c0_14, %c0_15, %c0_16], %38 {strides = array<i32>} : memref<2x2x256xf32, #tpu.memory_space<vmem>>, vector<1x2x256xf32>,
    %cst_17 = arith.constant dense<0xFF800000> : vector<2x256xf32>
    %39 = vector.multi_reduction <maximumf>, %32, %cst_17 [1] : vector<2x32x256xf32> to vector<2x256xf32>
    %c1 = arith.constant 1 : index
    %c0_18 = arith.constant 0 : index
    %c0_19 = arith.constant 0 : index
    %40 = vector.load %arg7[%c1, %c0_18, %c0_19] : memref<2x2x256xf32, #tpu.memory_space<vmem>>, vector<1x2x256xf32>
    %41 = vector.shape_cast %40 : vector<1x2x256xf32> to vector<2x256xf32>
    %42 = vector.shape_cast %39 : vector<2x256xf32> to vector<1x2x256xf32>
    tpu.vector_store %arg7[%c1, %c0_18, %c0_19], %42 {strides = array<i32>} : memref<2x2x256xf32, #tpu.memory_space<vmem>>, vector<1x2x256xf32>,
    %cst_20 = arith.constant 0.000000e+00 : f32
    %43 = vector.broadcast %cst_20 : f32 to vector<2x2x24x128xf32>
    %c0_21 = arith.constant 0 : index
    %c0_22 = arith.constant 0 : index
    %c0_23 = arith.constant 0 : index
    %c0_24 = arith.constant 0 : index
    %44 = vector.load %arg6[%c0_21, %c0_22, %c0_23, %c0_24] : memref<2x2x24x128xf32, #tpu.memory_space<vmem>>, vector<2x2x24x128xf32>
    tpu.vector_store %arg6[%c0_21, %c0_22, %c0_23, %c0_24], %43 {strides = array<i32>} : memref<2x2x24x128xf32, #tpu.memory_space<vmem>>, vector<2x2x24x128xf32>,
    %c0_25 = arith.constant 0 : index
    %c0_26 = arith.constant 0 : index
    %c0_27 = arith.constant 0 : index
    %45 = vector.load %arg7[%c0_25, %c0_26, %c0_27] : memref<2x2x256xf32, #tpu.memory_space<vmem>>, vector<1x1x16xf32>
    %46 = vector.shape_cast %45 : vector<1x1x16xf32> to vector<16xf32>
    %c0_28 = arith.constant 0 : index
    %c0_29 = arith.constant 0 : index
    %c3 = arith.constant 3 : index
    %c3_30 = arith.constant 3 : index
    %47 = vector.load %arg6[%c0_28, %c0_29, %c3, %c3_30] : memref<2x2x24x128xf32, #tpu.memory_space<vmem>>, vector<1x1x1x16xf32>
    %48 = vector.shape_cast %47 : vector<1x1x1x16xf32> to vector<16xf32>
    %49 = vector.shape_cast %46 : vector<16xf32> to vector<1x1x1x16xf32>
    tpu.vector_store %arg6[%c0_28, %c0_29, %c3, %c3_30], %49 {strides = array<i32>} : memref<2x2x24x128xf32, #tpu.memory_space<vmem>>, vector<1x1x1x16xf32>,
    %c0_31 = arith.constant 0 : index
    %c0_32 = arith.constant 0 : index
    %c16 = arith.constant 16 : index
    %50 = vector.load %arg7[%c0_31, %c0_32, %c16] : memref<2x2x256xf32, #tpu.memory_space<vmem>>, vector<1x1x16xf32>
    %51 = vector.shape_cast %50 : vector<1x1x16xf32> to vector<16xf32>
    %c0_33 = arith.constant 0 : index
    %c0_34 = arith.constant 0 : index
    %c4 = arith.constant 4 : index
    %c3_35 = arith.constant 3 : index
    %52 = vector.load %arg6[%c0_33, %c0_34, %c4, %c3_35] : memref<2x2x24x128xf32, #tpu.memory_space<vmem>>, vector<1x1x1x16xf32>
    %53 = vector.shape_cast %52 : vector<1x1x1x16xf32> to vector<16xf32>
    %54 = vector.shape_cast %51 : vector<16xf32> to vector<1x1x1x16xf32>
    tpu.vector_store %arg6[%c0_33, %c0_34, %c4, %c3_35], %54 {strides = array<i32>} : memref<2x2x24x128xf32, #tpu.memory_space<vmem>>, vector<1x1x1x16xf32>,
    %c0_36 = arith.constant 0 : index
    %c0_37 = arith.constant 0 : index
    %c32 = arith.constant 32 : index
    %55 = vector.load %arg7[%c0_36, %c0_37, %c32] : memref<2x2x256xf32, #tpu.memory_space<vmem>>, vector<1x1x16xf32>
    %56 = vector.shape_cast %55 : vector<1x1x16xf32> to vector<16xf32>
    %c0_38 = arith.constant 0 : index
    %c0_39 = arith.constant 0 : index
    %c5 = arith.constant 5 : index
    %c3_40 = arith.constant 3 : index
    %57 = vector.load %arg6[%c0_38, %c0_39, %c5, %c3_40] : memref<2x2x24x128xf32, #tpu.memory_space<vmem>>, vector<1x1x1x16xf32>
    %58 = vector.shape_cast %57 : vector<1x1x1x16xf32> to vector<16xf32>
    %59 = vector.shape_cast %56 : vector<16xf32> to vector<1x1x1x16xf32>
    tpu.vector_store %arg6[%c0_38, %c0_39, %c5, %c3_40], %59 {strides = array<i32>} : memref<2x2x24x128xf32, #tpu.memory_space<vmem>>, vector<1x1x1x16xf32>,
    %c0_41 = arith.constant 0 : index
    %c0_42 = arith.constant 0 : index
    %c48 = arith.constant 48 : index
    %60 = vector.load %arg7[%c0_41, %c0_42, %c48] : memref<2x2x256xf32, #tpu.memory_space<vmem>>, vector<1x1x16xf32>
    %61 = vector.shape_cast %60 : vector<1x1x16xf32> to vector<16xf32>
    %c0_43 = arith.constant 0 : index
    %c0_44 = arith.constant 0 : index
    %c6 = arith.constant 6 : index
    %c3_45 = arith.constant 3 : index
    %62 = vector.load %arg6[%c0_43, %c0_44, %c6, %c3_45] : memref<2x2x24x128xf32, #tpu.memory_space<vmem>>, vector<1x1x1x16xf32>
    %63 = vector.shape_cast %62 : vector<1x1x1x16xf32> to vector<16xf32>
    %64 = vector.shape_cast %61 : vector<16xf32> to vector<1x1x1x16xf32>
    tpu.vector_store %arg6[%c0_43, %c0_44, %c6, %c3_45], %64 {strides = array<i32>} : memref<2x2x24x128xf32, #tpu.memory_space<vmem>>, vector<1x1x1x16xf32>,
    %c0_46 = arith.constant 0 : index
    %c0_47 = arith.constant 0 : index
    %c64 = arith.constant 64 : index
    %65 = vector.load %arg7[%c0_46, %c0_47, %c64] : memref<2x2x256xf32, #tpu.memory_space<vmem>>, vector<1x1x16xf32>
    %66 = vector.shape_cast %65 : vector<1x1x16xf32> to vector<16xf32>
    %c0_48 = arith.constant 0 : index
    %c0_49 = arith.constant 0 : index
    %c7 = arith.constant 7 : index
    %c3_50 = arith.constant 3 : index
    %67 = vector.load %arg6[%c0_48, %c0_49, %c7, %c3_50] : memref<2x2x24x128xf32, #tpu.memory_space<vmem>>, vector<1x1x1x16xf32>
    %68 = vector.shape_cast %67 : vector<1x1x1x16xf32> to vector<16xf32>
    %69 = vector.shape_cast %66 : vector<16xf32> to vector<1x1x1x16xf32>
    tpu.vector_store %arg6[%c0_48, %c0_49, %c7, %c3_50], %69 {strides = array<i32>} : memref<2x2x24x128xf32, #tpu.memory_space<vmem>>, vector<1x1x1x16xf32>,
    %c0_51 = arith.constant 0 : index
    %c0_52 = arith.constant 0 : index
    %c80 = arith.constant 80 : index
    %70 = vector.load %arg7[%c0_51, %c0_52, %c80] : memref<2x2x256xf32, #tpu.memory_space<vmem>>, vector<1x1x16xf32>
    %71 = vector.shape_cast %70 : vector<1x1x16xf32> to vector<16xf32>
    %c0_53 = arith.constant 0 : index
    %c0_54 = arith.constant 0 : index
    %c8 = arith.constant 8 : index
    %c3_55 = arith.constant 3 : index
    %72 = vector.load %arg6[%c0_53, %c0_54, %c8, %c3_55] : memref<2x2x24x128xf32, #tpu.memory_space<vmem>>, vector<1x1x1x16xf32>
    %73 = vector.shape_cast %72 : vector<1x1x1x16xf32> to vector<16xf32>
    %74 = vector.shape_cast %71 : vector<16xf32> to vector<1x1x1x16xf32>
    tpu.vector_store %arg6[%c0_53, %c0_54, %c8, %c3_55], %74 {strides = array<i32>} : memref<2x2x24x128xf32, #tpu.memory_space<vmem>>, vector<1x1x1x16xf32>,
    %c0_56 = arith.constant 0 : index
    %c0_57 = arith.constant 0 : index
    %c96 = arith.constant 96 : index
    %75 = vector.load %arg7[%c0_56, %c0_57, %c96] : memref<2x2x256xf32, #tpu.memory_space<vmem>>, vector<1x1x16xf32>
    %76 = vector.shape_cast %75 : vector<1x1x16xf32> to vector<16xf32>
    %c0_58 = arith.constant 0 : index
    %c0_59 = arith.constant 0 : index
    %c9 = arith.constant 9 : index
    %c3_60 = arith.constant 3 : index
    %77 = vector.load %arg6[%c0_58, %c0_59, %c9, %c3_60] : memref<2x2x24x128xf32, #tpu.memory_space<vmem>>, vector<1x1x1x16xf32>
    %78 = vector.shape_cast %77 : vector<1x1x1x16xf32> to vector<16xf32>
    %79 = vector.shape_cast %76 : vector<16xf32> to vector<1x1x1x16xf32>
    tpu.vector_store %arg6[%c0_58, %c0_59, %c9, %c3_60], %79 {strides = array<i32>} : memref<2x2x24x128xf32, #tpu.memory_space<vmem>>, vector<1x1x1x16xf32>,
    %c0_61 = arith.constant 0 : index
    %c0_62 = arith.constant 0 : index
    %c112 = arith.constant 112 : index
    %80 = vector.load %arg7[%c0_61, %c0_62, %c112] : memref<2x2x256xf32, #tpu.memory_space<vmem>>, vector<1x1x16xf32>
    %81 = vector.shape_cast %80 : vector<1x1x16xf32> to vector<16xf32>
    %c0_63 = arith.constant 0 : index
    %c0_64 = arith.constant 0 : index
    %c10 = arith.constant 10 : index
    %c3_65 = arith.constant 3 : index
    %82 = vector.load %arg6[%c0_63, %c0_64, %c10, %c3_65] : memref<2x2x24x128xf32, #tpu.memory_space<vmem>>, vector<1x1x1x16xf32>
    %83 = vector.shape_cast %82 : vector<1x1x1x16xf32> to vector<16xf32>
    %84 = vector.shape_cast %81 : vector<16xf32> to vector<1x1x1x16xf32>
    tpu.vector_store %arg6[%c0_63, %c0_64, %c10, %c3_65], %84 {strides = array<i32>} : memref<2x2x24x128xf32, #tpu.memory_space<vmem>>, vector<1x1x1x16xf32>,
    %c0_66 = arith.constant 0 : index
    %c0_67 = arith.constant 0 : index
    %c128 = arith.constant 128 : index
    %85 = vector.load %arg7[%c0_66, %c0_67, %c128] : memref<2x2x256xf32, #tpu.memory_space<vmem>>, vector<1x1x16xf32>
    %86 = vector.shape_cast %85 : vector<1x1x16xf32> to vector<16xf32>
    %c0_68 = arith.constant 0 : index
    %c0_69 = arith.constant 0 : index
    %c11 = arith.constant 11 : index
    %c3_70 = arith.constant 3 : index
    %87 = vector.load %arg6[%c0_68, %c0_69, %c11, %c3_70] : memref<2x2x24x128xf32, #tpu.memory_space<vmem>>, vector<1x1x1x16xf32>
    %88 = vector.shape_cast %87 : vector<1x1x1x16xf32> to vector<16xf32>
    %89 = vector.shape_cast %86 : vector<16xf32> to vector<1x1x1x16xf32>
    tpu.vector_store %arg6[%c0_68, %c0_69, %c11, %c3_70], %89 {strides = array<i32>} : memref<2x2x24x128xf32, #tpu.memory_space<vmem>>, vector<1x1x1x16xf32>,
    %c0_71 = arith.constant 0 : index
    %c0_72 = arith.constant 0 : index
    %c144 = arith.constant 144 : index
    %90 = vector.load %arg7[%c0_71, %c0_72, %c144] : memref<2x2x256xf32, #tpu.memory_space<vmem>>, vector<1x1x16xf32>
    %91 = vector.shape_cast %90 : vector<1x1x16xf32> to vector<16xf32>
    %c0_73 = arith.constant 0 : index
    %c0_74 = arith.constant 0 : index
    %c12 = arith.constant 12 : index
    %c3_75 = arith.constant 3 : index
    %92 = vector.load %arg6[%c0_73, %c0_74, %c12, %c3_75] : memref<2x2x24x128xf32, #tpu.memory_space<vmem>>, vector<1x1x1x16xf32>
    %93 = vector.shape_cast %92 : vector<1x1x1x16xf32> to vector<16xf32>
    %94 = vector.shape_cast %91 : vector<16xf32> to vector<1x1x1x16xf32>
    tpu.vector_store %arg6[%c0_73, %c0_74, %c12, %c3_75], %94 {strides = array<i32>} : memref<2x2x24x128xf32, #tpu.memory_space<vmem>>, vector<1x1x1x16xf32>,
    %c0_76 = arith.constant 0 : index
    %c0_77 = arith.constant 0 : index
    %c160 = arith.constant 160 : index
    %95 = vector.load %arg7[%c0_76, %c0_77, %c160] : memref<2x2x256xf32, #tpu.memory_space<vmem>>, vector<1x1x16xf32>
    %96 = vector.shape_cast %95 : vector<1x1x16xf32> to vector<16xf32>
    %c0_78 = arith.constant 0 : index
    %c0_79 = arith.constant 0 : index
    %c13 = arith.constant 13 : index
    %c3_80 = arith.constant 3 : index
    %97 = vector.load %arg6[%c0_78, %c0_79, %c13, %c3_80] : memref<2x2x24x128xf32, #tpu.memory_space<vmem>>, vector<1x1x1x16xf32>
    %98 = vector.shape_cast %97 : vector<1x1x1x16xf32> to vector<16xf32>
    %99 = vector.shape_cast %96 : vector<16xf32> to vector<1x1x1x16xf32>
    tpu.vector_store %arg6[%c0_78, %c0_79, %c13, %c3_80], %99 {strides = array<i32>} : memref<2x2x24x128xf32, #tpu.memory_space<vmem>>, vector<1x1x1x16xf32>,
    %c0_81 = arith.constant 0 : index
    %c0_82 = arith.constant 0 : index
    %c176 = arith.constant 176 : index
    %100 = vector.load %arg7[%c0_81, %c0_82, %c176] : memref<2x2x256xf32, #tpu.memory_space<vmem>>, vector<1x1x16xf32>
    %101 = vector.shape_cast %100 : vector<1x1x16xf32> to vector<16xf32>
    %c0_83 = arith.constant 0 : index
    %c0_84 = arith.constant 0 : index
    %c14 = arith.constant 14 : index
    %c3_85 = arith.constant 3 : index
    %102 = vector.load %arg6[%c0_83, %c0_84, %c14, %c3_85] : memref<2x2x24x128xf32, #tpu.memory_space<vmem>>, vector<1x1x1x16xf32>
    %103 = vector.shape_cast %102 : vector<1x1x1x16xf32> to vector<16xf32>
    %104 = vector.shape_cast %101 : vector<16xf32> to vector<1x1x1x16xf32>
    tpu.vector_store %arg6[%c0_83, %c0_84, %c14, %c3_85], %104 {strides = array<i32>} : memref<2x2x24x128xf32, #tpu.memory_space<vmem>>, vector<1x1x1x16xf32>,
    %c0_86 = arith.constant 0 : index
    %c0_87 = arith.constant 0 : index
    %c192 = arith.constant 192 : index
    %105 = vector.load %arg7[%c0_86, %c0_87, %c192] : memref<2x2x256xf32, #tpu.memory_space<vmem>>, vector<1x1x16xf32>
    %106 = vector.shape_cast %105 : vector<1x1x16xf32> to vector<16xf32>
    %c0_88 = arith.constant 0 : index
    %c0_89 = arith.constant 0 : index
    %c15 = arith.constant 15 : index
    %c3_90 = arith.constant 3 : index
    %107 = vector.load %arg6[%c0_88, %c0_89, %c15, %c3_90] : memref<2x2x24x128xf32, #tpu.memory_space<vmem>>, vector<1x1x1x16xf32>
    %108 = vector.shape_cast %107 : vector<1x1x1x16xf32> to vector<16xf32>
    %109 = vector.shape_cast %106 : vector<16xf32> to vector<1x1x1x16xf32>
    tpu.vector_store %arg6[%c0_88, %c0_89, %c15, %c3_90], %109 {strides = array<i32>} : memref<2x2x24x128xf32, #tpu.memory_space<vmem>>, vector<1x1x1x16xf32>,
    %c0_91 = arith.constant 0 : index
    %c0_92 = arith.constant 0 : index
    %c208 = arith.constant 208 : index
    %110 = vector.load %arg7[%c0_91, %c0_92, %c208] : memref<2x2x256xf32, #tpu.memory_space<vmem>>, vector<1x1x16xf32>
    %111 = vector.shape_cast %110 : vector<1x1x16xf32> to vector<16xf32>
    %c0_93 = arith.constant 0 : index
    %c0_94 = arith.constant 0 : index
    %c16_95 = arith.constant 16 : index
    %c3_96 = arith.constant 3 : index
    %112 = vector.load %arg6[%c0_93, %c0_94, %c16_95, %c3_96] : memref<2x2x24x128xf32, #tpu.memory_space<vmem>>, vector<1x1x1x16xf32>
    %113 = vector.shape_cast %112 : vector<1x1x1x16xf32> to vector<16xf32>
    %114 = vector.shape_cast %111 : vector<16xf32> to vector<1x1x1x16xf32>
    tpu.vector_store %arg6[%c0_93, %c0_94, %c16_95, %c3_96], %114 {strides = array<i32>} : memref<2x2x24x128xf32, #tpu.memory_space<vmem>>, vector<1x1x1x16xf32>,
    %c0_97 = arith.constant 0 : index
    %c0_98 = arith.constant 0 : index
    %c224 = arith.constant 224 : index
    %115 = vector.load %arg7[%c0_97, %c0_98, %c224] : memref<2x2x256xf32, #tpu.memory_space<vmem>>, vector<1x1x16xf32>
    %116 = vector.shape_cast %115 : vector<1x1x16xf32> to vector<16xf32>
    %c0_99 = arith.constant 0 : index
    %c0_100 = arith.constant 0 : index
    %c17 = arith.constant 17 : index
    %c3_101 = arith.constant 3 : index
    %117 = vector.load %arg6[%c0_99, %c0_100, %c17, %c3_101] : memref<2x2x24x128xf32, #tpu.memory_space<vmem>>, vector<1x1x1x16xf32>
    %118 = vector.shape_cast %117 : vector<1x1x1x16xf32> to vector<16xf32>
    %119 = vector.shape_cast %116 : vector<16xf32> to vector<1x1x1x16xf32>
    tpu.vector_store %arg6[%c0_99, %c0_100, %c17, %c3_101], %119 {strides = array<i32>} : memref<2x2x24x128xf32, #tpu.memory_space<vmem>>, vector<1x1x1x16xf32>,
    %c0_102 = arith.constant 0 : index
    %c0_103 = arith.constant 0 : index
    %c240 = arith.constant 240 : index
    %120 = vector.load %arg7[%c0_102, %c0_103, %c240] : memref<2x2x256xf32, #tpu.memory_space<vmem>>, vector<1x1x16xf32>
    %121 = vector.shape_cast %120 : vector<1x1x16xf32> to vector<16xf32>
    %c0_104 = arith.constant 0 : index
    %c0_105 = arith.constant 0 : index
    %c18 = arith.constant 18 : index
    %c3_106 = arith.constant 3 : index
    %122 = vector.load %arg6[%c0_104, %c0_105, %c18, %c3_106] : memref<2x2x24x128xf32, #tpu.memory_space<vmem>>, vector<1x1x1x16xf32>
    %123 = vector.shape_cast %122 : vector<1x1x1x16xf32> to vector<16xf32>
    %124 = vector.shape_cast %121 : vector<16xf32> to vector<1x1x1x16xf32>
    tpu.vector_store %arg6[%c0_104, %c0_105, %c18, %c3_106], %124 {strides = array<i32>} : memref<2x2x24x128xf32, #tpu.memory_space<vmem>>, vector<1x1x1x16xf32>,
    %c0_107 = arith.constant 0 : index
    %c1_108 = arith.constant 1 : index
    %c0_109 = arith.constant 0 : index
    %125 = vector.load %arg7[%c0_107, %c1_108, %c0_109] : memref<2x2x256xf32, #tpu.memory_space<vmem>>, vector<1x1x16xf32>
    %126 = vector.shape_cast %125 : vector<1x1x16xf32> to vector<16xf32>
    %c0_110 = arith.constant 0 : index
    %c1_111 = arith.constant 1 : index
    %c3_112 = arith.constant 3 : index
    %c3_113 = arith.constant 3 : index
    %127 = vector.load %arg6[%c0_110, %c1_111, %c3_112, %c3_113] : memref<2x2x24x128xf32, #tpu.memory_space<vmem>>, vector<1x1x1x16xf32>
    %128 = vector.shape_cast %127 : vector<1x1x1x16xf32> to vector<16xf32>
    %129 = vector.shape_cast %126 : vector<16xf32> to vector<1x1x1x16xf32>
    tpu.vector_store %arg6[%c0_110, %c1_111, %c3_112, %c3_113], %129 {strides = array<i32>} : memref<2x2x24x128xf32, #tpu.memory_space<vmem>>, vector<1x1x1x16xf32>,
    %c0_114 = arith.constant 0 : index
    %c1_115 = arith.constant 1 : index
    %c16_116 = arith.constant 16 : index
    %130 = vector.load %arg7[%c0_114, %c1_115, %c16_116] : memref<2x2x256xf32, #tpu.memory_space<vmem>>, vector<1x1x16xf32>
    %131 = vector.shape_cast %130 : vector<1x1x16xf32> to vector<16xf32>
    %c0_117 = arith.constant 0 : index
    %c1_118 = arith.constant 1 : index
    %c4_119 = arith.constant 4 : index
    %c3_120 = arith.constant 3 : index
    %132 = vector.load %arg6[%c0_117, %c1_118, %c4_119, %c3_120] : memref<2x2x24x128xf32, #tpu.memory_space<vmem>>, vector<1x1x1x16xf32>
    %133 = vector.shape_cast %132 : vector<1x1x1x16xf32> to vector<16xf32>
    %134 = vector.shape_cast %131 : vector<16xf32> to vector<1x1x1x16xf32>
    tpu.vector_store %arg6[%c0_117, %c1_118, %c4_119, %c3_120], %134 {strides = array<i32>} : memref<2x2x24x128xf32, #tpu.memory_space<vmem>>, vector<1x1x1x16xf32>,
    %c0_121 = arith.constant 0 : index
    %c1_122 = arith.constant 1 : index
    %c32_123 = arith.constant 32 : index
    %135 = vector.load %arg7[%c0_121, %c1_122, %c32_123] : memref<2x2x256xf32, #tpu.memory_space<vmem>>, vector<1x1x16xf32>
    %136 = vector.shape_cast %135 : vector<1x1x16xf32> to vector<16xf32>
    %c0_124 = arith.constant 0 : index
    %c1_125 = arith.constant 1 : index
    %c5_126 = arith.constant 5 : index
    %c3_127 = arith.constant 3 : index
    %137 = vector.load %arg6[%c0_124, %c1_125, %c5_126, %c3_127] : memref<2x2x24x128xf32, #tpu.memory_space<vmem>>, vector<1x1x1x16xf32>
    %138 = vector.shape_cast %137 : vector<1x1x1x16xf32> to vector<16xf32>
    %139 = vector.shape_cast %136 : vector<16xf32> to vector<1x1x1x16xf32>
    tpu.vector_store %arg6[%c0_124, %c1_125, %c5_126, %c3_127], %139 {strides = array<i32>} : memref<2x2x24x128xf32, #tpu.memory_space<vmem>>, vector<1x1x1x16xf32>,
    %c0_128 = arith.constant 0 : index
    %c1_129 = arith.constant 1 : index
    %c48_130 = arith.constant 48 : index
    %140 = vector.load %arg7[%c0_128, %c1_129, %c48_130] : memref<2x2x256xf32, #tpu.memory_space<vmem>>, vector<1x1x16xf32>
    %141 = vector.shape_cast %140 : vector<1x1x16xf32> to vector<16xf32>
    %c0_131 = arith.constant 0 : index
    %c1_132 = arith.constant 1 : index
    %c6_133 = arith.constant 6 : index
    %c3_134 = arith.constant 3 : index
    %142 = vector.load %arg6[%c0_131, %c1_132, %c6_133, %c3_134] : memref<2x2x24x128xf32, #tpu.memory_space<vmem>>, vector<1x1x1x16xf32>
    %143 = vector.shape_cast %142 : vector<1x1x1x16xf32> to vector<16xf32>
    %144 = vector.shape_cast %141 : vector<16xf32> to vector<1x1x1x16xf32>
    tpu.vector_store %arg6[%c0_131, %c1_132, %c6_133, %c3_134], %144 {strides = array<i32>} : memref<2x2x24x128xf32, #tpu.memory_space<vmem>>, vector<1x1x1x16xf32>,
    %c0_135 = arith.constant 0 : index
    %c1_136 = arith.constant 1 : index
    %c64_137 = arith.constant 64 : index
    %145 = vector.load %arg7[%c0_135, %c1_136, %c64_137] : memref<2x2x256xf32, #tpu.memory_space<vmem>>, vector<1x1x16xf32>
    %146 = vector.shape_cast %145 : vector<1x1x16xf32> to vector<16xf32>
    %c0_138 = arith.constant 0 : index
    %c1_139 = arith.constant 1 : index
    %c7_140 = arith.constant 7 : index
    %c3_141 = arith.constant 3 : index
    %147 = vector.load %arg6[%c0_138, %c1_139, %c7_140, %c3_141] : memref<2x2x24x128xf32, #tpu.memory_space<vmem>>, vector<1x1x1x16xf32>
    %148 = vector.shape_cast %147 : vector<1x1x1x16xf32> to vector<16xf32>
    %149 = vector.shape_cast %146 : vector<16xf32> to vector<1x1x1x16xf32>
    tpu.vector_store %arg6[%c0_138, %c1_139, %c7_140, %c3_141], %149 {strides = array<i32>} : memref<2x2x24x128xf32, #tpu.memory_space<vmem>>, vector<1x1x1x16xf32>,
    %c0_142 = arith.constant 0 : index
    %c1_143 = arith.constant 1 : index
    %c80_144 = arith.constant 80 : index
    %150 = vector.load %arg7[%c0_142, %c1_143, %c80_144] : memref<2x2x256xf32, #tpu.memory_space<vmem>>, vector<1x1x16xf32>
    %151 = vector.shape_cast %150 : vector<1x1x16xf32> to vector<16xf32>
    %c0_145 = arith.constant 0 : index
    %c1_146 = arith.constant 1 : index
    %c8_147 = arith.constant 8 : index
    %c3_148 = arith.constant 3 : index
    %152 = vector.load %arg6[%c0_145, %c1_146, %c8_147, %c3_148] : memref<2x2x24x128xf32, #tpu.memory_space<vmem>>, vector<1x1x1x16xf32>
    %153 = vector.shape_cast %152 : vector<1x1x1x16xf32> to vector<16xf32>
    %154 = vector.shape_cast %151 : vector<16xf32> to vector<1x1x1x16xf32>
    tpu.vector_store %arg6[%c0_145, %c1_146, %c8_147, %c3_148], %154 {strides = array<i32>} : memref<2x2x24x128xf32, #tpu.memory_space<vmem>>, vector<1x1x1x16xf32>,
    %c0_149 = arith.constant 0 : index
    %c1_150 = arith.constant 1 : index
    %c96_151 = arith.constant 96 : index
    %155 = vector.load %arg7[%c0_149, %c1_150, %c96_151] : memref<2x2x256xf32, #tpu.memory_space<vmem>>, vector<1x1x16xf32>
    %156 = vector.shape_cast %155 : vector<1x1x16xf32> to vector<16xf32>
    %c0_152 = arith.constant 0 : index
    %c1_153 = arith.constant 1 : index
    %c9_154 = arith.constant 9 : index
    %c3_155 = arith.constant 3 : index
    %157 = vector.load %arg6[%c0_152, %c1_153, %c9_154, %c3_155] : memref<2x2x24x128xf32, #tpu.memory_space<vmem>>, vector<1x1x1x16xf32>
    %158 = vector.shape_cast %157 : vector<1x1x1x16xf32> to vector<16xf32>
    %159 = vector.shape_cast %156 : vector<16xf32> to vector<1x1x1x16xf32>
    tpu.vector_store %arg6[%c0_152, %c1_153, %c9_154, %c3_155], %159 {strides = array<i32>} : memref<2x2x24x128xf32, #tpu.memory_space<vmem>>, vector<1x1x1x16xf32>,
    %c0_156 = arith.constant 0 : index
    %c1_157 = arith.constant 1 : index
    %c112_158 = arith.constant 112 : index
    %160 = vector.load %arg7[%c0_156, %c1_157, %c112_158] : memref<2x2x256xf32, #tpu.memory_space<vmem>>, vector<1x1x16xf32>
    %161 = vector.shape_cast %160 : vector<1x1x16xf32> to vector<16xf32>
    %c0_159 = arith.constant 0 : index
    %c1_160 = arith.constant 1 : index
    %c10_161 = arith.constant 10 : index
    %c3_162 = arith.constant 3 : index
    %162 = vector.load %arg6[%c0_159, %c1_160, %c10_161, %c3_162] : memref<2x2x24x128xf32, #tpu.memory_space<vmem>>, vector<1x1x1x16xf32>
    %163 = vector.shape_cast %162 : vector<1x1x1x16xf32> to vector<16xf32>
    %164 = vector.shape_cast %161 : vector<16xf32> to vector<1x1x1x16xf32>
    tpu.vector_store %arg6[%c0_159, %c1_160, %c10_161, %c3_162], %164 {strides = array<i32>} : memref<2x2x24x128xf32, #tpu.memory_space<vmem>>, vector<1x1x1x16xf32>,
    %c0_163 = arith.constant 0 : index
    %c1_164 = arith.constant 1 : index
    %c128_165 = arith.constant 128 : index
    %165 = vector.load %arg7[%c0_163, %c1_164, %c128_165] : memref<2x2x256xf32, #tpu.memory_space<vmem>>, vector<1x1x16xf32>
    %166 = vector.shape_cast %165 : vector<1x1x16xf32> to vector<16xf32>
    %c0_166 = arith.constant 0 : index
    %c1_167 = arith.constant 1 : index
    %c11_168 = arith.constant 11 : index
    %c3_169 = arith.constant 3 : index
    %167 = vector.load %arg6[%c0_166, %c1_167, %c11_168, %c3_169] : memref<2x2x24x128xf32, #tpu.memory_space<vmem>>, vector<1x1x1x16xf32>
    %168 = vector.shape_cast %167 : vector<1x1x1x16xf32> to vector<16xf32>
    %169 = vector.shape_cast %166 : vector<16xf32> to vector<1x1x1x16xf32>
    tpu.vector_store %arg6[%c0_166, %c1_167, %c11_168, %c3_169], %169 {strides = array<i32>} : memref<2x2x24x128xf32, #tpu.memory_space<vmem>>, vector<1x1x1x16xf32>,
    %c0_170 = arith.constant 0 : index
    %c1_171 = arith.constant 1 : index
    %c144_172 = arith.constant 144 : index
    %170 = vector.load %arg7[%c0_170, %c1_171, %c144_172] : memref<2x2x256xf32, #tpu.memory_space<vmem>>, vector<1x1x16xf32>
    %171 = vector.shape_cast %170 : vector<1x1x16xf32> to vector<16xf32>
    %c0_173 = arith.constant 0 : index
    %c1_174 = arith.constant 1 : index
    %c12_175 = arith.constant 12 : index
    %c3_176 = arith.constant 3 : index
    %172 = vector.load %arg6[%c0_173, %c1_174, %c12_175, %c3_176] : memref<2x2x24x128xf32, #tpu.memory_space<vmem>>, vector<1x1x1x16xf32>
    %173 = vector.shape_cast %172 : vector<1x1x1x16xf32> to vector<16xf32>
    %174 = vector.shape_cast %171 : vector<16xf32> to vector<1x1x1x16xf32>
    tpu.vector_store %arg6[%c0_173, %c1_174, %c12_175, %c3_176], %174 {strides = array<i32>} : memref<2x2x24x128xf32, #tpu.memory_space<vmem>>, vector<1x1x1x16xf32>,
    %c0_177 = arith.constant 0 : index
    %c1_178 = arith.constant 1 : index
    %c160_179 = arith.constant 160 : index
    %175 = vector.load %arg7[%c0_177, %c1_178, %c160_179] : memref<2x2x256xf32, #tpu.memory_space<vmem>>, vector<1x1x16xf32>
    %176 = vector.shape_cast %175 : vector<1x1x16xf32> to vector<16xf32>
    %c0_180 = arith.constant 0 : index
    %c1_181 = arith.constant 1 : index
    %c13_182 = arith.constant 13 : index
    %c3_183 = arith.constant 3 : index
    %177 = vector.load %arg6[%c0_180, %c1_181, %c13_182, %c3_183] : memref<2x2x24x128xf32, #tpu.memory_space<vmem>>, vector<1x1x1x16xf32>
    %178 = vector.shape_cast %177 : vector<1x1x1x16xf32> to vector<16xf32>
    %179 = vector.shape_cast %176 : vector<16xf32> to vector<1x1x1x16xf32>
    tpu.vector_store %arg6[%c0_180, %c1_181, %c13_182, %c3_183], %179 {strides = array<i32>} : memref<2x2x24x128xf32, #tpu.memory_space<vmem>>, vector<1x1x1x16xf32>,
    %c0_184 = arith.constant 0 : index
    %c1_185 = arith.constant 1 : index
    %c176_186 = arith.constant 176 : index
    %180 = vector.load %arg7[%c0_184, %c1_185, %c176_186] : memref<2x2x256xf32, #tpu.memory_space<vmem>>, vector<1x1x16xf32>
    %181 = vector.shape_cast %180 : vector<1x1x16xf32> to vector<16xf32>
    %c0_187 = arith.constant 0 : index
    %c1_188 = arith.constant 1 : index
    %c14_189 = arith.constant 14 : index
    %c3_190 = arith.constant 3 : index
    %182 = vector.load %arg6[%c0_187, %c1_188, %c14_189, %c3_190] : memref<2x2x24x128xf32, #tpu.memory_space<vmem>>, vector<1x1x1x16xf32>
    %183 = vector.shape_cast %182 : vector<1x1x1x16xf32> to vector<16xf32>
    %184 = vector.shape_cast %181 : vector<16xf32> to vector<1x1x1x16xf32>
    tpu.vector_store %arg6[%c0_187, %c1_188, %c14_189, %c3_190], %184 {strides = array<i32>} : memref<2x2x24x128xf32, #tpu.memory_space<vmem>>, vector<1x1x1x16xf32>,
    %c0_191 = arith.constant 0 : index
    %c1_192 = arith.constant 1 : index
    %c192_193 = arith.constant 192 : index
    %185 = vector.load %arg7[%c0_191, %c1_192, %c192_193] : memref<2x2x256xf32, #tpu.memory_space<vmem>>, vector<1x1x16xf32>
    %186 = vector.shape_cast %185 : vector<1x1x16xf32> to vector<16xf32>
    %c0_194 = arith.constant 0 : index
    %c1_195 = arith.constant 1 : index
    %c15_196 = arith.constant 15 : index
    %c3_197 = arith.constant 3 : index
    %187 = vector.load %arg6[%c0_194, %c1_195, %c15_196, %c3_197] : memref<2x2x24x128xf32, #tpu.memory_space<vmem>>, vector<1x1x1x16xf32>
    %188 = vector.shape_cast %187 : vector<1x1x1x16xf32> to vector<16xf32>
    %189 = vector.shape_cast %186 : vector<16xf32> to vector<1x1x1x16xf32>
    tpu.vector_store %arg6[%c0_194, %c1_195, %c15_196, %c3_197], %189 {strides = array<i32>} : memref<2x2x24x128xf32, #tpu.memory_space<vmem>>, vector<1x1x1x16xf32>,
    %c0_198 = arith.constant 0 : index
    %c1_199 = arith.constant 1 : index
    %c208_200 = arith.constant 208 : index
    %190 = vector.load %arg7[%c0_198, %c1_199, %c208_200] : memref<2x2x256xf32, #tpu.memory_space<vmem>>, vector<1x1x16xf32>
    %191 = vector.shape_cast %190 : vector<1x1x16xf32> to vector<16xf32>
    %c0_201 = arith.constant 0 : index
    %c1_202 = arith.constant 1 : index
    %c16_203 = arith.constant 16 : index
    %c3_204 = arith.constant 3 : index
    %192 = vector.load %arg6[%c0_201, %c1_202, %c16_203, %c3_204] : memref<2x2x24x128xf32, #tpu.memory_space<vmem>>, vector<1x1x1x16xf32>
    %193 = vector.shape_cast %192 : vector<1x1x1x16xf32> to vector<16xf32>
    %194 = vector.shape_cast %191 : vector<16xf32> to vector<1x1x1x16xf32>
    tpu.vector_store %arg6[%c0_201, %c1_202, %c16_203, %c3_204], %194 {strides = array<i32>} : memref<2x2x24x128xf32, #tpu.memory_space<vmem>>, vector<1x1x1x16xf32>,
    %c0_205 = arith.constant 0 : index
    %c1_206 = arith.constant 1 : index
    %c224_207 = arith.constant 224 : index
    %195 = vector.load %arg7[%c0_205, %c1_206, %c224_207] : memref<2x2x256xf32, #tpu.memory_space<vmem>>, vector<1x1x16xf32>
    %196 = vector.shape_cast %195 : vector<1x1x16xf32> to vector<16xf32>
    %c0_208 = arith.constant 0 : index
    %c1_209 = arith.constant 1 : index
    %c17_210 = arith.constant 17 : index
    %c3_211 = arith.constant 3 : index
    %197 = vector.load %arg6[%c0_208, %c1_209, %c17_210, %c3_211] : memref<2x2x24x128xf32, #tpu.memory_space<vmem>>, vector<1x1x1x16xf32>
    %198 = vector.shape_cast %197 : vector<1x1x1x16xf32> to vector<16xf32>
    %199 = vector.shape_cast %196 : vector<16xf32> to vector<1x1x1x16xf32>
    tpu.vector_store %arg6[%c0_208, %c1_209, %c17_210, %c3_211], %199 {strides = array<i32>} : memref<2x2x24x128xf32, #tpu.memory_space<vmem>>, vector<1x1x1x16xf32>,
    %c0_212 = arith.constant 0 : index
    %c1_213 = arith.constant 1 : index
    %c240_214 = arith.constant 240 : index
    %200 = vector.load %arg7[%c0_212, %c1_213, %c240_214] : memref<2x2x256xf32, #tpu.memory_space<vmem>>, vector<1x1x16xf32>
    %201 = vector.shape_cast %200 : vector<1x1x16xf32> to vector<16xf32>
    %c0_215 = arith.constant 0 : index
    %c1_216 = arith.constant 1 : index
    %c18_217 = arith.constant 18 : index
    %c3_218 = arith.constant 3 : index
    %202 = vector.load %arg6[%c0_215, %c1_216, %c18_217, %c3_218] : memref<2x2x24x128xf32, #tpu.memory_space<vmem>>, vector<1x1x1x16xf32>
    %203 = vector.shape_cast %202 : vector<1x1x1x16xf32> to vector<16xf32>
    %204 = vector.shape_cast %201 : vector<16xf32> to vector<1x1x1x16xf32>
    tpu.vector_store %arg6[%c0_215, %c1_216, %c18_217, %c3_218], %204 {strides = array<i32>} : memref<2x2x24x128xf32, #tpu.memory_space<vmem>>, vector<1x1x1x16xf32>,
    %c1_219 = arith.constant 1 : index
    %c0_220 = arith.constant 0 : index
    %c0_221 = arith.constant 0 : index
    %205 = vector.load %arg7[%c1_219, %c0_220, %c0_221] : memref<2x2x256xf32, #tpu.memory_space<vmem>>, vector<1x1x16xf32>
    %206 = vector.shape_cast %205 : vector<1x1x16xf32> to vector<16xf32>
    %c1_222 = arith.constant 1 : index
    %c0_223 = arith.constant 0 : index
    %c3_224 = arith.constant 3 : index
    %c3_225 = arith.constant 3 : index
    %207 = vector.load %arg6[%c1_222, %c0_223, %c3_224, %c3_225] : memref<2x2x24x128xf32, #tpu.memory_space<vmem>>, vector<1x1x1x16xf32>
    %208 = vector.shape_cast %207 : vector<1x1x1x16xf32> to vector<16xf32>
    %209 = vector.shape_cast %206 : vector<16xf32> to vector<1x1x1x16xf32>
    tpu.vector_store %arg6[%c1_222, %c0_223, %c3_224, %c3_225], %209 {strides = array<i32>} : memref<2x2x24x128xf32, #tpu.memory_space<vmem>>, vector<1x1x1x16xf32>,
    %c1_226 = arith.constant 1 : index
    %c0_227 = arith.constant 0 : index
    %c16_228 = arith.constant 16 : index
    %210 = vector.load %arg7[%c1_226, %c0_227, %c16_228] : memref<2x2x256xf32, #tpu.memory_space<vmem>>, vector<1x1x16xf32>
    %211 = vector.shape_cast %210 : vector<1x1x16xf32> to vector<16xf32>
    %c1_229 = arith.constant 1 : index
    %c0_230 = arith.constant 0 : index
    %c4_231 = arith.constant 4 : index
    %c3_232 = arith.constant 3 : index
    %212 = vector.load %arg6[%c1_229, %c0_230, %c4_231, %c3_232] : memref<2x2x24x128xf32, #tpu.memory_space<vmem>>, vector<1x1x1x16xf32>
    %213 = vector.shape_cast %212 : vector<1x1x1x16xf32> to vector<16xf32>
    %214 = vector.shape_cast %211 : vector<16xf32> to vector<1x1x1x16xf32>
    tpu.vector_store %arg6[%c1_229, %c0_230, %c4_231, %c3_232], %214 {strides = array<i32>} : memref<2x2x24x128xf32, #tpu.memory_space<vmem>>, vector<1x1x1x16xf32>,
    %c1_233 = arith.constant 1 : index
    %c0_234 = arith.constant 0 : index
    %c32_235 = arith.constant 32 : index
    %215 = vector.load %arg7[%c1_233, %c0_234, %c32_235] : memref<2x2x256xf32, #tpu.memory_space<vmem>>, vector<1x1x16xf32>
    %216 = vector.shape_cast %215 : vector<1x1x16xf32> to vector<16xf32>
    %c1_236 = arith.constant 1 : index
    %c0_237 = arith.constant 0 : index
    %c5_238 = arith.constant 5 : index
    %c3_239 = arith.constant 3 : index
    %217 = vector.load %arg6[%c1_236, %c0_237, %c5_238, %c3_239] : memref<2x2x24x128xf32, #tpu.memory_space<vmem>>, vector<1x1x1x16xf32>
    %218 = vector.shape_cast %217 : vector<1x1x1x16xf32> to vector<16xf32>
    %219 = vector.shape_cast %216 : vector<16xf32> to vector<1x1x1x16xf32>
    tpu.vector_store %arg6[%c1_236, %c0_237, %c5_238, %c3_239], %219 {strides = array<i32>} : memref<2x2x24x128xf32, #tpu.memory_space<vmem>>, vector<1x1x1x16xf32>,
    %c1_240 = arith.constant 1 : index
    %c0_241 = arith.constant 0 : index
    %c48_242 = arith.constant 48 : index
    %220 = vector.load %arg7[%c1_240, %c0_241, %c48_242] : memref<2x2x256xf32, #tpu.memory_space<vmem>>, vector<1x1x16xf32>
    %221 = vector.shape_cast %220 : vector<1x1x16xf32> to vector<16xf32>
    %c1_243 = arith.constant 1 : index
    %c0_244 = arith.constant 0 : index
    %c6_245 = arith.constant 6 : index
    %c3_246 = arith.constant 3 : index
    %222 = vector.load %arg6[%c1_243, %c0_244, %c6_245, %c3_246] : memref<2x2x24x128xf32, #tpu.memory_space<vmem>>, vector<1x1x1x16xf32>
    %223 = vector.shape_cast %222 : vector<1x1x1x16xf32> to vector<16xf32>
    %224 = vector.shape_cast %221 : vector<16xf32> to vector<1x1x1x16xf32>
    tpu.vector_store %arg6[%c1_243, %c0_244, %c6_245, %c3_246], %224 {strides = array<i32>} : memref<2x2x24x128xf32, #tpu.memory_space<vmem>>, vector<1x1x1x16xf32>,
    %c1_247 = arith.constant 1 : index
    %c0_248 = arith.constant 0 : index
    %c64_249 = arith.constant 64 : index
    %225 = vector.load %arg7[%c1_247, %c0_248, %c64_249] : memref<2x2x256xf32, #tpu.memory_space<vmem>>, vector<1x1x16xf32>
    %226 = vector.shape_cast %225 : vector<1x1x16xf32> to vector<16xf32>
    %c1_250 = arith.constant 1 : index
    %c0_251 = arith.constant 0 : index
    %c7_252 = arith.constant 7 : index
    %c3_253 = arith.constant 3 : index
    %227 = vector.load %arg6[%c1_250, %c0_251, %c7_252, %c3_253] : memref<2x2x24x128xf32, #tpu.memory_space<vmem>>, vector<1x1x1x16xf32>
    %228 = vector.shape_cast %227 : vector<1x1x1x16xf32> to vector<16xf32>
    %229 = vector.shape_cast %226 : vector<16xf32> to vector<1x1x1x16xf32>
    tpu.vector_store %arg6[%c1_250, %c0_251, %c7_252, %c3_253], %229 {strides = array<i32>} : memref<2x2x24x128xf32, #tpu.memory_space<vmem>>, vector<1x1x1x16xf32>,
    %c1_254 = arith.constant 1 : index
    %c0_255 = arith.constant 0 : index
    %c80_256 = arith.constant 80 : index
    %230 = vector.load %arg7[%c1_254, %c0_255, %c80_256] : memref<2x2x256xf32, #tpu.memory_space<vmem>>, vector<1x1x16xf32>
    %231 = vector.shape_cast %230 : vector<1x1x16xf32> to vector<16xf32>
    %c1_257 = arith.constant 1 : index
    %c0_258 = arith.constant 0 : index
    %c8_259 = arith.constant 8 : index
    %c3_260 = arith.constant 3 : index
    %232 = vector.load %arg6[%c1_257, %c0_258, %c8_259, %c3_260] : memref<2x2x24x128xf32, #tpu.memory_space<vmem>>, vector<1x1x1x16xf32>
    %233 = vector.shape_cast %232 : vector<1x1x1x16xf32> to vector<16xf32>
    %234 = vector.shape_cast %231 : vector<16xf32> to vector<1x1x1x16xf32>
    tpu.vector_store %arg6[%c1_257, %c0_258, %c8_259, %c3_260], %234 {strides = array<i32>} : memref<2x2x24x128xf32, #tpu.memory_space<vmem>>, vector<1x1x1x16xf32>,
    %c1_261 = arith.constant 1 : index
    %c0_262 = arith.constant 0 : index
    %c96_263 = arith.constant 96 : index
    %235 = vector.load %arg7[%c1_261, %c0_262, %c96_263] : memref<2x2x256xf32, #tpu.memory_space<vmem>>, vector<1x1x16xf32>
    %236 = vector.shape_cast %235 : vector<1x1x16xf32> to vector<16xf32>
    %c1_264 = arith.constant 1 : index
    %c0_265 = arith.constant 0 : index
    %c9_266 = arith.constant 9 : index
    %c3_267 = arith.constant 3 : index
    %237 = vector.load %arg6[%c1_264, %c0_265, %c9_266, %c3_267] : memref<2x2x24x128xf32, #tpu.memory_space<vmem>>, vector<1x1x1x16xf32>
    %238 = vector.shape_cast %237 : vector<1x1x1x16xf32> to vector<16xf32>
    %239 = vector.shape_cast %236 : vector<16xf32> to vector<1x1x1x16xf32>
    tpu.vector_store %arg6[%c1_264, %c0_265, %c9_266, %c3_267], %239 {strides = array<i32>} : memref<2x2x24x128xf32, #tpu.memory_space<vmem>>, vector<1x1x1x16xf32>,
    %c1_268 = arith.constant 1 : index
    %c0_269 = arith.constant 0 : index
    %c112_270 = arith.constant 112 : index
    %240 = vector.load %arg7[%c1_268, %c0_269, %c112_270] : memref<2x2x256xf32, #tpu.memory_space<vmem>>, vector<1x1x16xf32>
    %241 = vector.shape_cast %240 : vector<1x1x16xf32> to vector<16xf32>
    %c1_271 = arith.constant 1 : index
    %c0_272 = arith.constant 0 : index
    %c10_273 = arith.constant 10 : index
    %c3_274 = arith.constant 3 : index
    %242 = vector.load %arg6[%c1_271, %c0_272, %c10_273, %c3_274] : memref<2x2x24x128xf32, #tpu.memory_space<vmem>>, vector<1x1x1x16xf32>
    %243 = vector.shape_cast %242 : vector<1x1x1x16xf32> to vector<16xf32>
    %244 = vector.shape_cast %241 : vector<16xf32> to vector<1x1x1x16xf32>
    tpu.vector_store %arg6[%c1_271, %c0_272, %c10_273, %c3_274], %244 {strides = array<i32>} : memref<2x2x24x128xf32, #tpu.memory_space<vmem>>, vector<1x1x1x16xf32>,
    %c1_275 = arith.constant 1 : index
    %c0_276 = arith.constant 0 : index
    %c128_277 = arith.constant 128 : index
    %245 = vector.load %arg7[%c1_275, %c0_276, %c128_277] : memref<2x2x256xf32, #tpu.memory_space<vmem>>, vector<1x1x16xf32>
    %246 = vector.shape_cast %245 : vector<1x1x16xf32> to vector<16xf32>
    %c1_278 = arith.constant 1 : index
    %c0_279 = arith.constant 0 : index
    %c11_280 = arith.constant 11 : index
    %c3_281 = arith.constant 3 : index
    %247 = vector.load %arg6[%c1_278, %c0_279, %c11_280, %c3_281] : memref<2x2x24x128xf32, #tpu.memory_space<vmem>>, vector<1x1x1x16xf32>
    %248 = vector.shape_cast %247 : vector<1x1x1x16xf32> to vector<16xf32>
    %249 = vector.shape_cast %246 : vector<16xf32> to vector<1x1x1x16xf32>
    tpu.vector_store %arg6[%c1_278, %c0_279, %c11_280, %c3_281], %249 {strides = array<i32>} : memref<2x2x24x128xf32, #tpu.memory_space<vmem>>, vector<1x1x1x16xf32>,
    %c1_282 = arith.constant 1 : index
    %c0_283 = arith.constant 0 : index
    %c144_284 = arith.constant 144 : index
    %250 = vector.load %arg7[%c1_282, %c0_283, %c144_284] : memref<2x2x256xf32, #tpu.memory_space<vmem>>, vector<1x1x16xf32>
    %251 = vector.shape_cast %250 : vector<1x1x16xf32> to vector<16xf32>
    %c1_285 = arith.constant 1 : index
    %c0_286 = arith.constant 0 : index
    %c12_287 = arith.constant 12 : index
    %c3_288 = arith.constant 3 : index
    %252 = vector.load %arg6[%c1_285, %c0_286, %c12_287, %c3_288] : memref<2x2x24x128xf32, #tpu.memory_space<vmem>>, vector<1x1x1x16xf32>
    %253 = vector.shape_cast %252 : vector<1x1x1x16xf32> to vector<16xf32>
    %254 = vector.shape_cast %251 : vector<16xf32> to vector<1x1x1x16xf32>
    tpu.vector_store %arg6[%c1_285, %c0_286, %c12_287, %c3_288], %254 {strides = array<i32>} : memref<2x2x24x128xf32, #tpu.memory_space<vmem>>, vector<1x1x1x16xf32>,
    %c1_289 = arith.constant 1 : index
    %c0_290 = arith.constant 0 : index
    %c160_291 = arith.constant 160 : index
    %255 = vector.load %arg7[%c1_289, %c0_290, %c160_291] : memref<2x2x256xf32, #tpu.memory_space<vmem>>, vector<1x1x16xf32>
    %256 = vector.shape_cast %255 : vector<1x1x16xf32> to vector<16xf32>
    %c1_292 = arith.constant 1 : index
    %c0_293 = arith.constant 0 : index
    %c13_294 = arith.constant 13 : index
    %c3_295 = arith.constant 3 : index
    %257 = vector.load %arg6[%c1_292, %c0_293, %c13_294, %c3_295] : memref<2x2x24x128xf32, #tpu.memory_space<vmem>>, vector<1x1x1x16xf32>
    %258 = vector.shape_cast %257 : vector<1x1x1x16xf32> to vector<16xf32>
    %259 = vector.shape_cast %256 : vector<16xf32> to vector<1x1x1x16xf32>
    tpu.vector_store %arg6[%c1_292, %c0_293, %c13_294, %c3_295], %259 {strides = array<i32>} : memref<2x2x24x128xf32, #tpu.memory_space<vmem>>, vector<1x1x1x16xf32>,
    %c1_296 = arith.constant 1 : index
    %c0_297 = arith.constant 0 : index
    %c176_298 = arith.constant 176 : index
    %260 = vector.load %arg7[%c1_296, %c0_297, %c176_298] : memref<2x2x256xf32, #tpu.memory_space<vmem>>, vector<1x1x16xf32>
    %261 = vector.shape_cast %260 : vector<1x1x16xf32> to vector<16xf32>
    %c1_299 = arith.constant 1 : index
    %c0_300 = arith.constant 0 : index
    %c14_301 = arith.constant 14 : index
    %c3_302 = arith.constant 3 : index
    %262 = vector.load %arg6[%c1_299, %c0_300, %c14_301, %c3_302] : memref<2x2x24x128xf32, #tpu.memory_space<vmem>>, vector<1x1x1x16xf32>
    %263 = vector.shape_cast %262 : vector<1x1x1x16xf32> to vector<16xf32>
    %264 = vector.shape_cast %261 : vector<16xf32> to vector<1x1x1x16xf32>
    tpu.vector_store %arg6[%c1_299, %c0_300, %c14_301, %c3_302], %264 {strides = array<i32>} : memref<2x2x24x128xf32, #tpu.memory_space<vmem>>, vector<1x1x1x16xf32>,
    %c1_303 = arith.constant 1 : index
    %c0_304 = arith.constant 0 : index
    %c192_305 = arith.constant 192 : index
    %265 = vector.load %arg7[%c1_303, %c0_304, %c192_305] : memref<2x2x256xf32, #tpu.memory_space<vmem>>, vector<1x1x16xf32>
    %266 = vector.shape_cast %265 : vector<1x1x16xf32> to vector<16xf32>
    %c1_306 = arith.constant 1 : index
    %c0_307 = arith.constant 0 : index
    %c15_308 = arith.constant 15 : index
    %c3_309 = arith.constant 3 : index
    %267 = vector.load %arg6[%c1_306, %c0_307, %c15_308, %c3_309] : memref<2x2x24x128xf32, #tpu.memory_space<vmem>>, vector<1x1x1x16xf32>
    %268 = vector.shape_cast %267 : vector<1x1x1x16xf32> to vector<16xf32>
    %269 = vector.shape_cast %266 : vector<16xf32> to vector<1x1x1x16xf32>
    tpu.vector_store %arg6[%c1_306, %c0_307, %c15_308, %c3_309], %269 {strides = array<i32>} : memref<2x2x24x128xf32, #tpu.memory_space<vmem>>, vector<1x1x1x16xf32>,
    %c1_310 = arith.constant 1 : index
    %c0_311 = arith.constant 0 : index
    %c208_312 = arith.constant 208 : index
    %270 = vector.load %arg7[%c1_310, %c0_311, %c208_312] : memref<2x2x256xf32, #tpu.memory_space<vmem>>, vector<1x1x16xf32>
    %271 = vector.shape_cast %270 : vector<1x1x16xf32> to vector<16xf32>
    %c1_313 = arith.constant 1 : index
    %c0_314 = arith.constant 0 : index
    %c16_315 = arith.constant 16 : index
    %c3_316 = arith.constant 3 : index
    %272 = vector.load %arg6[%c1_313, %c0_314, %c16_315, %c3_316] : memref<2x2x24x128xf32, #tpu.memory_space<vmem>>, vector<1x1x1x16xf32>
    %273 = vector.shape_cast %272 : vector<1x1x1x16xf32> to vector<16xf32>
    %274 = vector.shape_cast %271 : vector<16xf32> to vector<1x1x1x16xf32>
    tpu.vector_store %arg6[%c1_313, %c0_314, %c16_315, %c3_316], %274 {strides = array<i32>} : memref<2x2x24x128xf32, #tpu.memory_space<vmem>>, vector<1x1x1x16xf32>,
    %c1_317 = arith.constant 1 : index
    %c0_318 = arith.constant 0 : index
    %c224_319 = arith.constant 224 : index
    %275 = vector.load %arg7[%c1_317, %c0_318, %c224_319] : memref<2x2x256xf32, #tpu.memory_space<vmem>>, vector<1x1x16xf32>
    %276 = vector.shape_cast %275 : vector<1x1x16xf32> to vector<16xf32>
    %c1_320 = arith.constant 1 : index
    %c0_321 = arith.constant 0 : index
    %c17_322 = arith.constant 17 : index
    %c3_323 = arith.constant 3 : index
    %277 = vector.load %arg6[%c1_320, %c0_321, %c17_322, %c3_323] : memref<2x2x24x128xf32, #tpu.memory_space<vmem>>, vector<1x1x1x16xf32>
    %278 = vector.shape_cast %277 : vector<1x1x1x16xf32> to vector<16xf32>
    %279 = vector.shape_cast %276 : vector<16xf32> to vector<1x1x1x16xf32>
    tpu.vector_store %arg6[%c1_320, %c0_321, %c17_322, %c3_323], %279 {strides = array<i32>} : memref<2x2x24x128xf32, #tpu.memory_space<vmem>>, vector<1x1x1x16xf32>,
    %c1_324 = arith.constant 1 : index
    %c0_325 = arith.constant 0 : index
    %c240_326 = arith.constant 240 : index
    %280 = vector.load %arg7[%c1_324, %c0_325, %c240_326] : memref<2x2x256xf32, #tpu.memory_space<vmem>>, vector<1x1x16xf32>
    %281 = vector.shape_cast %280 : vector<1x1x16xf32> to vector<16xf32>
    %c1_327 = arith.constant 1 : index
    %c0_328 = arith.constant 0 : index
    %c18_329 = arith.constant 18 : index
    %c3_330 = arith.constant 3 : index
    %282 = vector.load %arg6[%c1_327, %c0_328, %c18_329, %c3_330] : memref<2x2x24x128xf32, #tpu.memory_space<vmem>>, vector<1x1x1x16xf32>
    %283 = vector.shape_cast %282 : vector<1x1x1x16xf32> to vector<16xf32>
    %284 = vector.shape_cast %281 : vector<16xf32> to vector<1x1x1x16xf32>
    tpu.vector_store %arg6[%c1_327, %c0_328, %c18_329, %c3_330], %284 {strides = array<i32>} : memref<2x2x24x128xf32, #tpu.memory_space<vmem>>, vector<1x1x1x16xf32>,
    %c1_331 = arith.constant 1 : index
    %c1_332 = arith.constant 1 : index
    %c0_333 = arith.constant 0 : index
    %285 = vector.load %arg7[%c1_331, %c1_332, %c0_333] : memref<2x2x256xf32, #tpu.memory_space<vmem>>, vector<1x1x16xf32>
    %286 = vector.shape_cast %285 : vector<1x1x16xf32> to vector<16xf32>
    %c1_334 = arith.constant 1 : index
    %c1_335 = arith.constant 1 : index
    %c3_336 = arith.constant 3 : index
    %c3_337 = arith.constant 3 : index
    %287 = vector.load %arg6[%c1_334, %c1_335, %c3_336, %c3_337] : memref<2x2x24x128xf32, #tpu.memory_space<vmem>>, vector<1x1x1x16xf32>
    %288 = vector.shape_cast %287 : vector<1x1x1x16xf32> to vector<16xf32>
    %289 = vector.shape_cast %286 : vector<16xf32> to vector<1x1x1x16xf32>
    tpu.vector_store %arg6[%c1_334, %c1_335, %c3_336, %c3_337], %289 {strides = array<i32>} : memref<2x2x24x128xf32, #tpu.memory_space<vmem>>, vector<1x1x1x16xf32>,
    %c1_338 = arith.constant 1 : index
    %c1_339 = arith.constant 1 : index
    %c16_340 = arith.constant 16 : index
    %290 = vector.load %arg7[%c1_338, %c1_339, %c16_340] : memref<2x2x256xf32, #tpu.memory_space<vmem>>, vector<1x1x16xf32>
    %291 = vector.shape_cast %290 : vector<1x1x16xf32> to vector<16xf32>
    %c1_341 = arith.constant 1 : index
    %c1_342 = arith.constant 1 : index
    %c4_343 = arith.constant 4 : index
    %c3_344 = arith.constant 3 : index
    %292 = vector.load %arg6[%c1_341, %c1_342, %c4_343, %c3_344] : memref<2x2x24x128xf32, #tpu.memory_space<vmem>>, vector<1x1x1x16xf32>
    %293 = vector.shape_cast %292 : vector<1x1x1x16xf32> to vector<16xf32>
    %294 = vector.shape_cast %291 : vector<16xf32> to vector<1x1x1x16xf32>
    tpu.vector_store %arg6[%c1_341, %c1_342, %c4_343, %c3_344], %294 {strides = array<i32>} : memref<2x2x24x128xf32, #tpu.memory_space<vmem>>, vector<1x1x1x16xf32>,
    %c1_345 = arith.constant 1 : index
    %c1_346 = arith.constant 1 : index
    %c32_347 = arith.constant 32 : index
    %295 = vector.load %arg7[%c1_345, %c1_346, %c32_347] : memref<2x2x256xf32, #tpu.memory_space<vmem>>, vector<1x1x16xf32>
    %296 = vector.shape_cast %295 : vector<1x1x16xf32> to vector<16xf32>
    %c1_348 = arith.constant 1 : index
    %c1_349 = arith.constant 1 : index
    %c5_350 = arith.constant 5 : index
    %c3_351 = arith.constant 3 : index
    %297 = vector.load %arg6[%c1_348, %c1_349, %c5_350, %c3_351] : memref<2x2x24x128xf32, #tpu.memory_space<vmem>>, vector<1x1x1x16xf32>
    %298 = vector.shape_cast %297 : vector<1x1x1x16xf32> to vector<16xf32>
    %299 = vector.shape_cast %296 : vector<16xf32> to vector<1x1x1x16xf32>
    tpu.vector_store %arg6[%c1_348, %c1_349, %c5_350, %c3_351], %299 {strides = array<i32>} : memref<2x2x24x128xf32, #tpu.memory_space<vmem>>, vector<1x1x1x16xf32>,
    %c1_352 = arith.constant 1 : index
    %c1_353 = arith.constant 1 : index
    %c48_354 = arith.constant 48 : index
    %300 = vector.load %arg7[%c1_352, %c1_353, %c48_354] : memref<2x2x256xf32, #tpu.memory_space<vmem>>, vector<1x1x16xf32>
    %301 = vector.shape_cast %300 : vector<1x1x16xf32> to vector<16xf32>
    %c1_355 = arith.constant 1 : index
    %c1_356 = arith.constant 1 : index
    %c6_357 = arith.constant 6 : index
    %c3_358 = arith.constant 3 : index
    %302 = vector.load %arg6[%c1_355, %c1_356, %c6_357, %c3_358] : memref<2x2x24x128xf32, #tpu.memory_space<vmem>>, vector<1x1x1x16xf32>
    %303 = vector.shape_cast %302 : vector<1x1x1x16xf32> to vector<16xf32>
    %304 = vector.shape_cast %301 : vector<16xf32> to vector<1x1x1x16xf32>
    tpu.vector_store %arg6[%c1_355, %c1_356, %c6_357, %c3_358], %304 {strides = array<i32>} : memref<2x2x24x128xf32, #tpu.memory_space<vmem>>, vector<1x1x1x16xf32>,
    %c1_359 = arith.constant 1 : index
    %c1_360 = arith.constant 1 : index
    %c64_361 = arith.constant 64 : index
    %305 = vector.load %arg7[%c1_359, %c1_360, %c64_361] : memref<2x2x256xf32, #tpu.memory_space<vmem>>, vector<1x1x16xf32>
    %306 = vector.shape_cast %305 : vector<1x1x16xf32> to vector<16xf32>
    %c1_362 = arith.constant 1 : index
    %c1_363 = arith.constant 1 : index
    %c7_364 = arith.constant 7 : index
    %c3_365 = arith.constant 3 : index
    %307 = vector.load %arg6[%c1_362, %c1_363, %c7_364, %c3_365] : memref<2x2x24x128xf32, #tpu.memory_space<vmem>>, vector<1x1x1x16xf32>
    %308 = vector.shape_cast %307 : vector<1x1x1x16xf32> to vector<16xf32>
    %309 = vector.shape_cast %306 : vector<16xf32> to vector<1x1x1x16xf32>
    tpu.vector_store %arg6[%c1_362, %c1_363, %c7_364, %c3_365], %309 {strides = array<i32>} : memref<2x2x24x128xf32, #tpu.memory_space<vmem>>, vector<1x1x1x16xf32>,
    %c1_366 = arith.constant 1 : index
    %c1_367 = arith.constant 1 : index
    %c80_368 = arith.constant 80 : index
    %310 = vector.load %arg7[%c1_366, %c1_367, %c80_368] : memref<2x2x256xf32, #tpu.memory_space<vmem>>, vector<1x1x16xf32>
    %311 = vector.shape_cast %310 : vector<1x1x16xf32> to vector<16xf32>
    %c1_369 = arith.constant 1 : index
    %c1_370 = arith.constant 1 : index
    %c8_371 = arith.constant 8 : index
    %c3_372 = arith.constant 3 : index
    %312 = vector.load %arg6[%c1_369, %c1_370, %c8_371, %c3_372] : memref<2x2x24x128xf32, #tpu.memory_space<vmem>>, vector<1x1x1x16xf32>
    %313 = vector.shape_cast %312 : vector<1x1x1x16xf32> to vector<16xf32>
    %314 = vector.shape_cast %311 : vector<16xf32> to vector<1x1x1x16xf32>
    tpu.vector_store %arg6[%c1_369, %c1_370, %c8_371, %c3_372], %314 {strides = array<i32>} : memref<2x2x24x128xf32, #tpu.memory_space<vmem>>, vector<1x1x1x16xf32>,
    %c1_373 = arith.constant 1 : index
    %c1_374 = arith.constant 1 : index
    %c96_375 = arith.constant 96 : index
    %315 = vector.load %arg7[%c1_373, %c1_374, %c96_375] : memref<2x2x256xf32, #tpu.memory_space<vmem>>, vector<1x1x16xf32>
    %316 = vector.shape_cast %315 : vector<1x1x16xf32> to vector<16xf32>
    %c1_376 = arith.constant 1 : index
    %c1_377 = arith.constant 1 : index
    %c9_378 = arith.constant 9 : index
    %c3_379 = arith.constant 3 : index
    %317 = vector.load %arg6[%c1_376, %c1_377, %c9_378, %c3_379] : memref<2x2x24x128xf32, #tpu.memory_space<vmem>>, vector<1x1x1x16xf32>
    %318 = vector.shape_cast %317 : vector<1x1x1x16xf32> to vector<16xf32>
    %319 = vector.shape_cast %316 : vector<16xf32> to vector<1x1x1x16xf32>
    tpu.vector_store %arg6[%c1_376, %c1_377, %c9_378, %c3_379], %319 {strides = array<i32>} : memref<2x2x24x128xf32, #tpu.memory_space<vmem>>, vector<1x1x1x16xf32>,
    %c1_380 = arith.constant 1 : index
    %c1_381 = arith.constant 1 : index
    %c112_382 = arith.constant 112 : index
    %320 = vector.load %arg7[%c1_380, %c1_381, %c112_382] : memref<2x2x256xf32, #tpu.memory_space<vmem>>, vector<1x1x16xf32>
    %321 = vector.shape_cast %320 : vector<1x1x16xf32> to vector<16xf32>
    %c1_383 = arith.constant 1 : index
    %c1_384 = arith.constant 1 : index
    %c10_385 = arith.constant 10 : index
    %c3_386 = arith.constant 3 : index
    %322 = vector.load %arg6[%c1_383, %c1_384, %c10_385, %c3_386] : memref<2x2x24x128xf32, #tpu.memory_space<vmem>>, vector<1x1x1x16xf32>
    %323 = vector.shape_cast %322 : vector<1x1x1x16xf32> to vector<16xf32>
    %324 = vector.shape_cast %321 : vector<16xf32> to vector<1x1x1x16xf32>
    tpu.vector_store %arg6[%c1_383, %c1_384, %c10_385, %c3_386], %324 {strides = array<i32>} : memref<2x2x24x128xf32, #tpu.memory_space<vmem>>, vector<1x1x1x16xf32>,
    %c1_387 = arith.constant 1 : index
    %c1_388 = arith.constant 1 : index
    %c128_389 = arith.constant 128 : index
    %325 = vector.load %arg7[%c1_387, %c1_388, %c128_389] : memref<2x2x256xf32, #tpu.memory_space<vmem>>, vector<1x1x16xf32>
    %326 = vector.shape_cast %325 : vector<1x1x16xf32> to vector<16xf32>
    %c1_390 = arith.constant 1 : index
    %c1_391 = arith.constant 1 : index
    %c11_392 = arith.constant 11 : index
    %c3_393 = arith.constant 3 : index
    %327 = vector.load %arg6[%c1_390, %c1_391, %c11_392, %c3_393] : memref<2x2x24x128xf32, #tpu.memory_space<vmem>>, vector<1x1x1x16xf32>
    %328 = vector.shape_cast %327 : vector<1x1x1x16xf32> to vector<16xf32>
    %329 = vector.shape_cast %326 : vector<16xf32> to vector<1x1x1x16xf32>
    tpu.vector_store %arg6[%c1_390, %c1_391, %c11_392, %c3_393], %329 {strides = array<i32>} : memref<2x2x24x128xf32, #tpu.memory_space<vmem>>, vector<1x1x1x16xf32>,
    %c1_394 = arith.constant 1 : index
    %c1_395 = arith.constant 1 : index
    %c144_396 = arith.constant 144 : index
    %330 = vector.load %arg7[%c1_394, %c1_395, %c144_396] : memref<2x2x256xf32, #tpu.memory_space<vmem>>, vector<1x1x16xf32>
    %331 = vector.shape_cast %330 : vector<1x1x16xf32> to vector<16xf32>
    %c1_397 = arith.constant 1 : index
    %c1_398 = arith.constant 1 : index
    %c12_399 = arith.constant 12 : index
    %c3_400 = arith.constant 3 : index
    %332 = vector.load %arg6[%c1_397, %c1_398, %c12_399, %c3_400] : memref<2x2x24x128xf32, #tpu.memory_space<vmem>>, vector<1x1x1x16xf32>
    %333 = vector.shape_cast %332 : vector<1x1x1x16xf32> to vector<16xf32>
    %334 = vector.shape_cast %331 : vector<16xf32> to vector<1x1x1x16xf32>
    tpu.vector_store %arg6[%c1_397, %c1_398, %c12_399, %c3_400], %334 {strides = array<i32>} : memref<2x2x24x128xf32, #tpu.memory_space<vmem>>, vector<1x1x1x16xf32>,
    %c1_401 = arith.constant 1 : index
    %c1_402 = arith.constant 1 : index
    %c160_403 = arith.constant 160 : index
    %335 = vector.load %arg7[%c1_401, %c1_402, %c160_403] : memref<2x2x256xf32, #tpu.memory_space<vmem>>, vector<1x1x16xf32>
    %336 = vector.shape_cast %335 : vector<1x1x16xf32> to vector<16xf32>
    %c1_404 = arith.constant 1 : index
    %c1_405 = arith.constant 1 : index
    %c13_406 = arith.constant 13 : index
    %c3_407 = arith.constant 3 : index
    %337 = vector.load %arg6[%c1_404, %c1_405, %c13_406, %c3_407] : memref<2x2x24x128xf32, #tpu.memory_space<vmem>>, vector<1x1x1x16xf32>
    %338 = vector.shape_cast %337 : vector<1x1x1x16xf32> to vector<16xf32>
    %339 = vector.shape_cast %336 : vector<16xf32> to vector<1x1x1x16xf32>
    tpu.vector_store %arg6[%c1_404, %c1_405, %c13_406, %c3_407], %339 {strides = array<i32>} : memref<2x2x24x128xf32, #tpu.memory_space<vmem>>, vector<1x1x1x16xf32>,
    %c1_408 = arith.constant 1 : index
    %c1_409 = arith.constant 1 : index
    %c176_410 = arith.constant 176 : index
    %340 = vector.load %arg7[%c1_408, %c1_409, %c176_410] : memref<2x2x256xf32, #tpu.memory_space<vmem>>, vector<1x1x16xf32>
    %341 = vector.shape_cast %340 : vector<1x1x16xf32> to vector<16xf32>
    %c1_411 = arith.constant 1 : index
    %c1_412 = arith.constant 1 : index
    %c14_413 = arith.constant 14 : index
    %c3_414 = arith.constant 3 : index
    %342 = vector.load %arg6[%c1_411, %c1_412, %c14_413, %c3_414] : memref<2x2x24x128xf32, #tpu.memory_space<vmem>>, vector<1x1x1x16xf32>
    %343 = vector.shape_cast %342 : vector<1x1x1x16xf32> to vector<16xf32>
    %344 = vector.shape_cast %341 : vector<16xf32> to vector<1x1x1x16xf32>
    tpu.vector_store %arg6[%c1_411, %c1_412, %c14_413, %c3_414], %344 {strides = array<i32>} : memref<2x2x24x128xf32, #tpu.memory_space<vmem>>, vector<1x1x1x16xf32>,
    %c1_415 = arith.constant 1 : index
    %c1_416 = arith.constant 1 : index
    %c192_417 = arith.constant 192 : index
    %345 = vector.load %arg7[%c1_415, %c1_416, %c192_417] : memref<2x2x256xf32, #tpu.memory_space<vmem>>, vector<1x1x16xf32>
    %346 = vector.shape_cast %345 : vector<1x1x16xf32> to vector<16xf32>
    %c1_418 = arith.constant 1 : index
    %c1_419 = arith.constant 1 : index
    %c15_420 = arith.constant 15 : index
    %c3_421 = arith.constant 3 : index
    %347 = vector.load %arg6[%c1_418, %c1_419, %c15_420, %c3_421] : memref<2x2x24x128xf32, #tpu.memory_space<vmem>>, vector<1x1x1x16xf32>
    %348 = vector.shape_cast %347 : vector<1x1x1x16xf32> to vector<16xf32>
    %349 = vector.shape_cast %346 : vector<16xf32> to vector<1x1x1x16xf32>
    tpu.vector_store %arg6[%c1_418, %c1_419, %c15_420, %c3_421], %349 {strides = array<i32>} : memref<2x2x24x128xf32, #tpu.memory_space<vmem>>, vector<1x1x1x16xf32>,
    %c1_422 = arith.constant 1 : index
    %c1_423 = arith.constant 1 : index
    %c208_424 = arith.constant 208 : index
    %350 = vector.load %arg7[%c1_422, %c1_423, %c208_424] : memref<2x2x256xf32, #tpu.memory_space<vmem>>, vector<1x1x16xf32>
    %351 = vector.shape_cast %350 : vector<1x1x16xf32> to vector<16xf32>
    %c1_425 = arith.constant 1 : index
    %c1_426 = arith.constant 1 : index
    %c16_427 = arith.constant 16 : index
    %c3_428 = arith.constant 3 : index
    %352 = vector.load %arg6[%c1_425, %c1_426, %c16_427, %c3_428] : memref<2x2x24x128xf32, #tpu.memory_space<vmem>>, vector<1x1x1x16xf32>
    %353 = vector.shape_cast %352 : vector<1x1x1x16xf32> to vector<16xf32>
    %354 = vector.shape_cast %351 : vector<16xf32> to vector<1x1x1x16xf32>
    tpu.vector_store %arg6[%c1_425, %c1_426, %c16_427, %c3_428], %354 {strides = array<i32>} : memref<2x2x24x128xf32, #tpu.memory_space<vmem>>, vector<1x1x1x16xf32>,
    %c1_429 = arith.constant 1 : index
    %c1_430 = arith.constant 1 : index
    %c224_431 = arith.constant 224 : index
    %355 = vector.load %arg7[%c1_429, %c1_430, %c224_431] : memref<2x2x256xf32, #tpu.memory_space<vmem>>, vector<1x1x16xf32>
    %356 = vector.shape_cast %355 : vector<1x1x16xf32> to vector<16xf32>
    %c1_432 = arith.constant 1 : index
    %c1_433 = arith.constant 1 : index
    %c17_434 = arith.constant 17 : index
    %c3_435 = arith.constant 3 : index
    %357 = vector.load %arg6[%c1_432, %c1_433, %c17_434, %c3_435] : memref<2x2x24x128xf32, #tpu.memory_space<vmem>>, vector<1x1x1x16xf32>
    %358 = vector.shape_cast %357 : vector<1x1x1x16xf32> to vector<16xf32>
    %359 = vector.shape_cast %356 : vector<16xf32> to vector<1x1x1x16xf32>
    tpu.vector_store %arg6[%c1_432, %c1_433, %c17_434, %c3_435], %359 {strides = array<i32>} : memref<2x2x24x128xf32, #tpu.memory_space<vmem>>, vector<1x1x1x16xf32>,
    %c1_436 = arith.constant 1 : index
    %c1_437 = arith.constant 1 : index
    %c240_438 = arith.constant 240 : index
    %360 = vector.load %arg7[%c1_436, %c1_437, %c240_438] : memref<2x2x256xf32, #tpu.memory_space<vmem>>, vector<1x1x16xf32>
    %361 = vector.shape_cast %360 : vector<1x1x16xf32> to vector<16xf32>
    %c1_439 = arith.constant 1 : index
    %c1_440 = arith.constant 1 : index
    %c18_441 = arith.constant 18 : index
    %c3_442 = arith.constant 3 : index
    %362 = vector.load %arg6[%c1_439, %c1_440, %c18_441, %c3_442] : memref<2x2x24x128xf32, #tpu.memory_space<vmem>>, vector<1x1x1x16xf32>
    %363 = vector.shape_cast %362 : vector<1x1x1x16xf32> to vector<16xf32>
    %364 = vector.shape_cast %361 : vector<16xf32> to vector<1x1x1x16xf32>
    tpu.vector_store %arg6[%c1_439, %c1_440, %c18_441, %c3_442], %364 {strides = array<i32>} : memref<2x2x24x128xf32, #tpu.memory_space<vmem>>, vector<1x1x1x16xf32>,
    %cst_443 = arith.constant 0.000000e+00 : f32
    %365 = vector.broadcast %cst_443 : f32 to vector<2x16x128xf32>
    %cst_444 = arith.constant 0.000000e+00 : f32
    %366 = vector.broadcast %cst_444 : f32 to vector<2x16x128xf32>
    %cst_445 = arith.constant 0.000000e+00 : f32
    %367 = vector.broadcast %cst_445 : f32 to vector<2x16x128xf32>
    %cst_446 = arith.constant 0.000000e+00 : f32
    %368 = vector.broadcast %cst_446 : f32 to vector<2x16x128xf32>
    %c0_447 = arith.constant 0 : index
    %369 = memref.load %arg4[%c0_447] : memref<98xf32, #tpu.memory_space<smem>>
    %c0_448 = arith.constant 0 : index
    %c0_449 = arith.constant 0 : index
    %c0_450 = arith.constant 0 : index
    %c0_451 = arith.constant 0 : index
    %370 = vector.load %arg6[%c0_448, %c0_449, %c0_450, %c0_451] : memref<2x2x24x128xf32, #tpu.memory_space<vmem>>, vector<1x2x16x128xf32>
    %371 = vector.shape_cast %370 : vector<1x2x16x128xf32> to vector<2x16x128xf32>
    %372 = vector.broadcast %369 : f32 to vector<2x16x128xf32>
    %373 = arith.mulf %372, %371 : vector<2x16x128xf32>
    %374 = arith.addf %365, %373 : vector<2x16x128xf32>
    %c7_452 = arith.constant 7 : index
    %375 = memref.load %arg4[%c7_452] : memref<98xf32, #tpu.memory_space<smem>>
    %c0_453 = arith.constant 0 : index
    %c0_454 = arith.constant 0 : index
    %c1_455 = arith.constant 1 : index
    %c0_456 = arith.constant 0 : index
    %376 = vector.load %arg6[%c0_453, %c0_454, %c1_455, %c0_456] : memref<2x2x24x128xf32, #tpu.memory_space<vmem>>, vector<1x2x16x128xf32>
    %377 = vector.shape_cast %376 : vector<1x2x16x128xf32> to vector<2x16x128xf32>
    %378 = vector.broadcast %375 : f32 to vector<2x16x128xf32>
    %379 = arith.mulf %378, %377 : vector<2x16x128xf32>
    %380 = arith.addf %366, %379 : vector<2x16x128xf32>
    %c14_457 = arith.constant 14 : index
    %381 = memref.load %arg4[%c14_457] : memref<98xf32, #tpu.memory_space<smem>>
    %c0_458 = arith.constant 0 : index
    %c0_459 = arith.constant 0 : index
    %c2 = arith.constant 2 : index
    %c0_460 = arith.constant 0 : index
    %382 = vector.load %arg6[%c0_458, %c0_459, %c2, %c0_460] : memref<2x2x24x128xf32, #tpu.memory_space<vmem>>, vector<1x2x16x128xf32>
    %383 = vector.shape_cast %382 : vector<1x2x16x128xf32> to vector<2x16x128xf32>
    %384 = vector.broadcast %381 : f32 to vector<2x16x128xf32>
    %385 = arith.mulf %384, %383 : vector<2x16x128xf32>
    %386 = arith.addf %367, %385 : vector<2x16x128xf32>
    %c21 = arith.constant 21 : index
    %387 = memref.load %arg4[%c21] : memref<98xf32, #tpu.memory_space<smem>>
    %c0_461 = arith.constant 0 : index
    %c0_462 = arith.constant 0 : index
    %c3_463 = arith.constant 3 : index
    %c0_464 = arith.constant 0 : index
    %388 = vector.load %arg6[%c0_461, %c0_462, %c3_463, %c0_464] : memref<2x2x24x128xf32, #tpu.memory_space<vmem>>, vector<1x2x16x128xf32>
    %389 = vector.shape_cast %388 : vector<1x2x16x128xf32> to vector<2x16x128xf32>
    %390 = vector.broadcast %387 : f32 to vector<2x16x128xf32>
    %391 = arith.mulf %390, %389 : vector<2x16x128xf32>
    %392 = arith.addf %368, %391 : vector<2x16x128xf32>
    %c28 = arith.constant 28 : index
    %393 = memref.load %arg4[%c28] : memref<98xf32, #tpu.memory_space<smem>>
    %c0_465 = arith.constant 0 : index
    %c0_466 = arith.constant 0 : index
    %c4_467 = arith.constant 4 : index
    %c0_468 = arith.constant 0 : index
    %394 = vector.load %arg6[%c0_465, %c0_466, %c4_467, %c0_468] : memref<2x2x24x128xf32, #tpu.memory_space<vmem>>, vector<1x2x16x128xf32>
    %395 = vector.shape_cast %394 : vector<1x2x16x128xf32> to vector<2x16x128xf32>
    %396 = vector.broadcast %393 : f32 to vector<2x16x128xf32>
    %397 = arith.mulf %396, %395 : vector<2x16x128xf32>
    %398 = arith.addf %374, %397 : vector<2x16x128xf32>
    %c35 = arith.constant 35 : index
    %399 = memref.load %arg4[%c35] : memref<98xf32, #tpu.memory_space<smem>>
    %c0_469 = arith.constant 0 : index
    %c0_470 = arith.constant 0 : index
    %c5_471 = arith.constant 5 : index
    %c0_472 = arith.constant 0 : index
    %400 = vector.load %arg6[%c0_469, %c0_470, %c5_471, %c0_472] : memref<2x2x24x128xf32, #tpu.memory_space<vmem>>, vector<1x2x16x128xf32>
    %401 = vector.shape_cast %400 : vector<1x2x16x128xf32> to vector<2x16x128xf32>
    %402 = vector.broadcast %399 : f32 to vector<2x16x128xf32>
    %403 = arith.mulf %402, %401 : vector<2x16x128xf32>
    %404 = arith.addf %380, %403 : vector<2x16x128xf32>
    %c42 = arith.constant 42 : index
    %405 = memref.load %arg4[%c42] : memref<98xf32, #tpu.memory_space<smem>>
    %c0_473 = arith.constant 0 : index
    %c0_474 = arith.constant 0 : index
    %c6_475 = arith.constant 6 : index
    %c0_476 = arith.constant 0 : index
    %406 = vector.load %arg6[%c0_473, %c0_474, %c6_475, %c0_476] : memref<2x2x24x128xf32, #tpu.memory_space<vmem>>, vector<1x2x16x128xf32>
    %407 = vector.shape_cast %406 : vector<1x2x16x128xf32> to vector<2x16x128xf32>
    %408 = vector.broadcast %405 : f32 to vector<2x16x128xf32>
    %409 = arith.mulf %408, %407 : vector<2x16x128xf32>
    %410 = arith.addf %386, %409 : vector<2x16x128xf32>
    %c0_477 = arith.constant 0 : index
    %c0_478 = arith.constant 0 : index
    %c0_479 = arith.constant 0 : index
    %c0_480 = arith.constant 0 : index
    %411 = vector.load %arg6[%c0_477, %c0_478, %c0_479, %c0_480] : memref<2x2x24x128xf32, #tpu.memory_space<vmem>>, vector<1x2x24x128xf32>
    %412 = vector.shape_cast %411 : vector<1x2x24x128xf32> to vector<2x24x128xf32>
    %c127_i32 = arith.constant 127 : i32
    %413 = tpu.dynamic_rotate %412 by %c127_i32 dim 2 : vector<2x24x128xf32>, i32 -> vector<2x24x128xf32>
    %c0_481 = arith.constant 0 : index
    %c0_482 = arith.constant 0 : index
    %c0_483 = arith.constant 0 : index
    %414 = vector.load %arg8[%c0_481, %c0_482, %c0_483] : memref<2x24x128xf32, #tpu.memory_space<vmem>>, vector<2x24x128xf32>
    tpu.vector_store %arg8[%c0_481, %c0_482, %c0_483], %413 {strides = array<i32>} : memref<2x24x128xf32, #tpu.memory_space<vmem>>, vector<2x24x128xf32>,
    %c1_484 = arith.constant 1 : index
    %415 = memref.load %arg4[%c1_484] : memref<98xf32, #tpu.memory_space<smem>>
    %c0_485 = arith.constant 0 : index
    %c0_486 = arith.constant 0 : index
    %c0_487 = arith.constant 0 : index
    %416 = vector.load %arg8[%c0_485, %c0_486, %c0_487] : memref<2x24x128xf32, #tpu.memory_space<vmem>>, vector<2x16x128xf32>
    %417 = vector.broadcast %415 : f32 to vector<2x16x128xf32>
    %418 = arith.mulf %417, %416 : vector<2x16x128xf32>
    %419 = arith.addf %392, %418 : vector<2x16x128xf32>
    %c8_488 = arith.constant 8 : index
    %420 = memref.load %arg4[%c8_488] : memref<98xf32, #tpu.memory_space<smem>>
    %c0_489 = arith.constant 0 : index
    %c1_490 = arith.constant 1 : index
    %c0_491 = arith.constant 0 : index
    %421 = vector.load %arg8[%c0_489, %c1_490, %c0_491] : memref<2x24x128xf32, #tpu.memory_space<vmem>>, vector<2x16x128xf32>
    %422 = vector.broadcast %420 : f32 to vector<2x16x128xf32>
    %423 = arith.mulf %422, %421 : vector<2x16x128xf32>
    %424 = arith.addf %398, %423 : vector<2x16x128xf32>
    %c15_492 = arith.constant 15 : index
    %425 = memref.load %arg4[%c15_492] : memref<98xf32, #tpu.memory_space<smem>>
    %c0_493 = arith.constant 0 : index
    %c2_494 = arith.constant 2 : index
    %c0_495 = arith.constant 0 : index
    %426 = vector.load %arg8[%c0_493, %c2_494, %c0_495] : memref<2x24x128xf32, #tpu.memory_space<vmem>>, vector<2x16x128xf32>
    %427 = vector.broadcast %425 : f32 to vector<2x16x128xf32>
    %428 = arith.mulf %427, %426 : vector<2x16x128xf32>
    %429 = arith.addf %404, %428 : vector<2x16x128xf32>
    %c22 = arith.constant 22 : index
    %430 = memref.load %arg4[%c22] : memref<98xf32, #tpu.memory_space<smem>>
    %c0_496 = arith.constant 0 : index
    %c3_497 = arith.constant 3 : index
    %c0_498 = arith.constant 0 : index
    %431 = vector.load %arg8[%c0_496, %c3_497, %c0_498] : memref<2x24x128xf32, #tpu.memory_space<vmem>>, vector<2x16x128xf32>
    %432 = vector.broadcast %430 : f32 to vector<2x16x128xf32>
    %433 = arith.mulf %432, %431 : vector<2x16x128xf32>
    %434 = arith.addf %410, %433 : vector<2x16x128xf32>
    %c29 = arith.constant 29 : index
    %435 = memref.load %arg4[%c29] : memref<98xf32, #tpu.memory_space<smem>>
    %c0_499 = arith.constant 0 : index
    %c4_500 = arith.constant 4 : index
    %c0_501 = arith.constant 0 : index
    %436 = vector.load %arg8[%c0_499, %c4_500, %c0_501] : memref<2x24x128xf32, #tpu.memory_space<vmem>>, vector<2x16x128xf32>
    %437 = vector.broadcast %435 : f32 to vector<2x16x128xf32>
    %438 = arith.mulf %437, %436 : vector<2x16x128xf32>
    %439 = arith.addf %419, %438 : vector<2x16x128xf32>
    %c36 = arith.constant 36 : index
    %440 = memref.load %arg4[%c36] : memref<98xf32, #tpu.memory_space<smem>>
    %c0_502 = arith.constant 0 : index
    %c5_503 = arith.constant 5 : index
    %c0_504 = arith.constant 0 : index
    %441 = vector.load %arg8[%c0_502, %c5_503, %c0_504] : memref<2x24x128xf32, #tpu.memory_space<vmem>>, vector<2x16x128xf32>
    %442 = vector.broadcast %440 : f32 to vector<2x16x128xf32>
    %443 = arith.mulf %442, %441 : vector<2x16x128xf32>
    %444 = arith.addf %424, %443 : vector<2x16x128xf32>
    %c43 = arith.constant 43 : index
    %445 = memref.load %arg4[%c43] : memref<98xf32, #tpu.memory_space<smem>>
    %c0_505 = arith.constant 0 : index
    %c6_506 = arith.constant 6 : index
    %c0_507 = arith.constant 0 : index
    %446 = vector.load %arg8[%c0_505, %c6_506, %c0_507] : memref<2x24x128xf32, #tpu.memory_space<vmem>>, vector<2x16x128xf32>
    %447 = vector.broadcast %445 : f32 to vector<2x16x128xf32>
    %448 = arith.mulf %447, %446 : vector<2x16x128xf32>
    %449 = arith.addf %429, %448 : vector<2x16x128xf32>
    %c0_508 = arith.constant 0 : index
    %c0_509 = arith.constant 0 : index
    %c0_510 = arith.constant 0 : index
    %c0_511 = arith.constant 0 : index
    %450 = vector.load %arg6[%c0_508, %c0_509, %c0_510, %c0_511] : memref<2x2x24x128xf32, #tpu.memory_space<vmem>>, vector<1x2x24x128xf32>
    %451 = vector.shape_cast %450 : vector<1x2x24x128xf32> to vector<2x24x128xf32>
    %c126_i32 = arith.constant 126 : i32
    %452 = tpu.dynamic_rotate %451 by %c126_i32 dim 2 : vector<2x24x128xf32>, i32 -> vector<2x24x128xf32>
    %c0_512 = arith.constant 0 : index
    %c0_513 = arith.constant 0 : index
    %c0_514 = arith.constant 0 : index
    %453 = vector.load %arg8[%c0_512, %c0_513, %c0_514] : memref<2x24x128xf32, #tpu.memory_space<vmem>>, vector<2x24x128xf32>
    tpu.vector_store %arg8[%c0_512, %c0_513, %c0_514], %452 {strides = array<i32>} : memref<2x24x128xf32, #tpu.memory_space<vmem>>, vector<2x24x128xf32>,
    %c2_515 = arith.constant 2 : index
    %454 = memref.load %arg4[%c2_515] : memref<98xf32, #tpu.memory_space<smem>>
    %c0_516 = arith.constant 0 : index
    %c0_517 = arith.constant 0 : index
    %c0_518 = arith.constant 0 : index
    %455 = vector.load %arg8[%c0_516, %c0_517, %c0_518] : memref<2x24x128xf32, #tpu.memory_space<vmem>>, vector<2x16x128xf32>
    %456 = vector.broadcast %454 : f32 to vector<2x16x128xf32>
    %457 = arith.mulf %456, %455 : vector<2x16x128xf32>
    %458 = arith.addf %434, %457 : vector<2x16x128xf32>
    %c9_519 = arith.constant 9 : index
    %459 = memref.load %arg4[%c9_519] : memref<98xf32, #tpu.memory_space<smem>>
    %c0_520 = arith.constant 0 : index
    %c1_521 = arith.constant 1 : index
    %c0_522 = arith.constant 0 : index
    %460 = vector.load %arg8[%c0_520, %c1_521, %c0_522] : memref<2x24x128xf32, #tpu.memory_space<vmem>>, vector<2x16x128xf32>
    %461 = vector.broadcast %459 : f32 to vector<2x16x128xf32>
    %462 = arith.mulf %461, %460 : vector<2x16x128xf32>
    %463 = arith.addf %439, %462 : vector<2x16x128xf32>
    %c16_523 = arith.constant 16 : index
    %464 = memref.load %arg4[%c16_523] : memref<98xf32, #tpu.memory_space<smem>>
    %c0_524 = arith.constant 0 : index
    %c2_525 = arith.constant 2 : index
    %c0_526 = arith.constant 0 : index
    %465 = vector.load %arg8[%c0_524, %c2_525, %c0_526] : memref<2x24x128xf32, #tpu.memory_space<vmem>>, vector<2x16x128xf32>
    %466 = vector.broadcast %464 : f32 to vector<2x16x128xf32>
    %467 = arith.mulf %466, %465 : vector<2x16x128xf32>
    %468 = arith.addf %444, %467 : vector<2x16x128xf32>
    %c23 = arith.constant 23 : index
    %469 = memref.load %arg4[%c23] : memref<98xf32, #tpu.memory_space<smem>>
    %c0_527 = arith.constant 0 : index
    %c3_528 = arith.constant 3 : index
    %c0_529 = arith.constant 0 : index
    %470 = vector.load %arg8[%c0_527, %c3_528, %c0_529] : memref<2x24x128xf32, #tpu.memory_space<vmem>>, vector<2x16x128xf32>
    %471 = vector.broadcast %469 : f32 to vector<2x16x128xf32>
    %472 = arith.mulf %471, %470 : vector<2x16x128xf32>
    %473 = arith.addf %449, %472 : vector<2x16x128xf32>
    %c30 = arith.constant 30 : index
    %474 = memref.load %arg4[%c30] : memref<98xf32, #tpu.memory_space<smem>>
    %c0_530 = arith.constant 0 : index
    %c4_531 = arith.constant 4 : index
    %c0_532 = arith.constant 0 : index
    %475 = vector.load %arg8[%c0_530, %c4_531, %c0_532] : memref<2x24x128xf32, #tpu.memory_space<vmem>>, vector<2x16x128xf32>
    %476 = vector.broadcast %474 : f32 to vector<2x16x128xf32>
    %477 = arith.mulf %476, %475 : vector<2x16x128xf32>
    %478 = arith.addf %458, %477 : vector<2x16x128xf32>
    %c37 = arith.constant 37 : index
    %479 = memref.load %arg4[%c37] : memref<98xf32, #tpu.memory_space<smem>>
    %c0_533 = arith.constant 0 : index
    %c5_534 = arith.constant 5 : index
    %c0_535 = arith.constant 0 : index
    %480 = vector.load %arg8[%c0_533, %c5_534, %c0_535] : memref<2x24x128xf32, #tpu.memory_space<vmem>>, vector<2x16x128xf32>
    %481 = vector.broadcast %479 : f32 to vector<2x16x128xf32>
    %482 = arith.mulf %481, %480 : vector<2x16x128xf32>
    %483 = arith.addf %463, %482 : vector<2x16x128xf32>
    %c44 = arith.constant 44 : index
    %484 = memref.load %arg4[%c44] : memref<98xf32, #tpu.memory_space<smem>>
    %c0_536 = arith.constant 0 : index
    %c6_537 = arith.constant 6 : index
    %c0_538 = arith.constant 0 : index
    %485 = vector.load %arg8[%c0_536, %c6_537, %c0_538] : memref<2x24x128xf32, #tpu.memory_space<vmem>>, vector<2x16x128xf32>
    %486 = vector.broadcast %484 : f32 to vector<2x16x128xf32>
    %487 = arith.mulf %486, %485 : vector<2x16x128xf32>
    %488 = arith.addf %468, %487 : vector<2x16x128xf32>
    %c0_539 = arith.constant 0 : index
    %c0_540 = arith.constant 0 : index
    %c0_541 = arith.constant 0 : index
    %c0_542 = arith.constant 0 : index
    %489 = vector.load %arg6[%c0_539, %c0_540, %c0_541, %c0_542] : memref<2x2x24x128xf32, #tpu.memory_space<vmem>>, vector<1x2x24x128xf32>
    %490 = vector.shape_cast %489 : vector<1x2x24x128xf32> to vector<2x24x128xf32>
    %c125_i32 = arith.constant 125 : i32
    %491 = tpu.dynamic_rotate %490 by %c125_i32 dim 2 : vector<2x24x128xf32>, i32 -> vector<2x24x128xf32>
    %c0_543 = arith.constant 0 : index
    %c0_544 = arith.constant 0 : index
    %c0_545 = arith.constant 0 : index
    %492 = vector.load %arg8[%c0_543, %c0_544, %c0_545] : memref<2x24x128xf32, #tpu.memory_space<vmem>>, vector<2x24x128xf32>
    tpu.vector_store %arg8[%c0_543, %c0_544, %c0_545], %491 {strides = array<i32>} : memref<2x24x128xf32, #tpu.memory_space<vmem>>, vector<2x24x128xf32>,
    %c3_546 = arith.constant 3 : index
    %493 = memref.load %arg4[%c3_546] : memref<98xf32, #tpu.memory_space<smem>>
    %c0_547 = arith.constant 0 : index
    %c0_548 = arith.constant 0 : index
    %c0_549 = arith.constant 0 : index
    %494 = vector.load %arg8[%c0_547, %c0_548, %c0_549] : memref<2x24x128xf32, #tpu.memory_space<vmem>>, vector<2x16x128xf32>
    %495 = vector.broadcast %493 : f32 to vector<2x16x128xf32>
    %496 = arith.mulf %495, %494 : vector<2x16x128xf32>
    %497 = arith.addf %473, %496 : vector<2x16x128xf32>
    %c10_550 = arith.constant 10 : index
    %498 = memref.load %arg4[%c10_550] : memref<98xf32, #tpu.memory_space<smem>>
    %c0_551 = arith.constant 0 : index
    %c1_552 = arith.constant 1 : index
    %c0_553 = arith.constant 0 : index
    %499 = vector.load %arg8[%c0_551, %c1_552, %c0_553] : memref<2x24x128xf32, #tpu.memory_space<vmem>>, vector<2x16x128xf32>
    %500 = vector.broadcast %498 : f32 to vector<2x16x128xf32>
    %501 = arith.mulf %500, %499 : vector<2x16x128xf32>
    %502 = arith.addf %478, %501 : vector<2x16x128xf32>
    %c17_554 = arith.constant 17 : index
    %503 = memref.load %arg4[%c17_554] : memref<98xf32, #tpu.memory_space<smem>>
    %c0_555 = arith.constant 0 : index
    %c2_556 = arith.constant 2 : index
    %c0_557 = arith.constant 0 : index
    %504 = vector.load %arg8[%c0_555, %c2_556, %c0_557] : memref<2x24x128xf32, #tpu.memory_space<vmem>>, vector<2x16x128xf32>
    %505 = vector.broadcast %503 : f32 to vector<2x16x128xf32>
    %506 = arith.mulf %505, %504 : vector<2x16x128xf32>
    %507 = arith.addf %483, %506 : vector<2x16x128xf32>
    %c24 = arith.constant 24 : index
    %508 = memref.load %arg4[%c24] : memref<98xf32, #tpu.memory_space<smem>>
    %c0_558 = arith.constant 0 : index
    %c3_559 = arith.constant 3 : index
    %c0_560 = arith.constant 0 : index
    %509 = vector.load %arg8[%c0_558, %c3_559, %c0_560] : memref<2x24x128xf32, #tpu.memory_space<vmem>>, vector<2x16x128xf32>
    %510 = vector.broadcast %508 : f32 to vector<2x16x128xf32>
    %511 = arith.mulf %510, %509 : vector<2x16x128xf32>
    %512 = arith.addf %488, %511 : vector<2x16x128xf32>
    %c31 = arith.constant 31 : index
    %513 = memref.load %arg4[%c31] : memref<98xf32, #tpu.memory_space<smem>>
    %c0_561 = arith.constant 0 : index
    %c4_562 = arith.constant 4 : index
    %c0_563 = arith.constant 0 : index
    %514 = vector.load %arg8[%c0_561, %c4_562, %c0_563] : memref<2x24x128xf32, #tpu.memory_space<vmem>>, vector<2x16x128xf32>
    %515 = vector.broadcast %513 : f32 to vector<2x16x128xf32>
    %516 = arith.mulf %515, %514 : vector<2x16x128xf32>
    %517 = arith.addf %497, %516 : vector<2x16x128xf32>
    %c38 = arith.constant 38 : index
    %518 = memref.load %arg4[%c38] : memref<98xf32, #tpu.memory_space<smem>>
    %c0_564 = arith.constant 0 : index
    %c5_565 = arith.constant 5 : index
    %c0_566 = arith.constant 0 : index
    %519 = vector.load %arg8[%c0_564, %c5_565, %c0_566] : memref<2x24x128xf32, #tpu.memory_space<vmem>>, vector<2x16x128xf32>
    %520 = vector.broadcast %518 : f32 to vector<2x16x128xf32>
    %521 = arith.mulf %520, %519 : vector<2x16x128xf32>
    %522 = arith.addf %502, %521 : vector<2x16x128xf32>
    %c45 = arith.constant 45 : index
    %523 = memref.load %arg4[%c45] : memref<98xf32, #tpu.memory_space<smem>>
    %c0_567 = arith.constant 0 : index
    %c6_568 = arith.constant 6 : index
    %c0_569 = arith.constant 0 : index
    %524 = vector.load %arg8[%c0_567, %c6_568, %c0_569] : memref<2x24x128xf32, #tpu.memory_space<vmem>>, vector<2x16x128xf32>
    %525 = vector.broadcast %523 : f32 to vector<2x16x128xf32>
    %526 = arith.mulf %525, %524 : vector<2x16x128xf32>
    %527 = arith.addf %507, %526 : vector<2x16x128xf32>
    %c0_570 = arith.constant 0 : index
    %c0_571 = arith.constant 0 : index
    %c0_572 = arith.constant 0 : index
    %c0_573 = arith.constant 0 : index
    %528 = vector.load %arg6[%c0_570, %c0_571, %c0_572, %c0_573] : memref<2x2x24x128xf32, #tpu.memory_space<vmem>>, vector<1x2x24x128xf32>
    %529 = vector.shape_cast %528 : vector<1x2x24x128xf32> to vector<2x24x128xf32>
    %c124_i32 = arith.constant 124 : i32
    %530 = tpu.dynamic_rotate %529 by %c124_i32 dim 2 : vector<2x24x128xf32>, i32 -> vector<2x24x128xf32>
    %c0_574 = arith.constant 0 : index
    %c0_575 = arith.constant 0 : index
    %c0_576 = arith.constant 0 : index
    %531 = vector.load %arg8[%c0_574, %c0_575, %c0_576] : memref<2x24x128xf32, #tpu.memory_space<vmem>>, vector<2x24x128xf32>
    tpu.vector_store %arg8[%c0_574, %c0_575, %c0_576], %530 {strides = array<i32>} : memref<2x24x128xf32, #tpu.memory_space<vmem>>, vector<2x24x128xf32>,
    %c4_577 = arith.constant 4 : index
    %532 = memref.load %arg4[%c4_577] : memref<98xf32, #tpu.memory_space<smem>>
    %c0_578 = arith.constant 0 : index
    %c0_579 = arith.constant 0 : index
    %c0_580 = arith.constant 0 : index
    %533 = vector.load %arg8[%c0_578, %c0_579, %c0_580] : memref<2x24x128xf32, #tpu.memory_space<vmem>>, vector<2x16x128xf32>
    %534 = vector.broadcast %532 : f32 to vector<2x16x128xf32>
    %535 = arith.mulf %534, %533 : vector<2x16x128xf32>
    %536 = arith.addf %512, %535 : vector<2x16x128xf32>
    %c11_581 = arith.constant 11 : index
    %537 = memref.load %arg4[%c11_581] : memref<98xf32, #tpu.memory_space<smem>>
    %c0_582 = arith.constant 0 : index
    %c1_583 = arith.constant 1 : index
    %c0_584 = arith.constant 0 : index
    %538 = vector.load %arg8[%c0_582, %c1_583, %c0_584] : memref<2x24x128xf32, #tpu.memory_space<vmem>>, vector<2x16x128xf32>
    %539 = vector.broadcast %537 : f32 to vector<2x16x128xf32>
    %540 = arith.mulf %539, %538 : vector<2x16x128xf32>
    %541 = arith.addf %517, %540 : vector<2x16x128xf32>
    %c18_585 = arith.constant 18 : index
    %542 = memref.load %arg4[%c18_585] : memref<98xf32, #tpu.memory_space<smem>>
    %c0_586 = arith.constant 0 : index
    %c2_587 = arith.constant 2 : index
    %c0_588 = arith.constant 0 : index
    %543 = vector.load %arg8[%c0_586, %c2_587, %c0_588] : memref<2x24x128xf32, #tpu.memory_space<vmem>>, vector<2x16x128xf32>
    %544 = vector.broadcast %542 : f32 to vector<2x16x128xf32>
    %545 = arith.mulf %544, %543 : vector<2x16x128xf32>
    %546 = arith.addf %522, %545 : vector<2x16x128xf32>
    %c25 = arith.constant 25 : index
    %547 = memref.load %arg4[%c25] : memref<98xf32, #tpu.memory_space<smem>>
    %c0_589 = arith.constant 0 : index
    %c3_590 = arith.constant 3 : index
    %c0_591 = arith.constant 0 : index
    %548 = vector.load %arg8[%c0_589, %c3_590, %c0_591] : memref<2x24x128xf32, #tpu.memory_space<vmem>>, vector<2x16x128xf32>
    %549 = vector.broadcast %547 : f32 to vector<2x16x128xf32>
    %550 = arith.mulf %549, %548 : vector<2x16x128xf32>
    %551 = arith.addf %527, %550 : vector<2x16x128xf32>
    %c32_592 = arith.constant 32 : index
    %552 = memref.load %arg4[%c32_592] : memref<98xf32, #tpu.memory_space<smem>>
    %c0_593 = arith.constant 0 : index
    %c4_594 = arith.constant 4 : index
    %c0_595 = arith.constant 0 : index
    %553 = vector.load %arg8[%c0_593, %c4_594, %c0_595] : memref<2x24x128xf32, #tpu.memory_space<vmem>>, vector<2x16x128xf32>
    %554 = vector.broadcast %552 : f32 to vector<2x16x128xf32>
    %555 = arith.mulf %554, %553 : vector<2x16x128xf32>
    %556 = arith.addf %536, %555 : vector<2x16x128xf32>
    %c39 = arith.constant 39 : index
    %557 = memref.load %arg4[%c39] : memref<98xf32, #tpu.memory_space<smem>>
    %c0_596 = arith.constant 0 : index
    %c5_597 = arith.constant 5 : index
    %c0_598 = arith.constant 0 : index
    %558 = vector.load %arg8[%c0_596, %c5_597, %c0_598] : memref<2x24x128xf32, #tpu.memory_space<vmem>>, vector<2x16x128xf32>
    %559 = vector.broadcast %557 : f32 to vector<2x16x128xf32>
    %560 = arith.mulf %559, %558 : vector<2x16x128xf32>
    %561 = arith.addf %541, %560 : vector<2x16x128xf32>
    %c46 = arith.constant 46 : index
    %562 = memref.load %arg4[%c46] : memref<98xf32, #tpu.memory_space<smem>>
    %c0_599 = arith.constant 0 : index
    %c6_600 = arith.constant 6 : index
    %c0_601 = arith.constant 0 : index
    %563 = vector.load %arg8[%c0_599, %c6_600, %c0_601] : memref<2x24x128xf32, #tpu.memory_space<vmem>>, vector<2x16x128xf32>
    %564 = vector.broadcast %562 : f32 to vector<2x16x128xf32>
    %565 = arith.mulf %564, %563 : vector<2x16x128xf32>
    %566 = arith.addf %546, %565 : vector<2x16x128xf32>
    %c0_602 = arith.constant 0 : index
    %c0_603 = arith.constant 0 : index
    %c0_604 = arith.constant 0 : index
    %c0_605 = arith.constant 0 : index
    %567 = vector.load %arg6[%c0_602, %c0_603, %c0_604, %c0_605] : memref<2x2x24x128xf32, #tpu.memory_space<vmem>>, vector<1x2x24x128xf32>
    %568 = vector.shape_cast %567 : vector<1x2x24x128xf32> to vector<2x24x128xf32>
    %c123_i32 = arith.constant 123 : i32
    %569 = tpu.dynamic_rotate %568 by %c123_i32 dim 2 : vector<2x24x128xf32>, i32 -> vector<2x24x128xf32>
    %c0_606 = arith.constant 0 : index
    %c0_607 = arith.constant 0 : index
    %c0_608 = arith.constant 0 : index
    %570 = vector.load %arg8[%c0_606, %c0_607, %c0_608] : memref<2x24x128xf32, #tpu.memory_space<vmem>>, vector<2x24x128xf32>
    tpu.vector_store %arg8[%c0_606, %c0_607, %c0_608], %569 {strides = array<i32>} : memref<2x24x128xf32, #tpu.memory_space<vmem>>, vector<2x24x128xf32>,
    %c5_609 = arith.constant 5 : index
    %571 = memref.load %arg4[%c5_609] : memref<98xf32, #tpu.memory_space<smem>>
    %c0_610 = arith.constant 0 : index
    %c0_611 = arith.constant 0 : index
    %c0_612 = arith.constant 0 : index
    %572 = vector.load %arg8[%c0_610, %c0_611, %c0_612] : memref<2x24x128xf32, #tpu.memory_space<vmem>>, vector<2x16x128xf32>
    %573 = vector.broadcast %571 : f32 to vector<2x16x128xf32>
    %574 = arith.mulf %573, %572 : vector<2x16x128xf32>
    %575 = arith.addf %551, %574 : vector<2x16x128xf32>
    %c12_613 = arith.constant 12 : index
    %576 = memref.load %arg4[%c12_613] : memref<98xf32, #tpu.memory_space<smem>>
    %c0_614 = arith.constant 0 : index
    %c1_615 = arith.constant 1 : index
    %c0_616 = arith.constant 0 : index
    %577 = vector.load %arg8[%c0_614, %c1_615, %c0_616] : memref<2x24x128xf32, #tpu.memory_space<vmem>>, vector<2x16x128xf32>
    %578 = vector.broadcast %576 : f32 to vector<2x16x128xf32>
    %579 = arith.mulf %578, %577 : vector<2x16x128xf32>
    %580 = arith.addf %556, %579 : vector<2x16x128xf32>
    %c19 = arith.constant 19 : index
    %581 = memref.load %arg4[%c19] : memref<98xf32, #tpu.memory_space<smem>>
    %c0_617 = arith.constant 0 : index
    %c2_618 = arith.constant 2 : index
    %c0_619 = arith.constant 0 : index
    %582 = vector.load %arg8[%c0_617, %c2_618, %c0_619] : memref<2x24x128xf32, #tpu.memory_space<vmem>>, vector<2x16x128xf32>
    %583 = vector.broadcast %581 : f32 to vector<2x16x128xf32>
    %584 = arith.mulf %583, %582 : vector<2x16x128xf32>
    %585 = arith.addf %561, %584 : vector<2x16x128xf32>
    %c26 = arith.constant 26 : index
    %586 = memref.load %arg4[%c26] : memref<98xf32, #tpu.memory_space<smem>>
    %c0_620 = arith.constant 0 : index
    %c3_621 = arith.constant 3 : index
    %c0_622 = arith.constant 0 : index
    %587 = vector.load %arg8[%c0_620, %c3_621, %c0_622] : memref<2x24x128xf32, #tpu.memory_space<vmem>>, vector<2x16x128xf32>
    %588 = vector.broadcast %586 : f32 to vector<2x16x128xf32>
    %589 = arith.mulf %588, %587 : vector<2x16x128xf32>
    %590 = arith.addf %566, %589 : vector<2x16x128xf32>
    %c33 = arith.constant 33 : index
    %591 = memref.load %arg4[%c33] : memref<98xf32, #tpu.memory_space<smem>>
    %c0_623 = arith.constant 0 : index
    %c4_624 = arith.constant 4 : index
    %c0_625 = arith.constant 0 : index
    %592 = vector.load %arg8[%c0_623, %c4_624, %c0_625] : memref<2x24x128xf32, #tpu.memory_space<vmem>>, vector<2x16x128xf32>
    %593 = vector.broadcast %591 : f32 to vector<2x16x128xf32>
    %594 = arith.mulf %593, %592 : vector<2x16x128xf32>
    %595 = arith.addf %575, %594 : vector<2x16x128xf32>
    %c40 = arith.constant 40 : index
    %596 = memref.load %arg4[%c40] : memref<98xf32, #tpu.memory_space<smem>>
    %c0_626 = arith.constant 0 : index
    %c5_627 = arith.constant 5 : index
    %c0_628 = arith.constant 0 : index
    %597 = vector.load %arg8[%c0_626, %c5_627, %c0_628] : memref<2x24x128xf32, #tpu.memory_space<vmem>>, vector<2x16x128xf32>
    %598 = vector.broadcast %596 : f32 to vector<2x16x128xf32>
    %599 = arith.mulf %598, %597 : vector<2x16x128xf32>
    %600 = arith.addf %580, %599 : vector<2x16x128xf32>
    %c47 = arith.constant 47 : index
    %601 = memref.load %arg4[%c47] : memref<98xf32, #tpu.memory_space<smem>>
    %c0_629 = arith.constant 0 : index
    %c6_630 = arith.constant 6 : index
    %c0_631 = arith.constant 0 : index
    %602 = vector.load %arg8[%c0_629, %c6_630, %c0_631] : memref<2x24x128xf32, #tpu.memory_space<vmem>>, vector<2x16x128xf32>
    %603 = vector.broadcast %601 : f32 to vector<2x16x128xf32>
    %604 = arith.mulf %603, %602 : vector<2x16x128xf32>
    %605 = arith.addf %585, %604 : vector<2x16x128xf32>
    %c0_632 = arith.constant 0 : index
    %c0_633 = arith.constant 0 : index
    %c0_634 = arith.constant 0 : index
    %c0_635 = arith.constant 0 : index
    %606 = vector.load %arg6[%c0_632, %c0_633, %c0_634, %c0_635] : memref<2x2x24x128xf32, #tpu.memory_space<vmem>>, vector<1x2x24x128xf32>
    %607 = vector.shape_cast %606 : vector<1x2x24x128xf32> to vector<2x24x128xf32>
    %c122_i32 = arith.constant 122 : i32
    %608 = tpu.dynamic_rotate %607 by %c122_i32 dim 2 : vector<2x24x128xf32>, i32 -> vector<2x24x128xf32>
    %c0_636 = arith.constant 0 : index
    %c0_637 = arith.constant 0 : index
    %c0_638 = arith.constant 0 : index
    %609 = vector.load %arg8[%c0_636, %c0_637, %c0_638] : memref<2x24x128xf32, #tpu.memory_space<vmem>>, vector<2x24x128xf32>
    tpu.vector_store %arg8[%c0_636, %c0_637, %c0_638], %608 {strides = array<i32>} : memref<2x24x128xf32, #tpu.memory_space<vmem>>, vector<2x24x128xf32>,
    %c6_639 = arith.constant 6 : index
    %610 = memref.load %arg4[%c6_639] : memref<98xf32, #tpu.memory_space<smem>>
    %c0_640 = arith.constant 0 : index
    %c0_641 = arith.constant 0 : index
    %c0_642 = arith.constant 0 : index
    %611 = vector.load %arg8[%c0_640, %c0_641, %c0_642] : memref<2x24x128xf32, #tpu.memory_space<vmem>>, vector<2x16x128xf32>
    %612 = vector.broadcast %610 : f32 to vector<2x16x128xf32>
    %613 = arith.mulf %612, %611 : vector<2x16x128xf32>
    %614 = arith.addf %590, %613 : vector<2x16x128xf32>
    %c13_643 = arith.constant 13 : index
    %615 = memref.load %arg4[%c13_643] : memref<98xf32, #tpu.memory_space<smem>>
    %c0_644 = arith.constant 0 : index
    %c1_645 = arith.constant 1 : index
    %c0_646 = arith.constant 0 : index
    %616 = vector.load %arg8[%c0_644, %c1_645, %c0_646] : memref<2x24x128xf32, #tpu.memory_space<vmem>>, vector<2x16x128xf32>
    %617 = vector.broadcast %615 : f32 to vector<2x16x128xf32>
    %618 = arith.mulf %617, %616 : vector<2x16x128xf32>
    %619 = arith.addf %595, %618 : vector<2x16x128xf32>
    %c20 = arith.constant 20 : index
    %620 = memref.load %arg4[%c20] : memref<98xf32, #tpu.memory_space<smem>>
    %c0_647 = arith.constant 0 : index
    %c2_648 = arith.constant 2 : index
    %c0_649 = arith.constant 0 : index
    %621 = vector.load %arg8[%c0_647, %c2_648, %c0_649] : memref<2x24x128xf32, #tpu.memory_space<vmem>>, vector<2x16x128xf32>
    %622 = vector.broadcast %620 : f32 to vector<2x16x128xf32>
    %623 = arith.mulf %622, %621 : vector<2x16x128xf32>
    %624 = arith.addf %600, %623 : vector<2x16x128xf32>
    %c27 = arith.constant 27 : index
    %625 = memref.load %arg4[%c27] : memref<98xf32, #tpu.memory_space<smem>>
    %c0_650 = arith.constant 0 : index
    %c3_651 = arith.constant 3 : index
    %c0_652 = arith.constant 0 : index
    %626 = vector.load %arg8[%c0_650, %c3_651, %c0_652] : memref<2x24x128xf32, #tpu.memory_space<vmem>>, vector<2x16x128xf32>
    %627 = vector.broadcast %625 : f32 to vector<2x16x128xf32>
    %628 = arith.mulf %627, %626 : vector<2x16x128xf32>
    %629 = arith.addf %605, %628 : vector<2x16x128xf32>
    %c34 = arith.constant 34 : index
    %630 = memref.load %arg4[%c34] : memref<98xf32, #tpu.memory_space<smem>>
    %c0_653 = arith.constant 0 : index
    %c4_654 = arith.constant 4 : index
    %c0_655 = arith.constant 0 : index
    %631 = vector.load %arg8[%c0_653, %c4_654, %c0_655] : memref<2x24x128xf32, #tpu.memory_space<vmem>>, vector<2x16x128xf32>
    %632 = vector.broadcast %630 : f32 to vector<2x16x128xf32>
    %633 = arith.mulf %632, %631 : vector<2x16x128xf32>
    %634 = arith.addf %614, %633 : vector<2x16x128xf32>
    %c41 = arith.constant 41 : index
    %635 = memref.load %arg4[%c41] : memref<98xf32, #tpu.memory_space<smem>>
    %c0_656 = arith.constant 0 : index
    %c5_657 = arith.constant 5 : index
    %c0_658 = arith.constant 0 : index
    %636 = vector.load %arg8[%c0_656, %c5_657, %c0_658] : memref<2x24x128xf32, #tpu.memory_space<vmem>>, vector<2x16x128xf32>
    %637 = vector.broadcast %635 : f32 to vector<2x16x128xf32>
    %638 = arith.mulf %637, %636 : vector<2x16x128xf32>
    %639 = arith.addf %619, %638 : vector<2x16x128xf32>
    %c48_659 = arith.constant 48 : index
    %640 = memref.load %arg4[%c48_659] : memref<98xf32, #tpu.memory_space<smem>>
    %c0_660 = arith.constant 0 : index
    %c6_661 = arith.constant 6 : index
    %c0_662 = arith.constant 0 : index
    %641 = vector.load %arg8[%c0_660, %c6_661, %c0_662] : memref<2x24x128xf32, #tpu.memory_space<vmem>>, vector<2x16x128xf32>
    %642 = vector.broadcast %640 : f32 to vector<2x16x128xf32>
    %643 = arith.mulf %642, %641 : vector<2x16x128xf32>
    %644 = arith.addf %624, %643 : vector<2x16x128xf32>
    %c49 = arith.constant 49 : index
    %645 = memref.load %arg4[%c49] : memref<98xf32, #tpu.memory_space<smem>>
    %c1_663 = arith.constant 1 : index
    %c0_664 = arith.constant 0 : index
    %c0_665 = arith.constant 0 : index
    %c0_666 = arith.constant 0 : index
    %646 = vector.load %arg6[%c1_663, %c0_664, %c0_665, %c0_666] : memref<2x2x24x128xf32, #tpu.memory_space<vmem>>, vector<1x2x16x128xf32>
    %647 = vector.shape_cast %646 : vector<1x2x16x128xf32> to vector<2x16x128xf32>
    %648 = vector.broadcast %645 : f32 to vector<2x16x128xf32>
    %649 = arith.mulf %648, %647 : vector<2x16x128xf32>
    %650 = arith.addf %629, %649 : vector<2x16x128xf32>
    %c56 = arith.constant 56 : index
    %651 = memref.load %arg4[%c56] : memref<98xf32, #tpu.memory_space<smem>>
    %c1_667 = arith.constant 1 : index
    %c0_668 = arith.constant 0 : index
    %c1_669 = arith.constant 1 : index
    %c0_670 = arith.constant 0 : index
    %652 = vector.load %arg6[%c1_667, %c0_668, %c1_669, %c0_670] : memref<2x2x24x128xf32, #tpu.memory_space<vmem>>, vector<1x2x16x128xf32>
    %653 = vector.shape_cast %652 : vector<1x2x16x128xf32> to vector<2x16x128xf32>
    %654 = vector.broadcast %651 : f32 to vector<2x16x128xf32>
    %655 = arith.mulf %654, %653 : vector<2x16x128xf32>
    %656 = arith.addf %634, %655 : vector<2x16x128xf32>
    %c63 = arith.constant 63 : index
    %657 = memref.load %arg4[%c63] : memref<98xf32, #tpu.memory_space<smem>>
    %c1_671 = arith.constant 1 : index
    %c0_672 = arith.constant 0 : index
    %c2_673 = arith.constant 2 : index
    %c0_674 = arith.constant 0 : index
    %658 = vector.load %arg6[%c1_671, %c0_672, %c2_673, %c0_674] : memref<2x2x24x128xf32, #tpu.memory_space<vmem>>, vector<1x2x16x128xf32>
    %659 = vector.shape_cast %658 : vector<1x2x16x128xf32> to vector<2x16x128xf32>
    %660 = vector.broadcast %657 : f32 to vector<2x16x128xf32>
    %661 = arith.mulf %660, %659 : vector<2x16x128xf32>
    %662 = arith.addf %639, %661 : vector<2x16x128xf32>
    %c70 = arith.constant 70 : index
    %663 = memref.load %arg4[%c70] : memref<98xf32, #tpu.memory_space<smem>>
    %c1_675 = arith.constant 1 : index
    %c0_676 = arith.constant 0 : index
    %c3_677 = arith.constant 3 : index
    %c0_678 = arith.constant 0 : index
    %664 = vector.load %arg6[%c1_675, %c0_676, %c3_677, %c0_678] : memref<2x2x24x128xf32, #tpu.memory_space<vmem>>, vector<1x2x16x128xf32>
    %665 = vector.shape_cast %664 : vector<1x2x16x128xf32> to vector<2x16x128xf32>
    %666 = vector.broadcast %663 : f32 to vector<2x16x128xf32>
    %667 = arith.mulf %666, %665 : vector<2x16x128xf32>
    %668 = arith.addf %644, %667 : vector<2x16x128xf32>
    %c77 = arith.constant 77 : index
    %669 = memref.load %arg4[%c77] : memref<98xf32, #tpu.memory_space<smem>>
    %c1_679 = arith.constant 1 : index
    %c0_680 = arith.constant 0 : index
    %c4_681 = arith.constant 4 : index
    %c0_682 = arith.constant 0 : index
    %670 = vector.load %arg6[%c1_679, %c0_680, %c4_681, %c0_682] : memref<2x2x24x128xf32, #tpu.memory_space<vmem>>, vector<1x2x16x128xf32>
    %671 = vector.shape_cast %670 : vector<1x2x16x128xf32> to vector<2x16x128xf32>
    %672 = vector.broadcast %669 : f32 to vector<2x16x128xf32>
    %673 = arith.mulf %672, %671 : vector<2x16x128xf32>
    %674 = arith.addf %650, %673 : vector<2x16x128xf32>
    %c84 = arith.constant 84 : index
    %675 = memref.load %arg4[%c84] : memref<98xf32, #tpu.memory_space<smem>>
    %c1_683 = arith.constant 1 : index
    %c0_684 = arith.constant 0 : index
    %c5_685 = arith.constant 5 : index
    %c0_686 = arith.constant 0 : index
    %676 = vector.load %arg6[%c1_683, %c0_684, %c5_685, %c0_686] : memref<2x2x24x128xf32, #tpu.memory_space<vmem>>, vector<1x2x16x128xf32>
    %677 = vector.shape_cast %676 : vector<1x2x16x128xf32> to vector<2x16x128xf32>
    %678 = vector.broadcast %675 : f32 to vector<2x16x128xf32>
    %679 = arith.mulf %678, %677 : vector<2x16x128xf32>
    %680 = arith.addf %656, %679 : vector<2x16x128xf32>
    %c91 = arith.constant 91 : index
    %681 = memref.load %arg4[%c91] : memref<98xf32, #tpu.memory_space<smem>>
    %c1_687 = arith.constant 1 : index
    %c0_688 = arith.constant 0 : index
    %c6_689 = arith.constant 6 : index
    %c0_690 = arith.constant 0 : index
    %682 = vector.load %arg6[%c1_687, %c0_688, %c6_689, %c0_690] : memref<2x2x24x128xf32, #tpu.memory_space<vmem>>, vector<1x2x16x128xf32>
    %683 = vector.shape_cast %682 : vector<1x2x16x128xf32> to vector<2x16x128xf32>
    %684 = vector.broadcast %681 : f32 to vector<2x16x128xf32>
    %685 = arith.mulf %684, %683 : vector<2x16x128xf32>
    %686 = arith.addf %662, %685 : vector<2x16x128xf32>
    %c1_691 = arith.constant 1 : index
    %c0_692 = arith.constant 0 : index
    %c0_693 = arith.constant 0 : index
    %c0_694 = arith.constant 0 : index
    %687 = vector.load %arg6[%c1_691, %c0_692, %c0_693, %c0_694] : memref<2x2x24x128xf32, #tpu.memory_space<vmem>>, vector<1x2x24x128xf32>
    %688 = vector.shape_cast %687 : vector<1x2x24x128xf32> to vector<2x24x128xf32>
    %c127_i32_695 = arith.constant 127 : i32
    %689 = tpu.dynamic_rotate %688 by %c127_i32_695 dim 2 : vector<2x24x128xf32>, i32 -> vector<2x24x128xf32>
    %c0_696 = arith.constant 0 : index
    %c0_697 = arith.constant 0 : index
    %c0_698 = arith.constant 0 : index
    %690 = vector.load %arg8[%c0_696, %c0_697, %c0_698] : memref<2x24x128xf32, #tpu.memory_space<vmem>>, vector<2x24x128xf32>
    tpu.vector_store %arg8[%c0_696, %c0_697, %c0_698], %689 {strides = array<i32>} : memref<2x24x128xf32, #tpu.memory_space<vmem>>, vector<2x24x128xf32>,
    %c50 = arith.constant 50 : index
    %691 = memref.load %arg4[%c50] : memref<98xf32, #tpu.memory_space<smem>>
    %c0_699 = arith.constant 0 : index
    %c0_700 = arith.constant 0 : index
    %c0_701 = arith.constant 0 : index
    %692 = vector.load %arg8[%c0_699, %c0_700, %c0_701] : memref<2x24x128xf32, #tpu.memory_space<vmem>>, vector<2x16x128xf32>
    %693 = vector.broadcast %691 : f32 to vector<2x16x128xf32>
    %694 = arith.mulf %693, %692 : vector<2x16x128xf32>
    %695 = arith.addf %668, %694 : vector<2x16x128xf32>
    %c57 = arith.constant 57 : index
    %696 = memref.load %arg4[%c57] : memref<98xf32, #tpu.memory_space<smem>>
    %c0_702 = arith.constant 0 : index
    %c1_703 = arith.constant 1 : index
    %c0_704 = arith.constant 0 : index
    %697 = vector.load %arg8[%c0_702, %c1_703, %c0_704] : memref<2x24x128xf32, #tpu.memory_space<vmem>>, vector<2x16x128xf32>
    %698 = vector.broadcast %696 : f32 to vector<2x16x128xf32>
    %699 = arith.mulf %698, %697 : vector<2x16x128xf32>
    %700 = arith.addf %674, %699 : vector<2x16x128xf32>
    %c64_705 = arith.constant 64 : index
    %701 = memref.load %arg4[%c64_705] : memref<98xf32, #tpu.memory_space<smem>>
    %c0_706 = arith.constant 0 : index
    %c2_707 = arith.constant 2 : index
    %c0_708 = arith.constant 0 : index
    %702 = vector.load %arg8[%c0_706, %c2_707, %c0_708] : memref<2x24x128xf32, #tpu.memory_space<vmem>>, vector<2x16x128xf32>
    %703 = vector.broadcast %701 : f32 to vector<2x16x128xf32>
    %704 = arith.mulf %703, %702 : vector<2x16x128xf32>
    %705 = arith.addf %680, %704 : vector<2x16x128xf32>
    %c71 = arith.constant 71 : index
    %706 = memref.load %arg4[%c71] : memref<98xf32, #tpu.memory_space<smem>>
    %c0_709 = arith.constant 0 : index
    %c3_710 = arith.constant 3 : index
    %c0_711 = arith.constant 0 : index
    %707 = vector.load %arg8[%c0_709, %c3_710, %c0_711] : memref<2x24x128xf32, #tpu.memory_space<vmem>>, vector<2x16x128xf32>
    %708 = vector.broadcast %706 : f32 to vector<2x16x128xf32>
    %709 = arith.mulf %708, %707 : vector<2x16x128xf32>
    %710 = arith.addf %686, %709 : vector<2x16x128xf32>
    %c78 = arith.constant 78 : index
    %711 = memref.load %arg4[%c78] : memref<98xf32, #tpu.memory_space<smem>>
    %c0_712 = arith.constant 0 : index
    %c4_713 = arith.constant 4 : index
    %c0_714 = arith.constant 0 : index
    %712 = vector.load %arg8[%c0_712, %c4_713, %c0_714] : memref<2x24x128xf32, #tpu.memory_space<vmem>>, vector<2x16x128xf32>
    %713 = vector.broadcast %711 : f32 to vector<2x16x128xf32>
    %714 = arith.mulf %713, %712 : vector<2x16x128xf32>
    %715 = arith.addf %695, %714 : vector<2x16x128xf32>
    %c85 = arith.constant 85 : index
    %716 = memref.load %arg4[%c85] : memref<98xf32, #tpu.memory_space<smem>>
    %c0_715 = arith.constant 0 : index
    %c5_716 = arith.constant 5 : index
    %c0_717 = arith.constant 0 : index
    %717 = vector.load %arg8[%c0_715, %c5_716, %c0_717] : memref<2x24x128xf32, #tpu.memory_space<vmem>>, vector<2x16x128xf32>
    %718 = vector.broadcast %716 : f32 to vector<2x16x128xf32>
    %719 = arith.mulf %718, %717 : vector<2x16x128xf32>
    %720 = arith.addf %700, %719 : vector<2x16x128xf32>
    %c92 = arith.constant 92 : index
    %721 = memref.load %arg4[%c92] : memref<98xf32, #tpu.memory_space<smem>>
    %c0_718 = arith.constant 0 : index
    %c6_719 = arith.constant 6 : index
    %c0_720 = arith.constant 0 : index
    %722 = vector.load %arg8[%c0_718, %c6_719, %c0_720] : memref<2x24x128xf32, #tpu.memory_space<vmem>>, vector<2x16x128xf32>
    %723 = vector.broadcast %721 : f32 to vector<2x16x128xf32>
    %724 = arith.mulf %723, %722 : vector<2x16x128xf32>
    %725 = arith.addf %705, %724 : vector<2x16x128xf32>
    %c1_721 = arith.constant 1 : index
    %c0_722 = arith.constant 0 : index
    %c0_723 = arith.constant 0 : index
    %c0_724 = arith.constant 0 : index
    %726 = vector.load %arg6[%c1_721, %c0_722, %c0_723, %c0_724] : memref<2x2x24x128xf32, #tpu.memory_space<vmem>>, vector<1x2x24x128xf32>
    %727 = vector.shape_cast %726 : vector<1x2x24x128xf32> to vector<2x24x128xf32>
    %c126_i32_725 = arith.constant 126 : i32
    %728 = tpu.dynamic_rotate %727 by %c126_i32_725 dim 2 : vector<2x24x128xf32>, i32 -> vector<2x24x128xf32>
    %c0_726 = arith.constant 0 : index
    %c0_727 = arith.constant 0 : index
    %c0_728 = arith.constant 0 : index
    %729 = vector.load %arg8[%c0_726, %c0_727, %c0_728] : memref<2x24x128xf32, #tpu.memory_space<vmem>>, vector<2x24x128xf32>
    tpu.vector_store %arg8[%c0_726, %c0_727, %c0_728], %728 {strides = array<i32>} : memref<2x24x128xf32, #tpu.memory_space<vmem>>, vector<2x24x128xf32>,
    %c51 = arith.constant 51 : index
    %730 = memref.load %arg4[%c51] : memref<98xf32, #tpu.memory_space<smem>>
    %c0_729 = arith.constant 0 : index
    %c0_730 = arith.constant 0 : index
    %c0_731 = arith.constant 0 : index
    %731 = vector.load %arg8[%c0_729, %c0_730, %c0_731] : memref<2x24x128xf32, #tpu.memory_space<vmem>>, vector<2x16x128xf32>
    %732 = vector.broadcast %730 : f32 to vector<2x16x128xf32>
    %733 = arith.mulf %732, %731 : vector<2x16x128xf32>
    %734 = arith.addf %710, %733 : vector<2x16x128xf32>
    %c58 = arith.constant 58 : index
    %735 = memref.load %arg4[%c58] : memref<98xf32, #tpu.memory_space<smem>>
    %c0_732 = arith.constant 0 : index
    %c1_733 = arith.constant 1 : index
    %c0_734 = arith.constant 0 : index
    %736 = vector.load %arg8[%c0_732, %c1_733, %c0_734] : memref<2x24x128xf32, #tpu.memory_space<vmem>>, vector<2x16x128xf32>
    %737 = vector.broadcast %735 : f32 to vector<2x16x128xf32>
    %738 = arith.mulf %737, %736 : vector<2x16x128xf32>
    %739 = arith.addf %715, %738 : vector<2x16x128xf32>
    %c65 = arith.constant 65 : index
    %740 = memref.load %arg4[%c65] : memref<98xf32, #tpu.memory_space<smem>>
    %c0_735 = arith.constant 0 : index
    %c2_736 = arith.constant 2 : index
    %c0_737 = arith.constant 0 : index
    %741 = vector.load %arg8[%c0_735, %c2_736, %c0_737] : memref<2x24x128xf32, #tpu.memory_space<vmem>>, vector<2x16x128xf32>
    %742 = vector.broadcast %740 : f32 to vector<2x16x128xf32>
    %743 = arith.mulf %742, %741 : vector<2x16x128xf32>
    %744 = arith.addf %720, %743 : vector<2x16x128xf32>
    %c72 = arith.constant 72 : index
    %745 = memref.load %arg4[%c72] : memref<98xf32, #tpu.memory_space<smem>>
    %c0_738 = arith.constant 0 : index
    %c3_739 = arith.constant 3 : index
    %c0_740 = arith.constant 0 : index
    %746 = vector.load %arg8[%c0_738, %c3_739, %c0_740] : memref<2x24x128xf32, #tpu.memory_space<vmem>>, vector<2x16x128xf32>
    %747 = vector.broadcast %745 : f32 to vector<2x16x128xf32>
    %748 = arith.mulf %747, %746 : vector<2x16x128xf32>
    %749 = arith.addf %725, %748 : vector<2x16x128xf32>
    %c79 = arith.constant 79 : index
    %750 = memref.load %arg4[%c79] : memref<98xf32, #tpu.memory_space<smem>>
    %c0_741 = arith.constant 0 : index
    %c4_742 = arith.constant 4 : index
    %c0_743 = arith.constant 0 : index
    %751 = vector.load %arg8[%c0_741, %c4_742, %c0_743] : memref<2x24x128xf32, #tpu.memory_space<vmem>>, vector<2x16x128xf32>
    %752 = vector.broadcast %750 : f32 to vector<2x16x128xf32>
    %753 = arith.mulf %752, %751 : vector<2x16x128xf32>
    %754 = arith.addf %734, %753 : vector<2x16x128xf32>
    %c86 = arith.constant 86 : index
    %755 = memref.load %arg4[%c86] : memref<98xf32, #tpu.memory_space<smem>>
    %c0_744 = arith.constant 0 : index
    %c5_745 = arith.constant 5 : index
    %c0_746 = arith.constant 0 : index
    %756 = vector.load %arg8[%c0_744, %c5_745, %c0_746] : memref<2x24x128xf32, #tpu.memory_space<vmem>>, vector<2x16x128xf32>
    %757 = vector.broadcast %755 : f32 to vector<2x16x128xf32>
    %758 = arith.mulf %757, %756 : vector<2x16x128xf32>
    %759 = arith.addf %739, %758 : vector<2x16x128xf32>
    %c93 = arith.constant 93 : index
    %760 = memref.load %arg4[%c93] : memref<98xf32, #tpu.memory_space<smem>>
    %c0_747 = arith.constant 0 : index
    %c6_748 = arith.constant 6 : index
    %c0_749 = arith.constant 0 : index
    %761 = vector.load %arg8[%c0_747, %c6_748, %c0_749] : memref<2x24x128xf32, #tpu.memory_space<vmem>>, vector<2x16x128xf32>
    %762 = vector.broadcast %760 : f32 to vector<2x16x128xf32>
    %763 = arith.mulf %762, %761 : vector<2x16x128xf32>
    %764 = arith.addf %744, %763 : vector<2x16x128xf32>
    %c1_750 = arith.constant 1 : index
    %c0_751 = arith.constant 0 : index
    %c0_752 = arith.constant 0 : index
    %c0_753 = arith.constant 0 : index
    %765 = vector.load %arg6[%c1_750, %c0_751, %c0_752, %c0_753] : memref<2x2x24x128xf32, #tpu.memory_space<vmem>>, vector<1x2x24x128xf32>
    %766 = vector.shape_cast %765 : vector<1x2x24x128xf32> to vector<2x24x128xf32>
    %c125_i32_754 = arith.constant 125 : i32
    %767 = tpu.dynamic_rotate %766 by %c125_i32_754 dim 2 : vector<2x24x128xf32>, i32 -> vector<2x24x128xf32>
    %c0_755 = arith.constant 0 : index
    %c0_756 = arith.constant 0 : index
    %c0_757 = arith.constant 0 : index
    %768 = vector.load %arg8[%c0_755, %c0_756, %c0_757] : memref<2x24x128xf32, #tpu.memory_space<vmem>>, vector<2x24x128xf32>
    tpu.vector_store %arg8[%c0_755, %c0_756, %c0_757], %767 {strides = array<i32>} : memref<2x24x128xf32, #tpu.memory_space<vmem>>, vector<2x24x128xf32>,
    %c52 = arith.constant 52 : index
    %769 = memref.load %arg4[%c52] : memref<98xf32, #tpu.memory_space<smem>>
    %c0_758 = arith.constant 0 : index
    %c0_759 = arith.constant 0 : index
    %c0_760 = arith.constant 0 : index
    %770 = vector.load %arg8[%c0_758, %c0_759, %c0_760] : memref<2x24x128xf32, #tpu.memory_space<vmem>>, vector<2x16x128xf32>
    %771 = vector.broadcast %769 : f32 to vector<2x16x128xf32>
    %772 = arith.mulf %771, %770 : vector<2x16x128xf32>
    %773 = arith.addf %749, %772 : vector<2x16x128xf32>
    %c59 = arith.constant 59 : index
    %774 = memref.load %arg4[%c59] : memref<98xf32, #tpu.memory_space<smem>>
    %c0_761 = arith.constant 0 : index
    %c1_762 = arith.constant 1 : index
    %c0_763 = arith.constant 0 : index
    %775 = vector.load %arg8[%c0_761, %c1_762, %c0_763] : memref<2x24x128xf32, #tpu.memory_space<vmem>>, vector<2x16x128xf32>
    %776 = vector.broadcast %774 : f32 to vector<2x16x128xf32>
    %777 = arith.mulf %776, %775 : vector<2x16x128xf32>
    %778 = arith.addf %754, %777 : vector<2x16x128xf32>
    %c66 = arith.constant 66 : index
    %779 = memref.load %arg4[%c66] : memref<98xf32, #tpu.memory_space<smem>>
    %c0_764 = arith.constant 0 : index
    %c2_765 = arith.constant 2 : index
    %c0_766 = arith.constant 0 : index
    %780 = vector.load %arg8[%c0_764, %c2_765, %c0_766] : memref<2x24x128xf32, #tpu.memory_space<vmem>>, vector<2x16x128xf32>
    %781 = vector.broadcast %779 : f32 to vector<2x16x128xf32>
    %782 = arith.mulf %781, %780 : vector<2x16x128xf32>
    %783 = arith.addf %759, %782 : vector<2x16x128xf32>
    %c73 = arith.constant 73 : index
    %784 = memref.load %arg4[%c73] : memref<98xf32, #tpu.memory_space<smem>>
    %c0_767 = arith.constant 0 : index
    %c3_768 = arith.constant 3 : index
    %c0_769 = arith.constant 0 : index
    %785 = vector.load %arg8[%c0_767, %c3_768, %c0_769] : memref<2x24x128xf32, #tpu.memory_space<vmem>>, vector<2x16x128xf32>
    %786 = vector.broadcast %784 : f32 to vector<2x16x128xf32>
    %787 = arith.mulf %786, %785 : vector<2x16x128xf32>
    %788 = arith.addf %764, %787 : vector<2x16x128xf32>
    %c80_770 = arith.constant 80 : index
    %789 = memref.load %arg4[%c80_770] : memref<98xf32, #tpu.memory_space<smem>>
    %c0_771 = arith.constant 0 : index
    %c4_772 = arith.constant 4 : index
    %c0_773 = arith.constant 0 : index
    %790 = vector.load %arg8[%c0_771, %c4_772, %c0_773] : memref<2x24x128xf32, #tpu.memory_space<vmem>>, vector<2x16x128xf32>
    %791 = vector.broadcast %789 : f32 to vector<2x16x128xf32>
    %792 = arith.mulf %791, %790 : vector<2x16x128xf32>
    %793 = arith.addf %773, %792 : vector<2x16x128xf32>
    %c87 = arith.constant 87 : index
    %794 = memref.load %arg4[%c87] : memref<98xf32, #tpu.memory_space<smem>>
    %c0_774 = arith.constant 0 : index
    %c5_775 = arith.constant 5 : index
    %c0_776 = arith.constant 0 : index
    %795 = vector.load %arg8[%c0_774, %c5_775, %c0_776] : memref<2x24x128xf32, #tpu.memory_space<vmem>>, vector<2x16x128xf32>
    %796 = vector.broadcast %794 : f32 to vector<2x16x128xf32>
    %797 = arith.mulf %796, %795 : vector<2x16x128xf32>
    %798 = arith.addf %778, %797 : vector<2x16x128xf32>
    %c94 = arith.constant 94 : index
    %799 = memref.load %arg4[%c94] : memref<98xf32, #tpu.memory_space<smem>>
    %c0_777 = arith.constant 0 : index
    %c6_778 = arith.constant 6 : index
    %c0_779 = arith.constant 0 : index
    %800 = vector.load %arg8[%c0_777, %c6_778, %c0_779] : memref<2x24x128xf32, #tpu.memory_space<vmem>>, vector<2x16x128xf32>
    %801 = vector.broadcast %799 : f32 to vector<2x16x128xf32>
    %802 = arith.mulf %801, %800 : vector<2x16x128xf32>
    %803 = arith.addf %783, %802 : vector<2x16x128xf32>
    %c1_780 = arith.constant 1 : index
    %c0_781 = arith.constant 0 : index
    %c0_782 = arith.constant 0 : index
    %c0_783 = arith.constant 0 : index
    %804 = vector.load %arg6[%c1_780, %c0_781, %c0_782, %c0_783] : memref<2x2x24x128xf32, #tpu.memory_space<vmem>>, vector<1x2x24x128xf32>
    %805 = vector.shape_cast %804 : vector<1x2x24x128xf32> to vector<2x24x128xf32>
    %c124_i32_784 = arith.constant 124 : i32
    %806 = tpu.dynamic_rotate %805 by %c124_i32_784 dim 2 : vector<2x24x128xf32>, i32 -> vector<2x24x128xf32>
    %c0_785 = arith.constant 0 : index
    %c0_786 = arith.constant 0 : index
    %c0_787 = arith.constant 0 : index
    %807 = vector.load %arg8[%c0_785, %c0_786, %c0_787] : memref<2x24x128xf32, #tpu.memory_space<vmem>>, vector<2x24x128xf32>
    tpu.vector_store %arg8[%c0_785, %c0_786, %c0_787], %806 {strides = array<i32>} : memref<2x24x128xf32, #tpu.memory_space<vmem>>, vector<2x24x128xf32>,
    %c53 = arith.constant 53 : index
    %808 = memref.load %arg4[%c53] : memref<98xf32, #tpu.memory_space<smem>>
    %c0_788 = arith.constant 0 : index
    %c0_789 = arith.constant 0 : index
    %c0_790 = arith.constant 0 : index
    %809 = vector.load %arg8[%c0_788, %c0_789, %c0_790] : memref<2x24x128xf32, #tpu.memory_space<vmem>>, vector<2x16x128xf32>
    %810 = vector.broadcast %808 : f32 to vector<2x16x128xf32>
    %811 = arith.mulf %810, %809 : vector<2x16x128xf32>
    %812 = arith.addf %788, %811 : vector<2x16x128xf32>
    %c60 = arith.constant 60 : index
    %813 = memref.load %arg4[%c60] : memref<98xf32, #tpu.memory_space<smem>>
    %c0_791 = arith.constant 0 : index
    %c1_792 = arith.constant 1 : index
    %c0_793 = arith.constant 0 : index
    %814 = vector.load %arg8[%c0_791, %c1_792, %c0_793] : memref<2x24x128xf32, #tpu.memory_space<vmem>>, vector<2x16x128xf32>
    %815 = vector.broadcast %813 : f32 to vector<2x16x128xf32>
    %816 = arith.mulf %815, %814 : vector<2x16x128xf32>
    %817 = arith.addf %793, %816 : vector<2x16x128xf32>
    %c67 = arith.constant 67 : index
    %818 = memref.load %arg4[%c67] : memref<98xf32, #tpu.memory_space<smem>>
    %c0_794 = arith.constant 0 : index
    %c2_795 = arith.constant 2 : index
    %c0_796 = arith.constant 0 : index
    %819 = vector.load %arg8[%c0_794, %c2_795, %c0_796] : memref<2x24x128xf32, #tpu.memory_space<vmem>>, vector<2x16x128xf32>
    %820 = vector.broadcast %818 : f32 to vector<2x16x128xf32>
    %821 = arith.mulf %820, %819 : vector<2x16x128xf32>
    %822 = arith.addf %798, %821 : vector<2x16x128xf32>
    %c74 = arith.constant 74 : index
    %823 = memref.load %arg4[%c74] : memref<98xf32, #tpu.memory_space<smem>>
    %c0_797 = arith.constant 0 : index
    %c3_798 = arith.constant 3 : index
    %c0_799 = arith.constant 0 : index
    %824 = vector.load %arg8[%c0_797, %c3_798, %c0_799] : memref<2x24x128xf32, #tpu.memory_space<vmem>>, vector<2x16x128xf32>
    %825 = vector.broadcast %823 : f32 to vector<2x16x128xf32>
    %826 = arith.mulf %825, %824 : vector<2x16x128xf32>
    %827 = arith.addf %803, %826 : vector<2x16x128xf32>
    %c81 = arith.constant 81 : index
    %828 = memref.load %arg4[%c81] : memref<98xf32, #tpu.memory_space<smem>>
    %c0_800 = arith.constant 0 : index
    %c4_801 = arith.constant 4 : index
    %c0_802 = arith.constant 0 : index
    %829 = vector.load %arg8[%c0_800, %c4_801, %c0_802] : memref<2x24x128xf32, #tpu.memory_space<vmem>>, vector<2x16x128xf32>
    %830 = vector.broadcast %828 : f32 to vector<2x16x128xf32>
    %831 = arith.mulf %830, %829 : vector<2x16x128xf32>
    %832 = arith.addf %812, %831 : vector<2x16x128xf32>
    %c88 = arith.constant 88 : index
    %833 = memref.load %arg4[%c88] : memref<98xf32, #tpu.memory_space<smem>>
    %c0_803 = arith.constant 0 : index
    %c5_804 = arith.constant 5 : index
    %c0_805 = arith.constant 0 : index
    %834 = vector.load %arg8[%c0_803, %c5_804, %c0_805] : memref<2x24x128xf32, #tpu.memory_space<vmem>>, vector<2x16x128xf32>
    %835 = vector.broadcast %833 : f32 to vector<2x16x128xf32>
    %836 = arith.mulf %835, %834 : vector<2x16x128xf32>
    %837 = arith.addf %817, %836 : vector<2x16x128xf32>
    %c95 = arith.constant 95 : index
    %838 = memref.load %arg4[%c95] : memref<98xf32, #tpu.memory_space<smem>>
    %c0_806 = arith.constant 0 : index
    %c6_807 = arith.constant 6 : index
    %c0_808 = arith.constant 0 : index
    %839 = vector.load %arg8[%c0_806, %c6_807, %c0_808] : memref<2x24x128xf32, #tpu.memory_space<vmem>>, vector<2x16x128xf32>
    %840 = vector.broadcast %838 : f32 to vector<2x16x128xf32>
    %841 = arith.mulf %840, %839 : vector<2x16x128xf32>
    %842 = arith.addf %822, %841 : vector<2x16x128xf32>
    %c1_809 = arith.constant 1 : index
    %c0_810 = arith.constant 0 : index
    %c0_811 = arith.constant 0 : index
    %c0_812 = arith.constant 0 : index
    %843 = vector.load %arg6[%c1_809, %c0_810, %c0_811, %c0_812] : memref<2x2x24x128xf32, #tpu.memory_space<vmem>>, vector<1x2x24x128xf32>
    %844 = vector.shape_cast %843 : vector<1x2x24x128xf32> to vector<2x24x128xf32>
    %c123_i32_813 = arith.constant 123 : i32
    %845 = tpu.dynamic_rotate %844 by %c123_i32_813 dim 2 : vector<2x24x128xf32>, i32 -> vector<2x24x128xf32>
    %c0_814 = arith.constant 0 : index
    %c0_815 = arith.constant 0 : index
    %c0_816 = arith.constant 0 : index
    %846 = vector.load %arg8[%c0_814, %c0_815, %c0_816] : memref<2x24x128xf32, #tpu.memory_space<vmem>>, vector<2x24x128xf32>
    tpu.vector_store %arg8[%c0_814, %c0_815, %c0_816], %845 {strides = array<i32>} : memref<2x24x128xf32, #tpu.memory_space<vmem>>, vector<2x24x128xf32>,
    %c54 = arith.constant 54 : index
    %847 = memref.load %arg4[%c54] : memref<98xf32, #tpu.memory_space<smem>>
    %c0_817 = arith.constant 0 : index
    %c0_818 = arith.constant 0 : index
    %c0_819 = arith.constant 0 : index
    %848 = vector.load %arg8[%c0_817, %c0_818, %c0_819] : memref<2x24x128xf32, #tpu.memory_space<vmem>>, vector<2x16x128xf32>
    %849 = vector.broadcast %847 : f32 to vector<2x16x128xf32>
    %850 = arith.mulf %849, %848 : vector<2x16x128xf32>
    %851 = arith.addf %827, %850 : vector<2x16x128xf32>
    %c61 = arith.constant 61 : index
    %852 = memref.load %arg4[%c61] : memref<98xf32, #tpu.memory_space<smem>>
    %c0_820 = arith.constant 0 : index
    %c1_821 = arith.constant 1 : index
    %c0_822 = arith.constant 0 : index
    %853 = vector.load %arg8[%c0_820, %c1_821, %c0_822] : memref<2x24x128xf32, #tpu.memory_space<vmem>>, vector<2x16x128xf32>
    %854 = vector.broadcast %852 : f32 to vector<2x16x128xf32>
    %855 = arith.mulf %854, %853 : vector<2x16x128xf32>
    %856 = arith.addf %832, %855 : vector<2x16x128xf32>
    %c68 = arith.constant 68 : index
    %857 = memref.load %arg4[%c68] : memref<98xf32, #tpu.memory_space<smem>>
    %c0_823 = arith.constant 0 : index
    %c2_824 = arith.constant 2 : index
    %c0_825 = arith.constant 0 : index
    %858 = vector.load %arg8[%c0_823, %c2_824, %c0_825] : memref<2x24x128xf32, #tpu.memory_space<vmem>>, vector<2x16x128xf32>
    %859 = vector.broadcast %857 : f32 to vector<2x16x128xf32>
    %860 = arith.mulf %859, %858 : vector<2x16x128xf32>
    %861 = arith.addf %837, %860 : vector<2x16x128xf32>
    %c75 = arith.constant 75 : index
    %862 = memref.load %arg4[%c75] : memref<98xf32, #tpu.memory_space<smem>>
    %c0_826 = arith.constant 0 : index
    %c3_827 = arith.constant 3 : index
    %c0_828 = arith.constant 0 : index
    %863 = vector.load %arg8[%c0_826, %c3_827, %c0_828] : memref<2x24x128xf32, #tpu.memory_space<vmem>>, vector<2x16x128xf32>
    %864 = vector.broadcast %862 : f32 to vector<2x16x128xf32>
    %865 = arith.mulf %864, %863 : vector<2x16x128xf32>
    %866 = arith.addf %842, %865 : vector<2x16x128xf32>
    %c82 = arith.constant 82 : index
    %867 = memref.load %arg4[%c82] : memref<98xf32, #tpu.memory_space<smem>>
    %c0_829 = arith.constant 0 : index
    %c4_830 = arith.constant 4 : index
    %c0_831 = arith.constant 0 : index
    %868 = vector.load %arg8[%c0_829, %c4_830, %c0_831] : memref<2x24x128xf32, #tpu.memory_space<vmem>>, vector<2x16x128xf32>
    %869 = vector.broadcast %867 : f32 to vector<2x16x128xf32>
    %870 = arith.mulf %869, %868 : vector<2x16x128xf32>
    %871 = arith.addf %851, %870 : vector<2x16x128xf32>
    %c89 = arith.constant 89 : index
    %872 = memref.load %arg4[%c89] : memref<98xf32, #tpu.memory_space<smem>>
    %c0_832 = arith.constant 0 : index
    %c5_833 = arith.constant 5 : index
    %c0_834 = arith.constant 0 : index
    %873 = vector.load %arg8[%c0_832, %c5_833, %c0_834] : memref<2x24x128xf32, #tpu.memory_space<vmem>>, vector<2x16x128xf32>
    %874 = vector.broadcast %872 : f32 to vector<2x16x128xf32>
    %875 = arith.mulf %874, %873 : vector<2x16x128xf32>
    %876 = arith.addf %856, %875 : vector<2x16x128xf32>
    %c96_835 = arith.constant 96 : index
    %877 = memref.load %arg4[%c96_835] : memref<98xf32, #tpu.memory_space<smem>>
    %c0_836 = arith.constant 0 : index
    %c6_837 = arith.constant 6 : index
    %c0_838 = arith.constant 0 : index
    %878 = vector.load %arg8[%c0_836, %c6_837, %c0_838] : memref<2x24x128xf32, #tpu.memory_space<vmem>>, vector<2x16x128xf32>
    %879 = vector.broadcast %877 : f32 to vector<2x16x128xf32>
    %880 = arith.mulf %879, %878 : vector<2x16x128xf32>
    %881 = arith.addf %861, %880 : vector<2x16x128xf32>
    %c1_839 = arith.constant 1 : index
    %c0_840 = arith.constant 0 : index
    %c0_841 = arith.constant 0 : index
    %c0_842 = arith.constant 0 : index
    %882 = vector.load %arg6[%c1_839, %c0_840, %c0_841, %c0_842] : memref<2x2x24x128xf32, #tpu.memory_space<vmem>>, vector<1x2x24x128xf32>
    %883 = vector.shape_cast %882 : vector<1x2x24x128xf32> to vector<2x24x128xf32>
    %c122_i32_843 = arith.constant 122 : i32
    %884 = tpu.dynamic_rotate %883 by %c122_i32_843 dim 2 : vector<2x24x128xf32>, i32 -> vector<2x24x128xf32>
    %c0_844 = arith.constant 0 : index
    %c0_845 = arith.constant 0 : index
    %c0_846 = arith.constant 0 : index
    %885 = vector.load %arg8[%c0_844, %c0_845, %c0_846] : memref<2x24x128xf32, #tpu.memory_space<vmem>>, vector<2x24x128xf32>
    tpu.vector_store %arg8[%c0_844, %c0_845, %c0_846], %884 {strides = array<i32>} : memref<2x24x128xf32, #tpu.memory_space<vmem>>, vector<2x24x128xf32>,
    %c55 = arith.constant 55 : index
    %886 = memref.load %arg4[%c55] : memref<98xf32, #tpu.memory_space<smem>>
    %c0_847 = arith.constant 0 : index
    %c0_848 = arith.constant 0 : index
    %c0_849 = arith.constant 0 : index
    %887 = vector.load %arg8[%c0_847, %c0_848, %c0_849] : memref<2x24x128xf32, #tpu.memory_space<vmem>>, vector<2x16x128xf32>
    %888 = vector.broadcast %886 : f32 to vector<2x16x128xf32>
    %889 = arith.mulf %888, %887 : vector<2x16x128xf32>
    %890 = arith.addf %866, %889 : vector<2x16x128xf32>
    %c62 = arith.constant 62 : index
    %891 = memref.load %arg4[%c62] : memref<98xf32, #tpu.memory_space<smem>>
    %c0_850 = arith.constant 0 : index
    %c1_851 = arith.constant 1 : index
    %c0_852 = arith.constant 0 : index
    %892 = vector.load %arg8[%c0_850, %c1_851, %c0_852] : memref<2x24x128xf32, #tpu.memory_space<vmem>>, vector<2x16x128xf32>
    %893 = vector.broadcast %891 : f32 to vector<2x16x128xf32>
    %894 = arith.mulf %893, %892 : vector<2x16x128xf32>
    %895 = arith.addf %871, %894 : vector<2x16x128xf32>
    %c69 = arith.constant 69 : index
    %896 = memref.load %arg4[%c69] : memref<98xf32, #tpu.memory_space<smem>>
    %c0_853 = arith.constant 0 : index
    %c2_854 = arith.constant 2 : index
    %c0_855 = arith.constant 0 : index
    %897 = vector.load %arg8[%c0_853, %c2_854, %c0_855] : memref<2x24x128xf32, #tpu.memory_space<vmem>>, vector<2x16x128xf32>
    %898 = vector.broadcast %896 : f32 to vector<2x16x128xf32>
    %899 = arith.mulf %898, %897 : vector<2x16x128xf32>
    %900 = arith.addf %876, %899 : vector<2x16x128xf32>
    %c76 = arith.constant 76 : index
    %901 = memref.load %arg4[%c76] : memref<98xf32, #tpu.memory_space<smem>>
    %c0_856 = arith.constant 0 : index
    %c3_857 = arith.constant 3 : index
    %c0_858 = arith.constant 0 : index
    %902 = vector.load %arg8[%c0_856, %c3_857, %c0_858] : memref<2x24x128xf32, #tpu.memory_space<vmem>>, vector<2x16x128xf32>
    %903 = vector.broadcast %901 : f32 to vector<2x16x128xf32>
    %904 = arith.mulf %903, %902 : vector<2x16x128xf32>
    %905 = arith.addf %881, %904 : vector<2x16x128xf32>
    %c83 = arith.constant 83 : index
    %906 = memref.load %arg4[%c83] : memref<98xf32, #tpu.memory_space<smem>>
    %c0_859 = arith.constant 0 : index
    %c4_860 = arith.constant 4 : index
    %c0_861 = arith.constant 0 : index
    %907 = vector.load %arg8[%c0_859, %c4_860, %c0_861] : memref<2x24x128xf32, #tpu.memory_space<vmem>>, vector<2x16x128xf32>
    %908 = vector.broadcast %906 : f32 to vector<2x16x128xf32>
    %909 = arith.mulf %908, %907 : vector<2x16x128xf32>
    %910 = arith.addf %890, %909 : vector<2x16x128xf32>
    %c90 = arith.constant 90 : index
    %911 = memref.load %arg4[%c90] : memref<98xf32, #tpu.memory_space<smem>>
    %c0_862 = arith.constant 0 : index
    %c5_863 = arith.constant 5 : index
    %c0_864 = arith.constant 0 : index
    %912 = vector.load %arg8[%c0_862, %c5_863, %c0_864] : memref<2x24x128xf32, #tpu.memory_space<vmem>>, vector<2x16x128xf32>
    %913 = vector.broadcast %911 : f32 to vector<2x16x128xf32>
    %914 = arith.mulf %913, %912 : vector<2x16x128xf32>
    %915 = arith.addf %895, %914 : vector<2x16x128xf32>
    %c97 = arith.constant 97 : index
    %916 = memref.load %arg4[%c97] : memref<98xf32, #tpu.memory_space<smem>>
    %c0_865 = arith.constant 0 : index
    %c6_866 = arith.constant 6 : index
    %c0_867 = arith.constant 0 : index
    %917 = vector.load %arg8[%c0_865, %c6_866, %c0_867] : memref<2x24x128xf32, #tpu.memory_space<vmem>>, vector<2x16x128xf32>
    %918 = vector.broadcast %916 : f32 to vector<2x16x128xf32>
    %919 = arith.mulf %918, %917 : vector<2x16x128xf32>
    %920 = arith.addf %900, %919 : vector<2x16x128xf32>
    %921 = arith.addf %915, %920 : vector<2x16x128xf32>
    %922 = arith.addf %905, %910 : vector<2x16x128xf32>
    %923 = arith.addf %921, %922 : vector<2x16x128xf32>
    %c0_868 = arith.constant 0 : index
    %c0_869 = arith.constant 0 : index
    %c0_870 = arith.constant 0 : index
    %924 = vector.load %arg9[%c0_868, %c0_869, %c0_870] : memref<2x16x128xf32, #tpu.memory_space<vmem>>, vector<2x16x128xf32>
    tpu.vector_store %arg9[%c0_868, %c0_869, %c0_870], %923 {strides = array<i32>} : memref<2x16x128xf32, #tpu.memory_space<vmem>>, vector<2x16x128xf32>,
    %c0_871 = arith.constant 0 : index
    %c0_872 = arith.constant 0 : index
    %c0_873 = arith.constant 0 : index
    %925 = vector.load %arg9[%c0_871, %c0_872, %c0_873] : memref<2x16x128xf32, #tpu.memory_space<vmem>>, vector<1x1x16xf32>
    %926 = vector.shape_cast %925 : vector<1x1x16xf32> to vector<16xf32>
    %c0_874 = arith.constant 0 : index
    %c0_875 = arith.constant 0 : index
    %c0_876 = arith.constant 0 : index
    %927 = vector.load %arg7[%c0_874, %c0_875, %c0_876] : memref<2x2x256xf32, #tpu.memory_space<vmem>>, vector<1x1x16xf32>
    %928 = vector.shape_cast %927 : vector<1x1x16xf32> to vector<16xf32>
    %929 = vector.shape_cast %926 : vector<16xf32> to vector<1x1x16xf32>
    tpu.vector_store %arg7[%c0_874, %c0_875, %c0_876], %929 {strides = array<i32>} : memref<2x2x256xf32, #tpu.memory_space<vmem>>, vector<1x1x16xf32>,
    %c0_877 = arith.constant 0 : index
    %c1_878 = arith.constant 1 : index
    %c0_879 = arith.constant 0 : index
    %930 = vector.load %arg9[%c0_877, %c1_878, %c0_879] : memref<2x16x128xf32, #tpu.memory_space<vmem>>, vector<1x1x16xf32>
    %931 = vector.shape_cast %930 : vector<1x1x16xf32> to vector<16xf32>
    %c0_880 = arith.constant 0 : index
    %c0_881 = arith.constant 0 : index
    %c16_882 = arith.constant 16 : index
    %932 = vector.load %arg7[%c0_880, %c0_881, %c16_882] : memref<2x2x256xf32, #tpu.memory_space<vmem>>, vector<1x1x16xf32>
    %933 = vector.shape_cast %932 : vector<1x1x16xf32> to vector<16xf32>
    %934 = vector.shape_cast %931 : vector<16xf32> to vector<1x1x16xf32>
    tpu.vector_store %arg7[%c0_880, %c0_881, %c16_882], %934 {strides = array<i32>} : memref<2x2x256xf32, #tpu.memory_space<vmem>>, vector<1x1x16xf32>,
    %c0_883 = arith.constant 0 : index
    %c2_884 = arith.constant 2 : index
    %c0_885 = arith.constant 0 : index
    %935 = vector.load %arg9[%c0_883, %c2_884, %c0_885] : memref<2x16x128xf32, #tpu.memory_space<vmem>>, vector<1x1x16xf32>
    %936 = vector.shape_cast %935 : vector<1x1x16xf32> to vector<16xf32>
    %c0_886 = arith.constant 0 : index
    %c0_887 = arith.constant 0 : index
    %c32_888 = arith.constant 32 : index
    %937 = vector.load %arg7[%c0_886, %c0_887, %c32_888] : memref<2x2x256xf32, #tpu.memory_space<vmem>>, vector<1x1x16xf32>
    %938 = vector.shape_cast %937 : vector<1x1x16xf32> to vector<16xf32>
    %939 = vector.shape_cast %936 : vector<16xf32> to vector<1x1x16xf32>
    tpu.vector_store %arg7[%c0_886, %c0_887, %c32_888], %939 {strides = array<i32>} : memref<2x2x256xf32, #tpu.memory_space<vmem>>, vector<1x1x16xf32>,
    %c0_889 = arith.constant 0 : index
    %c3_890 = arith.constant 3 : index
    %c0_891 = arith.constant 0 : index
    %940 = vector.load %arg9[%c0_889, %c3_890, %c0_891] : memref<2x16x128xf32, #tpu.memory_space<vmem>>, vector<1x1x16xf32>
    %941 = vector.shape_cast %940 : vector<1x1x16xf32> to vector<16xf32>
    %c0_892 = arith.constant 0 : index
    %c0_893 = arith.constant 0 : index
    %c48_894 = arith.constant 48 : index
    %942 = vector.load %arg7[%c0_892, %c0_893, %c48_894] : memref<2x2x256xf32, #tpu.memory_space<vmem>>, vector<1x1x16xf32>
    %943 = vector.shape_cast %942 : vector<1x1x16xf32> to vector<16xf32>
    %944 = vector.shape_cast %941 : vector<16xf32> to vector<1x1x16xf32>
    tpu.vector_store %arg7[%c0_892, %c0_893, %c48_894], %944 {strides = array<i32>} : memref<2x2x256xf32, #tpu.memory_space<vmem>>, vector<1x1x16xf32>,
    %c0_895 = arith.constant 0 : index
    %c4_896 = arith.constant 4 : index
    %c0_897 = arith.constant 0 : index
    %945 = vector.load %arg9[%c0_895, %c4_896, %c0_897] : memref<2x16x128xf32, #tpu.memory_space<vmem>>, vector<1x1x16xf32>
    %946 = vector.shape_cast %945 : vector<1x1x16xf32> to vector<16xf32>
    %c0_898 = arith.constant 0 : index
    %c0_899 = arith.constant 0 : index
    %c64_900 = arith.constant 64 : index
    %947 = vector.load %arg7[%c0_898, %c0_899, %c64_900] : memref<2x2x256xf32, #tpu.memory_space<vmem>>, vector<1x1x16xf32>
    %948 = vector.shape_cast %947 : vector<1x1x16xf32> to vector<16xf32>
    %949 = vector.shape_cast %946 : vector<16xf32> to vector<1x1x16xf32>
    tpu.vector_store %arg7[%c0_898, %c0_899, %c64_900], %949 {strides = array<i32>} : memref<2x2x256xf32, #tpu.memory_space<vmem>>, vector<1x1x16xf32>,
    %c0_901 = arith.constant 0 : index
    %c5_902 = arith.constant 5 : index
    %c0_903 = arith.constant 0 : index
    %950 = vector.load %arg9[%c0_901, %c5_902, %c0_903] : memref<2x16x128xf32, #tpu.memory_space<vmem>>, vector<1x1x16xf32>
    %951 = vector.shape_cast %950 : vector<1x1x16xf32> to vector<16xf32>
    %c0_904 = arith.constant 0 : index
    %c0_905 = arith.constant 0 : index
    %c80_906 = arith.constant 80 : index
    %952 = vector.load %arg7[%c0_904, %c0_905, %c80_906] : memref<2x2x256xf32, #tpu.memory_space<vmem>>, vector<1x1x16xf32>
    %953 = vector.shape_cast %952 : vector<1x1x16xf32> to vector<16xf32>
    %954 = vector.shape_cast %951 : vector<16xf32> to vector<1x1x16xf32>
    tpu.vector_store %arg7[%c0_904, %c0_905, %c80_906], %954 {strides = array<i32>} : memref<2x2x256xf32, #tpu.memory_space<vmem>>, vector<1x1x16xf32>,
    %c0_907 = arith.constant 0 : index
    %c6_908 = arith.constant 6 : index
    %c0_909 = arith.constant 0 : index
    %955 = vector.load %arg9[%c0_907, %c6_908, %c0_909] : memref<2x16x128xf32, #tpu.memory_space<vmem>>, vector<1x1x16xf32>
    %956 = vector.shape_cast %955 : vector<1x1x16xf32> to vector<16xf32>
    %c0_910 = arith.constant 0 : index
    %c0_911 = arith.constant 0 : index
    %c96_912 = arith.constant 96 : index
    %957 = vector.load %arg7[%c0_910, %c0_911, %c96_912] : memref<2x2x256xf32, #tpu.memory_space<vmem>>, vector<1x1x16xf32>
    %958 = vector.shape_cast %957 : vector<1x1x16xf32> to vector<16xf32>
    %959 = vector.shape_cast %956 : vector<16xf32> to vector<1x1x16xf32>
    tpu.vector_store %arg7[%c0_910, %c0_911, %c96_912], %959 {strides = array<i32>} : memref<2x2x256xf32, #tpu.memory_space<vmem>>, vector<1x1x16xf32>,
    %c0_913 = arith.constant 0 : index
    %c7_914 = arith.constant 7 : index
    %c0_915 = arith.constant 0 : index
    %960 = vector.load %arg9[%c0_913, %c7_914, %c0_915] : memref<2x16x128xf32, #tpu.memory_space<vmem>>, vector<1x1x16xf32>
    %961 = vector.shape_cast %960 : vector<1x1x16xf32> to vector<16xf32>
    %c0_916 = arith.constant 0 : index
    %c0_917 = arith.constant 0 : index
    %c112_918 = arith.constant 112 : index
    %962 = vector.load %arg7[%c0_916, %c0_917, %c112_918] : memref<2x2x256xf32, #tpu.memory_space<vmem>>, vector<1x1x16xf32>
    %963 = vector.shape_cast %962 : vector<1x1x16xf32> to vector<16xf32>
    %964 = vector.shape_cast %961 : vector<16xf32> to vector<1x1x16xf32>
    tpu.vector_store %arg7[%c0_916, %c0_917, %c112_918], %964 {strides = array<i32>} : memref<2x2x256xf32, #tpu.memory_space<vmem>>, vector<1x1x16xf32>,
    %c0_919 = arith.constant 0 : index
    %c8_920 = arith.constant 8 : index
    %c0_921 = arith.constant 0 : index
    %965 = vector.load %arg9[%c0_919, %c8_920, %c0_921] : memref<2x16x128xf32, #tpu.memory_space<vmem>>, vector<1x1x16xf32>
    %966 = vector.shape_cast %965 : vector<1x1x16xf32> to vector<16xf32>
    %c0_922 = arith.constant 0 : index
    %c0_923 = arith.constant 0 : index
    %c128_924 = arith.constant 128 : index
    %967 = vector.load %arg7[%c0_922, %c0_923, %c128_924] : memref<2x2x256xf32, #tpu.memory_space<vmem>>, vector<1x1x16xf32>
    %968 = vector.shape_cast %967 : vector<1x1x16xf32> to vector<16xf32>
    %969 = vector.shape_cast %966 : vector<16xf32> to vector<1x1x16xf32>
    tpu.vector_store %arg7[%c0_922, %c0_923, %c128_924], %969 {strides = array<i32>} : memref<2x2x256xf32, #tpu.memory_space<vmem>>, vector<1x1x16xf32>,
    %c0_925 = arith.constant 0 : index
    %c9_926 = arith.constant 9 : index
    %c0_927 = arith.constant 0 : index
    %970 = vector.load %arg9[%c0_925, %c9_926, %c0_927] : memref<2x16x128xf32, #tpu.memory_space<vmem>>, vector<1x1x16xf32>
    %971 = vector.shape_cast %970 : vector<1x1x16xf32> to vector<16xf32>
    %c0_928 = arith.constant 0 : index
    %c0_929 = arith.constant 0 : index
    %c144_930 = arith.constant 144 : index
    %972 = vector.load %arg7[%c0_928, %c0_929, %c144_930] : memref<2x2x256xf32, #tpu.memory_space<vmem>>, vector<1x1x16xf32>
    %973 = vector.shape_cast %972 : vector<1x1x16xf32> to vector<16xf32>
    %974 = vector.shape_cast %971 : vector<16xf32> to vector<1x1x16xf32>
    tpu.vector_store %arg7[%c0_928, %c0_929, %c144_930], %974 {strides = array<i32>} : memref<2x2x256xf32, #tpu.memory_space<vmem>>, vector<1x1x16xf32>,
    %c0_931 = arith.constant 0 : index
    %c10_932 = arith.constant 10 : index
    %c0_933 = arith.constant 0 : index
    %975 = vector.load %arg9[%c0_931, %c10_932, %c0_933] : memref<2x16x128xf32, #tpu.memory_space<vmem>>, vector<1x1x16xf32>
    %976 = vector.shape_cast %975 : vector<1x1x16xf32> to vector<16xf32>
    %c0_934 = arith.constant 0 : index
    %c0_935 = arith.constant 0 : index
    %c160_936 = arith.constant 160 : index
    %977 = vector.load %arg7[%c0_934, %c0_935, %c160_936] : memref<2x2x256xf32, #tpu.memory_space<vmem>>, vector<1x1x16xf32>
    %978 = vector.shape_cast %977 : vector<1x1x16xf32> to vector<16xf32>
    %979 = vector.shape_cast %976 : vector<16xf32> to vector<1x1x16xf32>
    tpu.vector_store %arg7[%c0_934, %c0_935, %c160_936], %979 {strides = array<i32>} : memref<2x2x256xf32, #tpu.memory_space<vmem>>, vector<1x1x16xf32>,
    %c0_937 = arith.constant 0 : index
    %c11_938 = arith.constant 11 : index
    %c0_939 = arith.constant 0 : index
    %980 = vector.load %arg9[%c0_937, %c11_938, %c0_939] : memref<2x16x128xf32, #tpu.memory_space<vmem>>, vector<1x1x16xf32>
    %981 = vector.shape_cast %980 : vector<1x1x16xf32> to vector<16xf32>
    %c0_940 = arith.constant 0 : index
    %c0_941 = arith.constant 0 : index
    %c176_942 = arith.constant 176 : index
    %982 = vector.load %arg7[%c0_940, %c0_941, %c176_942] : memref<2x2x256xf32, #tpu.memory_space<vmem>>, vector<1x1x16xf32>
    %983 = vector.shape_cast %982 : vector<1x1x16xf32> to vector<16xf32>
    %984 = vector.shape_cast %981 : vector<16xf32> to vector<1x1x16xf32>
    tpu.vector_store %arg7[%c0_940, %c0_941, %c176_942], %984 {strides = array<i32>} : memref<2x2x256xf32, #tpu.memory_space<vmem>>, vector<1x1x16xf32>,
    %c0_943 = arith.constant 0 : index
    %c12_944 = arith.constant 12 : index
    %c0_945 = arith.constant 0 : index
    %985 = vector.load %arg9[%c0_943, %c12_944, %c0_945] : memref<2x16x128xf32, #tpu.memory_space<vmem>>, vector<1x1x16xf32>
    %986 = vector.shape_cast %985 : vector<1x1x16xf32> to vector<16xf32>
    %c0_946 = arith.constant 0 : index
    %c0_947 = arith.constant 0 : index
    %c192_948 = arith.constant 192 : index
    %987 = vector.load %arg7[%c0_946, %c0_947, %c192_948] : memref<2x2x256xf32, #tpu.memory_space<vmem>>, vector<1x1x16xf32>
    %988 = vector.shape_cast %987 : vector<1x1x16xf32> to vector<16xf32>
    %989 = vector.shape_cast %986 : vector<16xf32> to vector<1x1x16xf32>
    tpu.vector_store %arg7[%c0_946, %c0_947, %c192_948], %989 {strides = array<i32>} : memref<2x2x256xf32, #tpu.memory_space<vmem>>, vector<1x1x16xf32>,
    %c0_949 = arith.constant 0 : index
    %c13_950 = arith.constant 13 : index
    %c0_951 = arith.constant 0 : index
    %990 = vector.load %arg9[%c0_949, %c13_950, %c0_951] : memref<2x16x128xf32, #tpu.memory_space<vmem>>, vector<1x1x16xf32>
    %991 = vector.shape_cast %990 : vector<1x1x16xf32> to vector<16xf32>
    %c0_952 = arith.constant 0 : index
    %c0_953 = arith.constant 0 : index
    %c208_954 = arith.constant 208 : index
    %992 = vector.load %arg7[%c0_952, %c0_953, %c208_954] : memref<2x2x256xf32, #tpu.memory_space<vmem>>, vector<1x1x16xf32>
    %993 = vector.shape_cast %992 : vector<1x1x16xf32> to vector<16xf32>
    %994 = vector.shape_cast %991 : vector<16xf32> to vector<1x1x16xf32>
    tpu.vector_store %arg7[%c0_952, %c0_953, %c208_954], %994 {strides = array<i32>} : memref<2x2x256xf32, #tpu.memory_space<vmem>>, vector<1x1x16xf32>,
    %c0_955 = arith.constant 0 : index
    %c14_956 = arith.constant 14 : index
    %c0_957 = arith.constant 0 : index
    %995 = vector.load %arg9[%c0_955, %c14_956, %c0_957] : memref<2x16x128xf32, #tpu.memory_space<vmem>>, vector<1x1x16xf32>
    %996 = vector.shape_cast %995 : vector<1x1x16xf32> to vector<16xf32>
    %c0_958 = arith.constant 0 : index
    %c0_959 = arith.constant 0 : index
    %c224_960 = arith.constant 224 : index
    %997 = vector.load %arg7[%c0_958, %c0_959, %c224_960] : memref<2x2x256xf32, #tpu.memory_space<vmem>>, vector<1x1x16xf32>
    %998 = vector.shape_cast %997 : vector<1x1x16xf32> to vector<16xf32>
    %999 = vector.shape_cast %996 : vector<16xf32> to vector<1x1x16xf32>
    tpu.vector_store %arg7[%c0_958, %c0_959, %c224_960], %999 {strides = array<i32>} : memref<2x2x256xf32, #tpu.memory_space<vmem>>, vector<1x1x16xf32>,
    %c0_961 = arith.constant 0 : index
    %c15_962 = arith.constant 15 : index
    %c0_963 = arith.constant 0 : index
    %1000 = vector.load %arg9[%c0_961, %c15_962, %c0_963] : memref<2x16x128xf32, #tpu.memory_space<vmem>>, vector<1x1x16xf32>
    %1001 = vector.shape_cast %1000 : vector<1x1x16xf32> to vector<16xf32>
    %c0_964 = arith.constant 0 : index
    %c0_965 = arith.constant 0 : index
    %c240_966 = arith.constant 240 : index
    %1002 = vector.load %arg7[%c0_964, %c0_965, %c240_966] : memref<2x2x256xf32, #tpu.memory_space<vmem>>, vector<1x1x16xf32>
    %1003 = vector.shape_cast %1002 : vector<1x1x16xf32> to vector<16xf32>
    %1004 = vector.shape_cast %1001 : vector<16xf32> to vector<1x1x16xf32>
    tpu.vector_store %arg7[%c0_964, %c0_965, %c240_966], %1004 {strides = array<i32>} : memref<2x2x256xf32, #tpu.memory_space<vmem>>, vector<1x1x16xf32>,
    %c1_967 = arith.constant 1 : index
    %c0_968 = arith.constant 0 : index
    %c0_969 = arith.constant 0 : index
    %1005 = vector.load %arg9[%c1_967, %c0_968, %c0_969] : memref<2x16x128xf32, #tpu.memory_space<vmem>>, vector<1x1x16xf32>
    %1006 = vector.shape_cast %1005 : vector<1x1x16xf32> to vector<16xf32>
    %c0_970 = arith.constant 0 : index
    %c1_971 = arith.constant 1 : index
    %c0_972 = arith.constant 0 : index
    %1007 = vector.load %arg7[%c0_970, %c1_971, %c0_972] : memref<2x2x256xf32, #tpu.memory_space<vmem>>, vector<1x1x16xf32>
    %1008 = vector.shape_cast %1007 : vector<1x1x16xf32> to vector<16xf32>
    %1009 = vector.shape_cast %1006 : vector<16xf32> to vector<1x1x16xf32>
    tpu.vector_store %arg7[%c0_970, %c1_971, %c0_972], %1009 {strides = array<i32>} : memref<2x2x256xf32, #tpu.memory_space<vmem>>, vector<1x1x16xf32>,
    %c1_973 = arith.constant 1 : index
    %c1_974 = arith.constant 1 : index
    %c0_975 = arith.constant 0 : index
    %1010 = vector.load %arg9[%c1_973, %c1_974, %c0_975] : memref<2x16x128xf32, #tpu.memory_space<vmem>>, vector<1x1x16xf32>
    %1011 = vector.shape_cast %1010 : vector<1x1x16xf32> to vector<16xf32>
    %c0_976 = arith.constant 0 : index
    %c1_977 = arith.constant 1 : index
    %c16_978 = arith.constant 16 : index
    %1012 = vector.load %arg7[%c0_976, %c1_977, %c16_978] : memref<2x2x256xf32, #tpu.memory_space<vmem>>, vector<1x1x16xf32>
    %1013 = vector.shape_cast %1012 : vector<1x1x16xf32> to vector<16xf32>
    %1014 = vector.shape_cast %1011 : vector<16xf32> to vector<1x1x16xf32>
    tpu.vector_store %arg7[%c0_976, %c1_977, %c16_978], %1014 {strides = array<i32>} : memref<2x2x256xf32, #tpu.memory_space<vmem>>, vector<1x1x16xf32>,
    %c1_979 = arith.constant 1 : index
    %c2_980 = arith.constant 2 : index
    %c0_981 = arith.constant 0 : index
    %1015 = vector.load %arg9[%c1_979, %c2_980, %c0_981] : memref<2x16x128xf32, #tpu.memory_space<vmem>>, vector<1x1x16xf32>
    %1016 = vector.shape_cast %1015 : vector<1x1x16xf32> to vector<16xf32>
    %c0_982 = arith.constant 0 : index
    %c1_983 = arith.constant 1 : index
    %c32_984 = arith.constant 32 : index
    %1017 = vector.load %arg7[%c0_982, %c1_983, %c32_984] : memref<2x2x256xf32, #tpu.memory_space<vmem>>, vector<1x1x16xf32>
    %1018 = vector.shape_cast %1017 : vector<1x1x16xf32> to vector<16xf32>
    %1019 = vector.shape_cast %1016 : vector<16xf32> to vector<1x1x16xf32>
    tpu.vector_store %arg7[%c0_982, %c1_983, %c32_984], %1019 {strides = array<i32>} : memref<2x2x256xf32, #tpu.memory_space<vmem>>, vector<1x1x16xf32>,
    %c1_985 = arith.constant 1 : index
    %c3_986 = arith.constant 3 : index
    %c0_987 = arith.constant 0 : index
    %1020 = vector.load %arg9[%c1_985, %c3_986, %c0_987] : memref<2x16x128xf32, #tpu.memory_space<vmem>>, vector<1x1x16xf32>
    %1021 = vector.shape_cast %1020 : vector<1x1x16xf32> to vector<16xf32>
    %c0_988 = arith.constant 0 : index
    %c1_989 = arith.constant 1 : index
    %c48_990 = arith.constant 48 : index
    %1022 = vector.load %arg7[%c0_988, %c1_989, %c48_990] : memref<2x2x256xf32, #tpu.memory_space<vmem>>, vector<1x1x16xf32>
    %1023 = vector.shape_cast %1022 : vector<1x1x16xf32> to vector<16xf32>
    %1024 = vector.shape_cast %1021 : vector<16xf32> to vector<1x1x16xf32>
    tpu.vector_store %arg7[%c0_988, %c1_989, %c48_990], %1024 {strides = array<i32>} : memref<2x2x256xf32, #tpu.memory_space<vmem>>, vector<1x1x16xf32>,
    %c1_991 = arith.constant 1 : index
    %c4_992 = arith.constant 4 : index
    %c0_993 = arith.constant 0 : index
    %1025 = vector.load %arg9[%c1_991, %c4_992, %c0_993] : memref<2x16x128xf32, #tpu.memory_space<vmem>>, vector<1x1x16xf32>
    %1026 = vector.shape_cast %1025 : vector<1x1x16xf32> to vector<16xf32>
    %c0_994 = arith.constant 0 : index
    %c1_995 = arith.constant 1 : index
    %c64_996 = arith.constant 64 : index
    %1027 = vector.load %arg7[%c0_994, %c1_995, %c64_996] : memref<2x2x256xf32, #tpu.memory_space<vmem>>, vector<1x1x16xf32>
    %1028 = vector.shape_cast %1027 : vector<1x1x16xf32> to vector<16xf32>
    %1029 = vector.shape_cast %1026 : vector<16xf32> to vector<1x1x16xf32>
    tpu.vector_store %arg7[%c0_994, %c1_995, %c64_996], %1029 {strides = array<i32>} : memref<2x2x256xf32, #tpu.memory_space<vmem>>, vector<1x1x16xf32>,
    %c1_997 = arith.constant 1 : index
    %c5_998 = arith.constant 5 : index
    %c0_999 = arith.constant 0 : index
    %1030 = vector.load %arg9[%c1_997, %c5_998, %c0_999] : memref<2x16x128xf32, #tpu.memory_space<vmem>>, vector<1x1x16xf32>
    %1031 = vector.shape_cast %1030 : vector<1x1x16xf32> to vector<16xf32>
    %c0_1000 = arith.constant 0 : index
    %c1_1001 = arith.constant 1 : index
    %c80_1002 = arith.constant 80 : index
    %1032 = vector.load %arg7[%c0_1000, %c1_1001, %c80_1002] : memref<2x2x256xf32, #tpu.memory_space<vmem>>, vector<1x1x16xf32>
    %1033 = vector.shape_cast %1032 : vector<1x1x16xf32> to vector<16xf32>
    %1034 = vector.shape_cast %1031 : vector<16xf32> to vector<1x1x16xf32>
    tpu.vector_store %arg7[%c0_1000, %c1_1001, %c80_1002], %1034 {strides = array<i32>} : memref<2x2x256xf32, #tpu.memory_space<vmem>>, vector<1x1x16xf32>,
    %c1_1003 = arith.constant 1 : index
    %c6_1004 = arith.constant 6 : index
    %c0_1005 = arith.constant 0 : index
    %1035 = vector.load %arg9[%c1_1003, %c6_1004, %c0_1005] : memref<2x16x128xf32, #tpu.memory_space<vmem>>, vector<1x1x16xf32>
    %1036 = vector.shape_cast %1035 : vector<1x1x16xf32> to vector<16xf32>
    %c0_1006 = arith.constant 0 : index
    %c1_1007 = arith.constant 1 : index
    %c96_1008 = arith.constant 96 : index
    %1037 = vector.load %arg7[%c0_1006, %c1_1007, %c96_1008] : memref<2x2x256xf32, #tpu.memory_space<vmem>>, vector<1x1x16xf32>
    %1038 = vector.shape_cast %1037 : vector<1x1x16xf32> to vector<16xf32>
    %1039 = vector.shape_cast %1036 : vector<16xf32> to vector<1x1x16xf32>
    tpu.vector_store %arg7[%c0_1006, %c1_1007, %c96_1008], %1039 {strides = array<i32>} : memref<2x2x256xf32, #tpu.memory_space<vmem>>, vector<1x1x16xf32>,
    %c1_1009 = arith.constant 1 : index
    %c7_1010 = arith.constant 7 : index
    %c0_1011 = arith.constant 0 : index
    %1040 = vector.load %arg9[%c1_1009, %c7_1010, %c0_1011] : memref<2x16x128xf32, #tpu.memory_space<vmem>>, vector<1x1x16xf32>
    %1041 = vector.shape_cast %1040 : vector<1x1x16xf32> to vector<16xf32>
    %c0_1012 = arith.constant 0 : index
    %c1_1013 = arith.constant 1 : index
    %c112_1014 = arith.constant 112 : index
    %1042 = vector.load %arg7[%c0_1012, %c1_1013, %c112_1014] : memref<2x2x256xf32, #tpu.memory_space<vmem>>, vector<1x1x16xf32>
    %1043 = vector.shape_cast %1042 : vector<1x1x16xf32> to vector<16xf32>
    %1044 = vector.shape_cast %1041 : vector<16xf32> to vector<1x1x16xf32>
    tpu.vector_store %arg7[%c0_1012, %c1_1013, %c112_1014], %1044 {strides = array<i32>} : memref<2x2x256xf32, #tpu.memory_space<vmem>>, vector<1x1x16xf32>,
    %c1_1015 = arith.constant 1 : index
    %c8_1016 = arith.constant 8 : index
    %c0_1017 = arith.constant 0 : index
    %1045 = vector.load %arg9[%c1_1015, %c8_1016, %c0_1017] : memref<2x16x128xf32, #tpu.memory_space<vmem>>, vector<1x1x16xf32>
    %1046 = vector.shape_cast %1045 : vector<1x1x16xf32> to vector<16xf32>
    %c0_1018 = arith.constant 0 : index
    %c1_1019 = arith.constant 1 : index
    %c128_1020 = arith.constant 128 : index
    %1047 = vector.load %arg7[%c0_1018, %c1_1019, %c128_1020] : memref<2x2x256xf32, #tpu.memory_space<vmem>>, vector<1x1x16xf32>
    %1048 = vector.shape_cast %1047 : vector<1x1x16xf32> to vector<16xf32>
    %1049 = vector.shape_cast %1046 : vector<16xf32> to vector<1x1x16xf32>
    tpu.vector_store %arg7[%c0_1018, %c1_1019, %c128_1020], %1049 {strides = array<i32>} : memref<2x2x256xf32, #tpu.memory_space<vmem>>, vector<1x1x16xf32>,
    %c1_1021 = arith.constant 1 : index
    %c9_1022 = arith.constant 9 : index
    %c0_1023 = arith.constant 0 : index
    %1050 = vector.load %arg9[%c1_1021, %c9_1022, %c0_1023] : memref<2x16x128xf32, #tpu.memory_space<vmem>>, vector<1x1x16xf32>
    %1051 = vector.shape_cast %1050 : vector<1x1x16xf32> to vector<16xf32>
    %c0_1024 = arith.constant 0 : index
    %c1_1025 = arith.constant 1 : index
    %c144_1026 = arith.constant 144 : index
    %1052 = vector.load %arg7[%c0_1024, %c1_1025, %c144_1026] : memref<2x2x256xf32, #tpu.memory_space<vmem>>, vector<1x1x16xf32>
    %1053 = vector.shape_cast %1052 : vector<1x1x16xf32> to vector<16xf32>
    %1054 = vector.shape_cast %1051 : vector<16xf32> to vector<1x1x16xf32>
    tpu.vector_store %arg7[%c0_1024, %c1_1025, %c144_1026], %1054 {strides = array<i32>} : memref<2x2x256xf32, #tpu.memory_space<vmem>>, vector<1x1x16xf32>,
    %c1_1027 = arith.constant 1 : index
    %c10_1028 = arith.constant 10 : index
    %c0_1029 = arith.constant 0 : index
    %1055 = vector.load %arg9[%c1_1027, %c10_1028, %c0_1029] : memref<2x16x128xf32, #tpu.memory_space<vmem>>, vector<1x1x16xf32>
    %1056 = vector.shape_cast %1055 : vector<1x1x16xf32> to vector<16xf32>
    %c0_1030 = arith.constant 0 : index
    %c1_1031 = arith.constant 1 : index
    %c160_1032 = arith.constant 160 : index
    %1057 = vector.load %arg7[%c0_1030, %c1_1031, %c160_1032] : memref<2x2x256xf32, #tpu.memory_space<vmem>>, vector<1x1x16xf32>
    %1058 = vector.shape_cast %1057 : vector<1x1x16xf32> to vector<16xf32>
    %1059 = vector.shape_cast %1056 : vector<16xf32> to vector<1x1x16xf32>
    tpu.vector_store %arg7[%c0_1030, %c1_1031, %c160_1032], %1059 {strides = array<i32>} : memref<2x2x256xf32, #tpu.memory_space<vmem>>, vector<1x1x16xf32>,
    %c1_1033 = arith.constant 1 : index
    %c11_1034 = arith.constant 11 : index
    %c0_1035 = arith.constant 0 : index
    %1060 = vector.load %arg9[%c1_1033, %c11_1034, %c0_1035] : memref<2x16x128xf32, #tpu.memory_space<vmem>>, vector<1x1x16xf32>
    %1061 = vector.shape_cast %1060 : vector<1x1x16xf32> to vector<16xf32>
    %c0_1036 = arith.constant 0 : index
    %c1_1037 = arith.constant 1 : index
    %c176_1038 = arith.constant 176 : index
    %1062 = vector.load %arg7[%c0_1036, %c1_1037, %c176_1038] : memref<2x2x256xf32, #tpu.memory_space<vmem>>, vector<1x1x16xf32>
    %1063 = vector.shape_cast %1062 : vector<1x1x16xf32> to vector<16xf32>
    %1064 = vector.shape_cast %1061 : vector<16xf32> to vector<1x1x16xf32>
    tpu.vector_store %arg7[%c0_1036, %c1_1037, %c176_1038], %1064 {strides = array<i32>} : memref<2x2x256xf32, #tpu.memory_space<vmem>>, vector<1x1x16xf32>,
    %c1_1039 = arith.constant 1 : index
    %c12_1040 = arith.constant 12 : index
    %c0_1041 = arith.constant 0 : index
    %1065 = vector.load %arg9[%c1_1039, %c12_1040, %c0_1041] : memref<2x16x128xf32, #tpu.memory_space<vmem>>, vector<1x1x16xf32>
    %1066 = vector.shape_cast %1065 : vector<1x1x16xf32> to vector<16xf32>
    %c0_1042 = arith.constant 0 : index
    %c1_1043 = arith.constant 1 : index
    %c192_1044 = arith.constant 192 : index
    %1067 = vector.load %arg7[%c0_1042, %c1_1043, %c192_1044] : memref<2x2x256xf32, #tpu.memory_space<vmem>>, vector<1x1x16xf32>
    %1068 = vector.shape_cast %1067 : vector<1x1x16xf32> to vector<16xf32>
    %1069 = vector.shape_cast %1066 : vector<16xf32> to vector<1x1x16xf32>
    tpu.vector_store %arg7[%c0_1042, %c1_1043, %c192_1044], %1069 {strides = array<i32>} : memref<2x2x256xf32, #tpu.memory_space<vmem>>, vector<1x1x16xf32>,
    %c1_1045 = arith.constant 1 : index
    %c13_1046 = arith.constant 13 : index
    %c0_1047 = arith.constant 0 : index
    %1070 = vector.load %arg9[%c1_1045, %c13_1046, %c0_1047] : memref<2x16x128xf32, #tpu.memory_space<vmem>>, vector<1x1x16xf32>
    %1071 = vector.shape_cast %1070 : vector<1x1x16xf32> to vector<16xf32>
    %c0_1048 = arith.constant 0 : index
    %c1_1049 = arith.constant 1 : index
    %c208_1050 = arith.constant 208 : index
    %1072 = vector.load %arg7[%c0_1048, %c1_1049, %c208_1050] : memref<2x2x256xf32, #tpu.memory_space<vmem>>, vector<1x1x16xf32>
    %1073 = vector.shape_cast %1072 : vector<1x1x16xf32> to vector<16xf32>
    %1074 = vector.shape_cast %1071 : vector<16xf32> to vector<1x1x16xf32>
    tpu.vector_store %arg7[%c0_1048, %c1_1049, %c208_1050], %1074 {strides = array<i32>} : memref<2x2x256xf32, #tpu.memory_space<vmem>>, vector<1x1x16xf32>,
    %c1_1051 = arith.constant 1 : index
    %c14_1052 = arith.constant 14 : index
    %c0_1053 = arith.constant 0 : index
    %1075 = vector.load %arg9[%c1_1051, %c14_1052, %c0_1053] : memref<2x16x128xf32, #tpu.memory_space<vmem>>, vector<1x1x16xf32>
    %1076 = vector.shape_cast %1075 : vector<1x1x16xf32> to vector<16xf32>
    %c0_1054 = arith.constant 0 : index
    %c1_1055 = arith.constant 1 : index
    %c224_1056 = arith.constant 224 : index
    %1077 = vector.load %arg7[%c0_1054, %c1_1055, %c224_1056] : memref<2x2x256xf32, #tpu.memory_space<vmem>>, vector<1x1x16xf32>
    %1078 = vector.shape_cast %1077 : vector<1x1x16xf32> to vector<16xf32>
    %1079 = vector.shape_cast %1076 : vector<16xf32> to vector<1x1x16xf32>
    tpu.vector_store %arg7[%c0_1054, %c1_1055, %c224_1056], %1079 {strides = array<i32>} : memref<2x2x256xf32, #tpu.memory_space<vmem>>, vector<1x1x16xf32>,
    %c1_1057 = arith.constant 1 : index
    %c15_1058 = arith.constant 15 : index
    %c0_1059 = arith.constant 0 : index
    %1080 = vector.load %arg9[%c1_1057, %c15_1058, %c0_1059] : memref<2x16x128xf32, #tpu.memory_space<vmem>>, vector<1x1x16xf32>
    %1081 = vector.shape_cast %1080 : vector<1x1x16xf32> to vector<16xf32>
    %c0_1060 = arith.constant 0 : index
    %c1_1061 = arith.constant 1 : index
    %c240_1062 = arith.constant 240 : index
    %1082 = vector.load %arg7[%c0_1060, %c1_1061, %c240_1062] : memref<2x2x256xf32, #tpu.memory_space<vmem>>, vector<1x1x16xf32>
    %1083 = vector.shape_cast %1082 : vector<1x1x16xf32> to vector<16xf32>
    %1084 = vector.shape_cast %1081 : vector<16xf32> to vector<1x1x16xf32>
    tpu.vector_store %arg7[%c0_1060, %c1_1061, %c240_1062], %1084 {strides = array<i32>} : memref<2x2x256xf32, #tpu.memory_space<vmem>>, vector<1x1x16xf32>,
    %c0_1063 = arith.constant 0 : index
    %c0_1064 = arith.constant 0 : index
    %c0_1065 = arith.constant 0 : index
    %1085 = vector.load %arg7[%c0_1063, %c0_1064, %c0_1065] : memref<2x2x256xf32, #tpu.memory_space<vmem>>, vector<1x2x256xf32>
    %1086 = vector.shape_cast %1085 : vector<1x2x256xf32> to vector<2x256xf32>
    %1087 = arith.negf %1086 : vector<2x256xf32>
    %1088 = math.exp %1087 : vector<2x256xf32>
    %cst_1066 = arith.constant 1.000000e+00 : f32
    %1089 = vector.broadcast %cst_1066 : f32 to vector<2x256xf32>
    %1090 = arith.addf %1089, %1088 : vector<2x256xf32>
    %1091 = arith.divf %1089, %1090 : vector<2x256xf32>
    %c0_1067 = arith.constant 0 : index
    %c0_1068 = arith.constant 0 : index
    %c0_1069 = arith.constant 0 : index
    %1092 = vector.load %arg1[%c0_1067, %c0_1068, %c0_1069] : memref<2x32x256xf32, #tpu.memory_space<vmem>>, vector<2x32x256xf32>
    %1093 = vector.shape_cast %29 : vector<2x32xf32> to vector<2x32x1xf32>
    %1094 = vector.broadcast %1093 : vector<2x32x1xf32> to vector<2x32x256xf32>
    %1095 = arith.mulf %1092, %1094 : vector<2x32x256xf32>
    %1096 = vector.shape_cast %1091 : vector<2x256xf32> to vector<2x1x256xf32>
    %1097 = vector.broadcast %1096 : vector<2x1x256xf32> to vector<2x32x256xf32>
    %1098 = arith.mulf %1095, %1097 : vector<2x32x256xf32>
    %c0_1070 = arith.constant 0 : index
    %c0_1071 = arith.constant 0 : index
    %c0_1072 = arith.constant 0 : index
    %1099 = vector.load %arg5[%c0_1070, %c0_1071, %c0_1072] : memref<2x32x256xf32, #tpu.memory_space<vmem>>, vector<2x32x256xf32>
    tpu.vector_store %arg5[%c0_1070, %c0_1071, %c0_1072], %1098 {strides = array<i32>} : memref<2x32x256xf32, #tpu.memory_space<vmem>>, vector<2x32x256xf32>,
    return
  }
  func.func @transform_0(%arg0: i32) -> (i32, i32, i32) {
    %c0_i32 = arith.constant 0 : i32
    %c0_i32_0 = arith.constant 0 : i32
    %c0_i32_1 = arith.constant 0 : i32
    return %arg0, %c0_i32, %c0_i32_0 : i32, i32, i32
  }
  func.func @transform_1(%arg0: i32) -> (i32, i32) {
    %c0_i32 = arith.constant 0 : i32
    %c0_i32_0 = arith.constant 0 : i32
    %c0_i32_1 = arith.constant 0 : i32
    return %c0_i32, %c0_i32_0 : i32, i32
  }
  func.func @transform_2(%arg0: i32) -> (i32, i32) {
    %c0_i32 = arith.constant 0 : i32
    %c0_i32_0 = arith.constant 0 : i32
    %c0_i32_1 = arith.constant 0 : i32
    return %c0_i32, %c0_i32_0 : i32, i32
  }
  func.func @transform_3(%arg0: i32) -> i32 {
    %c0_i32 = arith.constant 0 : i32
    %c0_i32_0 = arith.constant 0 : i32
    return %c0_i32 : i32
  }
  func.func @transform_4(%arg0: i32) -> (i32, i32, i32) {
    %c0_i32 = arith.constant 0 : i32
    %c0_i32_0 = arith.constant 0 : i32
    %c0_i32_1 = arith.constant 0 : i32
    return %arg0, %c0_i32, %c0_i32_0 : i32, i32, i32
  }
}

</mosaic_0001>

<bundles_post_ra>
// kernel: tpu_custom_call.1
= control target key start
LH: loop header
LB: loop body
LE: loop exit
PB: predicated region body
PF: predicated region fallthrough
CT: control target
= control target key end

     0   :  { %s9115_s0 = inlined_call_operand.hbm [shape: f32[4,32,256], index: 0, kind: input, shape index: {}]   ;;  %s9116_s1 = inlined_call_operand.vmem [shape: f32[4,32], index: 1, kind: input, shape index: {}]   ;;  %s9117_s2 = inlined_call_operand.vmem [shape: f32[32,4], index: 2, kind: input, shape index: {}]   ;;  %s9118_s3 = inlined_call_operand.vmem [shape: f32[98], index: 3, kind: input, shape index: {}]   ;;  %s9119_s4 = inlined_call_operand.hbm [shape: f32[4,32,256], index: 4, kind: output, shape index: {}]  }
   0x1   :  { %9309 = sst [smem:[#allocation216_spill]] %s9115_s0 }
   0x2   :  { %9310 = sst [smem:[#allocation217_spill]] %s9116_s1 }
   0x3   :  { %9311 = sst [smem:[#allocation218_spill]] %s9117_s2 }
   0x4   :  { %9312 = sst [smem:[#allocation219_spill]] %s9118_s3 }
   0x5   :  { %9313 = sst [smem:[#allocation220_spill]] %s9119_s4 }
   0x6   :  { %9 = vsyncpa [#allocation7], 0 }
   0x7   :  { %11 = vsyncpa [#allocation7 + $0x1], 0 }
   0x8   :  { %12 = vsyncpa [#allocation9], 0 }
   0x9   :  { %13 = vsyncpa [#allocation8], 0 }
   0xa   :  { %15 = vsyncpa [#allocation8 + $0x1], 0  ;;  %s5727_s15 = smov 0   ;;  %s5729_s16 = smov 0  }
   0xb   :  { %s5731_s17 = smov 0   ;;  %s5733_s18 = smov 0  }
   0xc LB: > { %9314 = sst [smem:[#allocation15_spill]] %s5657_s15  ;;  %s5748_s19 = sadd.s32 4294967295, %s5669_s18   ;;  %s5669_s18 = sphi %s5733_s18, %s9911_s18   ;;  %s5665_s17 = sphi %s5731_s17, %s9914_s17   ;;  %s5661_s16 = sphi %s5729_s16, %s9913_s16   ;;  %s5657_s15 = sphi %s5727_s15, %s9912_s15  }
   0xd   : > { %9315 = sst [smem:[#allocation16_spill]] %s5661_s16  ;;  %s5199_s20 = sadd.s32 4294967294, %s5669_s18  }
   0xe   : > { %9316 = sst [smem:[#allocation17_spill]] %s5665_s17  ;;  %s5752_s21 = sadd.s32 1, %s5669_s18  }
   0xf   : > { %9317 = sst [smem:[#allocation18_spill]] %s5669_s18  ;;  %s28_s22 = sadd.s32 1, %s5665_s17 }
  0x10   : > { %9318 = sst [smem:[#allocation19_spill]] %s5748_s19  ;;  %s25_s23 = ssub.s32 %s5669_s18, %s5752_s21 }
  0x11   : > { %9319 = sst [smem:[#allocation20_spill]] %s5752_s21  ;;  %p35_p0 = scmp.ne.s32.totalorder %s5665_s17, %s5661_s16 }
  0x12   : > { %p26_p1 = scmp.eq.s32.totalorder %s25_s23, 0  ;;  %p36_p2 = scmp.eq.s32.totalorder %s5669_s18, 0 }
  0x13   : > { %p41_p3 = scmp.ne.s32.totalorder %s5661_s16, %s5657_s15  ;;  %p9121_p4 = scmp.eq.s32.totalorder %s5748_s19, 0 }
  0x14   : > { %s5764_s24 = scalar_select %p26_p1, %s5665_s17, %s28_s22  }
  0x15   : > { %p5766_p5 = por %p36_p2, %p35_p0  ;;  %p5772_p6 = por %p9121_p4, %p41_p3 }
  0x16   : > { %9320 = sst [smem:[#allocation21_spill]] %s5764_s24  ;;  %p128_p7 = scmp.eq.s32.totalorder %s5748_s19, 1 }
  0x17   : > { %s9322_s26 = scalar_select %p5772_p6, 1, 0 }
  0x18   : > { %p134_p8 = scmp.eq.s32.totalorder %s5199_s20, 1  ;;  %p5200_p9 = scmp.ge.s32.totalorder %s5669_s18, 1 }
  0x19   : > { %p141_p10 = scmp.lt.s32.totalorder %s5669_s18, 3  ;;  %p5779_p11 = por %p128_p7, %p35_p0 }
  0x1a   : > { %p5783_p12 = por %p134_p8, %p41_p3  ;;  %s9328_s3 = sld [smem:[#allocation219_spill]] }
  0x1b   : > { %s9323_s27 = scalar_select %p5779_p11, 1, 0 }
  0x1c   : > { %s9325_s28 = scalar_select %p5783_p12, 1, 0 }
  0x1d   : > { %9324 = sst [smem:[#allocation22_spill]] %s9323_s27  ;;  %p5787_p13 = pnand %p5200_p9, %p141_p10 }
  0x1e   : > { %9326 = sst [smem:[#allocation23_spill]] %s9325_s28  ;;  %p5440_p2 = scmp.lt.s32.totalorder %s5669_s18, 2 }
  0x1f   : > { %s9327_s29 = scalar_select %p5787_p13, 1, 0 }
  0x20   : > { %s160_s6 = sshll.u32 %s9328_s3, 4  ;;  %p5427_p1 = pneg %p5787_p13  ;;  %s161_s6 = int_to_ptr.vmem [resolvable:$true] %s160_s6 }
  0x21   : > { %s171_s8 = sand.u32 1, %s5665_s17   ;;  %p5807_p3 = pnand %p5440_p2, %p5766_p5 }
  0x22   : > { %p5800_p7 = pnand %p5427_p1, %p9121_p4  ;;  %s5203_s10 = sshll.u32 %s171_s8, 7 }
  0x23   : > { %s5558_s11 = scalar_lea.vmem %s161_s6, 16  ;;  %p5566_p12 = scmp.lt.s32.totalorder %s161_s6, %s161_s6 }
  0x24   : > { %p5559_p8 = scmp.ne.s32.totalorder %s161_s6, %s5558_s11  ;;  %p5560_p9 = pneg %p5800_p7 }
  0x25   : > { %p5567_p11 = scmp.lt.s32.totalorder %s5558_s11, %s5558_s11 }
  0x26   : > { %p5561_p10 = pnand %p5560_p9, %p5559_p8 }
  0x27   : > { %p5568_p1 = por %p5567_p11, %p5566_p12 }
  0x28   : > { %p5562_p0 = pneg %p5561_p10 }
  0x2a   : > { %p5569_p4 = pnand %p5568_p1, %p5562_p0 }
  0x2c   : > { %5572 = shalt.err (!%p5569_p4)
}
  0x2d   : > { %s5671_s12 = smov [#allocation10]   ;;  %s5416_s13 = sshll.u32 %s5669_s18, 11 }
  0x2e   : > { %5430 = dma.vmem_to_smem (!%p5800_p7), %s161_s6, 16, %s5671_s12, [#allocation9]  }
  0x2f   : > { %s175_s14 = scalar_lea.vmem [#allocation6], %s5203_s10  ;;  %s9331_s0 = sld [smem:[#allocation216_spill]] }
  0x30   : > { %s183_s20 = sshll.u32 %s175_s14, 4  ;;  %s5823_s30 = scalar_lea.sflag [#allocation7], %s171_s8  ;;  %s5821_s20 = int_to_ptr.vmem [resolvable:$true] %s183_s20 }
  0x31   : > { %p5575_p5 = pneg %p5807_p3 }
  0x35   : > { %s5819_s25 = scalar_lea.hbm %s9331_s0, %s5416_s13  ;;  %s5578_s10 = scalar_lea.hbm %s9331_s0, 4096 }
  0x36   : > { %s5573_s5 = scalar_lea.hbm %s5819_s25, 2048  ;;  %p5579_p0 = scmp.lt.s32.totalorder %s5819_s25, %s9331_s0 }
  0x37   : > { %p5574_p4 = scmp.ne.s32.totalorder %s5819_s25, %s5573_s5  ;;  %p5580_p2 = scmp.lt.s32.totalorder %s5578_s10, %s5573_s5 }
  0x39   : > { %p5576_p11 = pnand %p5575_p5, %p5574_p4  ;;  %p5581_p7 = por %p5580_p2, %p5579_p0 }
  0x3b   : > { %p5577_p12 = pneg %p5576_p11 }
  0x3d   : > { %p5582_p8 = pnand %p5581_p7, %p5577_p12 }
  0x3f   : > { %5585 = shalt.err (!%p5582_p8)
}
  0x40   : > { %s5586_s8 = scalar_lea.vmem %s5821_s20, 2048  ;;  %s5672_s13 = smov [#allocation6]  }
  0x41   : > { %p5587_p9 = scmp.ne.s32.totalorder %s5821_s20, %s5586_s8  ;;  %s5591_s14 = sshll.u32 %s5672_s13, 4  ;;  %s5592_s14 = int_to_ptr.vmem [resolvable:$false] %s5591_s14 }
  0x42   : > { %s5593_s22 = scalar_lea.vmem %s5592_s14, 4096  ;;  %p5594_p4 = scmp.lt.s32.totalorder %s5821_s20, %s5592_s14 }
  0x43   : > { %p5589_p10 = pnand %p5587_p9, %p5575_p5  ;;  %p5595_p11 = scmp.lt.s32.totalorder %s5593_s22, %s5586_s8 }
  0x45   : > { %p5590_p1 = pneg %p5589_p10  ;;  %p5596_p6 = por %p5595_p11, %p5594_p4 }
  0x47   : > { %p5597_p13 = pnand %p5596_p6, %p5590_p1 }
  0x49   : > { %5600 = shalt.err (!%p5597_p13)
}
  0x4a   : > { %s5673_s23 = smov 256   ;;  %s5674_s5 = smov 16  }
  0x4b   : > { %5434 = dma.hbm_to_vmem [thread:$0]  (!%p5807_p3), %s5819_s25, 2048, %s5821_s20, %s5823_s30, %s5673_s23, %s5673_s23, %s5674_s5  }
  0x4c   : > { %p9332_p5 = scmp.ne.s32.totalorder %s9327_s29, 0 }
  0x4e   : > { %195 = sbr.rel (%p9332_p5) target bundleno = 1918 (0x77e), region = 36 }
  0x53   : > { %s5847_s6 = sand.u32 1, %s5661_s16   ;;  %p9335_p6 = scmp.ne.s32.totalorder %s9322_s26, 0 }
  0x54   : > { %9333 = sst [smem:[#allocation24_spill]] %s5847_s6  ;;  %s9130_s7 = sshll.u32 %s5847_s6, 7 }
  0x55   : > { %s198_s10 = scalar_lea.sflag [#allocation7], %s5847_s6  ;;  %s5853_s11 = scalar_lea.vmem [#allocation6], %s9130_s7 }
  0x56   : > { %9334 = sst [smem:[#allocation25_spill]] %s5853_s11 }
  0x57   : > { %5644 = dma.done.wait (%p9335_p6), %s198_s10, 2048  }
  0x58   : > { %5646 = vsyncadd (%p9335_p6), %s198_s10, 4294965248  ;;  %p9336_p13 = scmp.eq.s32.totalorder %s5748_s19, 0 }
  0x5a   : > { %5648 = dma.done.wait (%p9336_p13), [#allocation9], 16   ;;  %p9337_p3 = pmov %p9336_p13 }
  0x5c   : > { %5650 = vsyncadd (%p9337_p3), [#allocation9], 4294967280 }
  0x5d   : > { %210 = sfence }
  0x5e   : > { %v237_v0 = vld [vmem:[%s5853_s11 + $0x20] sm:$0xff]  ;;  %v238_v1 = vld [vmem:[%s5853_s11 + $0x28] sm:$0xff]  ;;  %v239_v5 = vld [vmem:[%s5853_s11 + $0x30] sm:$0xff]  ;;  %v313_v32 = vlaneseq  ;;  %s9340_s2 = sld [smem:[#allocation218_spill]]  ;;  %vm324_vm0 = vcmask 130112   ;;  %vm331_vm1 = vcmask 195712  }
  0x5f   : > { %v233_v2 = vld [vmem:[%s5853_s11] sm:$0xff]  ;;  %v255_v3 = vadd.f32 %v238_v1, %v237_v0  ;;  %v234_v4 = vld [vmem:[%s5853_s11 + $0x8] sm:$0xff]  ;;  %v240_v6 = vld [vmem:[%s5853_s11 + $0x38] sm:$0xff]  ;;  %v287_v27 = vmax.f32 %v237_v0, %v238_v1  ;;  %vm338_vm2 = vcmask 261312   ;;  %vm408_vm3 = vcmask 1043459   ;;  %s9343_s1 = sld [smem:[#allocation217_spill]] }
  0x60   : > { %v249_v7 = vadd.f32 %v234_v4, %v233_v2  ;;  %v235_v8 = vld [vmem:[%s5853_s11 + $0x10] sm:$0xff]  ;;  %v236_v9 = vld [vmem:[%s5853_s11 + $0x18] sm:$0xff]  ;;  %v258_v10 = vadd.f32 %v240_v6, %v239_v5  ;;  %v241_v14 = vld [vmem:[%s5853_s11 + $0x40] sm:$0xff]  ;;  %v281_v25 = vmax.f32 %v233_v2, %v234_v4  ;;  %v290_v26 = vmax.f32 %v239_v5, %v240_v6  ;;  %s5679_s22 = smov 115   ;;  %s5680_s23 = smov 3  }
  0x61   : > { %256 = vadd.xlane.f32.xlu1 %v255_v3  ;;  %v252_v11 = vadd.f32 %v236_v9, %v235_v8  ;;  %v243_v12 = vld [vmem:[%s5853_s11 + $0x50] sm:$0xff]  ;;  %v244_v13 = vld [vmem:[%s5853_s11 + $0x58] sm:$0xff]  ;;  %v242_v15 = vld [vmem:[%s5853_s11 + $0x48] sm:$0xff]  ;;  %v284_v24 = vmax.f32 %v235_v8, %v236_v9  ;;  %v5880_v33 = vshrl.u32 %v313_v32, 7  ;;  %vm359_vm4 = vcmask 1041409   ;;  %s5681_s5 = smov 83  }
  0x62   : > { %250 = vadd.xlane.f32.xlu0 %v249_v7  ;;  %v264_v16 = vadd.f32 %v244_v13, %v243_v12  ;;  %v261_v17 = vadd.f32 %v242_v15, %v241_v14  ;;  %v247_v18 = vld [vmem:[%s5853_s11 + $0x70] sm:$0xff]  ;;  %v248_v19 = vld [vmem:[%s5853_s11 + $0x78] sm:$0xff]  ;;  %v245_v20 = vld [vmem:[%s5853_s11 + $0x60] sm:$0xff]  ;;  %v296_v28 = vmax.f32 %v243_v12, %v244_v13  ;;  %v293_v29 = vmax.f32 %v241_v14, %v242_v15  ;;  %s5682_s10 = smov 99   ;;  %s5683_s26 = smov 51  }
  0x63   : > { %v246_v21 = vld [vmem:[%s5853_s11 + $0x68] sm:$0xff]  ;;  %v270_v22 = vadd.f32 %v248_v19, %v247_v18  ;;  %v302_v30 = vmax.f32 %v247_v18, %v248_v19  ;;  %9338 = vst [vmem:[#allocation26_spill] sm:$0xff] %v5880_v33  ;;  %v5883_v34 = vsub.s32 1, %v5880_v33  ;;  %v5890_v37 = vsub.s32 2, %v5880_v33  ;;  %s5684_s29 = smov 67   ;;  %s5685_s9 = smov 19  }
  0x64   : > { %v267_v23 = vadd.f32 %v246_v21, %v245_v20  ;;  %v299_v31 = vmax.f32 %v245_v20, %v246_v21  ;;  %v414_v35 = vld [vmem:[%s9340_s2] sm:$0xff]  ;;  %v5893_v38 = vsub.s32 0, %v5880_v33  ;;  %v511_v40 = vsub.s32 3, %v5880_v33  ;;  %v415_v51 = vld [vmem:[%s9340_s2 + $0x8] sm:$0xff]  ;;  %v416_v60 = vld [vmem:[%s9340_s2 + $0x10] sm:$0xff]  ;;  %s5686_s20 = smov 35  }
  0x65   : > { %259 = vadd.xlane.f32.xlu1 %v258_v10  ;;  %9339 = vst [vmem:[#allocation27_spill] sm:$0xff] %v5883_v34  ;;  %v498_v36 = vrot.slane %v414_v35, %v5883_v34  ;;  %v505_v39 = vrot.slane %v414_v35, %v5890_v37  ;;  %v518_v42 = vsub.s32 4, %v5880_v33  ;;  %v525_v44 = vsub.s32 5, %v5880_v33  ;;  %v417_v5 = vld [vmem:[%s9340_s2 + $0x18] sm:$0xff]  ;;  %s5687_s25 = smov 127   ;;  %s5688_s30 = smov 126  }
  0x66   : > { %253 = vadd.xlane.f32.xlu0 %v252_v11  ;;  %9341 = vst [vmem:[#allocation28_spill] sm:$0xff] %v5893_v38  ;;  %v491_v41 = vrot.slane %v414_v35, %v5893_v38  ;;  %v512_v43 = vrot.slane %v414_v35, %v511_v40  ;;  %v532_v46 = vsub.s32 6, %v5880_v33  ;;  %v539_v48 = vsub.s32 7, %v5880_v33  ;;  %s9131_s12 = smov 125   ;;  %s7141_s8 = sld [smem:[#allocation10 + $0x31]] }
  0x67   : > { %v519_v45 = vrot.slane %v414_v35, %v518_v42  ;;  %v526_v47 = vrot.slane %v414_v35, %v525_v44  ;;  %v547_v52 = vrot.slane %v415_v51, %v5893_v38  ;;  %v554_v53 = vrot.slane %v415_v51, %v5883_v34  ;;  %s7143_s13 = sld [smem:[#allocation10 + $0x38]]  ;;  %s9150_s0 = smov 123  }
  0x68   : > { %v533_v49 = vrot.slane %v414_v35, %v532_v46  ;;  %v540_v50 = vrot.slane %v414_v35, %v539_v48  ;;  %v561_v54 = vrot.slane %v415_v51, %v5890_v37  ;;  %v568_v55 = vrot.slane %v415_v51, %v511_v40  ;;  %s7145_s14 = sld [smem:[#allocation10 + $0x3f]]  ;;  %s9152_s4 = smov 122  }
  0x69   : > { %265 = vadd.xlane.f32.xlu1 %v264_v16  ;;  %v575_v56 = vrot.slane %v415_v51, %v518_v42  ;;  %v582_v57 = vrot.slane %v415_v51, %v525_v44  ;;  %v589_v58 = vrot.slane %v415_v51, %v532_v46  ;;  %v596_v59 = vrot.slane %v415_v51, %v539_v48  ;;  %s7177_s7 = sld [smem:[#allocation10 + $0x23]] }
  0x6a   : > { %262 = vadd.xlane.f32.xlu0 %v261_v17  ;;  %v603_v61 = vrot.slane %v416_v60, %v5893_v38  ;;  %v610_v62 = vrot.slane %v416_v60, %v5883_v34  ;;  %v617_v63 = vrot.slane %v416_v60, %v5890_v37  ;;  %v624_v0 = vrot.slane %v416_v60, %v511_v40  ;;  %s7187_s2 = sld [smem:[#allocation10 + $0x1]] }
  0x6b   : > { %v631_v1 = vrot.slane %v416_v60, %v518_v42  ;;  %v638_v2 = vrot.slane %v416_v60, %v525_v44  ;;  %v645_v3 = vrot.slane %v416_v60, %v532_v46  ;;  %v652_v4 = vrot.slane %v416_v60, %v539_v48  ;;  %s7189_s3 = sld [smem:[#allocation10 + $0x33]] }
  0x6c   : > { %v659_v6 = vrot.slane %v417_v5, %v5893_v38  ;;  %v666_v7 = vrot.slane %v417_v5, %v5883_v34  ;;  %v673_v8 = vrot.slane %v417_v5, %v5890_v37  ;;  %v680_v9 = vrot.slane %v417_v5, %v511_v40  ;;  %s7191_s24 = sld [smem:[#allocation10 + $0x16]] }
  0x6d   : > { %271 = vadd.xlane.f32.xlu1 %v270_v22  ;;  %v687_v10 = vrot.slane %v417_v5, %v518_v42  ;;  %v694_v11 = vrot.slane %v417_v5, %v525_v44  ;;  %v701_v12 = vrot.slane %v417_v5, %v532_v46  ;;  %v708_v13 = vrot.slane %v417_v5, %v539_v48  ;;  %s7195_s17 = sld [smem:[#allocation10 + $0x2]] }
  0x6e   : > { %268 = vadd.xlane.f32.xlu0 %v267_v23  ;;  %v314_v20 = vand.u32 127, %v313_v32  ;;  %vm411_vm5 = vcmask 1041408   ;;  %vm467_vm6 = vcmask 257024   ;;  %vm1897_vm7 = vcmask 1042434   ;;  %s7199_s16 = sld [smem:[#allocation10 + $0x8]] }
  0x6f   : > { %vm1900_vm8 = vcmask 1044484   ;;  %vm1902_vm9 = vcmask 1045509   ;;  %vm1904_vm10 = vcmask 1046534   ;;  %vm1906_vm11 = vcmask 1047559   ;;  %s7201_s21 = sld [smem:[#allocation10 + $0xf]] }
  0x70   : > { %v319_v23 = vadd.s32 4294967288, %v314_v20  ;;  %vm2029_vm12 = vcmask 31744   ;;  %vm2307_vm13 = vcmask 147480   ;;  %s7203_s18 = sld [smem:[#allocation10 + $0x1d]]  ;;  %vm4619_vm14 = vcmask 122880  }
  0x71   : > { %285 = vmax.xlane.f32.xlu1 %v284_v24  ;;  %s7211_s28 = sld [smem:[#allocation10 + $0x2b]]  ;;  %vm4633_vm15 = vcmask 254080  }
  0x72   : > { %282 = vmax.xlane.f32.xlu0 %v281_v25  ;;  %s7213_s15 = sld [smem:[#allocation10 + $0x9]] }
  0x73   : > { %s7215_s27 = sld [smem:[#allocation10 + $0x10]] }
  0x74   : > { %s7219_s6 = sld [smem:[#allocation10 + $0x17]] }
  0x75   : > { %291 = vmax.xlane.f32.xlu1 %v290_v26  ;;  %v326_v26 = vadd.s32 4294967280, %v314_v20  ;;  %s7223_s19 = sld [smem:[#allocation10 + $0x1e]] }
  0x76   : > { %288 = vmax.xlane.f32.xlu0 %v287_v27  ;;  %v322_v27 = vsub.s32 %v319_v23, %v5880_v33  ;;  %v413_v23 = vld [vmem:[%s9343_s1] sm:$0xf]  ;;  %s7183_s1 = sld [smem:[#allocation10 + $0x32]] }
  0x77   : > { %v329_v32 = vsub.s32 %v326_v26, %v5880_v33  ;;  %9380 = sst [smem:[#allocation44_spill]] %s7211_s28 }
  0x78   : > { %9381 = sst [smem:[#allocation45_spill]] %s7213_s15 }
  0x79   : > { %297 = vmax.xlane.f32.xlu1 %v296_v28  ;;  %9382 = sst [smem:[#allocation46_spill]] %s7215_s27 }
  0x7a   : > { %294 = vmax.xlane.f32.xlu0 %v293_v29  ;;  %9383 = sst [smem:[#allocation47_spill]] %s7219_s6 }
  0x7b   : > { %9384 = sst [smem:[#allocation48_spill]] %s7223_s19  ;;  %s9393_s19 = smov 125  }
  0x7c   : > { %s7231_s15 = sld [smem:[#allocation10 + $0x3]] }
  0x7d   : > { %303 = vmax.xlane.f32.xlu1 %v302_v30  ;;  %s7235_s27 = sld [smem:[#allocation10 + $0xa]] }
  0x7e   : > { %300 = vmax.xlane.f32.xlu0 %v299_v31  ;;  %v5923_v31 = vsub.s32 %v314_v20, %v5880_v33  ;;  %s7237_s6 = sld [smem:[#allocation10 + $0x11]] }
  0x7f   : > { %s7239_s28 = sld [smem:[#allocation10 + $0x18]] }
  0x82   : > { %9387 = sst [smem:[#allocation51_spill]] %s7231_s15 }
  0x83   : > { %9388 = sst [smem:[#allocation52_spill]] %s7235_s27 }
  0x84   : > { %9389 = sst [smem:[#allocation53_spill]] %s7237_s6 }
  0x85   : > { %9390 = sst [smem:[#allocation54_spill]] %s7239_s28 }
  0x86   : > { %s7249_s15 = sld [smem:[#allocation10 + $0x2d]] }
  0x87   : > { %s7255_s6 = sld [smem:[#allocation10 + $0xb]] }
  0x88   : > { %s7259_s28 = sld [smem:[#allocation10 + $0x12]] }
  0x89   : > { %s7263_s27 = sld [smem:[#allocation10 + $0x20]] }
  0x8c   : > { %9392 = sst [smem:[#allocation56_spill]] %s7249_s15 }
  0x8d   : > { %9394 = sst [smem:[#allocation57_spill]] %s7255_s6 }
  0x8e   : > { %500 = vbcast.lane.b32.xlu1 %v498_v36, 256  ;;  %9395 = sst [smem:[#allocation58_spill]] %s7259_s28 }
  0x8f   : > { %9397 = sst [smem:[#allocation60_spill]] %s7263_s27 }
  0x90   : > { %s7267_s15 = sld [smem:[#allocation10 + $0x27]] }
  0x91   : > { %s7271_s6 = sld [smem:[#allocation10 + $0x2e]] }
  0x92   : > { %507 = vbcast.lane.b32.xlu1 %v505_v39, 256  ;;  %v333_v39 = vadd.s32 4294967272, %v314_v20  ;;  %s7275_s28 = sld [smem:[#allocation10 + $0xc]] }
  0x93   : > { %s7279_s27 = sld [smem:[#allocation10 + $0x13]] }
  0x94   : > { %493 = vbcast.lane.b32.xlu0 %v491_v41, 256  ;;  %v336_v51 = vsub.s32 %v333_v39, %v5880_v33 }
  0x96   : > { %514 = vbcast.lane.b32.xlu1 %v512_v43, 256  ;;  %9398 = sst [smem:[#allocation61_spill]] %s7267_s15 }
  0x97   : > { %9399 = sst [smem:[#allocation62_spill]] %s7271_s6 }
  0x98   : > { %521 = vbcast.lane.b32.xlu0 %v519_v45, 256  ;;  %9401 = sst [smem:[#allocation64_spill]] %s7275_s28 }
  0x99   : > { %9402 = sst [smem:[#allocation65_spill]] %s7279_s27 }
  0x9a   : > { %528 = vbcast.lane.b32.xlu1 %v526_v47, 256  ;;  %s7283_s15 = sld [smem:[#allocation10 + $0x1a]] }
  0x9b   : > { %s7287_s6 = sld [smem:[#allocation10 + $0x28]] }
  0x9c   : > { %535 = vbcast.lane.b32.xlu0 %v533_v49, 256  ;;  %v5675_v49 = vmov 1966171168   ;;  %s7291_s28 = sld [smem:[#allocation10 + $0x2f]] }
  0x9d   : > { %s7298_s27 = sld [smem:[#allocation10 + $0x6]] }
  0x9e   : > { %542 = vbcast.lane.b32.xlu1 %v540_v50, 256  ;;  %v420_v50 = vunpack.c.l.s4 %v5675_v49 }
  0xa0   : > { %549 = vbcast.lane.b32.xlu0 %v547_v52, 256 }
  0xa2   : > { %556 = vbcast.lane.b32.xlu1 %v554_v53, 256 }
  0xa4   : > { %563 = vbcast.lane.b32.xlu0 %v561_v54, 256 }
  0xa6   : > { %570 = vbcast.lane.b32.xlu1 %v568_v55, 256 }
  0xa8   : > { %577 = vbcast.lane.b32.xlu0 %v575_v56, 256 }
  0xaa   : > { %584 = vbcast.lane.b32.xlu1 %v582_v57, 256 }
  0xac   : > { %591 = vbcast.lane.b32.xlu0 %v589_v58, 256 }
  0xae   : > { %598 = vbcast.lane.b32.xlu1 %v596_v59, 256 }
  0xb0   : > { %605 = vbcast.lane.b32.xlu0 %v603_v61, 256 }
  0xb2   : > { %612 = vbcast.lane.b32.xlu1 %v610_v62, 256 }
  0xb4   : > { %619 = vbcast.lane.b32.xlu0 %v617_v63, 256 }
  0xb6   : > { %626 = vbcast.lane.b32.xlu1 %v624_v0, 256 }
  0xb8   : > { %633 = vbcast.lane.b32.xlu0 %v631_v1, 256  ;;  %v421_v1 = vunpack.c.0.s8 %v420_v50 }
  0xba   : > { %640 = vbcast.lane.b32.xlu1 %v638_v2, 256 }
  0xbc   : > { %647 = vbcast.lane.b32.xlu0 %v645_v3, 256 }
  0xbe   : > { %654 = vbcast.lane.b32.xlu1 %v652_v4, 256 }
  0xc0   : > { %661 = vbcast.lane.b32.xlu0 %v659_v6, 256 }
  0xc2   : > { %668 = vbcast.lane.b32.xlu1 %v666_v7, 256 }
  0xc4   : > { %675 = vbcast.lane.b32.xlu0 %v673_v8, 256 }
  0xc6   : > { %682 = vbcast.lane.b32.xlu1 %v680_v9, 256 }
  0xc8   : > { %689 = vbcast.lane.b32.xlu0 %v687_v10, 256 }
  0xca   : > { %696 = vbcast.lane.b32.xlu1 %v694_v11, 256 }
  0xcc   : > { %703 = vbcast.lane.b32.xlu0 %v701_v12, 256 }
  0xce   : > { %710 = vbcast.lane.b32.xlu1 %v708_v13, 256  ;;  %v5940_v13 = vsub.s32 %v421_v1, %v5880_v33 }
  0xd0   : > { %9342 = vst [vmem:[#allocation29_spill] sm:$0xff] %v5940_v13 }
  0xea   : > { %v257_v14 = vpop.xlane.xlu1 %256 }
  0xeb   : > { %v251_v15 = vpop.xlane.xlu0 %250  ;;  %v275_v45 = vmul.f32 0.00390625, %v257_v14 }
  0xec   : > { %v273_v35 = vmul.f32 0.00390625, %v251_v15 }
  0xed   : > { %v330_v62 = vrot.slane %v275_v45, %v329_v32 }
  0xee   : > { %v260_v16 = vpop.xlane.xlu1 %259  ;;  %v318_v46 = vrot.slane %v273_v35, %v5923_v31 }
  0xef   : > { %v254_v17 = vpop.xlane.xlu0 %253  ;;  %v276_v52 = vmul.f32 0.00390625, %v260_v16 }
  0xf0   : > { %v274_v28 = vmul.f32 0.00390625, %v254_v17 }
  0xf1   : > { %v337_v2 = vrot.slane %v276_v52, %v336_v51 }
  0xf2   : > { %v266_v18 = vpop.xlane.xlu1 %265  ;;  %v323_v41 = vrot.slane %v274_v28, %v322_v27 }
  0xf3   : > { %v263_v19 = vpop.xlane.xlu0 %262  ;;  %v278_v29 = vmul.f32 0.00390625, %v266_v18 }
  0xf4   : > { %v277_v30 = vmul.f32 0.00390625, %v263_v19  ;;  %v325_v56 = vsel %vm324_vm0, %v323_v41, %v318_v46 }
  0xf5   : > { %v347_v42 = vrot.slane %v278_v29, %v322_v27  ;;  %v332_v9 = vsel %vm331_vm1, %v330_v62, %v325_v56 }
  0xf6   : > { %v272_v21 = vpop.xlane.xlu1 %271  ;;  %v343_v43 = vrot.slane %v277_v30, %v5923_v31  ;;  %v339_v16 = vsel %vm338_vm2, %v337_v2, %v332_v9 }
  0xf7   : > { %v269_v22 = vpop.xlane.xlu0 %268  ;;  %v280_v44 = vmul.f32 0.00390625, %v272_v21 }
  0xf8   : > { %v279_v36 = vmul.f32 0.00390625, %v269_v22  ;;  %v348_v58 = vsel %vm324_vm0, %v347_v42, %v343_v43  ;;  %v5676_v43 = vmov 0  }
  0xf9   : > { %v357_v59 = vrot.slane %v280_v44, %v336_v51  ;;  %5505 = vset.pattern.permute.xlu1 %v5676_v43  ;;  %5504 = vset.pattern.permute.xlu0 %v5676_v43 }
  0xfa   : > { %v286_v24 = vpop.xlane.xlu1 %285  ;;  %v352_v47 = vrot.slane %v279_v36, %v329_v32 }
  0xfb   : > { %v283_v25 = vpop.xlane.xlu0 %282  ;;  %v377_v53 = vrot.slane %v286_v24, %v322_v27 }
  0xfc   : > { %v373_v54 = vrot.slane %v283_v25, %v5923_v31  ;;  %v353_v63 = vsel %vm331_vm1, %v352_v47, %v348_v58 }
  0xfd   : > { %v358_v11 = vsel %vm338_vm2, %v357_v59, %v353_v63 }
  0xfe   : > { %v292_v37 = vpop.xlane.xlu1 %291  ;;  %v378_v3 = vsel %vm324_vm0, %v377_v53, %v373_v54  ;;  %v360_v18 = vsel %vm359_vm4, %v358_v11, %v339_v16 }
  0xff   : > { %v289_v40 = vpop.xlane.xlu0 %288  ;;  %v387_v4 = vrot.slane %v292_v37, %v336_v51 }
 0x100   : > { %v382_v57 = vrot.slane %v289_v40, %v329_v32 }
 0x102   : > { %v298_v48 = vpop.xlane.xlu1 %297  ;;  %v383_v7 = vsel %vm331_vm1, %v382_v57, %v378_v3 }
 0x103   : > { %v295_v55 = vpop.xlane.xlu0 %294  ;;  %v396_v60 = vrot.slane %v298_v48, %v322_v27  ;;  %v388_v14 = vsel %vm338_vm2, %v387_v4, %v383_v7 }
 0x104   : > { %v392_v61 = vrot.slane %v295_v55, %v5923_v31 }
 0x106   : > { %v304_v0 = vpop.xlane.xlu1 %303  ;;  %v397_v10 = vsel %vm324_vm0, %v396_v60, %v392_v61  ;;  %vm4647_vm0 = vcmask 385280  }
 0x107   : > { %v301_v5 = vpop.xlane.xlu0 %300  ;;  %v406_v6 = vrot.slane %v304_v0, %v336_v51 }
 0x108   : > { %v401_v8 = vrot.slane %v301_v5, %v329_v32 }
 0x10a   : > { %v402_v12 = vsel %vm331_vm1, %v401_v8, %v397_v10  ;;  %v5970_v52 = vpop.permute.xlu1 %500  ;;  %vm4661_vm1 = vcmask 516480  }
 0x10b   : > { %v407_v15 = vsel %vm338_vm2, %v406_v6, %v402_v12  ;;  %v5954_v44 = vpop.permute.xlu0 %493  ;;  %vm4675_vm2 = vcmask 647680  }
 0x10c   : > { %v409_v17 = vsel %vm408_vm3, %v407_v15, %v388_v14 }
 0x10d   : > { %v412_v19 = vsel %vm411_vm5, %v360_v18, %v409_v17  ;;  %vm4717_vm5 = vcmask 1041280  }
 0x10e   : > { %v425_v20 = vrot.slane %v412_v19, %v5940_v13  ;;  %v5974_v54 = vpop.permute.xlu1 %507 }
 0x10f   : > { %v5956_v45 = vpop.permute.xlu0 %521 }
 0x110   : > { %v433_v21 = vrot.slane %v425_v20, %v5940_v13  ;;  %v426_v22 = vcombine.high %v425_v20, %v425_v20 }
 0x112   : > { %v446_v24 = vrot.slane %v433_v21, %v5893_v38  ;;  %v440_v25 = vrot.slane %v426_v22, %v5940_v13  ;;  %v441_v26 = vcombine.high %v433_v21, %v433_v21  ;;  %v5978_v56 = vpop.permute.xlu1 %514 }
 0x113   : > { %v5958_v46 = vpop.permute.xlu0 %535 }
 0x114   : > { %v463_v27 = vmul.f32 %v446_v24, %v413_v23  ;;  %v450_v28 = vrot.slane %v440_v25, %v5893_v38  ;;  %v454_v29 = vrot.slane %v441_v26, %v5893_v38  ;;  %v442_v30 = vcombine.high %v440_v25, %v440_v25 }
 0x116   : > { %v468_v35 = vsel %vm467_vm6, %v463_v27, 0.0  ;;  %v464_v36 = vmul.f32 %v450_v28, %v413_v23  ;;  %v465_v37 = vmul.f32 %v454_v29, %v413_v23  ;;  %v458_v39 = vrot.slane %v442_v30, %v5893_v38  ;;  %v5982_v58 = vpop.permute.xlu1 %528 }
 0x117   : > { %469 = vadd.xlane.f32.xlu0 %v468_v35  ;;  %v5960_v47 = vpop.permute.xlu0 %549 }
 0x118   : > { %v471_v40 = vsel %vm467_vm6, %v464_v36, 0.0  ;;  %v466_v32 = vmul.f32 %v458_v39, %v413_v23  ;;  %v474_v41 = vsel %vm467_vm6, %v465_v37, 0.0 }
 0x119   : > { %472 = vadd.xlane.f32.xlu1 %v471_v40 }
 0x11a   : > { %v477_v42 = vsel %vm467_vm6, %v466_v32, 0.0  ;;  %v5986_v60 = vpop.permute.xlu1 %542 }
 0x11b   : > { %475 = vadd.xlane.f32.xlu0 %v474_v41  ;;  %v5962_v48 = vpop.permute.xlu0 %563 }
 0x11d   : > { %478 = vadd.xlane.f32.xlu1 %v477_v42 }
 0x11e   : > { %v5990_v62 = vpop.permute.xlu1 %556 }
 0x11f   : > { %v5964_v49 = vpop.permute.xlu0 %577 }
 0x122   : > { %v5994_v0 = vpop.permute.xlu1 %570 }
 0x123   : > { %v5966_v50 = vpop.permute.xlu0 %591 }
 0x126   : > { %v5998_v2 = vpop.permute.xlu1 %584 }
 0x127   : > { %v5968_v51 = vpop.permute.xlu0 %605 }
 0x12a   : > { %v6006_v7 = vpop.permute.xlu1 %598 }
 0x12b   : > { %v5972_v53 = vpop.permute.xlu0 %619 }
 0x12e   : > { %v6016_v12 = vpop.permute.xlu1 %612 }
 0x12f   : > { %v5976_v55 = vpop.permute.xlu0 %633 }
 0x132   : > { %v6022_v16 = vpop.permute.xlu1 %626 }
 0x133   : > { %v5980_v57 = vpop.permute.xlu0 %647 }
 0x136   : > { %v6032_v21 = vpop.permute.xlu1 %640 }
 0x137   : > { %v5984_v59 = vpop.permute.xlu0 %661 }
 0x13a   : > { %v6038_v24 = vpop.permute.xlu1 %654 }
 0x13b   : > { %v5988_v61 = vpop.permute.xlu0 %675 }
 0x13e   : > { %v6048_v29 = vpop.permute.xlu1 %668 }
 0x13f   : > { %v5992_v63 = vpop.permute.xlu0 %689 }
 0x142   : > { %v6054_v36 = vpop.permute.xlu1 %682 }
 0x143   : > { %v5996_v1 = vpop.permute.xlu0 %703 }
 0x146   : > { %v6064_v41 = vpop.permute.xlu1 %696 }
 0x1a0   : > { %v470_v3 = vpop.xlane.xlu0 %469 }
 0x1a1   : > { %v6000_v4 = vmax.f32 %v470_v3, 0.0  ;;  %v6070_v3 = vpop.permute.xlu1 %710 }
 0x1a3   : > { %v745_v5 = vmul.f32 %v5970_v52, %v6000_v4  ;;  %v744_v6 = vmul.f32 %v5954_v44, %v6000_v4  ;;  %v746_v8 = vmul.f32 %v5974_v54, %v6000_v4  ;;  %v747_v9 = vmul.f32 %v5978_v56, %v6000_v4 }
 0x1a4   : > { %v748_v10 = vmul.f32 %v5956_v45, %v6000_v4  ;;  %v749_v11 = vmul.f32 %v5982_v58, %v6000_v4  ;;  %v750_v14 = vmul.f32 %v5958_v46, %v6000_v4  ;;  %v751_v15 = vmul.f32 %v5986_v60, %v6000_v4 }
 0x1a5   : > { %1004 = vperm.xlu1 %5505, %v745_v5   ;;  %1001 = vperm.xlu0 %5504, %v744_v6   ;;  %v752_v17 = vmul.f32 %v5960_v47, %v6000_v4  ;;  %v753_v18 = vmul.f32 %v5990_v62, %v6000_v4  ;;  %v754_v19 = vmul.f32 %v5962_v48, %v6000_v4 }
 0x1a6   : > { %v755_v20 = vmul.f32 %v5994_v0, %v6000_v4  ;;  %v756_v22 = vmul.f32 %v5964_v49, %v6000_v4  ;;  %v757_v23 = vmul.f32 %v5998_v2, %v6000_v4  ;;  %v758_v25 = vmul.f32 %v5966_v50, %v6000_v4 }
 0x1a7   : > { %v759_v26 = vmul.f32 %v6006_v7, %v6000_v4  ;;  %v760_v27 = vmul.f32 %v5968_v51, %v6000_v4  ;;  %v761_v28 = vmul.f32 %v6016_v12, %v6000_v4  ;;  %v762_v30 = vmul.f32 %v5972_v53, %v6000_v4 }
 0x1a8   : > { %v763_v35 = vmul.f32 %v6022_v16, %v6000_v4  ;;  %v764_v37 = vmul.f32 %v5976_v55, %v6000_v4  ;;  %v765_v39 = vmul.f32 %v6032_v21, %v6000_v4  ;;  %v766_v40 = vmul.f32 %v5980_v57, %v6000_v4 }
 0x1a9   : > { %1007 = vperm.xlu1 %5505, %v746_v8   ;;  %1010 = vperm.xlu0 %5504, %v747_v9   ;;  %v767_v32 = vmul.f32 %v6038_v24, %v6000_v4  ;;  %v768_v42 = vmul.f32 %v5984_v59, %v6000_v4  ;;  %v769_v43 = vmul.f32 %v6048_v29, %v6000_v4 }
 0x1aa   : > { %v770_v5 = vmul.f32 %v5988_v61, %v6000_v4  ;;  %v771_v6 = vmul.f32 %v6054_v36, %v6000_v4  ;;  %v772_v8 = vmul.f32 %v5992_v63, %v6000_v4  ;;  %v773_v9 = vmul.f32 %v6064_v41, %v6000_v4 }
 0x1ad   : > { %1013 = vperm.xlu1 %5505, %v748_v10   ;;  %1016 = vperm.xlu0 %5504, %v749_v11   ;;  %v473_v10 = vpop.xlane.xlu1 %472 }
 0x1ae   : > { %v6080_v11 = vmax.f32 %v473_v10, 0.0 }
 0x1b0   : > { %v799_v10 = vmul.f32 %v6038_v24, %v6080_v11 }
 0x1b1   : > { %1019 = vperm.xlu1 %5505, %v750_v14   ;;  %1022 = vperm.xlu0 %5504, %v751_v15   ;;  %v774_v14 = vmul.f32 %v5996_v1, %v6000_v4  ;;  %v775_v15 = vmul.f32 %v6070_v3, %v6000_v4  ;;  %v780_v4 = vmul.f32 %v5956_v45, %v6080_v11 }
 0x1b5   : > { %1025 = vperm.xlu1 %5505, %v752_v17   ;;  %1028 = vperm.xlu0 %5504, %v753_v18   ;;  %v776_v17 = vmul.f32 %v5954_v44, %v6080_v11  ;;  %v777_v18 = vmul.f32 %v5970_v52, %v6080_v11 }
 0x1b9   : > { %1031 = vperm.xlu1 %5505, %v754_v19   ;;  %1034 = vperm.xlu0 %5504, %v755_v20   ;;  %v778_v19 = vmul.f32 %v5974_v54, %v6080_v11  ;;  %v779_v20 = vmul.f32 %v5978_v56, %v6080_v11 }
 0x1bd   : > { %1037 = vperm.xlu1 %5505, %v756_v22   ;;  %1040 = vperm.xlu0 %5504, %v757_v23   ;;  %v781_v22 = vmul.f32 %v5982_v58, %v6080_v11  ;;  %v782_v23 = vmul.f32 %v5958_v46, %v6080_v11 }
 0x1c1   : > { %1043 = vperm.xlu1 %5505, %v758_v25   ;;  %1046 = vperm.xlu0 %5504, %v759_v26   ;;  %v783_v25 = vmul.f32 %v5986_v60, %v6080_v11  ;;  %v784_v26 = vmul.f32 %v5960_v47, %v6080_v11 }
 0x1c5   : > { %1049 = vperm.xlu1 %5505, %v760_v27   ;;  %1052 = vperm.xlu0 %5504, %v761_v28   ;;  %v785_v27 = vmul.f32 %v5990_v62, %v6080_v11  ;;  %v786_v28 = vmul.f32 %v5962_v48, %v6080_v11 }
 0x1c9   : > { %1055 = vperm.xlu1 %5505, %v762_v30   ;;  %1058 = vperm.xlu0 %5504, %v763_v35   ;;  %v787_v30 = vmul.f32 %v5994_v0, %v6080_v11  ;;  %v788_v35 = vmul.f32 %v5964_v49, %v6080_v11 }
 0x1cd   : > { %1061 = vperm.xlu1 %5505, %v764_v37   ;;  %1064 = vperm.xlu0 %5504, %v765_v39   ;;  %v789_v37 = vmul.f32 %v5998_v2, %v6080_v11  ;;  %v790_v39 = vmul.f32 %v5966_v50, %v6080_v11 }
 0x1d1   : > { %1067 = vperm.xlu1 %5505, %v766_v40   ;;  %1070 = vperm.xlu0 %5504, %v767_v32   ;;  %v791_v40 = vmul.f32 %v6006_v7, %v6080_v11  ;;  %v792_v32 = vmul.f32 %v5968_v51, %v6080_v11 }
 0x1d5   : > { %1073 = vperm.xlu1 %5505, %v768_v42   ;;  %1076 = vperm.xlu0 %5504, %v769_v43   ;;  %v793_v42 = vmul.f32 %v6016_v12, %v6080_v11  ;;  %v794_v43 = vmul.f32 %v5972_v53, %v6080_v11 }
 0x1d9   : > { %1079 = vperm.xlu1 %5505, %v770_v5   ;;  %1082 = vperm.xlu0 %5504, %v771_v6   ;;  %v795_v5 = vmul.f32 %v6022_v16, %v6080_v11  ;;  %v796_v6 = vmul.f32 %v5976_v55, %v6080_v11 }
 0x1dd   : > { %1085 = vperm.xlu1 %5505, %v772_v8   ;;  %1088 = vperm.xlu0 %5504, %v773_v9   ;;  %v797_v8 = vmul.f32 %v6032_v21, %v6080_v11  ;;  %v798_v9 = vmul.f32 %v5980_v57, %v6080_v11 }
 0x1e1   : > { %1091 = vperm.xlu1 %5505, %v774_v14   ;;  %1094 = vperm.xlu0 %5504, %v775_v15   ;;  %v800_v14 = vmul.f32 %v5984_v59, %v6080_v11  ;;  %v801_v15 = vmul.f32 %v6048_v29, %v6080_v11 }
 0x1e5   : > { %1097 = vperm.xlu1 %5505, %v776_v17   ;;  %1100 = vperm.xlu0 %5504, %v777_v18   ;;  %v802_v17 = vmul.f32 %v5988_v61, %v6080_v11  ;;  %v803_v18 = vmul.f32 %v6054_v36, %v6080_v11 }
 0x1e9   : > { %1103 = vperm.xlu1 %5505, %v778_v19   ;;  %1106 = vperm.xlu0 %5504, %v779_v20   ;;  %v804_v19 = vmul.f32 %v5992_v63, %v6080_v11  ;;  %v805_v20 = vmul.f32 %v6064_v41, %v6080_v11 }
 0x1ed   : > { %1109 = vperm.xlu1 %5505, %v780_v4   ;;  %1112 = vperm.xlu0 %5504, %v781_v22   ;;  %v476_v4 = vpop.xlane.xlu0 %475  ;;  %v479_v22 = vpop.xlane.xlu1 %478 }
 0x1f1   : > { %1115 = vperm.xlu1 %5505, %v782_v23   ;;  %1118 = vperm.xlu0 %5504, %v783_v25   ;;  %v6146_v23 = vmax.f32 %v476_v4, 0.0  ;;  %v806_v25 = vmul.f32 %v5996_v1, %v6080_v11 }
 0x1f3   : > { %v819_v4 = vmul.f32 %v5994_v0, %v6146_v23 }
 0x1f5   : > { %1121 = vperm.xlu1 %5505, %v784_v26   ;;  %1124 = vperm.xlu0 %5504, %v785_v27   ;;  %v807_v26 = vmul.f32 %v6070_v3, %v6080_v11  ;;  %v811_v11 = vmul.f32 %v5978_v56, %v6146_v23 }
 0x1f9   : > { %1127 = vperm.xlu1 %5505, %v786_v28   ;;  %1130 = vperm.xlu0 %5504, %v787_v30   ;;  %v809_v30 = vmul.f32 %v5970_v52, %v6146_v23 }
 0x1fd   : > { %1133 = vperm.xlu1 %5505, %v788_v35   ;;  %1136 = vperm.xlu0 %5504, %v789_v37   ;;  %v808_v35 = vmul.f32 %v5954_v44, %v6146_v23 }
 0x201   : > { %1139 = vperm.xlu1 %5505, %v790_v39   ;;  %1142 = vperm.xlu0 %5504, %v791_v40   ;;  %v810_v40 = vmul.f32 %v5974_v54, %v6146_v23 }
 0x205   : > { %1145 = vperm.xlu1 %5505, %v792_v32   ;;  %1148 = vperm.xlu0 %5504, %v793_v42  }
 0x209   : > { %1151 = vperm.xlu1 %5505, %v794_v43   ;;  %1154 = vperm.xlu0 %5504, %v795_v5   ;;  %v813_v43 = vmul.f32 %v5982_v58, %v6146_v23  ;;  %v812_v5 = vmul.f32 %v5956_v45, %v6146_v23 }
 0x20d   : > { %1157 = vperm.xlu1 %5505, %v796_v6   ;;  %1160 = vperm.xlu0 %5504, %v797_v8  }
 0x211   : > { %1163 = vperm.xlu1 %5505, %v798_v9   ;;  %1166 = vperm.xlu0 %5504, %v799_v10   ;;  %v815_v9 = vmul.f32 %v5986_v60, %v6146_v23  ;;  %v814_v10 = vmul.f32 %v5958_v46, %v6146_v23 }
 0x215   : > { %1169 = vperm.xlu1 %5505, %v800_v14   ;;  %1172 = vperm.xlu0 %5504, %v801_v15  }
 0x219   : > { %1175 = vperm.xlu1 %5505, %v802_v17   ;;  %1178 = vperm.xlu0 %5504, %v803_v18   ;;  %v817_v17 = vmul.f32 %v5990_v62, %v6146_v23  ;;  %v816_v18 = vmul.f32 %v5960_v47, %v6146_v23 }
 0x21d   : > { %1181 = vperm.xlu1 %5505, %v804_v19   ;;  %1184 = vperm.xlu0 %5504, %v805_v20  }
 0x220   : > { %v6152_v27 = vpop.permute.xlu1 %1004  ;;  %v6154_v28 = vpop.permute.xlu0 %1001 }
 0x221   : > { %1187 = vperm.xlu1 %5505, %v806_v25   ;;  %1190 = vperm.xlu0 %5504, %v807_v26   ;;  %v818_v25 = vmul.f32 %v5962_v48, %v6146_v23 }
 0x224   : > { %v6160_v37 = vpop.permute.xlu1 %1007  ;;  %v6162_v39 = vpop.permute.xlu0 %1010 }
 0x225   : > { %1196 = vperm.xlu0 %5504, %v809_v30   ;;  %1193 = vperm.xlu1 %5505, %v808_v35   ;;  %v821_v35 = vmul.f32 %v5998_v2, %v6146_v23 }
 0x228   : > { %v6168_v32 = vpop.permute.xlu1 %1013  ;;  %v6170_v42 = vpop.permute.xlu0 %1016 }
 0x229   : > { %1202 = vperm.xlu0 %5504, %v811_v11   ;;  %1199 = vperm.xlu1 %5505, %v810_v40   ;;  %v820_v11 = vmul.f32 %v5964_v49, %v6146_v23 }
 0x22c   : > { %v6176_v6 = vpop.permute.xlu1 %1019  ;;  %v6178_v8 = vpop.permute.xlu0 %1022 }
 0x22d   : > { %1208 = vperm.xlu0 %5504, %v813_v43   ;;  %1205 = vperm.xlu1 %5505, %v812_v5   ;;  %v823_v5 = vmul.f32 %v6006_v7, %v6146_v23 }
 0x230   : > { %v6184_v14 = vpop.permute.xlu1 %1025  ;;  %v6186_v15 = vpop.permute.xlu0 %1028 }
 0x231   : > { %1214 = vperm.xlu0 %5504, %v815_v9   ;;  %1211 = vperm.xlu1 %5505, %v814_v10   ;;  %v822_v9 = vmul.f32 %v5966_v50, %v6146_v23 }
 0x234   : > { %v6192_v19 = vpop.permute.xlu1 %1031  ;;  %v6194_v20 = vpop.permute.xlu0 %1034 }
 0x235   : > { %1220 = vperm.xlu0 %5504, %v817_v17   ;;  %1217 = vperm.xlu1 %5505, %v816_v18   ;;  %v6220_v18 = vmax.f32 %v479_v22, 0.0 }
 0x237   : > { %v841_v34 = vmul.f32 %v5970_v52, %v6220_v18  ;;  %v849_v38 = vmul.f32 %v5990_v62, %v6220_v18  ;;  %v848_v13 = vmul.f32 %v5960_v47, %v6220_v18  ;;  %v842_v52 = vmul.f32 %v5974_v54, %v6220_v18 }
 0x238   : > { %v6200_v26 = vpop.permute.xlu1 %1037  ;;  %v6202_v30 = vpop.permute.xlu0 %1040  ;;  %v851_v47 = vmul.f32 %v5994_v0, %v6220_v18  ;;  %v843_v62 = vmul.f32 %v5978_v56, %v6220_v18  ;;  %v856_v54 = vmul.f32 %v5968_v51, %v6220_v18  ;;  %v852_v56 = vmul.f32 %v5964_v49, %v6220_v18 }
 0x239   : > { %1226 = vperm.xlu0 %5504, %v819_v4   ;;  %1223 = vperm.xlu1 %5505, %v818_v25   ;;  %v825_v4 = vmul.f32 %v6016_v12, %v6146_v23  ;;  %v824_v25 = vmul.f32 %v5968_v51, %v6146_v23  ;;  %v844_v0 = vmul.f32 %v5956_v45, %v6220_v18 }
 0x23a   : > { %v845_v51 = vmul.f32 %v5982_v58, %v6220_v18  ;;  %v859_v45 = vmul.f32 %v6022_v16, %v6220_v18  ;;  %v853_v49 = vmul.f32 %v5998_v2, %v6220_v18  ;;  %v864_v58 = vmul.f32 %v5984_v59, %v6220_v18 }
 0x23b   : > { %v865_v33 = vmul.f32 %v6048_v29, %v6220_v18  ;;  %v826_v2 = vmul.f32 %v5972_v53, %v6146_v23 }
 0x23c   : > { %v6208_v40 = vpop.permute.xlu1 %1043  ;;  %v6210_v43 = vpop.permute.xlu0 %1046 }
 0x23d   : > { %1232 = vperm.xlu0 %5504, %v821_v35   ;;  %1229 = vperm.xlu1 %5505, %v820_v11  }
 0x240   : > { %v6216_v10 = vpop.permute.xlu1 %1049  ;;  %v6218_v17 = vpop.permute.xlu0 %1052 }
 0x241   : > { %1238 = vperm.xlu0 %5504, %v823_v5   ;;  %1235 = vperm.xlu1 %5505, %v822_v9   ;;  %v840_v5 = vmul.f32 %v5954_v44, %v6220_v18  ;;  %v850_v44 = vmul.f32 %v5962_v48, %v6220_v18  ;;  %v857_v48 = vmul.f32 %v6016_v12, %v6220_v18 }
 0x242   : > { %v858_v12 = vmul.f32 %v5972_v53, %v6220_v18  ;;  %v827_v53 = vmul.f32 %v6022_v16, %v6146_v23  ;;  %v847_v16 = vmul.f32 %v5986_v60, %v6220_v18  ;;  %v828_v60 = vmul.f32 %v5976_v55, %v6146_v23 }
 0x244   : > { %v6226_v35 = vpop.permute.xlu1 %1055  ;;  %v6228_v11 = vpop.permute.xlu0 %1058 }
 0x245   : > { %1244 = vperm.xlu0 %5504, %v825_v4   ;;  %1241 = vperm.xlu1 %5505, %v824_v25  }
 0x248   : > { %v6234_v22 = vpop.permute.xlu1 %1061  ;;  %v6236_v9 = vpop.permute.xlu0 %1064 }
 0x249   : > { %1292 = vperm.xlu0 %5504, %v841_v34   ;;  %1289 = vperm.xlu1 %5505, %v840_v5  }
 0x24c   : > { %v6242_v4 = vpop.permute.xlu1 %1067  ;;  %v6244_v25 = vpop.permute.xlu0 %1070 }
 0x24d   : > { %1316 = vperm.xlu0 %5504, %v849_v38   ;;  %1313 = vperm.xlu1 %5505, %v848_v13  }
 0x250   : > { %v6250_v34 = vpop.permute.xlu1 %1073  ;;  %v6252_v5 = vpop.permute.xlu0 %1076 }
 0x251   : > { %1319 = vperm.xlu0 %5504, %v850_v44   ;;  %1295 = vperm.xlu1 %5505, %v842_v52  }
 0x254   : > { %v6258_v38 = vpop.permute.xlu1 %1079  ;;  %v6260_v13 = vpop.permute.xlu0 %1082 }
 0x255   : > { %1322 = vperm.xlu0 %5504, %v851_v47   ;;  %1298 = vperm.xlu1 %5505, %v843_v62  }
 0x258   : > { %v6266_v44 = vpop.permute.xlu1 %1085  ;;  %v6268_v52 = vpop.permute.xlu0 %1088 }
 0x259   : > { %1340 = vperm.xlu0 %5504, %v857_v48   ;;  %1337 = vperm.xlu1 %5505, %v856_v54  }
 0x25c   : > { %v6274_v47 = vpop.permute.xlu1 %1091  ;;  %v6276_v62 = vpop.permute.xlu0 %1094 }
 0x25d   : > { %9344 = vst [vmem:[#allocation30_spill] sm:$0xff] %v6276_v62  ;;  %1325 = vperm.xlu0 %5504, %v852_v56   ;;  %1301 = vperm.xlu1 %5505, %v844_v0   ;;  %v846_v62 = vmul.f32 %v5958_v46, %v6220_v18  ;;  %v866_v46 = vmul.f32 %v5988_v61, %v6220_v18 }
 0x260   : > { %v6282_v48 = vpop.permute.xlu1 %1097  ;;  %v6284_v54 = vpop.permute.xlu0 %1100 }
 0x261   : > { %1304 = vperm.xlu0 %5504, %v845_v51   ;;  %1343 = vperm.xlu1 %5505, %v858_v12  }
 0x264   : > { %v6290_v56 = vpop.permute.xlu1 %1103  ;;  %v6292_v0 = vpop.permute.xlu0 %1106 }
 0x265   : > { %9345 = vst [vmem:[#allocation31_spill] sm:$0xff] %v6292_v0  ;;  %1346 = vperm.xlu0 %5504, %v859_v45   ;;  %1328 = vperm.xlu1 %5505, %v853_v49   ;;  %v854_v0 = vmul.f32 %v5966_v50, %v6220_v18  ;;  %v832_v50 = vmul.f32 %v5984_v59, %v6146_v23 }
 0x266   : > { %v861_v59 = vmul.f32 %v6032_v21, %v6220_v18 }
 0x268   : > { %v6298_v51 = vpop.permute.xlu1 %1109  ;;  %v6300_v12 = vpop.permute.xlu0 %1112 }
 0x269   : > { %9346 = vst [vmem:[#allocation32_spill] sm:$0xff] %v6298_v51  ;;  %9347 = vst [vmem:[#allocation33_spill] sm:$0xff] %v6300_v12  ;;  %1361 = vperm.xlu1 %5505, %v864_v58   ;;  %1364 = vperm.xlu0 %5504, %v865_v33   ;;  %v860_v12 = vmul.f32 %v5976_v55, %v6220_v18  ;;  %v862_v51 = vmul.f32 %v5980_v57, %v6220_v18 }
 0x26a   : > { %v829_v55 = vmul.f32 %v6032_v21, %v6146_v23  ;;  %v830_v21 = vmul.f32 %v5980_v57, %v6146_v23  ;;  %v837_v57 = vmul.f32 %v6064_v41, %v6146_v23 }
 0x26c   : > { %v6306_v45 = vpop.permute.xlu1 %1115  ;;  %v6308_v49 = vpop.permute.xlu0 %1118 }
 0x26d   : > { %9348 = vst [vmem:[#allocation34_spill] sm:$0xff] %v6306_v45  ;;  %9349 = vst [vmem:[#allocation35_spill] sm:$0xff] %v6308_v49  ;;  %1247 = vperm.xlu1 %5505, %v826_v2   ;;  %1307 = vperm.xlu0 %5504, %v846_v62   ;;  %v833_v49 = vmul.f32 %v6048_v29, %v6146_v23  ;;  %v855_v45 = vmul.f32 %v6006_v7, %v6220_v18 }
 0x26e   : > { %v867_v29 = vmul.f32 %v6054_v36, %v6220_v18  ;;  %v834_v7 = vmul.f32 %v5988_v61, %v6146_v23  ;;  %v835_v61 = vmul.f32 %v6054_v36, %v6146_v23  ;;  %v836_v36 = vmul.f32 %v5992_v63, %v6146_v23 }
 0x270   : > { %v6314_v58 = vpop.permute.xlu1 %1121  ;;  %v6316_v33 = vpop.permute.xlu0 %1124 }
 0x271   : > { %1331 = vperm.xlu1 %5505, %v854_v0   ;;  %1349 = vperm.xlu0 %5504, %v860_v12  }
 0x274   : > { %v6322_v2 = vpop.permute.xlu1 %1127  ;;  %v6324_v62 = vpop.permute.xlu0 %1130 }
 0x275   : > { %1367 = vperm.xlu1 %5505, %v866_v46   ;;  %1250 = vperm.xlu0 %5504, %v827_v53  }
 0x278   : > { %v6330_v0 = vpop.permute.xlu1 %1133  ;;  %v6332_v12 = vpop.permute.xlu0 %1136 }
 0x279   : > { %1265 = vperm.xlu1 %5505, %v832_v50   ;;  %1268 = vperm.xlu0 %5504, %v833_v49  }
 0x27c   : > { %v6338_v46 = vpop.permute.xlu1 %1139  ;;  %v6340_v53 = vpop.permute.xlu0 %1142 }
 0x27d   : > { %1310 = vperm.xlu1 %5505, %v847_v16   ;;  %1334 = vperm.xlu0 %5504, %v855_v45  }
 0x280   : > { %v6346_v50 = vpop.permute.xlu1 %1145  ;;  %v6348_v49 = vpop.permute.xlu0 %1148 }
 0x281   : > { %9350 = vst [vmem:[#allocation36_spill] sm:$0xff] %v6348_v49  ;;  %1352 = vperm.xlu1 %5505, %v861_v59   ;;  %1370 = vperm.xlu0 %5504, %v867_v29   ;;  %v868_v49 = vmul.f32 %v5992_v63, %v6220_v18  ;;  %v871_v63 = vmul.f32 %v6070_v3, %v6220_v18 }
 0x284   : > { %v6354_v16 = vpop.permute.xlu1 %1151  ;;  %v6356_v45 = vpop.permute.xlu0 %1154 }
 0x285   : > { %9351 = vst [vmem:[#allocation37_spill] sm:$0xff] %v6356_v45  ;;  %1253 = vperm.xlu1 %5505, %v828_v60   ;;  %1271 = vperm.xlu0 %5504, %v834_v7   ;;  %v863_v45 = vmul.f32 %v6038_v24, %v6220_v18 }
 0x288   : > { %v6362_v59 = vpop.permute.xlu1 %1157  ;;  %v6364_v29 = vpop.permute.xlu0 %1160 }
 0x289   : > { %9352 = vst [vmem:[#allocation38_spill] sm:$0xff] %v6362_v59  ;;  %9353 = vst [vmem:[#allocation39_spill] sm:$0xff] %v6364_v29  ;;  %1355 = vperm.xlu1 %5505, %v862_v51   ;;  %1373 = vperm.xlu0 %5504, %v868_v49   ;;  %v869_v29 = vmul.f32 %v6064_v41, %v6220_v18  ;;  %v1387_v59 = vrot.slane %v6154_v28, %v5923_v31 }
 0x28a   : > { %v838_v41 = vmul.f32 %v5996_v1, %v6146_v23  ;;  %v1427_v28 = vrot.slane %v6192_v19, %v5923_v31 }
 0x28c   : > { %v6370_v60 = vpop.permute.xlu1 %1163  ;;  %v6372_v7 = vpop.permute.xlu0 %1166 }
 0x28d   : > { %9354 = vst [vmem:[#allocation40_spill] sm:$0xff] %v6370_v60  ;;  %9355 = vst [vmem:[#allocation41_spill] sm:$0xff] %v6372_v7  ;;  %1256 = vperm.xlu1 %5505, %v829_v55   ;;  %1274 = vperm.xlu0 %5504, %v835_v61   ;;  %v870_v7 = vmul.f32 %v5996_v1, %v6220_v18  ;;  %v831_v60 = vmul.f32 %v6038_v24, %v6146_v23 }
 0x28e   : > { %v1391_v24 = vrot.slane %v6152_v27, %v5923_v31  ;;  %v839_v18 = vmul.f32 %v6070_v3, %v6146_v23  ;;  %v1399_v3 = vrot.slane %v6162_v39, %v5923_v31  ;;  %v1435_v39 = vrot.slane %v6200_v26, %v5923_v31 }
 0x290   : > { %v6378_v51 = vpop.permute.xlu1 %1169  ;;  %v6380_v49 = vpop.permute.xlu0 %1172  ;;  %v1896_v1 = vsel %vm359_vm4, %v1391_v24, %v1387_v59 }
 0x291   : > { %1358 = vperm.xlu1 %5505, %v863_v45   ;;  %1376 = vperm.xlu0 %5504, %v869_v29  }
 0x294   : > { %v6386_v55 = vpop.permute.xlu1 %1175  ;;  %v6388_v61 = vpop.permute.xlu0 %1178 }
 0x295   : > { %1259 = vperm.xlu1 %5505, %v830_v21   ;;  %1277 = vperm.xlu0 %5504, %v836_v36  }
 0x298   : > { %v6394_v45 = vpop.permute.xlu1 %1181  ;;  %v6396_v29 = vpop.permute.xlu0 %1184 }
 0x299   : > { %1379 = vperm.xlu1 %5505, %v870_v7   ;;  %1262 = vperm.xlu0 %5504, %v831_v60   ;;  %v1395_v60 = vrot.slane %v6160_v37, %v5923_v31  ;;  %v1419_v7 = vrot.slane %v6184_v14, %v5923_v31  ;;  %v1403_v37 = vrot.slane %v6168_v32, %v5923_v31 }
 0x29a   : > { %v1407_v32 = vrot.slane %v6170_v42, %v5923_v31 }
 0x29b   : > { %v1898_v23 = vsel %vm1897_vm7, %v1395_v60, %v1896_v1  ;;  %v1443_v1 = vrot.slane %v6208_v40, %v5923_v31  ;;  %v1463_v40 = vrot.slane %v6228_v11, %v5923_v31  ;;  %v1555_v11 = vrot.slane %v6322_v2, %v5923_v31 }
 0x29c   : > { %v6402_v21 = vpop.permute.xlu1 %1187  ;;  %v6404_v36 = vpop.permute.xlu0 %1190  ;;  %v1899_v24 = vsel %vm408_vm3, %v1399_v3, %v1898_v23  ;;  %v1483_v2 = vrot.slane %v6250_v34, %v5923_v31 }
 0x29d   : > { %9356 = vst [vmem:[#allocation42_spill] sm:$0xff] %v6404_v36  ;;  %1280 = vperm.xlu1 %5505, %v837_v57   ;;  %1382 = vperm.xlu0 %5504, %v871_v63   ;;  %v1423_v57 = vrot.slane %v6186_v15, %v5923_v31  ;;  %v1431_v15 = vrot.slane %v6194_v20, %v5923_v31 }
 0x29e   : > { %v1901_v60 = vsel %vm1900_vm8, %v1403_v37, %v1899_v24  ;;  %v1439_v20 = vrot.slane %v6202_v30, %v5923_v31  ;;  %v1459_v30 = vrot.slane %v6226_v35, %v5923_v31 }
 0x29f   : > { %v1908_v14 = vsel %vm359_vm4, %v1423_v57, %v1419_v7  ;;  %v1455_v7 = vrot.slane %v6218_v17, %v5923_v31  ;;  %v1415_v17 = vrot.slane %v6178_v8, %v5923_v31  ;;  %v1467_v8 = vrot.slane %v6234_v22, %v5923_v31 }
 0x2a0   : > { %v6420_v27 = vpop.permute.xlu1 %1193  ;;  %v6422_v63 = vpop.permute.xlu0 %1196  ;;  %v1909_v59 = vsel %vm1897_vm7, %v1427_v28, %v1908_v14  ;;  %v1411_v28 = vrot.slane %v6176_v6, %v5923_v31  ;;  %v1447_v6 = vrot.slane %v6210_v43, %v5923_v31  ;;  %v1547_v43 = vrot.slane %v6314_v58, %v5923_v31 }
 0x2a1   : > { %1283 = vperm.xlu1 %5505, %v838_v41   ;;  %1286 = vperm.xlu0 %5504, %v839_v18   ;;  %v1910_v41 = vsel %vm408_vm3, %v1431_v15, %v1909_v59  ;;  %v1451_v18 = vrot.slane %v6216_v10, %v5923_v31  ;;  %v1903_v10 = vsel %vm1902_vm9, %v1407_v32, %v1901_v60 }
 0x2a2   : > { %v1911_v42 = vsel %vm1900_vm8, %v1435_v39, %v1910_v41  ;;  %v1905_v59 = vsel %vm1904_vm10, %v1411_v28, %v1903_v10  ;;  %v1551_v39 = vrot.slane %v6316_v33, %v5923_v31  ;;  %v1471_v60 = vrot.slane %v6236_v9, %v5923_v31 }
 0x2a3   : > { %v1912_v3 = vsel %vm1902_vm9, %v1439_v20, %v1911_v42  ;;  %v1915_v23 = vsel %vm359_vm4, %v1455_v7, %v1451_v18  ;;  %v1907_v58 = vsel %vm1906_vm11, %v1415_v17, %v1905_v59  ;;  %v1475_v33 = vrot.slane %v6242_v4, %v5923_v31 }
 0x2a4   : > { %v6435_v36 = vpop.permute.xlu1 %1199  ;;  %v6437_v19 = vpop.permute.xlu0 %1202  ;;  %v1916_v14 = vsel %vm1897_vm7, %v1459_v30, %v1915_v23  ;;  %v1913_v15 = vsel %vm1904_vm10, %v1443_v1, %v1912_v3  ;;  %v1487_v18 = vrot.slane %v6252_v5, %v5923_v31  ;;  %v1491_v9 = vrot.slane %v6258_v38, %v5923_v31 }
 0x2a5   : > { %v1917_v24 = vsel %vm408_vm3, %v1463_v40, %v1916_v14  ;;  %v1914_v41 = vsel %vm1906_vm11, %v1447_v6, %v1913_v15  ;;  %v1936_v7 = vsel %vm359_vm4, %v1551_v39, %v1547_v43  ;;  %v1559_v28 = vrot.slane %v6324_v62, %v5923_v31 }
 0x2a6   : > { %v1918_v20 = vsel %vm1900_vm8, %v1467_v8, %v1917_v24  ;;  %v1937_v42 = vsel %vm1897_vm7, %v1555_v11, %v1936_v7  ;;  %v1563_v1 = vrot.slane %v6330_v0, %v5923_v31  ;;  %v6513_v4 = vsel %vm2029_vm12, %v1907_v58, 0.0 }
 0x2a7   : > { %v1919_v34 = vsel %vm1902_vm9, %v1471_v60, %v1918_v20  ;;  %v1643_v5 = vrot.slane %v6420_v27, %v5923_v31  ;;  %v1647_v38 = vrot.slane %v6422_v63, %v5923_v31  ;;  %v2033_v62 = vsel %vm2029_vm12, %v1914_v41, 0.0 }
 0x2a8   : > { %v6453_v26 = vpop.permute.xlu1 %1205  ;;  %v6455_v57 = vpop.permute.xlu0 %1208  ;;  %v1479_v0 = vrot.slane %v6244_v25, %v5923_v31  ;;  %v1922_v17 = vsel %vm359_vm4, %v1487_v18, %v1483_v2  ;;  %v1651_v3 = vrot.slane %v6435_v36, %v5923_v31  ;;  %v1920_v6 = vsel %vm1904_vm10, %v1475_v33, %v1919_v34 }
 0x2a9   : > { %v1923_v27 = vsel %vm1897_vm7, %v1491_v9, %v1922_v17  ;;  %v1495_v63 = vrot.slane %v6260_v13, %v5923_v31  ;;  %v1938_v23 = vsel %vm408_vm3, %v1559_v28, %v1937_v42  ;;  %v1567_v40 = vrot.slane %v6332_v12, %v5923_v31  ;;  %v9357_v28 = vld [vmem:[#allocation31_spill] sm:$0xff] }
 0x2aa   : > { %v1515_v25 = vrot.slane %v6282_v48, %v5923_v31  ;;  %v1519_v14 = vrot.slane %v6284_v54, %v5923_v31  ;;  %v1939_v36 = vsel %vm1900_vm8, %v1563_v1, %v1938_v23  ;;  %v1571_v8 = vrot.slane %v6338_v46, %v5923_v31  ;;  %v9358_v1 = vld [vmem:[#allocation32_spill] sm:$0xff] }
 0x2ab   : > { %v1611_v15 = vrot.slane %v6378_v51, %v5923_v31  ;;  %v1615_v13 = vrot.slane %v6380_v49, %v5923_v31  ;;  %v1957_v59 = vsel %vm359_vm4, %v1647_v38, %v1643_v5  ;;  %v1655_v12 = vrot.slane %v6437_v19, %v5923_v31  ;;  %v9359_v5 = vld [vmem:[#allocation36_spill] sm:$0xff] }
 0x2ac   : > { %v6473_v37 = vpop.permute.xlu1 %1211  ;;  %v6475_v35 = vpop.permute.xlu0 %1214  ;;  %v1619_v54 = vrot.slane %v6386_v55, %v5923_v31  ;;  %v1958_v46 = vsel %vm1897_vm7, %v1651_v3, %v1957_v59  ;;  %v1659_v51 = vrot.slane %v6453_v26, %v5923_v31  ;;  %v6561_v39 = vsel %vm1906_vm11, %v1479_v0, %v1920_v6 }
 0x2ad   : > { %v1924_v49 = vsel %vm408_vm3, %v1495_v63, %v1923_v27  ;;  %v1499_v19 = vrot.slane %v6266_v44, %v5923_v31  ;;  %v1523_v11 = vrot.slane %v6290_v56, %v5923_v31  ;;  %v1940_v24 = vsel %vm1902_vm9, %v1567_v40, %v1939_v36 }
 0x2ae   : > { %v1503_v55 = vrot.slane %v6268_v52, %v5923_v31  ;;  %v1929_v60 = vsel %vm359_vm4, %v1519_v14, %v1515_v25  ;;  %v1575_v26 = vrot.slane %v6340_v53, %v5923_v31  ;;  %v1941_v41 = vsel %vm1904_vm10, %v1571_v8, %v1940_v24  ;;  %v9361_v8 = vld [vmem:[#allocation33_spill] sm:$0xff] }
 0x2af   : > { %v1950_v58 = vsel %vm359_vm4, %v1615_v13, %v1611_v15  ;;  %v1623_v44 = vrot.slane %v6388_v61, %v5923_v31  ;;  %v1959_v20 = vsel %vm408_vm3, %v1655_v12, %v1958_v46  ;;  %v1663_v56 = vrot.slane %v6455_v57, %v5923_v31  ;;  %v9362_v13 = vld [vmem:[#allocation34_spill] sm:$0xff] }
 0x2b0   : > { %v6491_v22 = vpop.permute.xlu1 %1217  ;;  %v6493_v32 = vpop.permute.xlu0 %1220  ;;  %v1951_v2 = vsel %vm1897_vm7, %v1619_v54, %v1950_v58  ;;  %v1627_v53 = vrot.slane %v6394_v45, %v5923_v31  ;;  %v1960_v18 = vsel %vm1900_vm8, %v1659_v51, %v1959_v20  ;;  %v1667_v9 = vrot.slane %v6473_v37, %v5923_v31  ;;  %v9363_v46 = vld [vmem:[#allocation42_spill] sm:$0xff] }
 0x2b1   : > { %v1925_v61 = vsel %vm1900_vm8, %v1499_v19, %v1924_v49  ;;  %v1507_v7 = vrot.slane %v6274_v47, %v5923_v31  ;;  %v1930_v57 = vsel %vm1897_vm7, %v1523_v11, %v1929_v60  ;;  %v1527_v42 = vrot.slane %v9357_v28, %v5923_v31  ;;  %v9364_v11 = vld [vmem:[#allocation37_spill] sm:$0xff]  ;;  %v9365_v58 = vld [vmem:[#allocation38_spill] sm:$0xff] }
 0x2b2   : > { %v1531_v34 = vrot.slane %v9358_v1, %v5923_v31  ;;  %v1579_v45 = vrot.slane %v6346_v50, %v5923_v31  ;;  %v1583_v38 = vrot.slane %v9359_v5, %v5923_v31  ;;  %v1942_v37 = vsel %vm1906_vm11, %v1575_v26, %v1941_v41 }
 0x2b3   : > { %v1952_v0 = vsel %vm408_vm3, %v1623_v44, %v1951_v2  ;;  %v1631_v47 = vrot.slane %v6396_v29, %v5923_v31  ;;  %v1961_v17 = vsel %vm1902_vm9, %v1663_v56, %v1960_v18  ;;  %v1671_v3 = vrot.slane %v6475_v35, %v5923_v31  ;;  %v9360_v29 = vld [vmem:[#allocation30_spill] sm:$0xff] }
 0x2b4   : > { %v6520_v30 = vpop.permute.xlu1 %1223  ;;  %v6522_v10 = vpop.permute.xlu0 %1226  ;;  %v1926_v50 = vsel %vm1902_vm9, %v1503_v55, %v1925_v61  ;;  %v1953_v63 = vsel %vm1900_vm8, %v1627_v53, %v1952_v0  ;;  %v1635_v23 = vrot.slane %v6402_v21, %v5923_v31  ;;  %v1962_v40 = vsel %vm1904_vm10, %v1667_v9, %v1961_v17 }
 0x2b5   : > { %v1511_v25 = vrot.slane %v9360_v29, %v5923_v31  ;;  %v1931_v14 = vsel %vm408_vm3, %v1527_v42, %v1930_v57  ;;  %v1587_v35 = vrot.slane %v6354_v16, %v5923_v31  ;;  %v1535_v15 = vrot.slane %v9361_v8, %v5923_v31  ;;  %v9367_v57 = vld [vmem:[#allocation39_spill] sm:$0xff] }
 0x2b6   : > { %v1932_v36 = vsel %vm1900_vm8, %v1531_v34, %v1931_v14  ;;  %v1539_v21 = vrot.slane %v9362_v13, %v5923_v31  ;;  %v2045_v59 = vsel %vm2029_vm12, %v1942_v37, 0.0  ;;  %v1943_v12 = vsel %vm359_vm4, %v1583_v38, %v1579_v45  ;;  %v9368_v34 = vld [vmem:[#allocation40_spill] sm:$0xff] }
 0x2b7   : > { %v1954_v54 = vsel %vm1902_vm9, %v1631_v47, %v1953_v63  ;;  %v1639_v51 = vrot.slane %v9363_v46, %v5923_v31  ;;  %v1963_v19 = vsel %vm1906_vm11, %v1671_v3, %v1962_v40  ;;  %v1591_v24 = vrot.slane %v9364_v11, %v5923_v31 }
 0x2b8   : > { %v6551_v48 = vpop.permute.xlu1 %1229  ;;  %v6553_v43 = vpop.permute.xlu0 %1232  ;;  %v1675_v55 = vrot.slane %v6491_v22, %v5923_v31  ;;  %v1679_v60 = vrot.slane %v6493_v32, %v5923_v31  ;;  %v1955_v26 = vsel %vm1904_vm10, %v1635_v23, %v1954_v54  ;;  %v1944_v41 = vsel %vm1897_vm7, %v1587_v35, %v1943_v12  ;;  %v9366_v32 = vld [vmem:[#allocation35_spill] sm:$0xff] }
 0x2b9   : > { %v1595_v44 = vrot.slane %v9365_v58, %v5923_v31  ;;  %v1683_v20 = vrot.slane %v6520_v30, %v5923_v31  ;;  %v1933_v56 = vsel %vm1902_vm9, %v1535_v15, %v1932_v36  ;;  %v2054_v2 = vsel %vm2029_vm12, %v1963_v19, 0.0 }
 0x2ba   : > { %v2036_v22 = vsel %vm2029_vm12, %v6561_v39, 0.0  ;;  %v1956_v9 = vsel %vm1906_vm11, %v1639_v51, %v1955_v26  ;;  %v1934_v30 = vsel %vm1904_vm10, %v1539_v21, %v1933_v56  ;;  %v1599_v28 = vrot.slane %v9367_v57, %v5923_v31 }
 0x2bb   : > { %v1964_v39 = vsel %vm359_vm4, %v1679_v60, %v1675_v55  ;;  %v1687_v42 = vrot.slane %v6522_v10, %v5923_v31  ;;  %v1603_v45 = vrot.slane %v9368_v34, %v5923_v31  ;;  %v1691_v38 = vrot.slane %v6551_v48, %v5923_v31 }
 0x2bc   : > { %v6581_v33 = vpop.permute.xlu1 %1235  ;;  %v6583_v52 = vpop.permute.xlu0 %1238  ;;  %v1965_v5 = vsel %vm1897_vm7, %v1683_v20, %v1964_v39  ;;  %v2051_v37 = vsel %vm2029_vm12, %v1956_v9, 0.0  ;;  %v1695_v48 = vrot.slane %v6553_v43, %v5923_v31 }
 0x2bd   : > { %v1966_v23 = vsel %vm408_vm3, %v1687_v42, %v1965_v5  ;;  %v1699_v29 = vrot.slane %v6581_v33, %v5923_v31  ;;  %v1703_v8 = vrot.slane %v6583_v52, %v5923_v31 }
 0x2be   : > { %v1967_v40 = vsel %vm1900_vm8, %v1691_v38, %v1966_v23 }
 0x2bf   : > { %v1968_v36 = vsel %vm1902_vm9, %v1695_v48, %v1967_v40 }
 0x2c0   : > { %v6610_v6 = vpop.permute.xlu1 %1241  ;;  %2034 = vadd.xlane.f32.xlu0 %v2033_v62  ;;  %v6612_v27 = vpop.permute.xlu0 %1244  ;;  %v1927_v62 = vsel %vm1904_vm10, %v1507_v7, %v1926_v50  ;;  %v1945_v7 = vsel %vm408_vm3, %v1591_v24, %v1944_v41  ;;  %v9369_v50 = vld [vmem:[#allocation41_spill] sm:$0xff]  ;;  %v1969_v15 = vsel %vm1904_vm10, %v1699_v29, %v1968_v36 }
 0x2c1   : > { %v1928_v61 = vsel %vm1906_vm11, %v1511_v25, %v1927_v62  ;;  %v1946_v1 = vsel %vm1900_vm8, %v1595_v44, %v1945_v7  ;;  %v1607_v63 = vrot.slane %v9369_v50, %v5923_v31  ;;  %v1707_v34 = vrot.slane %v6610_v6, %v5923_v31 }
 0x2c2   : > { %v2039_v10 = vsel %vm2029_vm12, %v1928_v61, 0.0  ;;  %v1947_v3 = vsel %vm1902_vm9, %v1599_v28, %v1946_v1 }
 0x2c3   : > { %v1948_v25 = vsel %vm1904_vm10, %v1603_v45, %v1947_v3  ;;  %v1711_v45 = vrot.slane %v6612_v27, %v5923_v31 }
 0x2c4   : > { %v6635_v16 = vpop.permute.xlu1 %1289  ;;  %2046 = vadd.xlane.f32.xlu0 %v2045_v59  ;;  %v6637_v49 = vpop.permute.xlu0 %1292  ;;  %v1949_v43 = vsel %vm1906_vm11, %v1607_v63, %v1948_v25  ;;  %v1970_v59 = vsel %vm1906_vm11, %v1703_v8, %v1969_v15 }
 0x2c5   : > { %2031 = vadd.xlane.f32.xlu1 %v6513_v4  ;;  %v1543_v4 = vrot.slane %v9366_v32, %v5923_v31  ;;  %v2048_v21 = vsel %vm2029_vm12, %v1949_v43, 0.0  ;;  %v2057_v52 = vsel %vm2029_vm12, %v1970_v59, 0.0  ;;  %v1971_v3 = vsel %vm359_vm4, %v1711_v45, %v1707_v34 }
 0x2c6   : > { %v1771_v27 = vrot.slane %v6635_v16, %v5923_v31  ;;  %v1775_v25 = vrot.slane %v6637_v49, %v5923_v31 }
 0x2c7   : > { %v1935_v17 = vsel %vm1906_vm11, %v1543_v4, %v1934_v30 }
 0x2c8   : > { %v6659_v53 = vpop.permute.xlu1 %1313  ;;  %2055 = vadd.xlane.f32.xlu0 %v2054_v2  ;;  %v6661_v18 = vpop.permute.xlu0 %1316  ;;  %v2042_v62 = vsel %vm2029_vm12, %v1935_v17, 0.0 }
 0x2c9   : > { %2037 = vadd.xlane.f32.xlu1 %v2036_v22  ;;  %v1807_v43 = vrot.slane %v6661_v18, %v5923_v31 }
 0x2cc   : > { %v6679_v0 = vpop.permute.xlu1 %1295  ;;  %2052 = vadd.xlane.f32.xlu0 %v2051_v37  ;;  %v6681_v47 = vpop.permute.xlu0 %1319 }
 0x2cd   : > { %2040 = vadd.xlane.f32.xlu1 %v2039_v10  ;;  %v1779_v59 = vrot.slane %v6679_v0, %v5923_v31 }
 0x2d0   : > { %v6695_v14 = vpop.permute.xlu1 %1298  ;;  %v6697_v35 = vpop.permute.xlu0 %1322 }
 0x2d1   : > { %2043 = vadd.xlane.f32.xlu1 %v2042_v62  ;;  %v1803_v62 = vrot.slane %v6659_v53, %v5923_v31 }
 0x2d3   : > { %v1992_v0 = vsel %vm359_vm4, %v1807_v43, %v1803_v62 }
 0x2d4   : > { %v6705_v13 = vpop.permute.xlu1 %1337  ;;  %v6707_v33 = vpop.permute.xlu0 %1340 }
 0x2d5   : > { %2049 = vadd.xlane.f32.xlu1 %v2048_v21 }
 0x2d8   : > { %v6711_v12 = vpop.permute.xlu1 %1301  ;;  %v6713_v54 = vpop.permute.xlu0 %1325 }
 0x2d9   : > { %2058 = vadd.xlane.f32.xlu1 %v2057_v52  ;;  %v1783_v52 = vrot.slane %v6695_v14, %v5923_v31  ;;  %v1787_v34 = vrot.slane %v6711_v12, %v5923_v31 }
 0x2dc   : > { %v6716_v46 = vpop.permute.xlu1 %1343  ;;  %v6718_v51 = vpop.permute.xlu0 %1304 }
 0x2e0   : > { %v6720_v19 = vpop.permute.xlu1 %1328  ;;  %v6722_v11 = vpop.permute.xlu0 %1346 }
 0x2e1   : > { %v1847_v43 = vrot.slane %v6722_v11, %v5923_v31 }
 0x2e4   : > { %v6724_v24 = vpop.permute.xlu1 %1361  ;;  %v6726_v55 = vpop.permute.xlu0 %1364 }
 0x2e5   : > { %v1871_v11 = vrot.slane %v6726_v55, %v5923_v31 }
 0x2e8   : > { %v1248_v60 = vpop.permute.xlu1 %1247  ;;  %v6728_v26 = vpop.permute.xlu0 %1307 }
 0x2e9   : > { %v1715_v5 = vrot.slane %v1248_v60, %v5923_v31 }
 0x2eb   : > { %v1972_v63 = vsel %vm1897_vm7, %v1715_v5, %v1971_v3 }
 0x2ec   : > { %v6730_v41 = vpop.permute.xlu1 %1331  ;;  %v6732_v58 = vpop.permute.xlu0 %1349 }
 0x2f0   : > { %v6734_v44 = vpop.permute.xlu1 %1367  ;;  %v1251_v20 = vpop.permute.xlu0 %1250 }
 0x2f1   : > { %v1719_v38 = vrot.slane %v1251_v20, %v5923_v31 }
 0x2f3   : > { %v1973_v6 = vsel %vm408_vm3, %v1719_v38, %v1972_v63  ;;  %v1815_v38 = vrot.slane %v6697_v35, %v5923_v31  ;;  %v1839_v35 = vrot.slane %v6707_v33, %v5923_v31  ;;  %v1823_v33 = vrot.slane %v6720_v19, %v5923_v31 }
 0x2f4   : > { %v1266_v56 = vpop.permute.xlu1 %1265  ;;  %v1269_v2 = vpop.permute.xlu0 %1268 }
 0x2f5   : > { %v1739_v16 = vrot.slane %v1266_v56, %v5923_v31  ;;  %v1743_v15 = vrot.slane %v1269_v2, %v5923_v31 }
 0x2f8   : > { %v6736_v22 = vpop.permute.xlu1 %1310  ;;  %v6738_v32 = vpop.permute.xlu0 %1334 }
 0x2fc   : > { %v6740_v4 = vpop.permute.xlu1 %1352  ;;  %v6742_v9 = vpop.permute.xlu0 %1370 }
 0x300   : > { %v1254_v61 = vpop.permute.xlu1 %1253  ;;  %v1272_v30 = vpop.permute.xlu0 %1271 }
 0x301   : > { %v1723_v37 = vrot.slane %v1254_v61, %v5923_v31  ;;  %v1747_v49 = vrot.slane %v1272_v30, %v5923_v31  ;;  %v1985_v61 = vsel %vm359_vm4, %v1775_v25, %v1771_v27  ;;  %v1978_v30 = vsel %vm359_vm4, %v1743_v15, %v1739_v16 }
 0x302   : > { %v1986_v14 = vsel %vm1897_vm7, %v1779_v59, %v1985_v61  ;;  %v1831_v16 = vrot.slane %v6738_v32, %v5923_v31  ;;  %v1855_v32 = vrot.slane %v6740_v4, %v5923_v31 }
 0x303   : > { %v1974_v48 = vsel %vm1900_vm8, %v1723_v37, %v1973_v6  ;;  %v1979_v45 = vsel %vm1897_vm7, %v1747_v49, %v1978_v30  ;;  %v1987_v5 = vsel %vm408_vm3, %v1783_v52, %v1986_v14  ;;  %v1791_v37 = vrot.slane %v6718_v51, %v5923_v31 }
 0x304   : > { %v6744_v7 = vpop.permute.xlu1 %1355  ;;  %v6746_v57 = vpop.permute.xlu0 %1373  ;;  %v1799_v51 = vrot.slane %v6736_v22, %v5923_v31  ;;  %v1988_v27 = vsel %vm1900_vm8, %v1787_v34, %v1987_v5  ;;  %v1867_v49 = vrot.slane %v6724_v24, %v5923_v31  ;;  %v1879_v24 = vrot.slane %v6742_v9, %v5923_v31 }
 0x305   : > { %v1989_v25 = vsel %vm1902_vm9, %v1791_v37, %v1988_v27  ;;  %v1859_v52 = vrot.slane %v6744_v7, %v5923_v31  ;;  %v1883_v7 = vrot.slane %v6746_v57, %v5923_v31 }
 0x308   : > { %v1257_v28 = vpop.permute.xlu1 %1256  ;;  %v1275_v39 = vpop.permute.xlu0 %1274 }
 0x309   : > { %v1727_v50 = vrot.slane %v1257_v28, %v5923_v31  ;;  %v1751_v60 = vrot.slane %v1275_v39, %v5923_v31  ;;  %v1811_v39 = vrot.slane %v6681_v47, %v5923_v31  ;;  %v1795_v47 = vrot.slane %v6728_v26, %v5923_v31 }
 0x30a   : > { %v1819_v26 = vrot.slane %v6713_v54, %v5923_v31 }
 0x30b   : > { %v1975_v36 = vsel %vm1902_vm9, %v1727_v50, %v1974_v48  ;;  %v1843_v48 = vrot.slane %v6716_v46, %v5923_v31  ;;  %v1990_v46 = vsel %vm1904_vm10, %v1795_v47, %v1989_v25 }
 0x30c   : > { %v6748_v42 = vpop.permute.xlu1 %1358  ;;  %v6750_v1 = vpop.permute.xlu0 %1376  ;;  %v1991_v19 = vsel %vm1906_vm11, %v1799_v51, %v1990_v46 }
 0x30d   : > { %v1863_v55 = vrot.slane %v6748_v42, %v5923_v31  ;;  %v1887_v61 = vrot.slane %v6750_v1, %v5923_v31 }
 0x310   : > { %v1260_v10 = vpop.permute.xlu1 %1259  ;;  %v1278_v17 = vpop.permute.xlu0 %1277 }
 0x311   : > { %v1731_v23 = vrot.slane %v1260_v10, %v5923_v31  ;;  %v1755_v2 = vrot.slane %v1278_v17, %v5923_v31  ;;  %v1980_v10 = vsel %vm408_vm3, %v1751_v60, %v1979_v45  ;;  %v2066_v60 = vsel %vm2029_vm12, %v1991_v19, 0.0 }
 0x313   : > { %v1976_v21 = vsel %vm1904_vm10, %v1731_v23, %v1975_v36  ;;  %v1981_v50 = vsel %vm1900_vm8, %v1755_v2, %v1980_v10  ;;  %v1835_v23 = vrot.slane %v6705_v13, %v5923_v31  ;;  %v1993_v13 = vsel %vm1897_vm7, %v1811_v39, %v1992_v0 }
 0x314   : > { %v6767_v40 = vpop.permute.xlu1 %1379  ;;  %v1263_v29 = vpop.permute.xlu0 %1262  ;;  %v1994_v62 = vsel %vm408_vm3, %v1815_v38, %v1993_v13  ;;  %v1827_v36 = vrot.slane %v6730_v41, %v5923_v31  ;;  %v1851_v41 = vrot.slane %v6732_v58, %v5923_v31 }
 0x315   : > { %v1735_v8 = vrot.slane %v1263_v29, %v5923_v31  ;;  %v1995_v15 = vsel %vm1900_vm8, %v1819_v26, %v1994_v62  ;;  %v1891_v42 = vrot.slane %v6767_v40, %v5923_v31 }
 0x316   : > { %v1996_v59 = vsel %vm1902_vm9, %v1823_v33, %v1995_v15 }
 0x317   : > { %v1977_v53 = vsel %vm1906_vm11, %v1735_v8, %v1976_v21  ;;  %v1999_v8 = vsel %vm359_vm4, %v1839_v35, %v1835_v23  ;;  %v1997_v58 = vsel %vm1904_vm10, %v1827_v36, %v1996_v59 }
 0x318   : > { %v1281_v20 = vpop.permute.xlu1 %1280  ;;  %v6787_v18 = vpop.permute.xlu0 %1382  ;;  %v2060_v56 = vsel %vm2029_vm12, %v1977_v53, 0.0  ;;  %v2000_v21 = vsel %vm1897_vm7, %v1843_v48, %v1999_v8  ;;  %v1875_v53 = vrot.slane %v6734_v44, %v5923_v31  ;;  %v1998_v4 = vsel %vm1906_vm11, %v1831_v16, %v1997_v58 }
 0x319   : > { %2061 = vadd.xlane.f32.xlu1 %v2060_v56  ;;  %v1759_v28 = vrot.slane %v1281_v20, %v5923_v31  ;;  %v2001_v20 = vsel %vm408_vm3, %v1847_v43, %v2000_v21  ;;  %v2006_v56 = vsel %vm359_vm4, %v1871_v11, %v1867_v49  ;;  %v2069_v0 = vsel %vm2029_vm12, %v1998_v4, 0.0 }
 0x31a   : > { %v2002_v44 = vsel %vm1900_vm8, %v1851_v41, %v2001_v20  ;;  %v2007_v9 = vsel %vm1897_vm7, %v1875_v53, %v2006_v56  ;;  %v1895_v57 = vrot.slane %v6787_v18, %v5923_v31 }
 0x31b   : > { %v1982_v6 = vsel %vm1902_vm9, %v1759_v28, %v1981_v50  ;;  %v2003_v2 = vsel %vm1902_vm9, %v1855_v32, %v2002_v44  ;;  %v2008_v28 = vsel %vm408_vm3, %v1879_v24, %v2007_v9 }
 0x31c   : > { %v1284_v17 = vpop.permute.xlu1 %1283  ;;  %v1287_v3 = vpop.permute.xlu0 %1286  ;;  %v2004_v30 = vsel %vm1904_vm10, %v1859_v52, %v2003_v2  ;;  %v2009_v39 = vsel %vm1900_vm8, %v1883_v7, %v2008_v28  ;;  %v5542_v7 = vld [vmem:[%s5853_s11 + $0x10] sm:$0xff]  ;;  %v5543_v2 = vld [vmem:[%s5853_s11 + $0x18] sm:$0xff] }
 0x31d   : > { %v1763_v12 = vrot.slane %v1284_v17, %v5923_v31  ;;  %v1767_v63 = vrot.slane %v1287_v3, %v5923_v31  ;;  %v2005_v14 = vsel %vm1906_vm11, %v1863_v55, %v2004_v30  ;;  %v2010_v1 = vsel %vm1902_vm9, %v1887_v61, %v2009_v39  ;;  %v5545_v30 = vld [vmem:[%s5853_s11 + $0x8] sm:$0xff] }
 0x31e   : > { %v2072_v34 = vsel %vm2029_vm12, %v2005_v14, 0.0  ;;  %v2011_v40 = vsel %vm1904_vm10, %v1891_v42, %v2010_v1  ;;  %v5544_v42 = vld [vmem:[%s5853_s11] sm:$0xff]  ;;  %v5547_v1 = vld [vmem:[%s5853_s11 + $0x28] sm:$0xff] }
 0x31f   : > { %v1983_v29 = vsel %vm1904_vm10, %v1763_v12, %v1982_v6  ;;  %v2012_v45 = vsel %vm1906_vm11, %v1895_v57, %v2011_v40  ;;  %v5546_v14 = vld [vmem:[%s5853_s11 + $0x20] sm:$0xff] }
 0x320   : > { %v1984_v22 = vsel %vm1906_vm11, %v1767_v63, %v1983_v29  ;;  %v2075_v5 = vsel %vm2029_vm12, %v2012_v45, 0.0 }
 0x321   : > { %v2063_v54 = vsel %vm2029_vm12, %v1984_v22, 0.0 }
 0x322   : > { %2064 = vadd.xlane.f32.xlu0 %v2063_v54 }
 0x326   : > { %2067 = vadd.xlane.f32.xlu0 %v2066_v60 }
 0x32a   : > { %2070 = vadd.xlane.f32.xlu0 %v2069_v0 }
 0x32e   : > { %2073 = vadd.xlane.f32.xlu0 %v2072_v34 }
 0x332   : > { %2076 = vadd.xlane.f32.xlu0 %v2075_v5 }
 0x349   : > { %v2035_v10 = vpop.xlane.xlu0 %2034 }
 0x34d   : > { %v2047_v3 = vpop.xlane.xlu0 %2046 }
 0x34e   : > { %v2032_v38 = vpop.xlane.xlu1 %2031 }
 0x351   : > { %v2056_v50 = vpop.xlane.xlu0 %2055 }
 0x352   : > { %v2038_v37 = vpop.xlane.xlu1 %2037  ;;  %v2078_v63 = vadd.f32 %v2056_v50, %v2032_v38 }
 0x354   : > { %v5211_v35 = vmul.f32 -1.442695, %v2078_v63 }
 0x355   : > { %v2053_v26 = vpop.xlane.xlu0 %2052 }
 0x356   : > { %v2041_v31 = vpop.xlane.xlu1 %2040 }
 0x35a   : > { %v2044_v18 = vpop.xlane.xlu1 %2043 }
 0x35e   : > { %v2050_v17 = vpop.xlane.xlu1 %2049 }
 0x362   : > { %v2059_v47 = vpop.xlane.xlu1 %2058 }
 0x363   : > { %v2079_v12 = vadd.f32 %v2059_v47, %v2035_v10 }
 0x365   : > { %v5212_v23 = vmul.f32 -1.442695, %v2079_v12 }
 0x367   : > { %5506 = vpow2.f32 %v5212_v23 }
 0x368   : > { %5508 = vpow2.f32 %v5211_v35 }
 0x374   : > { %v5507_v33 = vpop.eup %5506 }
 0x375   : > { %v5509_v62 = vpop.eup %5508  ;;  %v2111_v54 = vadd.f32 1.0, %v5507_v33 }
 0x376   : > { %v2110_v16 = vadd.f32 1.0, %v5509_v62 }
 0x3a2   : > { %v2062_v51 = vpop.xlane.xlu1 %2061 }
 0x3a3   : > { %v2080_v6 = vadd.f32 %v2062_v51, %v2038_v37 }
 0x3a5   : > { %v5213_v27 = vmul.f32 -1.442695, %v2080_v6 }
 0x3a7   : > { %5510 = vpow2.f32 %v5213_v27 }
 0x3ab   : > { %v2065_v48 = vpop.xlane.xlu0 %2064 }
 0x3ac   : > { %v2081_v29 = vadd.f32 %v2065_v48, %v2041_v31 }
 0x3ae   : > { %v5214_v13 = vmul.f32 -1.442695, %v2081_v29 }
 0x3af   : > { %v2068_v25 = vpop.xlane.xlu0 %2067 }
 0x3b0   : > { %5512 = vpow2.f32 %v5214_v13  ;;  %v2082_v22 = vadd.f32 %v2068_v25, %v2044_v18  ;;  %v5548_v18 = vld [vmem:[%s5853_s11 + $0x30] sm:$0xff] }
 0x3b2   : > { %v5215_v36 = vmul.f32 -1.442695, %v2082_v22  ;;  %v5550_v22 = vld [vmem:[%s5853_s11 + $0x50] sm:$0xff] }
 0x3b3   : > { %v2071_v46 = vpop.xlane.xlu0 %2070 }
 0x3b4   : > { %v5511_v8 = vpop.eup %5510  ;;  %v2083_v43 = vadd.f32 %v2071_v46, %v2047_v3  ;;  %5514 = vpow2.f32 %v5215_v36  ;;  %v5551_v36 = vld [vmem:[%s5853_s11 + $0x58] sm:$0xff] }
 0x3b5   : > { %v2112_v19 = vadd.f32 1.0, %v5511_v8  ;;  %5516 = vrcp.f32 %v2111_v54 }
 0x3b6   : > { %v5216_v15 = vmul.f32 -1.442695, %v2083_v43 }
 0x3b7   : > { %v2074_v21 = vpop.xlane.xlu0 %2073 }
 0x3b8   : > { %5518 = vpow2.f32 %v5216_v15  ;;  %v2084_v41 = vadd.f32 %v2074_v21, %v2050_v17  ;;  %v5549_v17 = vld [vmem:[%s5853_s11 + $0x38] sm:$0xff]  ;;  %v5553_v15 = vld [vmem:[%s5853_s11 + $0x48] sm:$0xff] }
 0x3b9   : > { %5520 = vrcp.f32 %v2110_v16  ;;  %v5552_v16 = vld [vmem:[%s5853_s11 + $0x40] sm:$0xff] }
 0x3ba   : > { %5522 = vrcp.f32 %v2112_v19  ;;  %v5217_v59 = vmul.f32 -1.442695, %v2084_v41  ;;  %v5554_v41 = vld [vmem:[%s5853_s11 + $0x60] sm:$0xff] }
 0x3bb   : > { %v2077_v49 = vpop.xlane.xlu0 %2076 }
 0x3bc   : > { %5524 = vpow2.f32 %v5217_v59  ;;  %v2085_v11 = vadd.f32 %v2077_v49, %v2053_v26  ;;  %v5555_v49 = vld [vmem:[%s5853_s11 + $0x68] sm:$0xff] }
 0x3bd   : > { %v5513_v32 = vpop.eup %5512 }
 0x3be   : > { %v2113_v53 = vadd.f32 1.0, %v5513_v32  ;;  %v5218_v52 = vmul.f32 -1.442695, %v2085_v11 }
 0x3c0   : > { %5526 = vrcp.f32 %v2113_v53 }
 0x3c1   : > { %5528 = vpow2.f32 %v5218_v52  ;;  %v5515_v60 = vpop.eup %5514 }
 0x3c2   : > { %v6886_v58 = vpop.eup %5516  ;;  %v2114_v24 = vadd.f32 1.0, %v5515_v60 }
 0x3c3   : > { %9370 = vst [vmem:[#allocation31_spill] sm:$0xff] %v6886_v58  ;;  %v2136_v56 = vmul.f32 %v5542_v7, %v6886_v58  ;;  %v2137_v61 = vmul.f32 %v5543_v2, %v6886_v58 }
 0x3c5   : > { %v5519_v20 = vpop.eup %5518 }
 0x3c6   : > { %v6888_v55 = vpop.eup %5520  ;;  %v2115_v4 = vadd.f32 1.0, %v5519_v20 }
 0x3c7   : > { %9371 = vst [vmem:[#allocation32_spill] sm:$0xff] %v6888_v55  ;;  %v6890_v44 = vpop.eup %5522  ;;  %v2134_v0 = vmul.f32 %v5544_v42, %v6888_v55  ;;  %v2135_v28 = vmul.f32 %v5545_v30, %v6888_v55 }
 0x3c8   : > { %9372 = vst [vmem:[#allocation36_spill] sm:$0xff] %v6890_v44  ;;  %5530 = vrcp.f32 %v2115_v4  ;;  %v2138_v39 = vmul.f32 %v5546_v14, %v6890_v44  ;;  %v2139_v34 = vmul.f32 %v5547_v1, %v6890_v44 }
 0x3c9   : > { %v5525_v9 = vpop.eup %5524  ;;  %5532 = vrcp.f32 %v2114_v24  ;;  %v2150_v40 = vadd.f32 %v2136_v56, %v2134_v0  ;;  %v2159_v45 = vadd.f32 %v2137_v61, %v2135_v28  ;;  %v2220_v38 = vmax.f32 %v2134_v0, %v2136_v56  ;;  %v5556_v0 = vld [vmem:[%s5853_s11 + $0x70] sm:$0xff] }
 0x3ca   : > { %v2116_v57 = vadd.f32 1.0, %v5525_v9  ;;  %v2229_v37 = vmax.f32 %v2135_v28, %v2137_v61  ;;  %v5557_v28 = vld [vmem:[%s5853_s11 + $0x78] sm:$0xff]  ;;  %s7225_s11 = sld [smem:[#allocation10 + $0x25]] }
 0x3cb   : > { %v2151_v47 = vadd.f32 %v2150_v40, %v2138_v39  ;;  %v2160_v50 = vadd.f32 %v2159_v45, %v2139_v34  ;;  %v2221_v35 = vmax.f32 %v2220_v38, %v2138_v39 }
 0x3cc   : > { %5534 = vrcp.f32 %v2116_v57  ;;  %v2230_v51 = vmax.f32 %v2229_v37, %v2139_v34 }
 0x3cd   : > { %v6904_v5 = vpop.eup %5526 }
 0x3ce   : > { %9373 = vst [vmem:[#allocation30_spill] sm:$0xff] %v6904_v5  ;;  %v5529_v31 = vpop.eup %5528  ;;  %v2140_v10 = vmul.f32 %v5548_v18, %v6904_v5  ;;  %v2141_v3 = vmul.f32 %v5549_v17, %v6904_v5 }
 0x3cf   : > { %v2117_v12 = vadd.f32 1.0, %v5529_v31 }
 0x3d0   : > { %v2152_v63 = vadd.f32 %v2151_v47, %v2140_v10  ;;  %v2161_v23 = vadd.f32 %v2160_v50, %v2141_v3  ;;  %v2222_v6 = vmax.f32 %v2221_v35, %v2140_v10  ;;  %v2231_v27 = vmax.f32 %v2230_v51, %v2141_v3  ;;  %9385 = sst [smem:[#allocation49_spill]] %s7225_s11 }
 0x3d1   : > { %5536 = vrcp.f32 %v2117_v12  ;;  %s7251_s11 = sld [smem:[#allocation10 + $0x4]] }
 0x3d2   : > { %v2153_v26 = vrot.slane %v2152_v63, 4  ;;  %v2162_v48 = vrot.slane %v2161_v23, 4  ;;  %v2223_v25 = vrot.slane %v2222_v6, 4  ;;  %v2232_v33 = vrot.slane %v2231_v27, 4 }
 0x3d4   : > { %v2154_v46 = vadd.f32 %v2153_v26, %v2152_v63  ;;  %v2163_v8 = vadd.f32 %v2162_v48, %v2161_v23  ;;  %v2224_v32 = vmax.f32 %v2222_v6, %v2223_v25  ;;  %v2233_v53 = vmax.f32 %v2231_v27, %v2232_v33 }
 0x3d5   : > { %v6910_v29 = vpop.eup %5530  ;;  %v5677_v6 = vmov 1983009808  }
 0x3d6   : > { %9374 = vst [vmem:[#allocation33_spill] sm:$0xff] %v6910_v29  ;;  %v6912_v13 = vpop.eup %5532  ;;  %v2144_v62 = vmul.f32 %v5550_v22, %v6910_v29  ;;  %v2145_v54 = vmul.f32 %v5551_v36, %v6910_v29  ;;  %v2155_v52 = vrot.slane %v2154_v46, 2  ;;  %v2164_v60 = vrot.slane %v2163_v8, 2 }
 0x3d7   : > { %9375 = vst [vmem:[#allocation34_spill] sm:$0xff] %v6912_v13  ;;  %v2142_v19 = vmul.f32 %v5552_v16, %v6912_v13  ;;  %v2143_v21 = vmul.f32 %v5553_v15, %v6912_v13  ;;  %v2225_v9 = vrot.slane %v2224_v32, 2  ;;  %v2234_v42 = vrot.slane %v2233_v53, 2 }
 0x3d8   : > { %v2156_v1 = vadd.f32 %v2155_v52, %v2154_v46  ;;  %v2165_v34 = vadd.f32 %v2164_v60, %v2163_v8  ;;  %v2197_v27 = vunpack.c.l.s4 %v5677_v6 }
 0x3d9   : > { %v6918_v43 = vpop.eup %5534  ;;  %v2168_v20 = vadd.f32 %v2144_v62, %v2142_v19  ;;  %v2177_v24 = vadd.f32 %v2145_v54, %v2143_v21  ;;  %v2238_v4 = vmax.f32 %v2142_v19, %v2144_v62  ;;  %v2247_v7 = vmax.f32 %v2143_v21, %v2145_v54 }
 0x3da   : > { %9376 = vst [vmem:[#allocation42_spill] sm:$0xff] %v6918_v43  ;;  %v2146_v59 = vmul.f32 %v5554_v41, %v6918_v43  ;;  %v2147_v11 = vmul.f32 %v5555_v49, %v6918_v43  ;;  %v2226_v31 = vmax.f32 %v2224_v32, %v2225_v9  ;;  %v2235_v18 = vmax.f32 %v2233_v53, %v2234_v42 }
 0x3db   : > { %v2157_v50 = vrot.slane %v2156_v1, 1  ;;  %v2166_v12 = vrot.slane %v2165_v34, 1  ;;  %v2198_v15 = vunpack.c.0.s8 %v2197_v27 }
 0x3dc   : > { %v2169_v2 = vadd.f32 %v2168_v20, %v2146_v59  ;;  %v2178_v61 = vadd.f32 %v2177_v24, %v2147_v11  ;;  %v2239_v14 = vmax.f32 %v2238_v4, %v2146_v59  ;;  %v2248_v39 = vmax.f32 %v2247_v7, %v2147_v11  ;;  %v9378_v7 = vld [vmem:[#allocation26_spill] sm:$0xff] }
 0x3dd   : > { %v2227_v26 = vrot.slane %v2226_v31, 1  ;;  %v2236_v48 = vrot.slane %v2235_v18, 1  ;;  %v2158_v36 = vadd.f32 %v2157_v50, %v2156_v1  ;;  %v2167_v54 = vadd.f32 %v2166_v12, %v2165_v34 }
 0x3de   : > { %v6928_v56 = vpop.eup %5536 }
 0x3df   : > { %9377 = vst [vmem:[#allocation37_spill] sm:$0xff] %v6928_v56  ;;  %v2148_v30 = vmul.f32 %v5556_v0, %v6928_v56  ;;  %v2149_v57 = vmul.f32 %v5557_v28, %v6928_v56  ;;  %v2228_v21 = vmax.f32 %v2226_v31, %v2227_v26  ;;  %v2237_v41 = vmax.f32 %v2235_v18, %v2236_v48 }
 0x3e0   : > { %v2187_v53 = vmul.f32 0.03125, %v2158_v36  ;;  %v2188_v52 = vmul.f32 0.03125, %v2167_v54 }
 0x3e1   : > { %v2179_v40 = vadd.f32 %v2178_v61, %v2149_v57  ;;  %v2240_v45 = vmax.f32 %v2239_v14, %v2148_v30  ;;  %v2249_v38 = vmax.f32 %v2248_v39, %v2149_v57  ;;  %v2170_v37 = vadd.f32 %v2169_v2, %v2148_v30 }
 0x3e2   : > { %v2201_v2 = vsub.s32 %v2198_v15, %v9378_v7  ;;  %v2260_v9 = vcombine.low %v2228_v21, %v2237_v41  ;;  %v2195_v30 = vcombine.low %v2187_v53, %v2188_v52  ;;  %v5678_v14 = vmov 0.0  }
 0x3e3   : > { %v2180_v10 = vrot.slane %v2179_v40, 4  ;;  %v2241_v17 = vrot.slane %v2240_v45, 4  ;;  %v2250_v3 = vrot.slane %v2249_v38, 4  ;;  %v2171_v47 = vrot.slane %v2170_v37, 4  ;;  %2292 = vst [vmem:[#allocation2 + $0x30] sm:$0xff] %v5678_v14  ;;  %2286 = vst [vmem:[#allocation2] sm:$0xff] %v5678_v14 }
 0x3e4   : > { %2287 = vst [vmem:[#allocation2 + $0x8] sm:$0xff] %v5678_v14  ;;  %2288 = vst [vmem:[#allocation2 + $0x10] sm:$0xff] %v5678_v14  ;;  %v2267_v39 = vrot.slane %v2260_v9, %v2201_v2 }
 0x3e5   : > { %v2181_v63 = vadd.f32 %v2180_v10, %v2179_v40  ;;  %v2242_v23 = vmax.f32 %v2240_v45, %v2241_v17  ;;  %v2251_v35 = vmax.f32 %v2249_v38, %v2250_v3  ;;  %v2172_v51 = vadd.f32 %v2171_v47, %v2170_v37  ;;  %2289 = vst [vmem:[#allocation2 + $0x18] sm:$0xff] %v5678_v14 }
 0x3e6   : > { %2290 = vst [vmem:[#allocation2 + $0x20] sm:$0xff] %v5678_v14  ;;  %2291 = vst [vmem:[#allocation2 + $0x28] sm:$0xff] %v5678_v14  ;;  %v2202_v40 = vrot.slane %v2195_v30, %v2201_v2 }
 0x3e7   : > { %v2182_v25 = vrot.slane %v2181_v63, 2  ;;  %v2243_v33 = vrot.slane %v2242_v23, 2  ;;  %v2252_v22 = vrot.slane %v2251_v35, 2  ;;  %v2173_v62 = vrot.slane %v2172_v51, 2  ;;  %2293 = vst [vmem:[#allocation2 + $0x38] sm:$0xff] %v5678_v14  ;;  %2294 = vst [vmem:[#allocation2 + $0x40] sm:$0xff] %v5678_v14 }
 0x3e8   : > { %2295 = vst [vmem:[#allocation2 + $0x48] sm:$0xff] %v5678_v14  ;;  %2296 = vst [vmem:[#allocation2 + $0x50] sm:$0xff] %v5678_v14 }
 0x3e9   : > { %v2183_v46 = vadd.f32 %v2182_v25, %v2181_v63  ;;  %v2244_v8 = vmax.f32 %v2242_v23, %v2243_v33  ;;  %v2253_v16 = vmax.f32 %v2251_v35, %v2252_v22  ;;  %v2174_v19 = vadd.f32 %v2173_v62, %v2172_v51  ;;  %2297 = vst [vmem:[#allocation2 + $0x58] sm:$0xff] %v5678_v14 }
 0x3eb   : > { %v2184_v59 = vrot.slane %v2183_v46, 1  ;;  %v2245_v49 = vrot.slane %v2244_v8, 1  ;;  %v2254_v11 = vrot.slane %v2253_v16, 1  ;;  %v2175_v32 = vrot.slane %v2174_v19, 1 }
 0x3ed   : > { %v2185_v60 = vadd.f32 %v2184_v59, %v2183_v46  ;;  %v2246_v20 = vmax.f32 %v2244_v8, %v2245_v49  ;;  %v2255_v24 = vmax.f32 %v2253_v16, %v2254_v11  ;;  %v2176_v4 = vadd.f32 %v2175_v32, %v2174_v19 }
 0x3ef   : > { %v2190_v61 = vmul.f32 0.03125, %v2185_v60  ;;  %v2268_v42 = vcombine.low %v2246_v20, %v2255_v24  ;;  %v2189_v0 = vmul.f32 0.03125, %v2176_v4 }
 0x3f1   : > { %v2275_v28 = vrot.slane %v2268_v42, %v2201_v2  ;;  %v2203_v57 = vcombine.low %v2189_v0, %v2190_v61 }
 0x3f3   : > { %v2278_v1 = vrot.slane %v2275_v28, 7  ;;  %v2210_v34 = vrot.slane %v2203_v57, %v2201_v2 }
 0x3f5   : > { %v2279_v45 = vsel %vm359_vm4, %v2278_v1, %v2267_v39  ;;  %v2213_v38 = vrot.slane %v2210_v34, 7 }
 0x3f6   : > { %v2280_v37 = vsel %vm408_vm3, %v2278_v1, %v2279_v45 }
 0x3f7   : > { %v2281_v31 = vsel %vm1902_vm9, %v2278_v1, %v2280_v37  ;;  %v2214_v18 = vsel %vm359_vm4, %v2213_v38, %v2202_v40  ;;  %vm4703_vm4 = vcmask 910080  }
 0x3f8   : > { %v2282_v10 = vsel %vm1906_vm11, %v2278_v1, %v2281_v31  ;;  %v2215_v17 = vsel %vm408_vm3, %v2213_v38, %v2214_v18  ;;  %vm4689_vm3 = vcmask 778880  }
 0x3f9   : > { %2285 = vst [vmem:[#allocation3 + $0x4] sm:$0xf] %v2282_v10  ;;  %v2216_v3 = vsel %vm1902_vm9, %v2213_v38, %v2215_v17 }
 0x3fa   : > { %v2217_v47 = vsel %vm1906_vm11, %v2213_v38, %v2216_v3 }
 0x3fb   : > { %2219 = vst [vmem:[#allocation3] sm:$0xf] %v2217_v47 }
 0x400   : > { %v5252_v50 = vld [vmem:[#allocation3 + $0x4] ss:$0 sm:$0xff]  ;;  %v5260_v12 = vld [vmem:[#allocation3 + $0x6] ss:$0 sm:$0xff]  ;;  %v5268_v63 = vld [vmem:[#allocation3 + $0x5] ss:$0 sm:$0xff] }
 0x401   : > { %2637 = vrot.lane.b32.xlu0 %v5252_v50, %s5679_s22  ;;  %2626 = vrot.lane.b32.xlu1 %v5252_v50, %s5680_s23  ;;  %v5276_v23 = vld [vmem:[#allocation3 + $0x7] ss:$0 sm:$0xff] }
 0x402   : > { %v5220_v35 = vld [vmem:[#allocation3] ss:$0 sm:$0xff]  ;;  %v5228_v51 = vld [vmem:[#allocation3 + $0x2] ss:$0 sm:$0xff]  ;;  %v5236_v6 = vld [vmem:[#allocation3 + $0x1] ss:$0 sm:$0xff] }
 0x403   : > { %v5244_v27 = vld [vmem:[#allocation3 + $0x3] ss:$0 sm:$0xff] }
 0x405   : > { %2657 = vrot.lane.b32.xlu0 %v5252_v50, %s5681_s5  ;;  %2647 = vrot.lane.b32.xlu1 %v5252_v50, %s5682_s10 }
 0x409   : > { %2677 = vrot.lane.b32.xlu0 %v5252_v50, %s5683_s26  ;;  %2667 = vrot.lane.b32.xlu1 %v5252_v50, %s5684_s29 }
 0x40d   : > { %2697 = vrot.lane.b32.xlu0 %v5252_v50, %s5685_s9  ;;  %2687 = vrot.lane.b32.xlu1 %v5252_v50, %s5686_s20 }
 0x411   : > { %2717 = vrot.lane.b32.xlu0 %v5260_v12, %s5679_s22  ;;  %2707 = vrot.lane.b32.xlu1 %v5260_v12, %s5680_s23 }
 0x415   : > { %2737 = vrot.lane.b32.xlu0 %v5260_v12, %s5681_s5  ;;  %2727 = vrot.lane.b32.xlu1 %v5260_v12, %s5682_s10 }
 0x419   : > { %2757 = vrot.lane.b32.xlu0 %v5260_v12, %s5683_s26  ;;  %2747 = vrot.lane.b32.xlu1 %v5260_v12, %s5684_s29 }
 0x41d   : > { %2777 = vrot.lane.b32.xlu0 %v5260_v12, %s5685_s9  ;;  %2767 = vrot.lane.b32.xlu1 %v5260_v12, %s5686_s20 }
 0x421   : > { %2798 = vrot.lane.b32.xlu0 %v5268_v63, %s5679_s22  ;;  %2787 = vrot.lane.b32.xlu1 %v5268_v63, %s5680_s23 }
 0x425   : > { %2818 = vrot.lane.b32.xlu0 %v5268_v63, %s5681_s5  ;;  %2808 = vrot.lane.b32.xlu1 %v5268_v63, %s5682_s10 }
 0x429   : > { %2838 = vrot.lane.b32.xlu0 %v5268_v63, %s5683_s26  ;;  %2828 = vrot.lane.b32.xlu1 %v5268_v63, %s5684_s29 }
 0x42d   : > { %2858 = vrot.lane.b32.xlu0 %v5268_v63, %s5685_s9  ;;  %2848 = vrot.lane.b32.xlu1 %v5268_v63, %s5686_s20 }
 0x431   : > { %2878 = vrot.lane.b32.xlu0 %v5276_v23, %s5679_s22  ;;  %2868 = vrot.lane.b32.xlu1 %v5276_v23, %s5680_s23 }
 0x435   : > { %2315 = vrot.lane.b32.xlu0 %v5220_v35, %s5679_s22  ;;  %2304 = vrot.lane.b32.xlu1 %v5220_v35, %s5680_s23 }
 0x439   : > { %2355 = vrot.lane.b32.xlu0 %v5220_v35, %s5683_s26  ;;  %2325 = vrot.lane.b32.xlu1 %v5220_v35, %s5682_s10 }
 0x43d   : > { %2375 = vrot.lane.b32.xlu0 %v5220_v35, %s5685_s9  ;;  %2335 = vrot.lane.b32.xlu1 %v5220_v35, %s5681_s5 }
 0x441   : > { %2395 = vrot.lane.b32.xlu0 %v5228_v51, %s5679_s22  ;;  %2345 = vrot.lane.b32.xlu1 %v5220_v35, %s5684_s29 }
 0x445   : > { %2415 = vrot.lane.b32.xlu0 %v5228_v51, %s5681_s5  ;;  %2365 = vrot.lane.b32.xlu1 %v5220_v35, %s5686_s20 }
 0x449   : > { %2435 = vrot.lane.b32.xlu0 %v5228_v51, %s5683_s26  ;;  %2385 = vrot.lane.b32.xlu1 %v5228_v51, %s5680_s23 }
 0x44d   : > { %2455 = vrot.lane.b32.xlu0 %v5228_v51, %s5685_s9  ;;  %2405 = vrot.lane.b32.xlu1 %v5228_v51, %s5682_s10 }
 0x451   : > { %2476 = vrot.lane.b32.xlu0 %v5236_v6, %s5679_s22  ;;  %2425 = vrot.lane.b32.xlu1 %v5228_v51, %s5684_s29 }
 0x455   : > { %2496 = vrot.lane.b32.xlu0 %v5236_v6, %s5681_s5  ;;  %2445 = vrot.lane.b32.xlu1 %v5228_v51, %s5686_s20 }
 0x459   : > { %2516 = vrot.lane.b32.xlu0 %v5236_v6, %s5683_s26  ;;  %2465 = vrot.lane.b32.xlu1 %v5236_v6, %s5680_s23 }
 0x45d   : > { %2536 = vrot.lane.b32.xlu0 %v5236_v6, %s5685_s9  ;;  %2486 = vrot.lane.b32.xlu1 %v5236_v6, %s5682_s10 }
 0x461   : > { %2556 = vrot.lane.b32.xlu0 %v5244_v27, %s5679_s22  ;;  %2506 = vrot.lane.b32.xlu1 %v5236_v6, %s5684_s29  ;;  %s9138_s22 = smov 124  }
 0x465   : > { %2576 = vrot.lane.b32.xlu0 %v5244_v27, %s5681_s5  ;;  %2526 = vrot.lane.b32.xlu1 %v5236_v6, %s5686_s20 }
 0x469   : > { %2596 = vrot.lane.b32.xlu0 %v5244_v27, %s5683_s26  ;;  %2546 = vrot.lane.b32.xlu1 %v5244_v27, %s5680_s23  ;;  %s7149_s23 = sld [smem:[#allocation10 + $0x46]] }
 0x46d   : > { %2616 = vrot.lane.b32.xlu0 %v5244_v27, %s5685_s9  ;;  %2566 = vrot.lane.b32.xlu1 %v5244_v27, %s5682_s10 }
 0x471   : > { %2898 = vrot.lane.b32.xlu0 %v5276_v23, %s5681_s5  ;;  %2586 = vrot.lane.b32.xlu1 %v5244_v27, %s5684_s29  ;;  %s7153_s5 = sld [smem:[#allocation10 + $0x4d]] }
 0x473   : > { %v2638_v26 = vpop.permute.xlu0 %2637  ;;  %v2627_v48 = vpop.permute.xlu1 %2626 }
 0x474   : > { %2640 = vst.msk [vmem:[#allocation2 + $0x34] sm:$0x1] %vm2307_vm13, %v2638_v26  ;;  %2630 = vst.msk [vmem:[#allocation2 + $0x33] sm:$0x1] %vm2307_vm13, %v2627_v48 }
 0x475   : > { %2918 = vrot.lane.b32.xlu0 %v5276_v23, %s5683_s26  ;;  %2606 = vrot.lane.b32.xlu1 %v5244_v27, %s5686_s20  ;;  %s7157_s26 = sld [smem:[#allocation10 + $0x5b]] }
 0x477   : > { %v2658_v25 = vpop.permute.xlu0 %2657  ;;  %v2648_v33 = vpop.permute.xlu1 %2647 }
 0x478   : > { %2660 = vst.msk [vmem:[#allocation2 + $0x36] sm:$0x1] %vm2307_vm13, %v2658_v25  ;;  %2650 = vst.msk [vmem:[#allocation2 + $0x35] sm:$0x1] %vm2307_vm13, %v2648_v33 }
 0x479   : > { %2938 = vrot.lane.b32.xlu0 %v5276_v23, %s5685_s9  ;;  %2888 = vrot.lane.b32.xlu1 %v5276_v23, %s5682_s10  ;;  %s7155_s10 = sld [smem:[#allocation10 + $0x54]] }
 0x47a   : > { %s7165_s9 = sld [smem:[#allocation10 + $0x7]] }
 0x47b   : > { %v2678_v22 = vpop.permute.xlu0 %2677  ;;  %v2668_v62 = vpop.permute.xlu1 %2667 }
 0x47c   : > { %2680 = vst.msk [vmem:[#allocation2 + $0x38] sm:$0x1] %vm2307_vm13, %v2678_v22  ;;  %2670 = vst.msk [vmem:[#allocation2 + $0x37] sm:$0x1] %vm2307_vm13, %v2668_v62 }
 0x47d   : > { %2908 = vrot.lane.b32.xlu1 %v5276_v23, %s5684_s29  ;;  %s7161_s29 = sld [smem:[#allocation10]] }
 0x47f   : > { %v2698_v36 = vpop.permute.xlu0 %2697  ;;  %v2688_v54 = vpop.permute.xlu1 %2687 }
 0x480   : > { %2700 = vst.msk [vmem:[#allocation2 + $0x3a] sm:$0x1] %vm2307_vm13, %v2698_v36  ;;  %2690 = vst.msk [vmem:[#allocation2 + $0x39] sm:$0x1] %vm2307_vm13, %v2688_v54 }
 0x481   : > { %2928 = vrot.lane.b32.xlu1 %v5276_v23, %s5686_s20  ;;  %s7167_s20 = sld [smem:[#allocation10 + $0xe]] }
 0x483   : > { %v7015_v46 = vld [vmem:[#allocation2 + $0x30] sm:$0xff]  ;;  %v2718_v8 = vpop.permute.xlu0 %2717  ;;  %v2708_v16 = vpop.permute.xlu1 %2707 }
 0x484   : > { %2720 = vst.msk [vmem:[#allocation2 + $0x3c] sm:$0x1] %vm2307_vm13, %v2718_v8  ;;  %2710 = vst.msk [vmem:[#allocation2 + $0x3b] sm:$0x1] %vm2307_vm13, %v2708_v16 }
 0x485   : > { %3876 = vrot.lane.b32.xlu1 %v7015_v46, %s5687_s25 }
 0x487   : > { %v2738_v19 = vpop.permute.xlu0 %2737  ;;  %v2728_v15 = vpop.permute.xlu1 %2727 }
 0x488   : > { %2740 = vst.msk [vmem:[#allocation2 + $0x3e] sm:$0x1] %vm2307_vm13, %v2738_v19  ;;  %2730 = vst.msk [vmem:[#allocation2 + $0x3d] sm:$0x1] %vm2307_vm13, %v2728_v15 }
 0x48b   : > { %v2758_v21 = vpop.permute.xlu0 %2757  ;;  %v2748_v41 = vpop.permute.xlu1 %2747 }
 0x48c   : > { %2760 = vst.msk [vmem:[#allocation2 + $0x40] sm:$0x1] %vm2307_vm13, %v2758_v21  ;;  %2750 = vst.msk [vmem:[#allocation2 + $0x3f] sm:$0x1] %vm2307_vm13, %v2748_v41 }
 0x48f   : > { %v2778_v59 = vpop.permute.xlu0 %2777  ;;  %v2768_v49 = vpop.permute.xlu1 %2767 }
 0x490   : > { %2780 = vst.msk [vmem:[#allocation2 + $0x42] sm:$0x1] %vm2307_vm13, %v2778_v59  ;;  %2770 = vst.msk [vmem:[#allocation2 + $0x41] sm:$0x1] %vm2307_vm13, %v2768_v49 }
 0x493   : > { %v7027_v11 = vld [vmem:[#allocation2 + $0x38] sm:$0xff]  ;;  %v2799_v32 = vpop.permute.xlu0 %2798  ;;  %v2788_v53 = vpop.permute.xlu1 %2787 }
 0x494   : > { %2801 = vst.msk [vmem:[#allocation2 + $0x4c] sm:$0x1] %vm2307_vm13, %v2799_v32  ;;  %2791 = vst.msk [vmem:[#allocation2 + $0x4b] sm:$0x1] %vm2307_vm13, %v2788_v53  ;;  %3878 = vrot.lane.b32.xlu0 %v7027_v11, %s5687_s25 }
 0x497   : > { %v2819_v52 = vpop.permute.xlu0 %2818  ;;  %v2809_v60 = vpop.permute.xlu1 %2808  ;;  %v7035_v20 = vld [vmem:[#allocation2 + $0x40] sm:$0xff] }
 0x498   : > { %2821 = vst.msk [vmem:[#allocation2 + $0x4e] sm:$0x1] %vm2307_vm13, %v2819_v52  ;;  %2811 = vst.msk [vmem:[#allocation2 + $0x4d] sm:$0x1] %vm2307_vm13, %v2809_v60  ;;  %3880 = vrot.lane.b32.xlu1 %v7035_v20, %s5687_s25 }
 0x49b   : > { %v2839_v24 = vpop.permute.xlu0 %2838  ;;  %v2829_v4 = vpop.permute.xlu1 %2828 }
 0x49c   : > { %2841 = vst.msk [vmem:[#allocation2 + $0x50] sm:$0x1] %vm2307_vm13, %v2839_v24  ;;  %2831 = vst.msk [vmem:[#allocation2 + $0x4f] sm:$0x1] %vm2307_vm13, %v2829_v4  ;;  %v7294_v24 = vstv %s7141_s8  ;;  %v7301_v4 = vstv %s7143_s13  ;;  %s7312_s8 = sld [smem:[#allocation10 + $0xd]] }
 0x49d   : > { %s7339_s13 = sld [smem:[#allocation10 + $0x1b]] }
 0x49f   : > { %v2859_v7 = vpop.permute.xlu0 %2858  ;;  %v2849_v2 = vpop.permute.xlu1 %2848 }
 0x4a0   : > { %2861 = vst.msk [vmem:[#allocation2 + $0x52] sm:$0x1] %vm2307_vm13, %v2859_v7  ;;  %2851 = vst.msk [vmem:[#allocation2 + $0x51] sm:$0x1] %vm2307_vm13, %v2849_v2  ;;  %v3787_v7 = vld [vmem:[#allocation2 + $0x31] sm:$0xff]  ;;  %v7304_v2 = vstv %s7145_s14  ;;  %s7356_s14 = sld [smem:[#allocation10 + $0x22]] }
 0x4a3   : > { %v7043_v61 = vld [vmem:[#allocation2 + $0x48] sm:$0xff]  ;;  %v2879_v9 = vpop.permute.xlu0 %2878  ;;  %v2869_v42 = vpop.permute.xlu1 %2868 }
 0x4a4   : > { %2881 = vst.msk [vmem:[#allocation2 + $0x54] sm:$0x1] %vm2307_vm13, %v2879_v9  ;;  %2871 = vst.msk [vmem:[#allocation2 + $0x53] sm:$0x1] %vm2307_vm13, %v2869_v42  ;;  %3882 = vrot.lane.b32.xlu0 %v7043_v61, %s5687_s25  ;;  %v7307_v9 = vstv %s7149_s23  ;;  %v3801_v42 = vld [vmem:[#allocation2 + $0x32] sm:$0xff]  ;;  %s7401_s23 = sld [smem:[#allocation10 + $0x34]] }
 0x4a7   : > { %v2316_v0 = vpop.permute.xlu0 %2315  ;;  %v2305_v30 = vpop.permute.xlu1 %2304 }
 0x4a8   : > { %2318 = vst.msk [vmem:[#allocation2 + $0x4] sm:$0x1] %vm2307_vm13, %v2316_v0  ;;  %2308 = vst.msk [vmem:[#allocation2 + $0x3] sm:$0x1] %vm2307_vm13, %v2305_v30  ;;  %v3815_v0 = vld [vmem:[#allocation2 + $0x33] sm:$0xff]  ;;  %v7310_v30 = vstv %s7153_s5  ;;  %s7429_s5 = sld [smem:[#allocation10 + $0x40]] }
 0x4ab   : > { %v2356_v28 = vpop.permute.xlu0 %2355  ;;  %v2326_v57 = vpop.permute.xlu1 %2325 }
 0x4ac   : > { %2358 = vst.msk [vmem:[#allocation2 + $0x8] sm:$0x1] %vm2307_vm13, %v2356_v28  ;;  %2328 = vst.msk [vmem:[#allocation2 + $0x5] sm:$0x1] %vm2307_vm13, %v2326_v57  ;;  %v7315_v28 = vstv %s7155_s10  ;;  %v3829_v57 = vld [vmem:[#allocation2 + $0x34] sm:$0xff]  ;;  %s7439_s10 = sld [smem:[#allocation10 + $0x47]] }
 0x4ad   : > { %9404 = vst [vmem:[#allocation38_spill] sm:$0xff] %v7315_v28 }
 0x4ae   : > { %9426 = sst [smem:[#allocation82_spill]] %s7429_s5 }
 0x4af   : > { %v2376_v14 = vpop.permute.xlu0 %2375  ;;  %v2336_v39 = vpop.permute.xlu1 %2335 }
 0x4b0   : > { %2378 = vst.msk [vmem:[#allocation2 + $0xa] sm:$0x1] %vm2307_vm13, %v2376_v14  ;;  %2338 = vst.msk [vmem:[#allocation2 + $0x6] sm:$0x1] %vm2307_vm13, %v2336_v39  ;;  %v3843_v14 = vld [vmem:[#allocation2 + $0x35] sm:$0xff]  ;;  %v7318_v39 = vstv %s7157_s26  ;;  %s9432_s26 = smov 123  }
 0x4b1   : > { %9405 = vst [vmem:[#allocation35_spill] sm:$0xff] %v7318_v39 }
 0x4b2   : > { %9429 = sst [smem:[#allocation85_spill]] %s7439_s10 }
 0x4b3   : > { %v2396_v1 = vpop.permute.xlu0 %2395  ;;  %v2346_v34 = vpop.permute.xlu1 %2345  ;;  %s9457_s10 = sld [smem:[#allocation48_spill]] }
 0x4b4   : > { %2398 = vst.msk [vmem:[#allocation2 + $0xc] sm:$0x1] %vm2307_vm13, %v2396_v1  ;;  %2348 = vst.msk [vmem:[#allocation2 + $0x7] sm:$0x1] %vm2307_vm13, %v2346_v34  ;;  %v3857_v1 = vld [vmem:[#allocation2 + $0x36] sm:$0xff]  ;;  %v7321_v34 = vstv %s7161_s29  ;;  %s7454_s29 = sld [smem:[#allocation10 + $0x4e]] }
 0x4b7   : > { %v2416_v40 = vpop.permute.xlu0 %2415  ;;  %v2366_v45 = vpop.permute.xlu1 %2365 }
 0x4b8   : > { %2418 = vst.msk [vmem:[#allocation2 + $0xe] sm:$0x1] %vm2307_vm13, %v2416_v40  ;;  %2368 = vst.msk [vmem:[#allocation2 + $0x9] sm:$0x1] %vm2307_vm13, %v2366_v45  ;;  %v7324_v40 = vstv %s7165_s9  ;;  %v3788_v45 = vld [vmem:[#allocation2 + $0x39] sm:$0xff]  ;;  %s7465_s9 = sld [smem:[#allocation10 + $0x55]] }
 0x4ba   : > { %9433 = sst [smem:[#allocation88_spill]] %s7454_s29 }
 0x4bb   : > { %v2436_v38 = vpop.permute.xlu0 %2435  ;;  %v2386_v37 = vpop.permute.xlu1 %2385  ;;  %v7100_v59 = vld [vmem:[#allocation2] sm:$0xff]  ;;  %s7557_s29 = sld [smem:[#allocation10 + $0x5d]] }
 0x4bc   : > { %2438 = vst.msk [vmem:[#allocation2 + $0x10] sm:$0x1] %vm2307_vm13, %v2436_v38  ;;  %2388 = vst.msk [vmem:[#allocation2 + $0xb] sm:$0x1] %vm2307_vm13, %v2386_v37  ;;  %v3802_v38 = vld [vmem:[#allocation2 + $0x3a] sm:$0xff] }
 0x4bd   : > { %v3816_v37 = vld [vmem:[#allocation2 + $0x3b] sm:$0xff] }
 0x4be   : > { %9434 = sst [smem:[#allocation89_spill]] %s7465_s9 }
 0x4bf   : > { %v2456_v31 = vpop.permute.xlu0 %2455  ;;  %v2406_v18 = vpop.permute.xlu1 %2405  ;;  %s9454_s9 = sld [smem:[#allocation46_spill]] }
 0x4c0   : > { %2458 = vst.msk [vmem:[#allocation2 + $0x12] sm:$0x1] %vm2307_vm13, %v2456_v31  ;;  %2408 = vst.msk [vmem:[#allocation2 + $0xd] sm:$0x1] %vm2307_vm13, %v2406_v18  ;;  %v7329_v31 = vstv %s7167_s20  ;;  %s7475_s20 = sld [smem:[#allocation10 + $0x5c]] }
 0x4c3   : > { %v2477_v10 = vpop.permute.xlu0 %2476  ;;  %v2426_v17 = vpop.permute.xlu1 %2425 }
 0x4c4   : > { %2479 = vst.msk [vmem:[#allocation2 + $0x1c] sm:$0x1] %vm2307_vm13, %v2477_v10  ;;  %2428 = vst.msk [vmem:[#allocation2 + $0xf] sm:$0x1] %vm2307_vm13, %v2426_v17  ;;  %v7343_v17 = vmul.f32 %v7294_v24, %v7015_v46 }
 0x4c6   : > { %9406 = vst [vmem:[#allocation39_spill] sm:$0xff] %v7343_v17  ;;  %9436 = sst [smem:[#allocation91_spill]] %s7475_s20  ;;  %v7705_v17 = vstv %s7287_s6 }
 0x4c7   : > { %v2497_v3 = vpop.permute.xlu0 %2496  ;;  %v2446_v47 = vpop.permute.xlu1 %2445  ;;  %s9452_s20 = sld [smem:[#allocation45_spill]]  ;;  %9510 = vst [vmem:[#allocation138_spill] sm:$0xff] %v7705_v17  ;;  %v7727_v17 = vstv %s7356_s14 }
 0x4c8   : > { %2499 = vst.msk [vmem:[#allocation2 + $0x1e] sm:$0x1] %vm2307_vm13, %v2497_v3  ;;  %2448 = vst.msk [vmem:[#allocation2 + $0x11] sm:$0x1] %vm2307_vm13, %v2446_v47  ;;  %v7346_v3 = vmul.f32 %v7301_v4, %v3787_v7  ;;  %v3830_v47 = vld [vmem:[#allocation2 + $0x3c] sm:$0xff]  ;;  %s9522_s6 = sld [smem:[#allocation91_spill]] }
 0x4c9   : > { %v2957_v7 = vld [vmem:[#allocation2 + $0x1] sm:$0xff]  ;;  %9519 = vst [vmem:[#allocation144_spill] sm:$0xff] %v7727_v17 }
 0x4ca   : > { %9407 = vst [vmem:[#allocation40_spill] sm:$0xff] %v7346_v3  ;;  %v2962_v44 = vmul.f32 %v7324_v40, %v2957_v7 }
 0x4cb   : > { %v2517_v50 = vpop.permute.xlu0 %2516  ;;  %v2466_v12 = vpop.permute.xlu1 %2465  ;;  %v7107_v32 = vld [vmem:[#allocation2 + $0x8] sm:$0xff] }
 0x4cc   : > { %2519 = vst.msk [vmem:[#allocation2 + $0x20] sm:$0x1] %vm2307_vm13, %v2517_v50  ;;  %2469 = vst.msk [vmem:[#allocation2 + $0x1b] sm:$0x1] %vm2307_vm13, %v2466_v12  ;;  %v3844_v50 = vld [vmem:[#allocation2 + $0x3d] sm:$0xff]  ;;  %v7349_v12 = vstv %s7177_s7  ;;  %s7372_s7 = sld [smem:[#allocation10 + $0x29]] }
 0x4cd   : > { %v2958_v43 = vld [vmem:[#allocation2 + $0x9] sm:$0xff] }
 0x4cf   : > { %v2537_v63 = vpop.permute.xlu0 %2536  ;;  %v2487_v23 = vpop.permute.xlu1 %2486  ;;  %v7105_v49 = vld [vmem:[#allocation2 + $0x10] sm:$0xff] }
 0x4d0   : > { %2539 = vst.msk [vmem:[#allocation2 + $0x22] sm:$0x1] %vm2307_vm13, %v2537_v63  ;;  %2489 = vst.msk [vmem:[#allocation2 + $0x1d] sm:$0x1] %vm2307_vm13, %v2487_v23  ;;  %v2999_v63 = vld [vmem:[#allocation2 + $0x4] sm:$0xff]  ;;  %v3014_v29 = vld [vmem:[#allocation2 + $0xd] sm:$0xff] }
 0x4d1   : > { %v2986_v58 = vld [vmem:[#allocation2 + $0xb] sm:$0xff] }
 0x4d2   : > { %v3028_v55 = vld [vmem:[#allocation2 + $0xe] sm:$0xff] }
 0x4d3   : > { %v2557_v35 = vpop.permute.xlu0 %2556  ;;  %v2507_v51 = vpop.permute.xlu1 %2506 }
 0x4d4   : > { %2559 = vst.msk [vmem:[#allocation2 + $0x24] sm:$0x1] %vm2307_vm13, %v2557_v35  ;;  %2509 = vst.msk [vmem:[#allocation2 + $0x1f] sm:$0x1] %vm2307_vm13, %v2507_v51  ;;  %v7359_v35 = vmul.f32 %v7304_v2, %v3801_v42  ;;  %v7362_v51 = vmul.f32 %v7307_v9, %v3815_v0  ;;  %v2971_v42 = vld [vmem:[#allocation2 + $0x2] sm:$0xff] }
 0x4d6   : > { %9408 = vst [vmem:[#allocation41_spill] sm:$0xff] %v7359_v35  ;;  %9409 = vst [vmem:[#allocation26_spill] sm:$0xff] %v7362_v51 }
 0x4d7   : > { %v2577_v6 = vpop.permute.xlu0 %2576  ;;  %v2527_v27 = vpop.permute.xlu1 %2526 }
 0x4d8   : > { %2579 = vst.msk [vmem:[#allocation2 + $0x26] sm:$0x1] %vm2307_vm13, %v2577_v6  ;;  %2529 = vst.msk [vmem:[#allocation2 + $0x21] sm:$0x1] %vm2307_vm13, %v2527_v27  ;;  %v7365_v6 = vmul.f32 %v7310_v30, %v3829_v57  ;;  %v7368_v27 = vmul.f32 %v7315_v28, %v3843_v14  ;;  %v3000_v57 = vld [vmem:[#allocation2 + $0xc] sm:$0xff]  ;;  %v7404_v14 = vmul.f32 %v7315_v28, %v3844_v50 }
 0x4da   : > { %9410 = vst [vmem:[#allocation66_spill] sm:$0xff] %v7365_v6  ;;  %9411 = vst [vmem:[#allocation67_spill] sm:$0xff] %v7368_v27 }
 0x4db   : > { %v2597_v26 = vpop.permute.xlu0 %2596  ;;  %v2547_v48 = vpop.permute.xlu1 %2546  ;;  %v7115_v52 = vld [vmem:[#allocation2 + $0x18] sm:$0xff]  ;;  %9420 = vst [vmem:[#allocation76_spill] sm:$0xff] %v7404_v14 }
 0x4dc   : > { %2599 = vst.msk [vmem:[#allocation2 + $0x28] sm:$0x1] %vm2307_vm13, %v2597_v26  ;;  %2549 = vst.msk [vmem:[#allocation2 + $0x23] sm:$0x1] %vm2307_vm13, %v2547_v48  ;;  %v3858_v26 = vld [vmem:[#allocation2 + $0x3e] sm:$0xff] }
 0x4dd   : > { %v3013_v48 = vld [vmem:[#allocation2 + $0x5] sm:$0xff] }
 0x4df   : > { %v2617_v25 = vpop.permute.xlu0 %2616  ;;  %v2567_v33 = vpop.permute.xlu1 %2566 }
 0x4e0   : > { %2619 = vst.msk [vmem:[#allocation2 + $0x2a] sm:$0x1] %vm2307_vm13, %v2617_v25  ;;  %2569 = vst.msk [vmem:[#allocation2 + $0x25] sm:$0x1] %vm2307_vm13, %v2567_v33  ;;  %v3027_v25 = vld [vmem:[#allocation2 + $0x6] sm:$0xff] }
 0x4e3   : > { %v2899_v22 = vpop.permute.xlu0 %2898  ;;  %v2587_v62 = vpop.permute.xlu1 %2586 }
 0x4e4   : > { %2901 = vst.msk [vmem:[#allocation2 + $0x56] sm:$0x1] %vm2307_vm13, %v2899_v22  ;;  %2589 = vst.msk [vmem:[#allocation2 + $0x27] sm:$0x1] %vm2307_vm13, %v2587_v62  ;;  %v7375_v22 = vmul.f32 %v7318_v39, %v3857_v1  ;;  %v7379_v62 = vmul.f32 %v7294_v24, %v7027_v11  ;;  %v7407_v1 = vmul.f32 %v7318_v39, %v3858_v26 }
 0x4e6   : > { %9413 = vst [vmem:[#allocation69_spill] sm:$0xff] %v7375_v22  ;;  %9414 = vst [vmem:[#allocation70_spill] sm:$0xff] %v7379_v62 }
 0x4e7   : > { %v2919_v36 = vpop.permute.xlu0 %2918  ;;  %v2607_v54 = vpop.permute.xlu1 %2606  ;;  %9421 = vst [vmem:[#allocation77_spill] sm:$0xff] %v7407_v1 }
 0x4e8   : > { %2921 = vst.msk [vmem:[#allocation2 + $0x58] sm:$0x1] %vm2307_vm13, %v2919_v36  ;;  %2609 = vst.msk [vmem:[#allocation2 + $0x29] sm:$0x1] %vm2307_vm13, %v2607_v54  ;;  %v7382_v36 = vmul.f32 %v7301_v4, %v3788_v45  ;;  %v3789_v54 = vld [vmem:[#allocation2 + $0x49] sm:$0xff] }
 0x4e9   : > { %v3831_v45 = vld [vmem:[#allocation2 + $0x4c] sm:$0xff]  ;;  %v7420_v50 = vmul.f32 %v7301_v4, %v3789_v54  ;;  %v2976_v54 = vmul.f32 %v7329_v31, %v2971_v42  ;;  %v3015_v42 = vld [vmem:[#allocation2 + $0x1d] sm:$0xff] }
 0x4ea   : > { %9415 = vst [vmem:[#allocation71_spill] sm:$0xff] %v7382_v36 }
 0x4eb   : > { %v2939_v8 = vpop.permute.xlu0 %2938  ;;  %v2889_v16 = vpop.permute.xlu1 %2888  ;;  %v7113_v53 = vld [vmem:[#allocation2 + $0x20] sm:$0xff]  ;;  %9423 = vst [vmem:[#allocation79_spill] sm:$0xff] %v7420_v50  ;;  %v7442_v50 = vmul.f32 %v7310_v30, %v3831_v45 }
 0x4ec   : > { %2941 = vst.msk [vmem:[#allocation2 + $0x5a] sm:$0x1] %vm2307_vm13, %v2939_v8  ;;  %2891 = vst.msk [vmem:[#allocation2 + $0x55] sm:$0x1] %vm2307_vm13, %v2889_v16  ;;  %v3803_v8 = vld [vmem:[#allocation2 + $0x4a] sm:$0xff]  ;;  %v2960_v14 = vld [vmem:[#allocation2 + $0x21] sm:$0xff] }
 0x4ed   : > { %v3817_v16 = vld [vmem:[#allocation2 + $0x4b] sm:$0xff]  ;;  %v7423_v26 = vmul.f32 %v7304_v2, %v3803_v8  ;;  %9430 = vst [vmem:[#allocation86_spill] sm:$0xff] %v7442_v50 }
 0x4ee   : > { %v7432_v5 = vmul.f32 %v7307_v9, %v3817_v16 }
 0x4ef   : > { %v2909_v19 = vpop.permute.xlu1 %2908  ;;  %v7122_v60 = vld [vmem:[#allocation2 + $0x28] sm:$0xff]  ;;  %9424 = vst [vmem:[#allocation80_spill] sm:$0xff] %v7423_v26  ;;  %v3001_v26 = vld [vmem:[#allocation2 + $0x1c] sm:$0xff] }
 0x4f0   : > { %2911 = vst.msk [vmem:[#allocation2 + $0x57] sm:$0x1] %vm2307_vm13, %v2909_v19  ;;  %v7387_v19 = vstv %s7183_s1  ;;  %s7413_s1 = sld [smem:[#allocation10 + $0x39]]  ;;  %9427 = vst [vmem:[#allocation83_spill] sm:$0xff] %v7432_v5  ;;  %v3029_v5 = vld [vmem:[#allocation2 + $0x1e] sm:$0xff] }
 0x4f1   : > { %9416 = vst [vmem:[#allocation72_spill] sm:$0xff] %v7387_v19 }
 0x4f3   : > { %v2929_v15 = vpop.permute.xlu1 %2928  ;;  %v3859_v22 = vld [vmem:[#allocation2 + $0x4e] sm:$0xff] }
 0x4f4   : > { %2931 = vst.msk [vmem:[#allocation2 + $0x59] sm:$0x1] %vm2307_vm13, %v2929_v15  ;;  %v7390_v15 = vmul.f32 %v7304_v2, %v3802_v38  ;;  %v3845_v38 = vld [vmem:[#allocation2 + $0x4d] sm:$0xff] }
 0x4f6   : > { %9417 = vst [vmem:[#allocation73_spill] sm:$0xff] %v7390_v15 }
 0x4f7   : > { %v7087_v21 = vld [vmem:[#allocation2 + $0x50] sm:$0xff]  ;;  %v7370_v33 = vpop.permute.xlu1 %3876 }
 0x4f8   : > { %3884 = vrot.lane.b32.xlu1 %v7087_v21, %s5687_s25  ;;  %9412 = vst [vmem:[#allocation68_spill] sm:$0xff] %v7370_v33 }
 0x4fb   : > { %v7092_v41 = vld [vmem:[#allocation2 + $0x58] sm:$0xff] }
 0x4fc   : > { %3998 = vrot.lane.b32.xlu1 %v7015_v46, %s5688_s30  ;;  %3886 = vrot.lane.b32.xlu0 %v7092_v41, %s5687_s25 }
 0x500   : > { %4002 = vrot.lane.b32.xlu1 %v7035_v20, %s5688_s30  ;;  %4000 = vrot.lane.b32.xlu0 %v7027_v11, %s5688_s30 }
 0x504   : > { %4006 = vrot.lane.b32.xlu1 %v7087_v21, %s5688_s30  ;;  %4004 = vrot.lane.b32.xlu0 %v7043_v61, %s5688_s30 }
 0x508   : > { %3046 = vrot.lane.b32.xlu1 %v7100_v59, %s5687_s25  ;;  %4008 = vrot.lane.b32.xlu0 %v7092_v41, %s5688_s30 }
 0x50a   : > { %v7427_v13 = vpop.permute.xlu1 %3880 }
 0x50b   : > { %9425 = vst [vmem:[#allocation81_spill] sm:$0xff] %v7427_v13  ;;  %v7708_v13 = vstv %s7291_s28  ;;  %s7729_s28 = sld [smem:[#allocation10 + $0x51]] }
 0x50c   : > { %3050 = vrot.lane.b32.xlu1 %v7105_v49, %s5687_s25  ;;  %3048 = vrot.lane.b32.xlu0 %v7107_v32, %s5687_s25  ;;  %9511 = vst [vmem:[#allocation139_spill] sm:$0xff] %v7708_v13  ;;  %v7738_v13 = vstv %s7372_s7 }
 0x50d   : > { %9523 = vst [vmem:[#allocation146_spill] sm:$0xff] %v7738_v13 }
 0x510   : > { %3054 = vrot.lane.b32.xlu1 %v7113_v53, %s5687_s25  ;;  %3052 = vrot.lane.b32.xlu0 %v7115_v52, %s5687_s25 }
 0x514   : > { %3168 = vrot.lane.b32.xlu1 %v7100_v59, %s5688_s30  ;;  %3056 = vrot.lane.b32.xlu0 %v7122_v60, %s5687_s25  ;;  %s7169_s25 = sld [smem:[#allocation10 + $0x15]] }
 0x518   : > { %3172 = vrot.lane.b32.xlu1 %v7105_v49, %s5688_s30  ;;  %3170 = vrot.lane.b32.xlu0 %v7107_v32, %s5688_s30 }
 0x51a   : > { %v7332_v18 = vstv %s7169_s25  ;;  %s7492_s25 = sld [smem:[#allocation10 + $0x3a]] }
 0x51c   : > { %3176 = vrot.lane.b32.xlu1 %v7113_v53, %s5688_s30  ;;  %3174 = vrot.lane.b32.xlu0 %v7115_v52, %s5688_s30 }
 0x520   : > { %3290 = vrot.lane.b32.xlu1 %v7100_v59, %s9131_s12  ;;  %3178 = vrot.lane.b32.xlu0 %v7122_v60, %s5688_s30  ;;  %s7173_s30 = sld [smem:[#allocation10 + $0x1c]] }
 0x521   : > { %9439 = sst [smem:[#allocation94_spill]] %s7492_s25 }
 0x522   : > { %s7514_s25 = sld [smem:[#allocation10 + $0x48]] }
 0x524   : > { %3294 = vrot.lane.b32.xlu1 %v7105_v49, %s9131_s12  ;;  %3292 = vrot.lane.b32.xlu0 %v7107_v32, %s9131_s12 }
 0x526   : > { %v7335_v10 = vstv %s7173_s30  ;;  %s7502_s30 = sld [smem:[#allocation10 + $0x41]] }
 0x527   : > { %v3004_v0 = vmul.f32 %v7335_v10, %v2999_v63  ;;  %v7417_v63 = vmul.f32 %v7294_v24, %v7043_v61  ;;  %v3005_v8 = vmul.f32 %v7335_v10, %v3000_v57  ;;  %v2974_v57 = vld [vmem:[#allocation2 + $0x22] sm:$0xff]  ;;  %v3006_v15 = vmul.f32 %v7335_v10, %v3001_v26 }
 0x528   : > { %3298 = vrot.lane.b32.xlu1 %v7113_v53, %s9131_s12  ;;  %3296 = vrot.lane.b32.xlu0 %v7115_v52, %s9131_s12  ;;  %v2950_v26 = vmul.f32 %v7321_v34, %v7115_v52  ;;  %9442 = sst [smem:[#allocation97_spill]] %s7514_s25 }
 0x529   : > { %9422 = vst [vmem:[#allocation78_spill] sm:$0xff] %v7417_v63  ;;  %v7445_v63 = vmul.f32 %v7315_v28, %v3845_v38  ;;  %v2949_v38 = vmul.f32 %v7321_v34, %v7107_v32  ;;  %v3002_v28 = vld [vmem:[#allocation2 + $0x24] sm:$0xff]  ;;  %s7540_s25 = sld [smem:[#allocation10 + $0x56]] }
 0x52b   : > { %9431 = vst [vmem:[#allocation87_spill] sm:$0xff] %v7445_v63  ;;  %v2963_v63 = vmul.f32 %v7324_v40, %v2958_v43  ;;  %v7477_v50 = vadd.f32 %v3005_v8, %v2949_v38  ;;  %v3020_v43 = vmul.f32 %v7349_v12, %v3015_v42 }
 0x52c   : > { %3412 = vrot.lane.b32.xlu1 %v7100_v59, %s9138_s22  ;;  %3300 = vrot.lane.b32.xlu0 %v7122_v60, %s9131_s12  ;;  %s7179_s12 = sld [smem:[#allocation10 + $0x2a]] }
 0x52d   : > { %9440 = sst [smem:[#allocation95_spill]] %s7502_s30 }
 0x52e   : > { %s7527_s30 = sld [smem:[#allocation10 + $0x4f]] }
 0x52f   : > { %9447 = sst [smem:[#allocation102_spill]] %s7540_s25 }
 0x530   : > { %3416 = vrot.lane.b32.xlu1 %v7105_v49, %s9138_s22  ;;  %3414 = vrot.lane.b32.xlu0 %v7107_v32, %s9138_s22  ;;  %s9456_s25 = sld [smem:[#allocation47_spill]] }
 0x531   : > { %s9529_s14 = sld [smem:[#allocation95_spill]] }
 0x532   : > { %v7352_v23 = vstv %s7179_s12  ;;  %s7384_s12 = sld [smem:[#allocation10 + $0x30]] }
 0x533   : > { %v3032_v56 = vmul.f32 %v7352_v23, %v3027_v25  ;;  %v2972_v25 = vld [vmem:[#allocation2 + $0xa] sm:$0xff] }
 0x534   : > { %3420 = vrot.lane.b32.xlu1 %v7113_v53, %s9138_s22  ;;  %3418 = vrot.lane.b32.xlu0 %v7115_v52, %s9138_s22  ;;  %9444 = sst [smem:[#allocation99_spill]] %s7527_s30 }
 0x535   : > { %v7458_v45 = vadd.f32 %v3032_v56, %v2976_v54  ;;  %v7470_v56 = vmul.f32 %v7332_v18, %v2986_v58  ;;  %v2973_v54 = vld [vmem:[#allocation2 + $0x1a] sm:$0xff]  ;;  %s9535_s7 = sld [smem:[#allocation99_spill]] }
 0x538   : > { %3534 = vrot.lane.b32.xlu1 %v7100_v59, %s9150_s0  ;;  %3422 = vrot.lane.b32.xlu0 %v7122_v60, %s9138_s22  ;;  %s7207_s22 = sld [smem:[#allocation10 + $0x24]] }
 0x53c   : > { %3538 = vrot.lane.b32.xlu1 %v7105_v49, %s9150_s0  ;;  %3536 = vrot.lane.b32.xlu0 %v7107_v32, %s9150_s0 }
 0x53e   : > { %9379 = sst [smem:[#allocation43_spill]] %s7207_s22 }
 0x53f   : > { %s7227_s22 = sld [smem:[#allocation10 + $0x2c]] }
 0x540   : > { %3542 = vrot.lane.b32.xlu1 %v7113_v53, %s9150_s0  ;;  %3540 = vrot.lane.b32.xlu0 %v7115_v52, %s9150_s0  ;;  %s9448_s30 = sld [smem:[#allocation43_spill]] }
 0x541   : > { %9455 = sst [smem:[#allocation43_spill]] %s7557_s29 }
 0x542   : > { %s9464_s29 = sld [smem:[#allocation51_spill]] }
 0x544   : > { %3656 = vrot.lane.b32.xlu1 %v7100_v59, %s9152_s4  ;;  %3544 = vrot.lane.b32.xlu0 %v7122_v60, %s9150_s0  ;;  %s7243_s0 = sld [smem:[#allocation10 + $0x1f]] }
 0x545   : > { %9386 = sst [smem:[#allocation50_spill]] %s7227_s22 }
 0x546   : > { %s7247_s22 = sld [smem:[#allocation10 + $0x26]] }
 0x547   : > { %s9463_s5 = sld [smem:[#allocation50_spill]] }
 0x548   : > { %3660 = vrot.lane.b32.xlu1 %v7105_v49, %s9152_s4  ;;  %3658 = vrot.lane.b32.xlu0 %v7107_v32, %s9152_s4  ;;  %v7393_v49 = vmul.f32 %v7307_v9, %v3816_v37  ;;  %v2985_v37 = vld [vmem:[#allocation2 + $0x3] sm:$0xff]  ;;  %v2959_v32 = vld [vmem:[#allocation2 + $0x19] sm:$0xff] }
 0x549   : > { %v7448_v16 = vmul.f32 %v7332_v18, %v2985_v37  ;;  %v3019_v37 = vmul.f32 %v7349_v12, %v3014_v29  ;;  %v2964_v42 = vmul.f32 %v7324_v40, %v2959_v32  ;;  %v7568_v32 = vstv %s7199_s16  ;;  %s9466_s16 = smov 122  }
 0x54a   : > { %9391 = sst [smem:[#allocation55_spill]] %s7243_s0  ;;  %9418 = vst [vmem:[#allocation74_spill] sm:$0xff] %v7393_v49  ;;  %v2987_v49 = vld [vmem:[#allocation2 + $0x1b] sm:$0xff] }
 0x54b   : > { %s7261_s0 = sld [smem:[#allocation10 + $0x19]] }
 0x54c   : > { %3664 = vrot.lane.b32.xlu1 %v7113_v53, %s9152_s4  ;;  %3662 = vrot.lane.b32.xlu0 %v7115_v52, %s9152_s4  ;;  %v2965_v52 = vmul.f32 %v7324_v40, %v2960_v14  ;;  %v7555_v14 = vstv %s7189_s3  ;;  %s9461_s3 = sld [smem:[#allocation49_spill]] }
 0x54d   : > { %9453 = vst [vmem:[#allocation105_spill] sm:$0xff] %v7555_v14 }
 0x550   : > { %4120 = vrot.lane.b32.xlu1 %v7015_v46, %s9393_s19  ;;  %3666 = vrot.lane.b32.xlu0 %v7122_v60, %s9152_s4  ;;  %s7273_s4 = sld [smem:[#allocation10 + $0x5]]  ;;  %v7396_v60 = vmul.f32 %v7310_v30, %v3830_v47  ;;  %v3018_v47 = vmul.f32 %v7349_v12, %v3013_v48  ;;  %v2948_v48 = vmul.f32 %v7321_v34, %v7100_v59  ;;  %v7437_v59 = vpop.permute.xlu0 %3878 }
 0x551   : > { %9396 = sst [smem:[#allocation59_spill]] %s7261_s0  ;;  %9428 = vst [vmem:[#allocation84_spill] sm:$0xff] %v7437_v59 }
 0x552   : > { %s7285_s0 = sld [smem:[#allocation10 + $0x21]]  ;;  %9419 = vst [vmem:[#allocation75_spill] sm:$0xff] %v7396_v60  ;;  %v7450_v7 = vadd.f32 %v3004_v0, %v2948_v48  ;;  %v7456_v1 = vadd.f32 %v3018_v47, %v2962_v44  ;;  %v3016_v0 = vld [vmem:[#allocation2 + $0x25] sm:$0xff]  ;;  %v2977_v44 = vmul.f32 %v7329_v31, %v2972_v25  ;;  %v3033_v47 = vmul.f32 %v7352_v23, %v3028_v55 }
 0x553   : > { %v3030_v48 = vld [vmem:[#allocation2 + $0x26] sm:$0xff]  ;;  %v3034_v25 = vmul.f32 %v7352_v23, %v3029_v5  ;;  %v2979_v55 = vmul.f32 %v7329_v31, %v2974_v57  ;;  %v3021_v8 = vmul.f32 %v7349_v12, %v3016_v0  ;;  %v7494_v5 = vadd.f32 %v3019_v37, %v2963_v63 }
 0x554   : > { %4124 = vrot.lane.b32.xlu1 %v7035_v20, %s9393_s19  ;;  %4122 = vrot.lane.b32.xlu0 %v7027_v11, %s9393_s19  ;;  %v7482_v58 = vpop.permute.xlu0 %3882  ;;  %v2988_v60 = vld [vmem:[#allocation2 + $0x23] sm:$0xff]  ;;  %v3035_v38 = vmul.f32 %v7352_v23, %v3030_v48  ;;  %v2978_v57 = vmul.f32 %v7329_v31, %v2973_v54  ;;  %v2951_v12 = vmul.f32 %v7321_v34, %v7113_v53  ;;  %v3790_v23 = vld [vmem:[#allocation2 + $0x51] sm:$0xff]  ;;  %v7571_v54 = vstv %s7201_s21  ;;  %s9467_s21 = sld [smem:[#allocation52_spill]] }
 0x555   : > { %9437 = vst [vmem:[#allocation92_spill] sm:$0xff] %v7482_v58  ;;  %v7516_v31 = vadd.f32 %v3006_v15, %v2950_v26  ;;  %v7518_v37 = vadd.f32 %v3020_v43, %v2964_v42  ;;  %v7531_v34 = vadd.f32 %v3021_v8, %v2965_v52  ;;  %v7536_v15 = vmul.f32 %v7318_v39, %v3859_v22 }
 0x556   : > { %9400 = sst [smem:[#allocation63_spill]] %s7273_s4  ;;  %s9403_s4 = smov 124   ;;  %v7520_v0 = vadd.f32 %v3034_v25, %v2978_v57  ;;  %v7533_v40 = vadd.f32 %v3035_v38, %v2979_v55  ;;  %v7552_v22 = vstv %s7187_s2  ;;  %v7578_v43 = vstv %s7203_s18 }
 0x557   : > { %9445 = vst [vmem:[#allocation100_spill] sm:$0xff] %v7531_v34  ;;  %9446 = vst [vmem:[#allocation101_spill] sm:$0xff] %v7536_v15  ;;  %s7573_s2 = sld [smem:[#allocation10 + $0x3b]]  ;;  %v7581_v25 = vstv %s9448_s30  ;;  %v7587_v8 = vstv %s9452_s20  ;;  %v7594_v38 = vstv %s9454_s9  ;;  %v7597_v26 = vstv %s9456_s25 }
 0x558   : > { %4128 = vrot.lane.b32.xlu1 %v7087_v21, %s9393_s19  ;;  %4126 = vrot.lane.b32.xlu0 %v7043_v61, %s9393_s19  ;;  %9465 = vst [vmem:[#allocation109_spill] sm:$0xff] %v7581_v25  ;;  %s9470_s18 = sld [smem:[#allocation55_spill]]  ;;  %v7600_v42 = vstv %s9457_s10  ;;  %v7604_v57 = vmul.f32 %v7387_v19, %v7370_v33  ;;  %v7614_v52 = vstv %s9461_s3  ;;  %v7750_v17 = vmul.f32 %v7387_v19, %v7482_v58 }
 0x559   : > { %s7606_s20 = sld [smem:[#allocation10 + $0x49]]  ;;  %9476 = vst [vmem:[#allocation112_spill] sm:$0xff] %v7614_v52  ;;  %v7711_v33 = vstv %s7298_s27 }
 0x55a   : > { %9471 = vst [vmem:[#allocation110_spill] sm:$0xff] %v7604_v57  ;;  %s9475_s9 = sld [smem:[#allocation57_spill]]  ;;  %9512 = vst [vmem:[#allocation140_spill] sm:$0xff] %v7711_v33 }
 0x55b   : > { %s7622_s10 = sld [smem:[#allocation10 + $0x50]]  ;;  %9527 = vst [vmem:[#allocation149_spill] sm:$0xff] %v7750_v17  ;;  %v7770_v17 = vstv %s9522_s6  ;;  %s5699_s6 = smov 112  }
 0x55c   : > { %4242 = vrot.lane.b32.xlu1 %v7015_v46, %s9403_s4  ;;  %4130 = vrot.lane.b32.xlu0 %v7092_v41, %s9393_s19  ;;  %s7326_s19 = sld [smem:[#allocation10 + $0x14]]  ;;  %9539 = vst [vmem:[#allocation155_spill] sm:$0xff] %v7770_v17 }
 0x55d   : > { %s9479_s25 = sld [smem:[#allocation58_spill]] }
 0x55e   : > { %s9480_s30 = sld [smem:[#allocation59_spill]]  ;;  %v7636_v15 = vstv %s9470_s18 }
 0x55f   : > { %9472 = sst [smem:[#allocation45_spill]] %s7606_s20  ;;  %9486 = vst [vmem:[#allocation119_spill] sm:$0xff] %v7636_v15 }
 0x560   : > { %4246 = vrot.lane.b32.xlu1 %v7035_v20, %s9403_s4  ;;  %4244 = vrot.lane.b32.xlu0 %v7027_v11, %s9403_s4  ;;  %s9482_s20 = sld [smem:[#allocation60_spill]]  ;;  %v7652_v36 = vstv %s9475_s9 }
 0x561   : > { %s9490_s3 = sld [smem:[#allocation63_spill]]  ;;  %9495 = vst [vmem:[#allocation124_spill] sm:$0xff] %v7652_v36 }
 0x562   : > { %s7700_s18 = sld [smem:[#allocation10 + $0x43]] }
 0x563   : > { %v7662_v27 = vstv %s9479_s25  ;;  %s9520_s27 = sld [smem:[#allocation89_spill]] }
 0x564   : > { %4250 = vrot.lane.b32.xlu1 %v7087_v21, %s9403_s4  ;;  %4248 = vrot.lane.b32.xlu0 %v7043_v61, %s9403_s4  ;;  %9498 = vst [vmem:[#allocation126_spill] sm:$0xff] %v7662_v27  ;;  %v7665_v6 = vstv %s9480_s30  ;;  %s9531_s9 = sld [smem:[#allocation97_spill]] }
 0x565   : > { %9499 = vst [vmem:[#allocation127_spill] sm:$0xff] %v7665_v6  ;;  %s9537_s25 = sld [smem:[#allocation43_spill]] }
 0x566   : > { %v7668_v51 = vstv %s9482_s20  ;;  %s9515_s20 = sld [smem:[#allocation85_spill]] }
 0x567   : > { %9500 = vst [vmem:[#allocation128_spill] sm:$0xff] %v7668_v51  ;;  %s7779_s30 = sld [smem:[#allocation10 + $0x37]] }
 0x568   : > { %4364 = vrot.lane.b32.xlu1 %v7015_v46, %s9432_s26  ;;  %4252 = vrot.lane.b32.xlu0 %v7092_v41, %s9403_s4  ;;  %s7484_s4 = sld [smem:[#allocation10 + $0x35]] }
 0x56a   : > { %v7473_v29 = vpop.permute.xlu1 %3884 }
 0x56b   : > { %9435 = vst [vmem:[#allocation90_spill] sm:$0xff] %v7473_v29  ;;  %v3007_v29 = vmul.f32 %v7335_v10, %v3002_v28  ;;  %v7504_v28 = vadd.f32 %v3033_v47, %v2977_v44  ;;  %v7507_v10 = vmul.f32 %v7332_v18, %v2987_v49  ;;  %v7523_v49 = vmul.f32 %v7332_v18, %v2988_v60  ;;  %v3804_v44 = vld [vmem:[#allocation2 + $0x52] sm:$0xff] }
 0x56c   : > { %4368 = vrot.lane.b32.xlu1 %v7035_v20, %s9432_s26  ;;  %4366 = vrot.lane.b32.xlu0 %v7027_v11, %s9432_s26  ;;  %v7544_v18 = vmul.f32 %v7294_v24, %v7087_v21  ;;  %v7547_v60 = vmul.f32 %v7301_v4, %v3790_v23  ;;  %v7562_v47 = vstv %s7191_s24  ;;  %v7565_v4 = vstv %s7195_s17  ;;  %s7589_s17 = sld [smem:[#allocation10 + $0x42]] }
 0x56d   : > { %v7529_v53 = vadd.f32 %v3007_v29, %v2951_v12  ;;  %9459 = vst [vmem:[#allocation107_spill] sm:$0xff] %v7565_v4  ;;  %s9468_s24 = sld [smem:[#allocation53_spill]]  ;;  %v7609_v12 = vmul.f32 %v7304_v2, %v3804_v44  ;;  %v7617_v23 = vstv %s9463_s5  ;;  %v7627_v44 = vstv %s9467_s21 }
 0x56e   : > { %9438 = sst [smem:[#allocation93_spill]] %s7484_s4  ;;  %v7512_v63 = vpop.permute.xlu1 %3998  ;;  %v7525_v48 = vpop.permute.xlu0 %3886  ;;  %9449 = vst [vmem:[#allocation103_spill] sm:$0xff] %v7544_v18  ;;  %9451 = vst [vmem:[#allocation104_spill] sm:$0xff] %v7547_v60  ;;  %v7620_v60 = vstv %s9464_s29  ;;  %v3832_v18 = vld [vmem:[#allocation2 + $0x54] sm:$0xff]  ;;  %v7759_v13 = vstv %s9515_s20  ;;  %s5695_s20 = smov 48  }
 0x56f   : > { %9441 = vst [vmem:[#allocation96_spill] sm:$0xff] %v7512_v63  ;;  %9443 = vst [vmem:[#allocation98_spill] sm:$0xff] %v7525_v48  ;;  %s9450_s4 = sld [smem:[#allocation44_spill]]  ;;  %v7643_v48 = vstv %s7247_s22  ;;  %v7673_v35 = vmul.f32 %v7310_v30, %v3832_v18  ;;  %v7695_v18 = vstv %s7283_s15 }
 0x570   : > { %4372 = vrot.lane.b32.xlu1 %v7087_v21, %s9432_s26  ;;  %4370 = vrot.lane.b32.xlu0 %v7043_v61, %s9432_s26  ;;  %9460 = sst [smem:[#allocation44_spill]] %s7573_s2  ;;  %9473 = vst [vmem:[#allocation111_spill] sm:$0xff] %v7609_v12  ;;  %9477 = vst [vmem:[#allocation113_spill] sm:$0xff] %v7617_v23 }
 0x571   : > { %s9469_s2 = sld [smem:[#allocation54_spill]]  ;;  %9478 = vst [vmem:[#allocation114_spill] sm:$0xff] %v7620_v60  ;;  %9483 = vst [vmem:[#allocation116_spill] sm:$0xff] %v7627_v44 }
 0x572   : > { %v7559_v24 = vpop.permute.xlu1 %4002  ;;  %v7575_v29 = vpop.permute.xlu0 %4000  ;;  %s9487_s5 = sld [smem:[#allocation61_spill]]  ;;  %9491 = vst [vmem:[#allocation121_spill] sm:$0xff] %v7643_v48  ;;  %9501 = vst [vmem:[#allocation129_spill] sm:$0xff] %v7673_v35 }
 0x573   : > { %9458 = vst [vmem:[#allocation106_spill] sm:$0xff] %v7559_v24  ;;  %9462 = vst [vmem:[#allocation108_spill] sm:$0xff] %v7575_v29  ;;  %v7630_v12 = vstv %s9468_s24  ;;  %s9488_s29 = sld [smem:[#allocation62_spill]] }
 0x574   : > { %4486 = vrot.lane.b32.xlu1 %v7015_v46, %s9466_s16  ;;  %v3818_v46 = vld [vmem:[#allocation2 + $0x53] sm:$0xff]  ;;  %4374 = vrot.lane.b32.xlu0 %v7092_v41, %s9432_s26  ;;  %9484 = vst [vmem:[#allocation117_spill] sm:$0xff] %v7630_v12  ;;  %s7638_s26 = sld [smem:[#allocation10 + $0x57]]  ;;  %9507 = vst [vmem:[#allocation135_spill] sm:$0xff] %v7695_v18 }
 0x575   : > { %v7584_v55 = vstv %s9450_s4  ;;  %s9474_s4 = sld [smem:[#allocation56_spill]]  ;;  %v7657_v62 = vmul.f32 %v7307_v9, %v3818_v46  ;;  %v7684_v46 = vstv %s9490_s3  ;;  %9533 = vst [vmem:[#allocation152_spill] sm:$0xff] %v7759_v13 }
 0x576   : > { %v7624_v2 = vpop.permute.xlu1 %4006  ;;  %v7640_v24 = vpop.permute.xlu0 %4004  ;;  %s9494_s21 = sld [smem:[#allocation64_spill]]  ;;  %9504 = vst [vmem:[#allocation132_spill] sm:$0xff] %v7684_v46 }
 0x577   : > { %9481 = vst [vmem:[#allocation115_spill] sm:$0xff] %v7624_v2  ;;  %v7633_v39 = vstv %s9469_s2  ;;  %9489 = vst [vmem:[#allocation120_spill] sm:$0xff] %v7640_v24  ;;  %v7649_v2 = vstv %s7251_s11  ;;  %s9496_s2 = sld [smem:[#allocation65_spill]] }
 0x578   : > { %9485 = vst [vmem:[#allocation118_spill] sm:$0xff] %v7633_v39  ;;  %9493 = vst [vmem:[#allocation123_spill] sm:$0xff] %v7649_v2  ;;  %s7654_s24 = sld [smem:[#allocation10 + $0x5e]]  ;;  %4490 = vrot.lane.b32.xlu1 %v7035_v20, %s9466_s16  ;;  %4488 = vrot.lane.b32.xlu0 %v7027_v11, %s9466_s16  ;;  %v7678_v9 = vstv %s9487_s5  ;;  %v7698_v11 = vstv %s7285_s0 }
 0x579   : > { %9497 = vst [vmem:[#allocation125_spill] sm:$0xff] %v7657_v62  ;;  %s7670_s11 = sld [smem:[#allocation10 + $0x36]]  ;;  %9502 = vst [vmem:[#allocation130_spill] sm:$0xff] %v7678_v9  ;;  %v7681_v20 = vstv %s9488_s29 }
 0x57a   : > { %9503 = vst [vmem:[#allocation131_spill] sm:$0xff] %v7681_v20  ;;  %s7686_s22 = sld [smem:[#allocation10 + $0x3c]]  ;;  %v3047_v62 = vpop.permute.xlu1 %3046  ;;  %9508 = vst [vmem:[#allocation136_spill] sm:$0xff] %v7698_v11  ;;  %v7702_v35 = vpop.permute.xlu0 %4008  ;;  %v7724_v11 = vstv %s7339_s13 }
 0x57b   : > { %v7646_v57 = vstv %s9474_s4  ;;  %9509 = vst [vmem:[#allocation137_spill] sm:$0xff] %v7702_v35  ;;  %3058 = vst [vmem:[#allocation4] sm:$0xff] %v3047_v62  ;;  %s9514_s15 = sld [smem:[#allocation82_spill]]  ;;  %v7721_v35 = vstv %s7326_s19 }
 0x57c   : > { %9492 = vst [vmem:[#allocation122_spill] sm:$0xff] %v7646_v57  ;;  %v7689_v3 = vstv %s9494_s21  ;;  %s7716_s0 = sld [smem:[#allocation10 + $0x4a]]  ;;  %4494 = vrot.lane.b32.xlu1 %v7087_v21, %s9466_s16  ;;  %9517 = vst [vmem:[#allocation142_spill] sm:$0xff] %v7721_v35  ;;  %4492 = vrot.lane.b32.xlu0 %v7043_v61, %s9466_s16  ;;  %v7741_v21 = vstv %s7384_s12 }
 0x57d   : > { %9505 = vst [vmem:[#allocation133_spill] sm:$0xff] %v7689_v3  ;;  %v7692_v30 = vstv %s9496_s2  ;;  %s9516_s4 = sld [smem:[#allocation88_spill]]  ;;  %9518 = vst [vmem:[#allocation143_spill] sm:$0xff] %v7724_v11  ;;  %v7744_v35 = vstv %s7401_s23 }
 0x57e   : > { %9506 = vst [vmem:[#allocation134_spill] sm:$0xff] %v7692_v30  ;;  %v7714_v30 = vstv %s7312_s8  ;;  %s9524_s8 = sld [smem:[#allocation93_spill]]  ;;  %9525 = vst [vmem:[#allocation147_spill] sm:$0xff] %v7741_v21  ;;  %v3049_v21 = vpop.permute.xlu0 %3048 }
 0x57f   : > { %9513 = vst [vmem:[#allocation141_spill] sm:$0xff] %v7714_v30  ;;  %v7733_v30 = vmul.f32 %v7387_v19, %v7437_v59  ;;  %9526 = vst [vmem:[#allocation148_spill] sm:$0xff] %v7744_v35  ;;  %s7746_s19 = sld [smem:[#allocation10 + $0x58]]  ;;  %v3051_v59 = vpop.permute.xlu1 %3050  ;;  %v7767_v19 = vstv %s9520_s27  ;;  %v3071_v17 = vmul.f32 %v7552_v22, %v3049_v21  ;;  %s5698_s27 = smov 96  }
 0x580   : > { %s9528_s13 = sld [smem:[#allocation94_spill]]  ;;  %3060 = vst [vmem:[#allocation4 + $0x10] sm:$0xff] %v3051_v59  ;;  %9538 = vst [vmem:[#allocation154_spill] sm:$0xff] %v7767_v19  ;;  %v7786_v59 = vstv %s9529_s14  ;;  %v7789_v19 = vstv %s9531_s9  ;;  %4496 = vrot.lane.b32.xlu0 %v7092_v41, %s9466_s16  ;;  %v7815_v41 = vmul.f32 %v7555_v14, %v7575_v29 }
 0x581   : > { %9521 = vst [vmem:[#allocation145_spill] sm:$0xff] %v7733_v30  ;;  %v7753_v30 = vstv %s7413_s1  ;;  %v7756_v61 = vstv %s9514_s15  ;;  %s7764_s12 = sld [smem:[#allocation10 + $0x5f]]  ;;  %3059 = vst [vmem:[#allocation4 + $0x8] sm:$0xff] %v3049_v21  ;;  %v7819_v21 = vmul.f32 %v7555_v14, %v7640_v24  ;;  %v7836_v24 = vstv %s7654_s24  ;;  %s5693_s15 = smov 16  }
 0x582   : > { %9530 = vst [vmem:[#allocation150_spill] sm:$0xff] %v7753_v30  ;;  %9532 = vst [vmem:[#allocation151_spill] sm:$0xff] %v7756_v61  ;;  %s9536_s23 = sld [smem:[#allocation102_spill]]  ;;  %v7774_v30 = vmul.f32 %v7555_v14, %v7512_v63 }
 0x583   : > { %v7762_v11 = vstv %s9516_s4  ;;  %s9540_s1 = sld [smem:[#allocation44_spill]]  ;;  %9544 = vst [vmem:[#allocation159_spill] sm:$0xff] %v7786_v59  ;;  %9545 = vst [vmem:[#allocation160_spill] sm:$0xff] %v7789_v19  ;;  %v7809_v19 = vstv %s7589_s17  ;;  %s5696_s4 = smov 64  }
 0x584   : > { %9534 = vst [vmem:[#allocation153_spill] sm:$0xff] %v7762_v11  ;;  %9541 = vst [vmem:[#allocation156_spill] sm:$0xff] %v7774_v30  ;;  %v7777_v13 = vstv %s9524_s8  ;;  %v3070_v11 = vmul.f32 %v7552_v22, %v3047_v62  ;;  %s9546_s5 = sld [smem:[#allocation45_spill]]  ;;  %v7795_v30 = vstv %s9535_s7  ;;  %v7801_v62 = vstv %s9537_s25 }
 0x585   : > { %9542 = vst [vmem:[#allocation157_spill] sm:$0xff] %v7777_v13  ;;  %9547 = vst [vmem:[#allocation161_spill] sm:$0xff] %v7795_v30  ;;  %s7803_s29 = sld [smem:[#allocation10 + $0x3d]]  ;;  %v7829_v30 = vstv %s7638_s26 }
 0x586   : > { %v7783_v61 = vstv %s9528_s13  ;;  %9549 = vst [vmem:[#allocation163_spill] sm:$0xff] %v7801_v62  ;;  %9551 = vst [vmem:[#allocation165_spill] sm:$0xff] %v7809_v19  ;;  %s7811_s3 = sld [smem:[#allocation10 + $0x44]]  ;;  %v3053_v62 = vpop.permute.xlu0 %3052  ;;  %v7826_v19 = vstv %s7622_s10  ;;  %v3074_v14 = vadd.f32 %v3070_v11, %v7448_v16  ;;  %v7861_v11 = vstv %s7729_s28  ;;  %s5697_s28 = smov 80  }
 0x587   : > { %9543 = vst [vmem:[#allocation158_spill] sm:$0xff] %v7783_v61  ;;  %v3055_v61 = vpop.permute.xlu1 %3054  ;;  %9552 = vst [vmem:[#allocation166_spill] sm:$0xff] %v7815_v41  ;;  %s7831_s17 = sld [smem:[#allocation10 + $0x4b]]  ;;  %v7839_v41 = vstv %s7670_s11 }
 0x588   : > { %v7798_v63 = vstv %s9536_s23  ;;  %9553 = vst [vmem:[#allocation167_spill] sm:$0xff] %v7819_v21  ;;  %3062 = vst [vmem:[#allocation4 + $0x20] sm:$0xff] %v3055_v61  ;;  %v3072_v21 = vmul.f32 %v7552_v22, %v3053_v62  ;;  %s7841_s16 = sld [smem:[#allocation10 + $0x52]]  ;;  %v3094_v58 = vld [vmem:[#allocation4 + $0xa] sm:$0xff] }
 0x589   : > { %9548 = vst [vmem:[#allocation162_spill] sm:$0xff] %v7798_v63  ;;  %v7806_v59 = vstv %s9540_s1  ;;  %9555 = vst [vmem:[#allocation169_spill] sm:$0xff] %v7826_v19  ;;  %v7847_v19 = vstv %s7686_s22  ;;  %s7855_s10 = sld [smem:[#allocation10 + $0x59]] }
 0x58a   : > { %9550 = vst [vmem:[#allocation164_spill] sm:$0xff] %v7806_v59  ;;  %v3073_v59 = vmul.f32 %v7552_v22, %v3055_v61  ;;  %v7823_v63 = vstv %s9546_s5  ;;  %9556 = vst [vmem:[#allocation170_spill] sm:$0xff] %v7829_v30  ;;  %v7844_v61 = vadd.f32 %v3071_v17, %v7470_v56  ;;  %v7850_v30 = vstv %s7700_s18  ;;  %s7869_s26 = sld [smem:[#allocation10 + $0x60]]  ;;  %v3079_v56 = vld [vmem:[#allocation4 + $0x1] sm:$0xff] }
 0x58b   : > { %9554 = vst [vmem:[#allocation168_spill] sm:$0xff] %v7823_v63  ;;  %3061 = vst [vmem:[#allocation4 + $0x18] sm:$0xff] %v3053_v62  ;;  %v7853_v63 = vstv %s7716_s0  ;;  %v3169_v22 = vpop.permute.xlu1 %3168  ;;  %v7864_v62 = vstv %s7746_s19  ;;  %v7867_v17 = vstv %s7764_s12  ;;  %s7881_s21 = sld [smem:[#allocation10 + $0x3e]]  ;;  %v3084_v13 = vmul.f32 %v7568_v32, %v3079_v56  ;;  %v3136_v56 = vld [vmem:[#allocation4 + $0xd] sm:$0xff]  ;;  %s5694_s0 = smov 32  }
 0x58c   : > { %9557 = vst [vmem:[#allocation171_spill] sm:$0xff] %v7836_v24  ;;  %9558 = vst [vmem:[#allocation172_spill] sm:$0xff] %v7839_v41  ;;  %v7858_v16 = vadd.f32 %v3073_v59, %v7523_v49  ;;  %v3057_v24 = vpop.permute.xlu0 %3056  ;;  %v3192_v49 = vmul.f32 %v7565_v4, %v3169_v22  ;;  %v7876_v59 = vstv %s7803_s29  ;;  %v7879_v41 = vstv %s7779_s30  ;;  %s7889_s2 = sld [smem:[#allocation10 + $0x45]] }
 0x58d   : > { %9559 = vst [vmem:[#allocation173_spill] sm:$0xff] %v7847_v19  ;;  %9560 = vst [vmem:[#allocation174_spill] sm:$0xff] %v7850_v30  ;;  %v3093_v30 = vld [vmem:[#allocation4 + $0x2] sm:$0xff]  ;;  %s7897_s24 = sld [smem:[#allocation10 + $0x4c]] }
 0x58e   : > { %9561 = vst [vmem:[#allocation175_spill] sm:$0xff] %v7853_v63  ;;  %9562 = vst [vmem:[#allocation176_spill] sm:$0xff] %v7858_v16  ;;  %v3107_v19 = vld [vmem:[#allocation4 + $0x3] sm:$0xff]  ;;  %v7872_v63 = vadd.f32 %v3072_v21, %v7507_v10  ;;  %v3098_v10 = vmul.f32 %v7571_v54, %v3093_v30  ;;  %v7887_v21 = vstv %s7811_s3  ;;  %v3122_v30 = vld [vmem:[#allocation4 + $0xc] sm:$0xff]  ;;  %s7903_s11 = sld [smem:[#allocation10 + $0x53]]  ;;  %v7908_v20 = vstv %s7841_s16 }
 0x58f   : > { %9563 = vst [vmem:[#allocation177_spill] sm:$0xff] %v7861_v11  ;;  %9564 = vst [vmem:[#allocation178_spill] sm:$0xff] %v7864_v62  ;;  %v3121_v62 = vld [vmem:[#allocation4 + $0x4] sm:$0xff]  ;;  %v3112_v29 = vmul.f32 %v7562_v47, %v3107_v19  ;;  %v7895_v19 = vstv %s7831_s17  ;;  %v7911_v9 = vstv %s7855_s10  ;;  %s7913_s22 = sld [smem:[#allocation10 + $0x5a]]  ;;  %s5700_s17 = smov [#allocation11]  }
 0x590   : > { %9565 = vst [vmem:[#allocation179_spill] sm:$0xff] %v7867_v17  ;;  %9566 = vst [vmem:[#allocation180_spill] sm:$0xff] %v7876_v59  ;;  %v3135_v17 = vld [vmem:[#allocation4 + $0x5] sm:$0xff]  ;;  %v3126_v35 = vmul.f32 %v7578_v43, %v3121_v62  ;;  %v3088_v62 = vadd.f32 %v3084_v13, %v7450_v7  ;;  %v3171_v16 = vpop.permute.xlu0 %3170  ;;  %s7922_s18 = sld [smem:[#allocation10 + $0x61]]  ;;  %s5605_s16 = sshll.u32 %s5700_s17, 4  ;;  %s5606_s16 = int_to_ptr.vmem [resolvable:$false] %s5605_s16 }
 0x591   : > { %9567 = vst [vmem:[#allocation181_spill] sm:$0xff] %v7879_v41  ;;  %v3149_v11 = vld [vmem:[#allocation4 + $0x6] sm:$0xff]  ;;  %3063 = vst [vmem:[#allocation4 + $0x28] sm:$0xff] %v3057_v24  ;;  %v3140_v18 = vmul.f32 %v7581_v25, %v3135_v17  ;;  %v3116_v33 = vadd.f32 %v3112_v29, %v7458_v45  ;;  %v3102_v17 = vadd.f32 %v3098_v10, %v7456_v1  ;;  %v7927_v10 = vstv %s7869_s26  ;;  %s9888_s8 = sld [smem:[#allocation25_spill]]  ;;  %s5607_s10 = scalar_lea.vmem %s5606_s16, 4096 }
 0x592   : > { %9568 = vst [vmem:[#allocation182_spill] sm:$0xff] %v7887_v21  ;;  %v3080_v59 = vld [vmem:[#allocation4 + $0x9] sm:$0xff]  ;;  %3180 = vst [vmem:[#allocation4] sm:$0xff] %v3169_v22  ;;  %v3154_v24 = vmul.f32 %v7584_v55, %v3149_v11  ;;  %v3173_v22 = vpop.permute.xlu1 %3172  ;;  %v3109_v11 = vld [vmem:[#allocation4 + $0x1b] sm:$0xff]  ;;  %s9895_s19 = sld [smem:[#allocation19_spill]] }
 0x593   : > { %v3108_v41 = vld [vmem:[#allocation4 + $0xb] sm:$0xff]  ;;  %9569 = vst [vmem:[#allocation183_spill] sm:$0xff] %v7895_v19  ;;  %v7905_v19 = vadd.f32 %v3126_v35, %v3074_v14  ;;  %9570 = vst [vmem:[#allocation184_spill] sm:$0xff] %v7908_v20  ;;  %v3085_v45 = vmul.f32 %v7568_v32, %v3080_v59  ;;  %v7917_v1 = vadd.f32 %v3192_v49, %v3116_v33  ;;  %v3081_v35 = vld [vmem:[#allocation4 + $0x19] sm:$0xff]  ;;  %v7930_v59 = vstv %s7881_s21  ;;  %s9898_s13 = sld [smem:[#allocation24_spill]] }
 0x594   : > { %v3150_v21 = vld [vmem:[#allocation4 + $0xe] sm:$0xff]  ;;  %v3113_v3 = vmul.f32 %v7562_v47, %v3108_v41  ;;  %9571 = vst [vmem:[#allocation185_spill] sm:$0xff] %v7911_v9  ;;  %v3114_v7 = vmul.f32 %v7562_v47, %v3109_v11  ;;  %v7920_v29 = vadd.f32 %v3140_v18, %v3088_v62  ;;  %v3095_v14 = vld [vmem:[#allocation4 + $0x1a] sm:$0xff]  ;;  %v7924_v41 = vadd.f32 %v3154_v24, %v3102_v17  ;;  %s9903_s1 = sld [smem:[#allocation220_spill]] }
 0x595   : > { %3182 = vst [vmem:[#allocation4 + $0x10] sm:$0xff] %v3173_v22  ;;  %3181 = vst [vmem:[#allocation4 + $0x8] sm:$0xff] %v3171_v16  ;;  %v3123_v33 = vld [vmem:[#allocation4 + $0x1c] sm:$0xff]  ;;  %v7939_v62 = vstv %s7889_s2  ;;  %v3099_v24 = vmul.f32 %v7571_v54, %v3094_v58  ;;  %v3127_v17 = vmul.f32 %v7578_v43, %v3122_v30  ;;  %v7962_v34 = vstv %s7903_s11  ;;  %s9904_s5 = sld [smem:[#allocation22_spill]] }
 0x596   : > { %v3117_v13 = vadd.f32 %v3113_v3, %v7504_v28  ;;  %9572 = vst [vmem:[#allocation186_spill] sm:$0xff] %v7927_v10  ;;  %9573 = vst [vmem:[#allocation187_spill] sm:$0xff] %v7930_v59  ;;  %v3089_v3 = vadd.f32 %v3085_v45, %v7477_v50  ;;  %v3137_v28 = vld [vmem:[#allocation4 + $0x1d] sm:$0xff]  ;;  %v3118_v18 = vadd.f32 %v3114_v7, %v7520_v0  ;;  %v7936_v22 = vpop.permute.xlu1 %3176  ;;  %v3175_v45 = vpop.permute.xlu0 %3174  ;;  %v7948_v10 = vstv %s7897_s24 }
 0x597   : > { %v7933_v49 = vld [vmem:[#allocation4 + $0x1e] sm:$0xff]  ;;  %9574 = vst [vmem:[#allocation188_spill] sm:$0xff] %v7936_v22  ;;  %9575 = vst [vmem:[#allocation189_spill] sm:$0xff] %v7939_v62  ;;  %v3141_v0 = vmul.f32 %v7581_v25, %v3136_v56  ;;  %v3155_v7 = vmul.f32 %v7584_v55, %v3150_v21  ;;  %v3193_v62 = vmul.f32 %v7565_v4, %v3171_v16  ;;  %v7967_v21 = vstv %s7913_s22 }
 0x598   : > { %v7943_v11 = vld [vmem:[#allocation4 + $0x21] sm:$0xff]  ;;  %9576 = vst [vmem:[#allocation190_spill] sm:$0xff] %v7948_v10  ;;  %3183 = vst [vmem:[#allocation4 + $0x18] sm:$0xff] %v3175_v45  ;;  %v3194_v51 = vmul.f32 %v7565_v4, %v3175_v45  ;;  %v3103_v56 = vadd.f32 %v3099_v24, %v7494_v5  ;;  %v3131_v16 = vadd.f32 %v3127_v17, %v7844_v61  ;;  %s5418_s14 = sshll.u32 %s9895_s19, 11 }
 0x599   : > { %v7945_v59 = vld [vmem:[#allocation4 + $0x22] sm:$0xff]  ;;  %9578 = vst [vmem:[#allocation192_spill] sm:$0xff] %v7962_v34  ;;  %9579 = vst [vmem:[#allocation193_spill] sm:$0xff] %v7967_v21  ;;  %v3145_v10 = vadd.f32 %v3141_v0, %v3089_v3  ;;  %v3197_v6 = vadd.f32 %v3193_v62, %v3117_v13  ;;  %v3086_v21 = vmul.f32 %v7568_v32, %v3081_v35  ;;  %s9902_s9 = sshll.u32 %s9898_s13, 7  ;;  %s5100_s29 = scalar_lea.sflag [#allocation8], %s9898_s13 }
 0x59a   : > { %v3110_v50 = vld [vmem:[#allocation4 + $0x23] sm:$0xff]  ;;  %v3159_v45 = vadd.f32 %v3155_v7, %v3103_v56  ;;  %v3179_v24 = vpop.permute.xlu0 %3178  ;;  %v3100_v61 = vmul.f32 %v7571_v54, %v3095_v14  ;;  %v3128_v13 = vmul.f32 %v7578_v43, %v3123_v33  ;;  %v3142_v17 = vmul.f32 %v7581_v25, %v3137_v28  ;;  %s230_s7 = scalar_lea.vmem [#allocation11], %s9902_s9  ;;  %s9069_s30 = scalar_lea.hbm %s9903_s1, %s5418_s14 }
 0x59b   : > { %v7953_v9 = vld [vmem:[#allocation4 + $0x24] sm:$0xff]  ;;  %v3115_v20 = vmul.f32 %v7562_v47, %v3110_v50  ;;  %v3291_v47 = vpop.permute.xlu1 %3290  ;;  %v7976_v50 = vstv %s7922_s18  ;;  %s5114_s12 = sshll.u32 %s230_s7, 4  ;;  %p9905_p0 = scmp.ne.s32.totalorder %s9904_s5, 0  ;;  %s9071_s12 = int_to_ptr.vmem [resolvable:$true] %s5114_s12 }
 0x59c   : > { %v7955_v58 = vld [vmem:[#allocation4 + $0x25] sm:$0xff]  ;;  %9581 = vst [vmem:[#allocation195_spill] sm:$0xff] %v7976_v50  ;;  %s5601_s3 = scalar_lea.vmem %s9071_s12, 2048  ;;  %p5608_p8 = scmp.lt.s32.totalorder %s9071_s12, %s5606_s16 }
 0x59d   : > { %v7957_v30 = vld [vmem:[#allocation4 + $0x26] sm:$0xff]  ;;  %v7971_v27 = vadd.f32 %v3115_v20, %v7533_v40  ;;  %p5602_p12 = scmp.ne.s32.totalorder %s9071_s12, %s5601_s3  ;;  %p5609_p9 = scmp.lt.s32.totalorder %s5607_s10, %s5601_s3 }
 0x59e   : > { %9577 = vst [vmem:[#allocation191_spill] sm:$0xff] %v7957_v30  ;;  %3184 = vst [vmem:[#allocation4 + $0x20] sm:$0xff] %v7936_v22  ;;  %v7973_v30 = vadd.f32 %v3194_v51, %v3118_v18  ;;  %v3201_v34 = vld [vmem:[#allocation4 + $0x1] sm:$0xff]  ;;  %v3314_v22 = vmul.f32 %v7620_v60, %v3291_v47  ;;  %v3202_v0 = vld [vmem:[#allocation4 + $0x9] sm:$0xff]  ;;  %v3293_v46 = vpop.permute.xlu0 %3292 }
 0x59f   : > { %9580 = vst [vmem:[#allocation194_spill] sm:$0xff] %v7971_v27  ;;  %v3215_v4 = vld [vmem:[#allocation4 + $0x2] sm:$0xff]  ;;  %3185 = vst [vmem:[#allocation4 + $0x28] sm:$0xff] %v3179_v24  ;;  %v3206_v3 = vmul.f32 %v7587_v8, %v3201_v34  ;;  %v3216_v7 = vld [vmem:[#allocation4 + $0xa] sm:$0xff]  ;;  %v3090_v24 = vadd.f32 %v3086_v21, %v7516_v31  ;;  %p5603_p2 = pnand %p5602_p12, %p9905_p0  ;;  %p5610_p10 = por %p5609_p9, %p5608_p8 }
 0x5a0   : > { %v3229_v5 = vld [vmem:[#allocation4 + $0x3] sm:$0xff]  ;;  %v3220_v18 = vmul.f32 %v7594_v38, %v3215_v4  ;;  %v3230_v56 = vld [vmem:[#allocation4 + $0xb] sm:$0xff]  ;;  %v3295_v4 = vpop.permute.xlu1 %3294 }
 0x5a1   : > { %v3243_v40 = vld [vmem:[#allocation4 + $0x4] sm:$0xff]  ;;  %v3234_v62 = vmul.f32 %v7597_v26, %v3229_v5  ;;  %v3244_v50 = vld [vmem:[#allocation4 + $0xc] sm:$0xff]  ;;  %v3210_v5 = vadd.f32 %v3206_v3, %v7905_v19  ;;  %v3235_v31 = vmul.f32 %v7597_v26, %v3230_v56  ;;  %p5604_p7 = pneg %p5603_p2 }
 0x5a2   : > { %v3257_v20 = vld [vmem:[#allocation4 + $0x5] sm:$0xff]  ;;  %v3248_v35 = vmul.f32 %v7600_v42, %v3243_v40  ;;  %v3258_v34 = vld [vmem:[#allocation4 + $0xd] sm:$0xff]  ;;  %v3224_v28 = vadd.f32 %v3220_v18, %v7920_v29  ;;  %v3249_v21 = vmul.f32 %v7600_v42, %v3244_v50 }
 0x5a3   : > { %v3271_v51 = vld [vmem:[#allocation4 + $0x6] sm:$0xff]  ;;  %v3262_v14 = vmul.f32 %v7614_v52, %v3257_v20  ;;  %v3272_v27 = vld [vmem:[#allocation4 + $0xe] sm:$0xff]  ;;  %v3238_v36 = vadd.f32 %v3234_v62, %v7924_v41  ;;  %v3221_v20 = vmul.f32 %v7594_v38, %v3216_v7  ;;  %v3263_v7 = vmul.f32 %v7614_v52, %v3258_v34  ;;  %p5611_p1 = pnand %p5610_p10, %p5604_p7 }
 0x5a4   : > { %3302 = vst [vmem:[#allocation4] sm:$0xff] %v3291_v47  ;;  %v3276_v33 = vmul.f32 %v7617_v23, %v3271_v51  ;;  %v3207_v47 = vmul.f32 %v7587_v8, %v3202_v0  ;;  %3304 = vst [vmem:[#allocation4 + $0x10] sm:$0xff] %v3295_v4  ;;  %v7995_v40 = vadd.f32 %v3248_v35, %v7917_v1  ;;  %v8009_v25 = vpop.permute.xlu1 %3298 }
 0x5a5   : > { %v3203_v51 = vld [vmem:[#allocation4 + $0x19] sm:$0xff]  ;;  %3303 = vst [vmem:[#allocation4 + $0x8] sm:$0xff] %v3293_v46  ;;  %v8000_v19 = vadd.f32 %v3262_v14, %v3210_v5  ;;  %v8004_v41 = vadd.f32 %v3314_v22, %v3238_v36  ;;  %v3225_v0 = vadd.f32 %v3221_v20, %v3145_v10  ;;  %v3239_v1 = vadd.f32 %v3235_v31, %v3159_v45  ;;  %v3297_v45 = vpop.permute.xlu0 %3296 }
 0x5a6   : > { %v8002_v29 = vadd.f32 %v3276_v33, %v3224_v28  ;;  %v3211_v3 = vadd.f32 %v3207_v47, %v3131_v16  ;;  %v3217_v18 = vld [vmem:[#allocation4 + $0x1a] sm:$0xff]  ;;  %v8006_v35 = vadd.f32 %v3249_v21, %v3197_v6  ;;  %9582 = vst [vmem:[#allocation196_spill] sm:$0xff] %v8009_v25  ;;  %v3277_v14 = vmul.f32 %v7617_v23, %v3272_v27  ;;  %v8017_v10 = vld [vmem:[#allocation4 + $0x22] sm:$0xff] }
 0x5a7   : > { %v3231_v62 = vld [vmem:[#allocation4 + $0x1b] sm:$0xff]  ;;  %v3315_v33 = vmul.f32 %v7620_v60, %v3293_v46  ;;  %v3104_v36 = vadd.f32 %v3100_v61, %v7518_v37  ;;  %v3132_v22 = vadd.f32 %v3128_v13, %v7872_v63  ;;  %v8019_v6 = vld [vmem:[#allocation4 + $0x23] sm:$0xff]  ;;  %v3146_v5 = vadd.f32 %v3142_v17, %v3090_v24 }
 0x5a8   : > { %v3245_v56 = vld [vmem:[#allocation4 + $0x1c] sm:$0xff]  ;;  %v3267_v34 = vadd.f32 %v3263_v7, %v3211_v3  ;;  %v3156_v28 = vmul.f32 %v7584_v55, %v7933_v49  ;;  %v3208_v27 = vmul.f32 %v7587_v8, %v3203_v51  ;;  %v8024_v47 = vld [vmem:[#allocation4 + $0x24] sm:$0xff]  ;;  %v3281_v63 = vadd.f32 %v3277_v14, %v3225_v0  ;;  %v3413_v21 = vpop.permute.xlu1 %3412 }
 0x5a9   : > { %v3259_v4 = vld [vmem:[#allocation4 + $0x1d] sm:$0xff]  ;;  %v8026_v46 = vld [vmem:[#allocation4 + $0x25] sm:$0xff]  ;;  %v8030_v61 = vadd.f32 %v3315_v33, %v3239_v1  ;;  %v3222_v13 = vmul.f32 %v7594_v38, %v3217_v18  ;;  %v3236_v20 = vmul.f32 %v7597_v26, %v3231_v62  ;;  %v3250_v24 = vmul.f32 %v7600_v42, %v3245_v56  ;;  %v3301_v14 = vpop.permute.xlu0 %3300 }
 0x5aa   : > { %v3273_v50 = vld [vmem:[#allocation4 + $0x1e] sm:$0xff]  ;;  %9583 = vst [vmem:[#allocation197_spill] sm:$0xff] %v8026_v46  ;;  %v8028_v37 = vld [vmem:[#allocation4 + $0x26] sm:$0xff]  ;;  %v3160_v17 = vadd.f32 %v3156_v28, %v3104_v36  ;;  %v3212_v49 = vadd.f32 %v3208_v27, %v3132_v22  ;;  %v3264_v31 = vmul.f32 %v7614_v52, %v3259_v4  ;;  %v3316_v0 = vmul.f32 %v7620_v60, %v3297_v45 }
 0x5ab   : > { %v8015_v16 = vld [vmem:[#allocation4 + $0x21] sm:$0xff]  ;;  %9584 = vst [vmem:[#allocation198_spill] sm:$0xff] %v8028_v37  ;;  %3305 = vst [vmem:[#allocation4 + $0x18] sm:$0xff] %v3297_v45  ;;  %v3226_v51 = vadd.f32 %v3222_v13, %v3146_v5  ;;  %v3278_v3 = vmul.f32 %v7617_v23, %v3273_v50  ;;  %v8041_v1 = vmul.f32 %v7568_v32, %v7943_v11  ;;  %v9677_v52 = vld [vmem:[#allocation145_spill] sm:$0xff] }
 0x5ac   : > { %3306 = vst [vmem:[#allocation4 + $0x20] sm:$0xff] %v8009_v25  ;;  %v3324_v18 = vld [vmem:[#allocation4 + $0x9] sm:$0xff]  ;;  %v3436_v33 = vmul.f32 %v7649_v2, %v3413_v21  ;;  %v3240_v36 = vadd.f32 %v3236_v20, %v3160_v17  ;;  %v8045_v56 = vadd.f32 %v3250_v24, %v7973_v30  ;;  %v8047_v4 = vadd.f32 %v3264_v31, %v3212_v49  ;;  %v3323_v27 = vld [vmem:[#allocation4 + $0x1] sm:$0xff]  ;;  %v3417_v25 = vpop.permute.xlu1 %3416 }
 0x5ad   : > { %v3338_v62 = vld [vmem:[#allocation4 + $0xa] sm:$0xff]  ;;  %3307 = vst [vmem:[#allocation4 + $0x28] sm:$0xff] %v3301_v14  ;;  %v3329_v45 = vmul.f32 %v7627_v44, %v3324_v18  ;;  %v3282_v28 = vadd.f32 %v3278_v3, %v3226_v51  ;;  %v3337_v13 = vld [vmem:[#allocation4 + $0x2] sm:$0xff]  ;;  %v3328_v18 = vmul.f32 %v7627_v44, %v3323_v27 }
 0x5ae   : > { %v3352_v7 = vld [vmem:[#allocation4 + $0xb] sm:$0xff]  ;;  %v3343_v32 = vmul.f32 %v7630_v12, %v3338_v62  ;;  %v3351_v60 = vld [vmem:[#allocation4 + $0x3] sm:$0xff]  ;;  %v3320_v49 = vadd.f32 %v3316_v0, %v3240_v36  ;;  %v3342_v62 = vmul.f32 %v7630_v12, %v3337_v13 }
 0x5af   : > { %v3366_v22 = vld [vmem:[#allocation4 + $0xc] sm:$0xff]  ;;  %v3357_v11 = vmul.f32 %v7633_v39, %v3352_v7  ;;  %v3365_v24 = vld [vmem:[#allocation4 + $0x4] sm:$0xff]  ;;  %v3356_v51 = vmul.f32 %v7633_v39, %v3351_v60  ;;  %v3333_v3 = vadd.f32 %v3329_v45, %v8006_v35  ;;  %v3415_v7 = vpop.permute.xlu0 %3414  ;;  %v3332_v13 = vadd.f32 %v3328_v18, %v7995_v40 }
 0x5b0   : > { %v3380_v50 = vld [vmem:[#allocation4 + $0xd] sm:$0xff]  ;;  %v3371_v20 = vmul.f32 %v7636_v15, %v3366_v22  ;;  %v3379_v31 = vld [vmem:[#allocation4 + $0x5] sm:$0xff]  ;;  %v3370_v22 = vmul.f32 %v7636_v15, %v3365_v24  ;;  %v3347_v36 = vadd.f32 %v3343_v32, %v3267_v34  ;;  %v3346_v60 = vadd.f32 %v3342_v62, %v8000_v19 }
 0x5b1   : > { %v3394_v5 = vld [vmem:[#allocation4 + $0xe] sm:$0xff]  ;;  %v3385_v30 = vmul.f32 %v7643_v48, %v3380_v50  ;;  %v3393_v14 = vld [vmem:[#allocation4 + $0x6] sm:$0xff]  ;;  %v3384_v50 = vmul.f32 %v7643_v48, %v3379_v31  ;;  %v3360_v35 = vadd.f32 %v3356_v51, %v8002_v29  ;;  %v3361_v45 = vadd.f32 %v3357_v11, %v3281_v63 }
 0x5b2   : > { %v3399_v17 = vmul.f32 %v7646_v57, %v3394_v5  ;;  %3426 = vst [vmem:[#allocation4 + $0x10] sm:$0xff] %v3417_v25  ;;  %3424 = vst [vmem:[#allocation4] sm:$0xff] %v3413_v21  ;;  %v3398_v0 = vmul.f32 %v7646_v57, %v3393_v14  ;;  %v8066_v24 = vadd.f32 %v3370_v22, %v8004_v41  ;;  %v8075_v14 = vpop.permute.xlu1 %3420 }
 0x5b3   : > { %3425 = vst [vmem:[#allocation4 + $0x8] sm:$0xff] %v3415_v7  ;;  %v3325_v5 = vld [vmem:[#allocation4 + $0x19] sm:$0xff]  ;;  %v8069_v31 = vadd.f32 %v3371_v20, %v8030_v61  ;;  %v8071_v34 = vadd.f32 %v3385_v30, %v3333_v3  ;;  %9585 = vst [vmem:[#allocation199_spill] sm:$0xff] %v8075_v14  ;;  %v8077_v40 = vadd.f32 %v3384_v50, %v3332_v13  ;;  %v3419_v20 = vpop.permute.xlu0 %3418 }
 0x5b4   : > { %v3339_v23 = vld [vmem:[#allocation4 + $0x1a] sm:$0xff]  ;;  %v8073_v32 = vadd.f32 %v3399_v17, %v3347_v36  ;;  %v8079_v19 = vadd.f32 %v3398_v0, %v3346_v60  ;;  %v8081_v29 = vadd.f32 %v3436_v33, %v3360_v35  ;;  %v3437_v63 = vmul.f32 %v7649_v2, %v3415_v7  ;;  %v8086_v41 = vld [vmem:[#allocation4 + $0x22] sm:$0xff] }
 0x5b5   : > { %v3353_v27 = vld [vmem:[#allocation4 + $0x1b] sm:$0xff]  ;;  %9587 = vst [vmem:[#allocation201_spill] sm:$0xff] %v8086_v41  ;;  %v8088_v61 = vld [vmem:[#allocation4 + $0x23] sm:$0xff]  ;;  %v3330_v30 = vmul.f32 %v7627_v44, %v3325_v5  ;;  %v3344_v17 = vmul.f32 %v7630_v12, %v3339_v23  ;;  %v3438_v0 = vmul.f32 %v7649_v2, %v3419_v20  ;;  %v8112_v60 = vadd.f32 %v8041_v1, %v7529_v53 }
 0x5b6   : > { %v3367_v25 = vld [vmem:[#allocation4 + $0x1c] sm:$0xff]  ;;  %9588 = vst [vmem:[#allocation202_spill] sm:$0xff] %v8088_v61  ;;  %v3358_v18 = vmul.f32 %v7633_v39, %v3353_v27  ;;  %v8094_v51 = vld [vmem:[#allocation4 + $0x24] sm:$0xff]  ;;  %v8100_v7 = vadd.f32 %v3437_v63, %v3361_v45  ;;  %v3535_v13 = vpop.permute.xlu1 %3534  ;;  %v3101_v35 = vmul.f32 %v7571_v54, %v7945_v59 }
 0x5b7   : > { %v3381_v21 = vld [vmem:[#allocation4 + $0x1d] sm:$0xff]  ;;  %v3372_v62 = vmul.f32 %v7636_v15, %v3367_v25  ;;  %9589 = vst [vmem:[#allocation203_spill] sm:$0xff] %v8094_v51  ;;  %v8096_v33 = vld [vmem:[#allocation4 + $0x25] sm:$0xff]  ;;  %v3334_v23 = vadd.f32 %v3330_v30, %v8045_v56  ;;  %v3348_v36 = vadd.f32 %v3344_v17, %v8047_v4 }
 0x5b8   : > { %v3395_v37 = vld [vmem:[#allocation4 + $0x1e] sm:$0xff]  ;;  %9590 = vst [vmem:[#allocation204_spill] sm:$0xff] %v8096_v33  ;;  %v8098_v3 = vld [vmem:[#allocation4 + $0x26] sm:$0xff]  ;;  %v3386_v22 = vmul.f32 %v7643_v48, %v3381_v21  ;;  %v3362_v5 = vadd.f32 %v3358_v18, %v3282_v28  ;;  %v9593_v21 = vld [vmem:[#allocation132_spill] sm:$0xff] }
 0x5b9   : > { %v8084_v11 = vld [vmem:[#allocation4 + $0x21] sm:$0xff]  ;;  %9591 = vst [vmem:[#allocation205_spill] sm:$0xff] %v8098_v3  ;;  %3427 = vst [vmem:[#allocation4 + $0x18] sm:$0xff] %v3419_v20  ;;  %v3400_v50 = vmul.f32 %v7646_v57, %v3395_v37  ;;  %v8108_v27 = vadd.f32 %v3372_v62, %v3320_v49  ;;  %v3129_v37 = vmul.f32 %v7578_v43, %v7953_v9  ;;  %v9592_v45 = vld [vmem:[#allocation109_spill] sm:$0xff]  ;;  %v3423_v49 = vpop.permute.xlu0 %3422 }
 0x5ba   : > { %9586 = vst [vmem:[#allocation200_spill] sm:$0xff] %v8084_v11  ;;  %3428 = vst [vmem:[#allocation4 + $0x20] sm:$0xff] %v8075_v14  ;;  %v8120_v25 = vmul.f32 %v9592_v45, %v7955_v58  ;;  %v3446_v56 = vld [vmem:[#allocation4 + $0x9] sm:$0xff]  ;;  %v3558_v63 = vmul.f32 %v9593_v21, %v3535_v13  ;;  %v8123_v20 = vadd.f32 %v3386_v22, %v3334_v23  ;;  %v9595_v58 = vld [vmem:[#allocation126_spill] sm:$0xff]  ;;  %v3539_v15 = vpop.permute.xlu1 %3538 }
 0x5bb   : > { %v3460_v4 = vld [vmem:[#allocation4 + $0xa] sm:$0xff]  ;;  %v8125_v53 = vadd.f32 %v3400_v50, %v3348_v36  ;;  %v8127_v1 = vadd.f32 %v3438_v0, %v3362_v5  ;;  %3429 = vst [vmem:[#allocation4 + $0x28] sm:$0xff] %v3423_v49  ;;  %v9597_v45 = vld [vmem:[#allocation100_spill] sm:$0xff]  ;;  %v3445_v14 = vld [vmem:[#allocation4 + $0x1] sm:$0xff] }
 0x5bc   : > { %v3474_v28 = vld [vmem:[#allocation4 + $0xb] sm:$0xff]  ;;  %v3465_v17 = vmul.f32 %v9595_v58, %v3460_v4  ;;  %v8133_v2 = vadd.f32 %v3101_v35, %v9597_v45  ;;  %v3459_v22 = vld [vmem:[#allocation4 + $0x2] sm:$0xff] }
 0x5bd   : > { %v3488_v54 = vld [vmem:[#allocation4 + $0xc] sm:$0xff]  ;;  %v3473_v23 = vld [vmem:[#allocation4 + $0x3] sm:$0xff]  ;;  %v3464_v35 = vmul.f32 %v9595_v58, %v3459_v22 }
 0x5be   : > { %v3502_v59 = vld [vmem:[#allocation4 + $0xd] sm:$0xff]  ;;  %v9599_v0 = vld [vmem:[#allocation130_spill] sm:$0xff] }
 0x5bf   : > { %v3516_v30 = vld [vmem:[#allocation4 + $0xe] sm:$0xff]  ;;  %v3507_v5 = vmul.f32 %v9599_v0, %v3502_v59  ;;  %v3501_v33 = vld [vmem:[#allocation4 + $0x5] sm:$0xff] }
 0x5c0   : > { %v9594_v43 = vld [vmem:[#allocation124_spill] sm:$0xff]  ;;  %v9596_v18 = vld [vmem:[#allocation127_spill] sm:$0xff]  ;;  %3548 = vst [vmem:[#allocation4 + $0x10] sm:$0xff] %v3539_v15  ;;  %v9672_v11 = vld [vmem:[#allocation154_spill] sm:$0xff] }
 0x5c1   : > { %v3451_v9 = vmul.f32 %v9594_v43, %v3446_v56  ;;  %v3479_v62 = vmul.f32 %v9596_v18, %v3474_v28  ;;  %v9598_v50 = vld [vmem:[#allocation128_spill] sm:$0xff]  ;;  %v9600_v57 = vld [vmem:[#allocation131_spill] sm:$0xff]  ;;  %v3450_v28 = vmul.f32 %v9594_v43, %v3445_v14  ;;  %v3478_v45 = vmul.f32 %v9596_v18, %v3473_v23  ;;  %v3447_v39 = vld [vmem:[#allocation4 + $0x19] sm:$0xff] }
 0x5c2   : > { %v3493_v36 = vmul.f32 %v9598_v50, %v3488_v54  ;;  %v3521_v3 = vmul.f32 %v9600_v57, %v3516_v30  ;;  %v9601_v48 = vld [vmem:[#allocation176_spill] sm:$0xff]  ;;  %v3487_v56 = vld [vmem:[#allocation4 + $0x4] sm:$0xff]  ;;  %v3537_v54 = vpop.permute.xlu0 %3536  ;;  %v3469_v30 = vadd.f32 %v3465_v17, %v8071_v34  ;;  %v3461_v14 = vld [vmem:[#allocation4 + $0x1a] sm:$0xff]  ;;  %v3468_v23 = vadd.f32 %v3464_v35, %v8077_v40 }
 0x5c3   : > { %v8139_v49 = vadd.f32 %v3129_v37, %v9601_v48  ;;  %v3515_v4 = vld [vmem:[#allocation4 + $0x6] sm:$0xff]  ;;  %v3455_v51 = vadd.f32 %v3451_v9, %v8069_v31  ;;  %v3492_v59 = vmul.f32 %v9598_v50, %v3487_v56  ;;  %v3506_v48 = vmul.f32 %v9599_v0, %v3501_v33  ;;  %v3475_v61 = vld [vmem:[#allocation4 + $0x1b] sm:$0xff] }
 0x5c4   : > { %3546 = vst [vmem:[#allocation4] sm:$0xff] %v3535_v13  ;;  %v3520_v37 = vmul.f32 %v9600_v57, %v3515_v4  ;;  %3547 = vst [vmem:[#allocation4 + $0x8] sm:$0xff] %v3537_v54  ;;  %v3454_v22 = vadd.f32 %v3450_v28, %v8066_v24  ;;  %v3482_v31 = vadd.f32 %v3478_v45, %v8079_v19  ;;  %v3489_v13 = vld [vmem:[#allocation4 + $0x1c] sm:$0xff]  ;;  %v8163_v24 = vpop.permute.xlu1 %3542  ;;  %v8182_v45 = vld [vmem:[#allocation4 + $0x24] sm:$0xff] }
 0x5c5   : > { %v3483_v15 = vadd.f32 %v3479_v62, %v8073_v32  ;;  %v3503_v9 = vld [vmem:[#allocation4 + $0x1d] sm:$0xff]  ;;  %v8154_v33 = vadd.f32 %v3492_v59, %v8081_v29  ;;  %v8157_v34 = vadd.f32 %v3493_v36, %v8100_v7  ;;  %v8159_v17 = vadd.f32 %v3507_v5, %v3455_v51  ;;  %9602 = vst [vmem:[#allocation109_spill] sm:$0xff] %v8163_v24 }
 0x5c6   : > { %v3517_v56 = vld [vmem:[#allocation4 + $0x1e] sm:$0xff]  ;;  %v8161_v4 = vadd.f32 %v3521_v3, %v3469_v30  ;;  %v8165_v40 = vadd.f32 %v3506_v48, %v3454_v22  ;;  %v8167_v19 = vadd.f32 %v3520_v37, %v3468_v23  ;;  %v8169_v32 = vadd.f32 %v3558_v63, %v3482_v31  ;;  %v3541_v51 = vpop.permute.xlu0 %3540  ;;  %9606 = vst [vmem:[#allocation207_spill] sm:$0xff] %v8182_v45 }
 0x5c7   : > { %v3559_v62 = vmul.f32 %v9593_v21, %v3537_v54  ;;  %v8172_v28 = vld [vmem:[#allocation4 + $0x21] sm:$0xff]  ;;  %v3452_v3 = vmul.f32 %v9594_v43, %v3447_v39  ;;  %v3466_v36 = vmul.f32 %v9595_v58, %v3461_v14  ;;  %v3480_v5 = vmul.f32 %v9596_v18, %v3475_v61  ;;  %3549 = vst [vmem:[#allocation4 + $0x18] sm:$0xff] %v3541_v51 }
 0x5c8   : > { %9603 = vst [vmem:[#allocation100_spill] sm:$0xff] %v8172_v28  ;;  %v8174_v29 = vld [vmem:[#allocation4 + $0x22] sm:$0xff]  ;;  %v3494_v35 = vmul.f32 %v9598_v50, %v3489_v13  ;;  %v3508_v48 = vmul.f32 %v9599_v0, %v3503_v9  ;;  %v3522_v37 = vmul.f32 %v9600_v57, %v3517_v56  ;;  %v3560_v39 = vmul.f32 %v9593_v21, %v3541_v51  ;;  %v3657_v23 = vpop.permute.xlu1 %3656  ;;  %v9610_v9 = vld [vmem:[#allocation188_spill] sm:$0xff] }
 0x5c9   : > { %9604 = vst [vmem:[#allocation176_spill] sm:$0xff] %v8174_v29  ;;  %v8176_v7 = vld [vmem:[#allocation4 + $0x23] sm:$0xff]  ;;  %v8188_v59 = vadd.f32 %v3559_v62, %v3483_v15  ;;  %v3456_v61 = vadd.f32 %v3452_v3, %v8108_v27  ;;  %v3470_v30 = vadd.f32 %v3466_v36, %v8123_v20  ;;  %v3484_v14 = vadd.f32 %v3480_v5, %v8125_v53  ;;  %v9612_v3 = vld [vmem:[#allocation140_spill] sm:$0xff] }
 0x5ca   : > { %9605 = vst [vmem:[#allocation206_spill] sm:$0xff] %v8176_v7  ;;  %v8184_v63 = vld [vmem:[#allocation4 + $0x25] sm:$0xff]  ;;  %v8198_v22 = vadd.f32 %v3494_v35, %v8127_v1  ;;  %v8202_v31 = vadd.f32 %v8120_v25, %v8112_v60  ;;  %v8210_v27 = vmul.f32 %v7587_v8, %v8015_v16  ;;  %v3545_v1 = vpop.permute.xlu0 %3544  ;;  %v3680_v36 = vmul.f32 %v9612_v3, %v3657_v23 }
 0x5cb   : > { %9607 = vst [vmem:[#allocation208_spill] sm:$0xff] %v8184_v63  ;;  %v8186_v54 = vld [vmem:[#allocation4 + $0x26] sm:$0xff]  ;;  %v8213_v5 = vadd.f32 %v3508_v48, %v3456_v61  ;;  %v8215_v60 = vadd.f32 %v3522_v37, %v3470_v30  ;;  %v8217_v25 = vadd.f32 %v3560_v39, %v3484_v14  ;;  %v9616_v37 = vld [vmem:[#allocation136_spill] sm:$0xff] }
 0x5cc   : > { %9608 = vst [vmem:[#allocation209_spill] sm:$0xff] %v8186_v54  ;;  %3550 = vst [vmem:[#allocation4 + $0x20] sm:$0xff] %v8163_v24  ;;  %v9609_v15 = vld [vmem:[#allocation191_spill] sm:$0xff]  ;;  %v9614_v8 = vld [vmem:[#allocation134_spill] sm:$0xff]  ;;  %v3661_v18 = vpop.permute.xlu1 %3660 }
 0x5cd   : > { %v3157_v13 = vmul.f32 %v7584_v55, %v9609_v15  ;;  %v9611_v56 = vld [vmem:[#allocation107_spill] sm:$0xff]  ;;  %3551 = vst [vmem:[#allocation4 + $0x28] sm:$0xff] %v3545_v1  ;;  %v9617_v39 = vld [vmem:[#allocation138_spill] sm:$0xff] }
 0x5ce   : > { %v3195_v62 = vmul.f32 %v9611_v56, %v9610_v9  ;;  %v3568_v20 = vld [vmem:[#allocation4 + $0x9] sm:$0xff]  ;;  %v9613_v9 = vld [vmem:[#allocation133_spill] sm:$0xff]  ;;  %v3567_v54 = vld [vmem:[#allocation4 + $0x1] sm:$0xff] }
 0x5cf   : > { %v3582_v53 = vld [vmem:[#allocation4 + $0xa] sm:$0xff]  ;;  %v3573_v56 = vmul.f32 %v9613_v9, %v3568_v20  ;;  %v8223_v57 = vadd.f32 %v3157_v13, %v8133_v2  ;;  %v3581_v48 = vld [vmem:[#allocation4 + $0x2] sm:$0xff] }
 0x5d0   : > { %v3596_v51 = vld [vmem:[#allocation4 + $0xb] sm:$0xff]  ;;  %v3587_v16 = vmul.f32 %v9614_v8, %v3582_v53  ;;  %v3595_v61 = vld [vmem:[#allocation4 + $0x3] sm:$0xff]  ;;  %v3586_v2 = vmul.f32 %v9614_v8, %v3581_v48 }
 0x5d1   : > { %v3610_v55 = vld [vmem:[#allocation4 + $0xc] sm:$0xff]  ;;  %v9619_v50 = vld [vmem:[#allocation194_spill] sm:$0xff]  ;;  %v3577_v7 = vadd.f32 %v3573_v56, %v8157_v34 }
 0x5d2   : > { %v3624_v35 = vld [vmem:[#allocation4 + $0xd] sm:$0xff]  ;;  %v3615_v30 = vmul.f32 %v9616_v37, %v3610_v55  ;;  %v8229_v1 = vadd.f32 %v3195_v62, %v9619_v50  ;;  %v3609_v20 = vld [vmem:[#allocation4 + $0x4] sm:$0xff]  ;;  %v3659_v55 = vpop.permute.xlu0 %3658 }
 0x5d3   : > { %v3638_v15 = vld [vmem:[#allocation4 + $0xe] sm:$0xff]  ;;  %v3629_v14 = vmul.f32 %v9617_v39, %v3624_v35  ;;  %v3623_v45 = vld [vmem:[#allocation4 + $0x5] sm:$0xff]  ;;  %v3614_v35 = vmul.f32 %v9616_v37, %v3609_v20  ;;  %v3569_v58 = vld [vmem:[#allocation4 + $0x19] sm:$0xff] }
 0x5d4   : > { %v9615_v21 = vld [vmem:[#allocation135_spill] sm:$0xff]  ;;  %9620 = vst [vmem:[#allocation191_spill] sm:$0xff] %v8229_v1  ;;  %3670 = vst [vmem:[#allocation4 + $0x10] sm:$0xff] %v3661_v18  ;;  %v3628_v50 = vmul.f32 %v9617_v39, %v3623_v45  ;;  %v3597_v29 = vld [vmem:[#allocation4 + $0x1b] sm:$0xff] }
 0x5d5   : > { %v3601_v24 = vmul.f32 %v9615_v21, %v3596_v51  ;;  %v9618_v0 = vld [vmem:[#allocation139_spill] sm:$0xff]  ;;  %v3572_v51 = vmul.f32 %v9613_v9, %v3567_v54  ;;  %v3600_v13 = vmul.f32 %v9615_v21, %v3595_v61  ;;  %v3583_v54 = vld [vmem:[#allocation4 + $0x1a] sm:$0xff]  ;;  %v3590_v61 = vadd.f32 %v3586_v2, %v8165_v40 }
 0x5d6   : > { %v3643_v63 = vmul.f32 %v9618_v0, %v3638_v15  ;;  %v3637_v53 = vld [vmem:[#allocation4 + $0x6] sm:$0xff]  ;;  %v3591_v15 = vadd.f32 %v3587_v16, %v8159_v17  ;;  %v3625_v56 = vld [vmem:[#allocation4 + $0x1d] sm:$0xff]  ;;  %v8244_v45 = vadd.f32 %v3614_v35, %v8169_v32  ;;  %v8247_v17 = vadd.f32 %v3615_v30, %v8188_v59  ;;  %v3663_v59 = vpop.permute.xlu0 %3662 }
 0x5d7   : > { %3668 = vst [vmem:[#allocation4] sm:$0xff] %v3657_v23  ;;  %v3642_v62 = vmul.f32 %v9618_v0, %v3637_v53  ;;  %3669 = vst [vmem:[#allocation4 + $0x8] sm:$0xff] %v3659_v55  ;;  %v3576_v48 = vadd.f32 %v3572_v51, %v8154_v33  ;;  %v3604_v34 = vadd.f32 %v3600_v13, %v8167_v19  ;;  %v3611_v23 = vld [vmem:[#allocation4 + $0x1c] sm:$0xff]  ;;  %v8253_v33 = vpop.permute.xlu1 %3664  ;;  %v8268_v13 = vld [vmem:[#allocation4 + $0x24] sm:$0xff] }
 0x5d8   : > { %v3605_v18 = vadd.f32 %v3601_v24, %v8161_v4  ;;  %v3639_v20 = vld [vmem:[#allocation4 + $0x1e] sm:$0xff]  ;;  %v8249_v16 = vadd.f32 %v3629_v14, %v3577_v7  ;;  %v8251_v53 = vadd.f32 %v3643_v63, %v3591_v15  ;;  %9621 = vst [vmem:[#allocation188_spill] sm:$0xff] %v8253_v33  ;;  %v3681_v4 = vmul.f32 %v9612_v3, %v3659_v55  ;;  %v8272_v55 = vld [vmem:[#allocation4 + $0x26] sm:$0xff] }
 0x5d9   : > { %v3632_v40 = vadd.f32 %v3628_v50, %v3576_v48  ;;  %v3646_v51 = vadd.f32 %v3642_v62, %v3590_v61  ;;  %v8255_v19 = vadd.f32 %v3680_v36, %v3604_v34  ;;  %v8258_v24 = vld [vmem:[#allocation4 + $0x21] sm:$0xff]  ;;  %v3574_v7 = vmul.f32 %v9613_v9, %v3569_v58  ;;  %9625 = vst [vmem:[#allocation211_spill] sm:$0xff] %v8268_v13 }
 0x5da   : > { %9622 = vst [vmem:[#allocation107_spill] sm:$0xff] %v8258_v24  ;;  %v8260_v2 = vld [vmem:[#allocation4 + $0x22] sm:$0xff]  ;;  %v3588_v63 = vmul.f32 %v9614_v8, %v3583_v54  ;;  %v3602_v30 = vmul.f32 %v9615_v21, %v3597_v29  ;;  %v3616_v14 = vmul.f32 %v9616_v37, %v3611_v23  ;;  %9627 = vst [vmem:[#allocation213_spill] sm:$0xff] %v8272_v55 }
 0x5db   : > { %9623 = vst [vmem:[#allocation194_spill] sm:$0xff] %v8260_v2  ;;  %v8262_v32 = vld [vmem:[#allocation4 + $0x23] sm:$0xff]  ;;  %3671 = vst [vmem:[#allocation4 + $0x18] sm:$0xff] %v3663_v59  ;;  %v8274_v35 = vadd.f32 %v3681_v4, %v3605_v18  ;;  %v3630_v50 = vmul.f32 %v9617_v39, %v3625_v56  ;;  %v3644_v62 = vmul.f32 %v9618_v0, %v3639_v20  ;;  %v8286_v61 = vpop.permute.xlu1 %4120  ;;  %v3667_v56 = vpop.permute.xlu0 %3666  ;;  %v9630_v20 = vld [vmem:[#allocation148_spill] sm:$0xff] }
 0x5dc   : > { %9624 = vst [vmem:[#allocation210_spill] sm:$0xff] %v8262_v32  ;;  %v8270_v36 = vld [vmem:[#allocation4 + $0x25] sm:$0xff]  ;;  %v3682_v58 = vmul.f32 %v9612_v3, %v3663_v59  ;;  %v3578_v29 = vadd.f32 %v3574_v7, %v8198_v22  ;;  %v3592_v15 = vadd.f32 %v3588_v63, %v8213_v5  ;;  %v3606_v54 = vadd.f32 %v3602_v30, %v8215_v60 }
 0x5dd   : > { %9626 = vst [vmem:[#allocation212_spill] sm:$0xff] %v8270_v36  ;;  %3672 = vst [vmem:[#allocation4 + $0x20] sm:$0xff] %v8253_v33  ;;  %v8284_v48 = vadd.f32 %v3616_v14, %v8217_v25  ;;  %v8290_v34 = vadd.f32 %v8210_v27, %v8139_v49  ;;  %v3223_v18 = vmul.f32 %v7594_v38, %v8017_v10  ;;  %v9632_v59 = vld [vmem:[#allocation142_spill] sm:$0xff]  ;;  %v9633_v63 = vld [vmem:[#allocation143_spill] sm:$0xff] }
 0x5de   : > { %v3237_v23 = vmul.f32 %v7597_v26, %v8019_v6  ;;  %v8298_v22 = vmul.f32 %v7600_v42, %v8024_v47  ;;  %v3689_v5 = vld [vmem:[#allocation4 + $0x1] sm:$0xff]  ;;  %v8302_v4 = vmul.f32 %v9630_v20, %v8286_v61  ;;  %v8304_v49 = vadd.f32 %v3630_v50, %v3578_v29  ;;  %3673 = vst [vmem:[#allocation4 + $0x28] sm:$0xff] %v3667_v56  ;;  %v9631_v42 = vld [vmem:[#allocation141_spill] sm:$0xff]  ;;  %v3690_v50 = vld [vmem:[#allocation4 + $0x9] sm:$0xff] }
 0x5df   : > { %9628 = vst [vmem:[#allocation214_spill] sm:$0xff] %v8290_v34  ;;  %v3703_v60 = vld [vmem:[#allocation4 + $0x2] sm:$0xff]  ;;  %v8306_v27 = vadd.f32 %v3644_v62, %v3592_v15  ;;  %v8308_v38 = vadd.f32 %v3682_v58, %v3606_v54  ;;  %v3694_v47 = vmul.f32 %v9631_v42, %v3689_v5  ;;  %v8314_v14 = vadd.f32 %v3223_v18, %v8202_v31  ;;  %v3704_v62 = vld [vmem:[#allocation4 + $0xa] sm:$0xff]  ;;  %v8323_v39 = vpop.permute.xlu1 %4124 }
 0x5e0   : > { %9629 = vst [vmem:[#allocation215_spill] sm:$0xff] %v8298_v22  ;;  %v3717_v25 = vld [vmem:[#allocation4 + $0x3] sm:$0xff]  ;;  %v3708_v7 = vmul.f32 %v9632_v59, %v3703_v60  ;;  %v3718_v29 = vld [vmem:[#allocation4 + $0xb] sm:$0xff]  ;;  %v8321_v5 = vadd.f32 %v3237_v23, %v8223_v57  ;;  %v3695_v36 = vmul.f32 %v9631_v42, %v3690_v50  ;;  %v3709_v23 = vmul.f32 %v9632_v59, %v3704_v62 }
 0x5e1   : > { %v3731_v10 = vld [vmem:[#allocation4 + $0x4] sm:$0xff]  ;;  %v3722_v30 = vmul.f32 %v9633_v63, %v3717_v25  ;;  %9634 = vst [vmem:[#allocation148_spill] sm:$0xff] %v8314_v14  ;;  %v9636_v58 = vld [vmem:[#allocation144_spill] sm:$0xff]  ;;  %v3698_v31 = vadd.f32 %v3694_v47, %v8244_v45  ;;  %v9671_v14 = vld [vmem:[#allocation153_spill] sm:$0xff] }
 0x5e2   : > { %v3745_v26 = vld [vmem:[#allocation4 + $0x5] sm:$0xff]  ;;  %v3736_v15 = vmul.f32 %v9636_v58, %v3731_v10  ;;  %v3746_v55 = vld [vmem:[#allocation4 + $0xd] sm:$0xff] }
 0x5e3   : > { %v3759_v6 = vld [vmem:[#allocation4 + $0x6] sm:$0xff]  ;;  %v3760_v25 = vld [vmem:[#allocation4 + $0xe] sm:$0xff]  ;;  %v3726_v18 = vadd.f32 %v3722_v30, %v3646_v51 }
 0x5e4   : > { %v9635_v3 = vld [vmem:[#allocation68_spill] sm:$0xff]  ;;  %v9637_v54 = vld [vmem:[#allocation146_spill] sm:$0xff]  ;;  %v9641_v10 = vld [vmem:[#allocation81_spill] sm:$0xff]  ;;  %v3740_v57 = vadd.f32 %v3736_v15, %v8255_v19 }
 0x5e5   : > { %3888 = vst [vmem:[#allocation4] sm:$0xff] %v9635_v3  ;;  %v3750_v33 = vmul.f32 %v9637_v54, %v3745_v26  ;;  %v9638_v0 = vld [vmem:[#allocation147_spill] sm:$0xff]  ;;  %9639 = vst [vmem:[#allocation68_spill] sm:$0xff] %v8321_v5  ;;  %v3712_v3 = vadd.f32 %v3708_v7, %v3632_v40  ;;  %v9640_v37 = vld [vmem:[#allocation84_spill] sm:$0xff]  ;;  %v8329_v26 = vpop.permute.xlu0 %4122 }
 0x5e6   : > { %v3764_v56 = vmul.f32 %v9638_v0, %v3759_v6  ;;  %v3732_v60 = vld [vmem:[#allocation4 + $0xc] sm:$0xff]  ;;  %v3723_v6 = vmul.f32 %v9633_v63, %v3718_v29  ;;  %v3691_v21 = vld [vmem:[#allocation4 + $0x19] sm:$0xff]  ;;  %v3713_v29 = vadd.f32 %v3709_v23, %v8249_v16  ;;  %v8352_v2 = vld [vmem:[#allocation4 + $0x21] sm:$0xff] }
 0x5e7   : > { %3889 = vst [vmem:[#allocation4 + $0x8] sm:$0xff] %v9640_v37  ;;  %3890 = vst [vmem:[#allocation4 + $0x10] sm:$0xff] %v9641_v10  ;;  %v3737_v13 = vmul.f32 %v9636_v58, %v3732_v60  ;;  %v3705_v45 = vld [vmem:[#allocation4 + $0x1a] sm:$0xff]  ;;  %v3754_v51 = vadd.f32 %v3750_v33, %v3698_v31  ;;  %v3699_v37 = vadd.f32 %v3695_v36, %v8247_v17  ;;  %v8346_v33 = vpop.permute.xlu1 %4128  ;;  %v9647_v17 = vld [vmem:[#allocation26_spill] sm:$0xff] }
 0x5e8   : > { %v3719_v40 = vld [vmem:[#allocation4 + $0x1b] sm:$0xff]  ;;  %v3768_v47 = vadd.f32 %v3764_v56, %v3712_v3  ;;  %v3727_v15 = vadd.f32 %v3723_v6, %v8251_v53  ;;  %9645 = vst [vmem:[#allocation84_spill] sm:$0xff] %v8346_v33  ;;  %v9646_v56 = vld [vmem:[#allocation41_spill] sm:$0xff]  ;;  %9649 = vst [vmem:[#allocation81_spill] sm:$0xff] %v8352_v2 }
 0x5e9   : > { %v9642_v7 = vld [vmem:[#allocation39_spill] sm:$0xff]  ;;  %v9643_v19 = vld [vmem:[#allocation40_spill] sm:$0xff]  ;;  %v3741_v60 = vadd.f32 %v3737_v13, %v8274_v35  ;;  %v3810_v31 = vadd.f32 %v9646_v56, %v3754_v51  ;;  %v8358_v53 = vpop.permute.xlu0 %4126  ;;  %v3765_v35 = vmul.f32 %v9638_v0, %v3760_v25  ;;  %v9658_v56 = vld [vmem:[#allocation69_spill] sm:$0xff] }
 0x5ea   : > { %v3782_v30 = vadd.f32 %v9642_v7, %v3726_v18  ;;  %v3733_v50 = vld [vmem:[#allocation4 + $0x1c] sm:$0xff]  ;;  %v3796_v62 = vadd.f32 %v9643_v19, %v3740_v57  ;;  %v3824_v36 = vadd.f32 %v9647_v17, %v3768_v47  ;;  %v3751_v7 = vmul.f32 %v9637_v54, %v3746_v55  ;;  %v8364_v19 = vld [vmem:[#allocation4 + $0x24] sm:$0xff] }
 0x5eb   : > { %v8337_v10 = vld [vmem:[#allocation4 + $0x1d] sm:$0xff]  ;;  %v8368_v55 = vld [vmem:[#allocation4 + $0x26] sm:$0xff]  ;;  %v3866_v17 = vadd.f32 %v9658_v56, %v3810_v31 }
 0x5ec   : > { %v8339_v32 = vld [vmem:[#allocation4 + $0x1e] sm:$0xff]  ;;  %9657 = vst [vmem:[#allocation26_spill] sm:$0xff] %v8368_v55  ;;  %v3696_v55 = vmul.f32 %v9631_v42, %v3691_v21 }
 0x5ed   : > { %v9644_v8 = vld [vmem:[#allocation92_spill] sm:$0xff]  ;;  %v9648_v3 = vld [vmem:[#allocation66_spill] sm:$0xff] }
 0x5ee   : > { %3891 = vst [vmem:[#allocation4 + $0x18] sm:$0xff] %v9644_v8  ;;  %v3838_v18 = vadd.f32 %v9648_v3, %v3782_v30  ;;  %v8354_v57 = vld [vmem:[#allocation4 + $0x22] sm:$0xff]  ;;  %v9653_v23 = vld [vmem:[#allocation70_spill] sm:$0xff]  ;;  %9655 = vst [vmem:[#allocation92_spill] sm:$0xff] %v8364_v19 }
 0x5ef   : > { %9650 = vst [vmem:[#allocation39_spill] sm:$0xff] %v8354_v57  ;;  %v8356_v16 = vld [vmem:[#allocation4 + $0x23] sm:$0xff]  ;;  %v3783_v6 = vadd.f32 %v9653_v23, %v3727_v15  ;;  %v3755_v57 = vadd.f32 %v3751_v7, %v3699_v37  ;;  %v9660_v25 = vld [vmem:[#allocation90_spill] sm:$0xff]  ;;  %v9661_v15 = vld [vmem:[#allocation98_spill] sm:$0xff] }
 0x5f0   : > { %9651 = vst [vmem:[#allocation40_spill] sm:$0xff] %v8356_v16  ;;  %v9652_v13 = vld [vmem:[#allocation67_spill] sm:$0xff]  ;;  %v3910_v31 = vld [vmem:[#allocation4 + $0x9] sm:$0xff]  ;;  %v9667_v2 = vld [vmem:[#allocation157_spill] sm:$0xff] }
 0x5f1   : > { %v3852_v8 = vadd.f32 %v9652_v13, %v3796_v62  ;;  %v9654_v51 = vld [vmem:[#allocation71_spill] sm:$0xff]  ;;  %v8374_v62 = vmul.f32 %v9630_v20, %v8329_v26  ;;  %v9664_v37 = vld [vmem:[#allocation73_spill] sm:$0xff] }
 0x5f2   : > { %v3797_v47 = vadd.f32 %v9654_v51, %v3741_v60  ;;  %v8366_v30 = vld [vmem:[#allocation4 + $0x25] sm:$0xff]  ;;  %v3769_v60 = vadd.f32 %v3765_v35, %v3713_v29  ;;  %v3811_v7 = vadd.f32 %v9664_v37, %v3755_v57  ;;  %v9668_v57 = vld [vmem:[#allocation74_spill] sm:$0xff] }
 0x5f3   : > { %9656 = vst [vmem:[#allocation41_spill] sm:$0xff] %v8366_v30  ;;  %v9659_v3 = vld [vmem:[#allocation110_spill] sm:$0xff]  ;;  %3892 = vst [vmem:[#allocation4 + $0x20] sm:$0xff] %v9660_v25  ;;  %v9663_v51 = vld [vmem:[#allocation76_spill] sm:$0xff]  ;;  %v3724_v25 = vmul.f32 %v9633_v63, %v3719_v40 }
 0x5f4   : > { %v3904_v16 = vadd.f32 %v9659_v3, %v3824_v36  ;;  %3893 = vst [vmem:[#allocation4 + $0x28] sm:$0xff] %v9661_v15  ;;  %v9662_v13 = vld [vmem:[#allocation75_spill] sm:$0xff]  ;;  %v3853_v30 = vadd.f32 %v9663_v51, %v3797_v47  ;;  %v8381_v36 = vpop.permute.xlu1 %4242  ;;  %v3710_v3 = vmul.f32 %v9632_v59, %v3705_v45  ;;  %v8387_v15 = vmul.f32 %v9636_v58, %v3733_v50  ;;  %v3924_v29 = vld [vmem:[#allocation4 + $0xa] sm:$0xff]  ;;  %v8389_v47 = vpop.permute.xlu0 %4130 }
 0x5f5   : > { %v3839_v23 = vadd.f32 %v9662_v13, %v3783_v6  ;;  %v3909_v19 = vld [vmem:[#allocation4 + $0x1] sm:$0xff]  ;;  %v3938_v6 = vld [vmem:[#allocation4 + $0xb] sm:$0xff]  ;;  %v8395_v9 = vmul.f32 %v9667_v2, %v8381_v36  ;;  %v3825_v45 = vadd.f32 %v9668_v57, %v3769_v60 }
 0x5f6   : > { %v3923_v56 = vld [vmem:[#allocation4 + $0x2] sm:$0xff]  ;;  %v3952_v40 = vld [vmem:[#allocation4 + $0xc] sm:$0xff] }
 0x5f7   : > { %v3937_v35 = vld [vmem:[#allocation4 + $0x3] sm:$0xff]  ;;  %v9669_v50 = vld [vmem:[#allocation152_spill] sm:$0xff]  ;;  %v3905_v46 = vadd.f32 %v9677_v52, %v3825_v45  ;;  %v3957_v52 = vmul.f32 %v9671_v14, %v3952_v40 }
 0x5f8   : > { %v9665_v21 = vld [vmem:[#allocation150_spill] sm:$0xff]  ;;  %v9666_v51 = vld [vmem:[#allocation151_spill] sm:$0xff]  ;;  %v3942_v58 = vmul.f32 %v9669_v50, %v3937_v35  ;;  %v9670_v59 = vld [vmem:[#allocation77_spill] sm:$0xff] }
 0x5f9   : > { %v3914_v13 = vmul.f32 %v9665_v21, %v3909_v19  ;;  %v3928_v42 = vmul.f32 %v9666_v51, %v3923_v56  ;;  %v3951_v37 = vld [vmem:[#allocation4 + $0x4] sm:$0xff]  ;;  %v3867_v24 = vadd.f32 %v9670_v59, %v3811_v7  ;;  %v3915_v43 = vmul.f32 %v9665_v21, %v3910_v31  ;;  %v3966_v19 = vld [vmem:[#allocation4 + $0xd] sm:$0xff]  ;;  %v8407_v59 = vpop.permute.xlu1 %4246 }
 0x5fa   : > { %v3965_v63 = vld [vmem:[#allocation4 + $0x5] sm:$0xff]  ;;  %v3929_v28 = vmul.f32 %v9666_v51, %v3924_v29  ;;  %v3980_v56 = vld [vmem:[#allocation4 + $0xe] sm:$0xff]  ;;  %v3956_v44 = vmul.f32 %v9671_v14, %v3951_v37  ;;  %v3946_v31 = vadd.f32 %v3942_v58, %v3866_v17  ;;  %v8439_v45 = vld [vmem:[#allocation4 + $0x1d] sm:$0xff] }
 0x5fb   : > { %v3979_v12 = vld [vmem:[#allocation4 + $0x6] sm:$0xff]  ;;  %v3918_v41 = vadd.f32 %v3914_v13, %v3838_v18  ;;  %v3932_v5 = vadd.f32 %v3928_v42, %v3852_v8  ;;  %v3970_v60 = vmul.f32 %v9672_v11, %v3965_v63  ;;  %v9673_v57 = vld [vmem:[#allocation108_spill] sm:$0xff]  ;;  %v3919_v22 = vadd.f32 %v3915_v43, %v3839_v23  ;;  %v8411_v18 = vpop.permute.xlu0 %4244  ;;  %v3953_v23 = vld [vmem:[#allocation4 + $0x1c] sm:$0xff] }
 0x5fc   : > { %4011 = vst [vmem:[#allocation4 + $0x8] sm:$0xff] %v9673_v57  ;;  %v9674_v34 = vld [vmem:[#allocation106_spill] sm:$0xff]  ;;  %v9675_v35 = vld [vmem:[#allocation96_spill] sm:$0xff]  ;;  %v8413_v42 = vadd.f32 %v3956_v44, %v3904_v16  ;;  %v3933_v63 = vadd.f32 %v3929_v28, %v3853_v30  ;;  %v3943_v13 = vmul.f32 %v9669_v50, %v3938_v6  ;;  %v9679_v58 = vld [vmem:[#allocation156_spill] sm:$0xff]  ;;  %v3971_v43 = vmul.f32 %v9672_v11, %v3966_v19 }
 0x5fd   : > { %4012 = vst [vmem:[#allocation4 + $0x10] sm:$0xff] %v9674_v34  ;;  %4010 = vst [vmem:[#allocation4] sm:$0xff] %v9675_v35  ;;  %v9676_v7 = vld [vmem:[#allocation155_spill] sm:$0xff]  ;;  %v8415_v8 = vadd.f32 %v3970_v60, %v3918_v41  ;;  %v3911_v34 = vld [vmem:[#allocation4 + $0x19] sm:$0xff]  ;;  %v8434_v17 = vmul.f32 %v9667_v2, %v8411_v18  ;;  %v8441_v40 = vpop.permute.xlu1 %4250  ;;  %v3961_v19 = vadd.f32 %v3957_v52, %v3905_v46 }
 0x5fe   : > { %v3984_v29 = vmul.f32 %v9676_v7, %v3979_v12  ;;  %v8418_v37 = vld [vmem:[#allocation4 + $0x21] sm:$0xff]  ;;  %v8423_v12 = vadd.f32 %v9679_v58, %v3946_v31  ;;  %v3947_v28 = vadd.f32 %v3943_v13, %v3867_v24  ;;  %v3985_v30 = vmul.f32 %v9676_v7, %v3980_v56  ;;  %9683 = vst [vmem:[#allocation69_spill] sm:$0xff] %v8441_v40 }
 0x5ff   : > { %9678 = vst [vmem:[#allocation66_spill] sm:$0xff] %v8418_v37  ;;  %v3925_v57 = vld [vmem:[#allocation4 + $0x1a] sm:$0xff]  ;;  %v8427_v44 = vld [vmem:[#allocation4 + $0x22] sm:$0xff]  ;;  %v3975_v60 = vadd.f32 %v3971_v43, %v3919_v22  ;;  %v3714_v31 = vadd.f32 %v3710_v3, %v8304_v49  ;;  %v3728_v24 = vadd.f32 %v3724_v25, %v8306_v27  ;;  %v3752_v46 = vmul.f32 %v9637_v54, %v8337_v10  ;;  %v9689_v27 = vld [vmem:[#allocation120_spill] sm:$0xff] }
 0x600   : > { %v8420_v35 = vadd.f32 %v3984_v29, %v3932_v5  ;;  %9680 = vst [vmem:[#allocation67_spill] sm:$0xff] %v8427_v44  ;;  %v3939_v41 = vld [vmem:[#allocation4 + $0x1b] sm:$0xff]  ;;  %v8429_v16 = vld [vmem:[#allocation4 + $0x23] sm:$0xff]  ;;  %v3700_v5 = vadd.f32 %v3696_v55, %v8284_v48  ;;  %v8451_v48 = vpop.permute.xlu0 %4248  ;;  %v3989_v55 = vadd.f32 %v3985_v30, %v3933_v63  ;;  %v3766_v25 = vmul.f32 %v9638_v0, %v8339_v32  ;;  %v9695_v44 = vld [vmem:[#allocation160_spill] sm:$0xff] }
 0x601   : > { %9681 = vst [vmem:[#allocation70_spill] sm:$0xff] %v8429_v16  ;;  %v8437_v6 = vld [vmem:[#allocation4 + $0x24] sm:$0xff]  ;;  %v3742_v16 = vadd.f32 %v8387_v15, %v8308_v38  ;;  %v9688_v49 = vld [vmem:[#allocation137_spill] sm:$0xff]  ;;  %v8467_v63 = vmul.f32 %v9665_v21, %v3911_v34  ;;  %v8470_v38 = vmul.f32 %v9666_v51, %v3925_v57  ;;  %v8479_v32 = vmul.f32 %v9671_v14, %v3953_v23  ;;  %v9696_v23 = vld [vmem:[#allocation172_spill] sm:$0xff] }
 0x602   : > { %9682 = vst [vmem:[#allocation71_spill] sm:$0xff] %v8437_v6  ;;  %v8445_v56 = vld [vmem:[#allocation4 + $0x25] sm:$0xff]  ;;  %v9690_v3 = vld [vmem:[#allocation78_spill] sm:$0xff] }
 0x603   : > { %9684 = vst [vmem:[#allocation110_spill] sm:$0xff] %v8445_v56  ;;  %v8447_v29 = vld [vmem:[#allocation4 + $0x1e] sm:$0xff]  ;;  %v8449_v13 = vld [vmem:[#allocation4 + $0x26] sm:$0xff]  ;;  %v8464_v52 = vadd.f32 %v9690_v3, %v3728_v24  ;;  %v8481_v3 = vpop.permute.xlu1 %4364 }
 0x604   : > { %9685 = vst [vmem:[#allocation98_spill] sm:$0xff] %v8449_v13  ;;  %v9686_v58 = vld [vmem:[#allocation166_spill] sm:$0xff]  ;;  %v9687_v22 = vld [vmem:[#allocation115_spill] sm:$0xff]  ;;  %4015 = vst [vmem:[#allocation4 + $0x28] sm:$0xff] %v9688_v49  ;;  %v8476_v49 = vmul.f32 %v9669_v50, %v3939_v41  ;;  %v8487_v41 = vpop.permute.xlu0 %4252  ;;  %v8491_v14 = vmul.f32 %v9696_v23, %v8481_v3 }
 0x605   : > { %v4027_v6 = vadd.f32 %v9686_v58, %v3947_v28  ;;  %4014 = vst [vmem:[#allocation4 + $0x20] sm:$0xff] %v9687_v22  ;;  %4013 = vst [vmem:[#allocation4 + $0x18] sm:$0xff] %v9689_v27  ;;  %v4032_v15 = vld [vmem:[#allocation4 + $0x9] sm:$0xff]  ;;  %v3756_v28 = vadd.f32 %v3752_v46, %v3700_v5  ;;  %v9691_v30 = vld [vmem:[#allocation79_spill] sm:$0xff]  ;;  %v3770_v46 = vadd.f32 %v3766_v25, %v3714_v31 }
 0x606   : > { %v4046_v10 = vld [vmem:[#allocation4 + $0xa] sm:$0xff]  ;;  %v8473_v58 = vadd.f32 %v9691_v30, %v3742_v16  ;;  %9692 = vst [vmem:[#allocation75_spill] sm:$0xff] %v8481_v3  ;;  %v9693_v57 = vld [vmem:[#allocation158_spill] sm:$0xff]  ;;  %9697 = vst [vmem:[#allocation76_spill] sm:$0xff] %v8491_v14 }
 0x607   : > { %v4060_v43 = vld [vmem:[#allocation4 + $0xb] sm:$0xff]  ;;  %v4037_v13 = vmul.f32 %v9693_v57, %v4032_v15  ;;  %v4031_v16 = vld [vmem:[#allocation4 + $0x1] sm:$0xff]  ;;  %v9698_v50 = vld [vmem:[#allocation161_spill] sm:$0xff]  ;;  %v8504_v3 = vpop.permute.xlu1 %4368 }
 0x608   : > { %v4074_v24 = vld [vmem:[#allocation4 + $0xc] sm:$0xff]  ;;  %v4065_v5 = vmul.f32 %v9695_v44, %v4060_v43  ;;  %v4045_v30 = vld [vmem:[#allocation4 + $0x2] sm:$0xff]  ;;  %v4036_v25 = vmul.f32 %v9693_v57, %v4031_v16 }
 0x609   : > { %v4088_v27 = vld [vmem:[#allocation4 + $0xd] sm:$0xff]  ;;  %v4059_v22 = vld [vmem:[#allocation4 + $0x3] sm:$0xff]  ;;  %v4079_v21 = vmul.f32 %v9698_v50, %v4074_v24  ;;  %v4041_v2 = vadd.f32 %v4037_v13, %v3961_v19 }
 0x60a   : > { %v4102_v34 = vld [vmem:[#allocation4 + $0xe] sm:$0xff]  ;;  %v9699_v37 = vld [vmem:[#allocation162_spill] sm:$0xff]  ;;  %v4040_v16 = vadd.f32 %v4036_v25, %v8413_v42  ;;  %v4069_v19 = vadd.f32 %v4065_v5, %v3989_v55  ;;  %v9708_v25 = vld [vmem:[#allocation83_spill] sm:$0xff] }
 0x60b   : > { %v9694_v56 = vld [vmem:[#allocation159_spill] sm:$0xff]  ;;  %4134 = vst [vmem:[#allocation4 + $0x10] sm:$0xff] %v8323_v39  ;;  %v4093_v15 = vmul.f32 %v9699_v37, %v4088_v27  ;;  %v4064_v39 = vmul.f32 %v9695_v44, %v4059_v22 }
 0x60c   : > { %v4051_v51 = vmul.f32 %v9694_v56, %v4046_v10  ;;  %v9700_v0 = vld [vmem:[#allocation163_spill] sm:$0xff]  ;;  %v4050_v1 = vmul.f32 %v9694_v56, %v4045_v30 }
 0x60d   : > { %v4107_v10 = vmul.f32 %v9700_v0, %v4102_v34  ;;  %v4073_v54 = vld [vmem:[#allocation4 + $0x4] sm:$0xff]  ;;  %v4068_v22 = vadd.f32 %v4064_v39, %v8420_v35  ;;  %v3826_v39 = vadd.f32 %v9708_v25, %v3770_v46 }
 0x60e   : > { %v4087_v43 = vld [vmem:[#allocation4 + $0x5] sm:$0xff]  ;;  %v4078_v24 = vmul.f32 %v9698_v50, %v4073_v54  ;;  %v4055_v14 = vadd.f32 %v4051_v51, %v3975_v60  ;;  %v4054_v30 = vadd.f32 %v4050_v1, %v8415_v8  ;;  %v8515_v54 = vpop.permute.xlu0 %4366  ;;  %v8520_v51 = vadd.f32 %v4079_v21, %v4027_v6 }
 0x60f   : > { %v4101_v31 = vld [vmem:[#allocation4 + $0x6] sm:$0xff]  ;;  %v4092_v27 = vmul.f32 %v9699_v37, %v4087_v43  ;;  %v8522_v60 = vadd.f32 %v4093_v15, %v4041_v2  ;;  %v8540_v21 = vadd.f32 %v8374_v62, %v4069_v19  ;;  %v4033_v2 = vld [vmem:[#allocation4 + $0x19] sm:$0xff]  ;;  %v8545_v6 = vmul.f32 %v9696_v23, %v8515_v54 }
 0x610   : > { %4133 = vst [vmem:[#allocation4 + $0x8] sm:$0xff] %v8329_v26  ;;  %4132 = vst [vmem:[#allocation4] sm:$0xff] %v8286_v61  ;;  %v4106_v34 = vmul.f32 %v9700_v0, %v4101_v31  ;;  %v8509_v13 = vld [vmem:[#allocation4 + $0x21] sm:$0xff]  ;;  %v8518_v43 = vadd.f32 %v4078_v24, %v8423_v12  ;;  %v8524_v42 = vadd.f32 %v4107_v10, %v4055_v14  ;;  %v9721_v23 = vld [vmem:[#allocation181_spill] sm:$0xff] }
 0x611   : > { %9701 = vst [vmem:[#allocation73_spill] sm:$0xff] %v8509_v13  ;;  %v8511_v26 = vld [vmem:[#allocation4 + $0x22] sm:$0xff]  ;;  %v8532_v55 = vadd.f32 %v4092_v27, %v4040_v16  ;;  %v8537_v31 = vadd.f32 %v8302_v4, %v4068_v22  ;;  %v4047_v12 = vld [vmem:[#allocation4 + $0x1a] sm:$0xff]  ;;  %v8553_v16 = vpop.permute.xlu1 %4372  ;;  %v8559_v22 = vmul.f32 %v9672_v11, %v8439_v45  ;;  %v8566_v46 = vmul.f32 %v9693_v57, %v4033_v2 }
 0x612   : > { %9702 = vst [vmem:[#allocation74_spill] sm:$0xff] %v8511_v26  ;;  %v8513_v61 = vld [vmem:[#allocation4 + $0x23] sm:$0xff]  ;;  %v8534_v5 = vadd.f32 %v4106_v34, %v4054_v30  ;;  %v4061_v14 = vld [vmem:[#allocation4 + $0x1b] sm:$0xff]  ;;  %9710 = vst [vmem:[#allocation145_spill] sm:$0xff] %v8553_v16 }
 0x613   : > { %9703 = vst [vmem:[#allocation77_spill] sm:$0xff] %v8513_v61  ;;  %v8526_v1 = vld [vmem:[#allocation4 + $0x24] sm:$0xff]  ;;  %v4075_v27 = vld [vmem:[#allocation4 + $0x1c] sm:$0xff]  ;;  %v9711_v30 = vld [vmem:[#allocation87_spill] sm:$0xff] }
 0x614   : > { %9704 = vst [vmem:[#allocation108_spill] sm:$0xff] %v8526_v1  ;;  %v8528_v8 = vld [vmem:[#allocation4 + $0x25] sm:$0xff]  ;;  %v4089_v34 = vld [vmem:[#allocation4 + $0x1d] sm:$0xff]  ;;  %v9716_v61 = vld [vmem:[#allocation168_spill] sm:$0xff] }
 0x615   : > { %9705 = vst [vmem:[#allocation106_spill] sm:$0xff] %v8528_v8  ;;  %v8530_v35 = vld [vmem:[#allocation4 + $0x26] sm:$0xff]  ;;  %v8551_v62 = vld [vmem:[#allocation4 + $0x1e] sm:$0xff]  ;;  %v8585_v8 = vmul.f32 %v9698_v50, %v4075_v27  ;;  %v8595_v27 = vpop.permute.xlu1 %4486 }
 0x616   : > { %9706 = vst [vmem:[#allocation96_spill] sm:$0xff] %v8530_v35  ;;  %4137 = vst [vmem:[#allocation4 + $0x28] sm:$0xff] %v8389_v47  ;;  %v9707_v15 = vld [vmem:[#allocation80_spill] sm:$0xff]  ;;  %v3854_v47 = vadd.f32 %v9711_v30, %v8473_v58  ;;  %v9712_v19 = vld [vmem:[#allocation101_spill] sm:$0xff] }
 0x617   : > { %v3812_v10 = vadd.f32 %v9707_v15, %v3756_v28  ;;  %v9709_v24 = vld [vmem:[#allocation86_spill] sm:$0xff]  ;;  %v8563_v28 = vmul.f32 %v9676_v7, %v8447_v29  ;;  %4136 = vst [vmem:[#allocation4 + $0x20] sm:$0xff] %v8346_v33  ;;  %4135 = vst [vmem:[#allocation4 + $0x18] sm:$0xff] %v8358_v53  ;;  %v9713_v58 = vld [vmem:[#allocation149_spill] sm:$0xff]  ;;  %v8582_v33 = vmul.f32 %v9695_v44, %v4061_v14 }
 0x618   : > { %v3840_v4 = vadd.f32 %v9709_v24, %v8464_v52  ;;  %v8570_v52 = vpop.permute.xlu0 %4370  ;;  %v3906_v25 = vadd.f32 %v9713_v58, %v3826_v39  ;;  %v8578_v24 = vmul.f32 %v9694_v56, %v4047_v12  ;;  %v4154_v29 = vld [vmem:[#allocation4 + $0x9] sm:$0xff]  ;;  %v3934_v35 = vadd.f32 %v8470_v38, %v3854_v47  ;;  %v9715_v58 = vld [vmem:[#allocation165_spill] sm:$0xff]  ;;  %v4153_v47 = vld [vmem:[#allocation4 + $0x1] sm:$0xff]  ;;  %9717 = vst [vmem:[#allocation156_spill] sm:$0xff] %v8595_v27 }
 0x619   : > { %v3868_v15 = vadd.f32 %v9712_v19, %v3812_v10  ;;  %v4168_v30 = vld [vmem:[#allocation4 + $0xa] sm:$0xff]  ;;  %v8588_v10 = vmul.f32 %v9699_v37, %v4089_v34  ;;  %v4167_v14 = vld [vmem:[#allocation4 + $0x2] sm:$0xff]  ;;  %v9718_v34 = vld [vmem:[#allocation169_spill] sm:$0xff] }
 0x61a   : > { %v8575_v45 = vadd.f32 %v8467_v63, %v3840_v4  ;;  %v4182_v2 = vld [vmem:[#allocation4 + $0xb] sm:$0xff]  ;;  %v4173_v1 = vmul.f32 %v9715_v58, %v4168_v30  ;;  %v4181_v44 = vld [vmem:[#allocation4 + $0x3] sm:$0xff] }
 0x61b   : > { %v4196_v39 = vld [vmem:[#allocation4 + $0xc] sm:$0xff]  ;;  %v4187_v56 = vmul.f32 %v9716_v61, %v4182_v2  ;;  %v3948_v38 = vadd.f32 %v8476_v49, %v3868_v15  ;;  %v9719_v50 = vld [vmem:[#allocation170_spill] sm:$0xff]  ;;  %v4172_v15 = vmul.f32 %v9715_v58, %v4167_v14 }
 0x61c   : > { %v4210_v63 = vld [vmem:[#allocation4 + $0xd] sm:$0xff]  ;;  %v4201_v37 = vmul.f32 %v9718_v34, %v4196_v39  ;;  %v4195_v30 = vld [vmem:[#allocation4 + $0x4] sm:$0xff]  ;;  %v8601_v11 = vpop.permute.xlu0 %4374  ;;  %v8608_v39 = vmul.f32 %v9721_v23, %v8595_v27 }
 0x61d   : > { %v4224_v4 = vld [vmem:[#allocation4 + $0xe] sm:$0xff]  ;;  %v4215_v26 = vmul.f32 %v9719_v50, %v4210_v63  ;;  %v4209_v7 = vld [vmem:[#allocation4 + $0x5] sm:$0xff] }
 0x61e   : > { %v9714_v19 = vld [vmem:[#allocation164_spill] sm:$0xff]  ;;  %4256 = vst [vmem:[#allocation4 + $0x10] sm:$0xff] %v8407_v59  ;;  %v9720_v57 = vld [vmem:[#allocation171_spill] sm:$0xff]  ;;  %v4186_v59 = vmul.f32 %v9716_v61, %v4181_v44  ;;  %9722 = vst [vmem:[#allocation166_spill] sm:$0xff] %v8608_v39  ;;  %v4176_v44 = vadd.f32 %v4172_v15, %v8532_v55  ;;  %v4177_v39 = vadd.f32 %v4173_v1, %v8522_v60 }
 0x61f   : > { %v4159_v12 = vmul.f32 %v9714_v19, %v4154_v29  ;;  %v4229_v13 = vmul.f32 %v9720_v57, %v4224_v4  ;;  %v3962_v29 = vadd.f32 %v8479_v32, %v3906_v25  ;;  %v4223_v2 = vld [vmem:[#allocation4 + $0x6] sm:$0xff]  ;;  %v4158_v49 = vmul.f32 %v9714_v19, %v4153_v47  ;;  %v4155_v15 = vld [vmem:[#allocation4 + $0x19] sm:$0xff] }
 0x620   : > { %4255 = vst [vmem:[#allocation4 + $0x8] sm:$0xff] %v8411_v18  ;;  %4254 = vst [vmem:[#allocation4] sm:$0xff] %v8381_v36  ;;  %v4200_v32 = vmul.f32 %v9718_v34, %v4195_v30  ;;  %v4214_v25 = vmul.f32 %v9719_v50, %v4209_v7  ;;  %v4228_v63 = vmul.f32 %v9720_v57, %v4223_v2  ;;  %v8620_v27 = vld [vmem:[#allocation4 + $0x21] sm:$0xff]  ;;  %v8639_v1 = vpop.permute.xlu0 %4488 }
 0x621   : > { %v4163_v4 = vadd.f32 %v4159_v12, %v8520_v51  ;;  %v4162_v47 = vadd.f32 %v4158_v49, %v8518_v43  ;;  %v4190_v14 = vadd.f32 %v4186_v59, %v8534_v5  ;;  %v8622_v18 = vld [vmem:[#allocation4 + $0x22] sm:$0xff]  ;;  %v4191_v30 = vadd.f32 %v4187_v56, %v8524_v42  ;;  %v4169_v56 = vld [vmem:[#allocation4 + $0x1a] sm:$0xff] }
 0x622   : > { %v8624_v36 = vld [vmem:[#allocation4 + $0x23] sm:$0xff]  ;;  %v8627_v7 = vadd.f32 %v4200_v32, %v8537_v31  ;;  %v4205_v51 = vadd.f32 %v4201_v37, %v8540_v21  ;;  %v4232_v2 = vadd.f32 %v4228_v63, %v4176_v44  ;;  %v4233_v31 = vadd.f32 %v4229_v13, %v4177_v39  ;;  %v4183_v42 = vld [vmem:[#allocation4 + $0x1b] sm:$0xff] }
 0x623   : > { %9723 = vst [vmem:[#allocation137_spill] sm:$0xff] %v8624_v36  ;;  %v8631_v43 = vadd.f32 %v4215_v26, %v4163_v4  ;;  %v8633_v55 = vld [vmem:[#allocation4 + $0x24] sm:$0xff]  ;;  %v4218_v12 = vadd.f32 %v4214_v25, %v4162_v47  ;;  %v8642_v49 = vadd.f32 %v8395_v9, %v4190_v14  ;;  %v4271_v37 = vadd.f32 %v8434_v17, %v4191_v30  ;;  %v4197_v32 = vld [vmem:[#allocation4 + $0x1c] sm:$0xff] }
 0x624   : > { %9724 = vst [vmem:[#allocation120_spill] sm:$0xff] %v8633_v55  ;;  %v8635_v5 = vld [vmem:[#allocation4 + $0x25] sm:$0xff]  ;;  %v8648_v26 = vmul.f32 %v9721_v23, %v8639_v1  ;;  %v3976_v21 = vadd.f32 %v8559_v22, %v8575_v45  ;;  %v3990_v59 = vadd.f32 %v8563_v28, %v3934_v35  ;;  %v8653_v9 = vld [vmem:[#allocation4 + $0x1d] sm:$0xff]  ;;  %v4108_v17 = vmul.f32 %v9700_v0, %v8551_v62 }
 0x625   : > { %9725 = vst [vmem:[#allocation78_spill] sm:$0xff] %v8635_v5  ;;  %v8637_v60 = vld [vmem:[#allocation4 + $0x26] sm:$0xff]  ;;  %v8655_v13 = vld [vmem:[#allocation4 + $0x1e] sm:$0xff]  ;;  %v4146_v63 = vmul.f32 %v9630_v20, %v8358_v53  ;;  %v4160_v28 = vmul.f32 %v9714_v19, %v4155_v15  ;;  %v4174_v45 = vmul.f32 %v9715_v58, %v4169_v56  ;;  %v4188_v53 = vmul.f32 %v9716_v61, %v4183_v42 }
 0x626   : > { %9726 = vst [vmem:[#allocation79_spill] sm:$0xff] %v8637_v60  ;;  %4259 = vst [vmem:[#allocation4 + $0x28] sm:$0xff] %v8487_v41  ;;  %v9727_v39 = vld [vmem:[#allocation167_spill] sm:$0xff]  ;;  %v4042_v41 = vadd.f32 %v8566_v46, %v3962_v29  ;;  %v4056_v35 = vadd.f32 %v8578_v24, %v3976_v21  ;;  %v4070_v22 = vadd.f32 %v8582_v33, %v3990_v59  ;;  %v9728_v14 = vld [vmem:[#allocation173_spill] sm:$0xff] }
 0x627   : > { %v4028_v25 = vadd.f32 %v9727_v39, %v3948_v38  ;;  %4258 = vst [vmem:[#allocation4 + $0x20] sm:$0xff] %v8441_v40  ;;  %4257 = vst [vmem:[#allocation4 + $0x18] sm:$0xff] %v8451_v48  ;;  %v4276_v38 = vld [vmem:[#allocation4 + $0x9] sm:$0xff]  ;;  %v4202_v47 = vmul.f32 %v9718_v34, %v4197_v32  ;;  %v9729_v30 = vld [vmem:[#allocation174_spill] sm:$0xff] }
 0x628   : > { %v4290_v46 = vld [vmem:[#allocation4 + $0xa] sm:$0xff]  ;;  %v4098_v4 = vadd.f32 %v8588_v10, %v4042_v41  ;;  %v4281_v33 = vmul.f32 %v9728_v14, %v4276_v38  ;;  %v4112_v59 = vadd.f32 %v4108_v17, %v4056_v35  ;;  %v4275_v39 = vld [vmem:[#allocation4 + $0x1] sm:$0xff]  ;;  %v4150_v5 = vadd.f32 %v4146_v63, %v4070_v22 }
 0x629   : > { %v4304_v29 = vld [vmem:[#allocation4 + $0xb] sm:$0xff]  ;;  %v4084_v62 = vadd.f32 %v8585_v8, %v4028_v25  ;;  %v4295_v15 = vmul.f32 %v9729_v30, %v4290_v46  ;;  %v4289_v40 = vld [vmem:[#allocation4 + $0x2] sm:$0xff]  ;;  %v9731_v8 = vld [vmem:[#allocation177_spill] sm:$0xff]  ;;  %v4280_v46 = vmul.f32 %v9728_v14, %v4275_v39 }
 0x62a   : > { %v4318_v48 = vld [vmem:[#allocation4 + $0xc] sm:$0xff]  ;;  %v4303_v60 = vld [vmem:[#allocation4 + $0x3] sm:$0xff]  ;;  %v4285_v35 = vadd.f32 %v4281_v33, %v4205_v51 }
 0x62b   : > { %v4332_v44 = vld [vmem:[#allocation4 + $0xd] sm:$0xff]  ;;  %v4323_v10 = vmul.f32 %v9731_v8, %v4318_v48  ;;  %v9732_v42 = vld [vmem:[#allocation178_spill] sm:$0xff]  ;;  %v4299_v63 = vadd.f32 %v4295_v15, %v8631_v43  ;;  %v4284_v22 = vadd.f32 %v4280_v46, %v8627_v7  ;;  %v4192_v46 = vadd.f32 %v4188_v53, %v4112_v59 }
 0x62c   : > { %v4346_v24 = vld [vmem:[#allocation4 + $0xe] sm:$0xff]  ;;  %v4337_v25 = vmul.f32 %v9732_v42, %v4332_v44  ;;  %v4317_v34 = vld [vmem:[#allocation4 + $0x4] sm:$0xff] }
 0x62d   : > { %v9730_v21 = vld [vmem:[#allocation175_spill] sm:$0xff]  ;;  %4378 = vst [vmem:[#allocation4 + $0x10] sm:$0xff] %v8504_v3  ;;  %v4322_v3 = vmul.f32 %v9731_v8, %v4317_v34 }
 0x62e   : > { %v4309_v56 = vmul.f32 %v9730_v21, %v4304_v29  ;;  %v9733_v32 = vld [vmem:[#allocation179_spill] sm:$0xff]  ;;  %v4294_v29 = vmul.f32 %v9729_v30, %v4289_v40  ;;  %v4308_v17 = vmul.f32 %v9730_v21, %v4303_v60  ;;  %v8699_v60 = vadd.f32 %v4337_v25, %v4285_v35  ;;  %v4305_v25 = vld [vmem:[#allocation4 + $0x1b] sm:$0xff] }
 0x62f   : > { %v4351_v41 = vmul.f32 %v9733_v32, %v4346_v24  ;;  %v4331_v55 = vld [vmem:[#allocation4 + $0x5] sm:$0xff]  ;;  %v8697_v34 = vadd.f32 %v4322_v3, %v8642_v49  ;;  %v4333_v35 = vld [vmem:[#allocation4 + $0x1d] sm:$0xff] }
 0x630   : > { %v4345_v38 = vld [vmem:[#allocation4 + $0x6] sm:$0xff]  ;;  %v4336_v48 = vmul.f32 %v9732_v42, %v4331_v55  ;;  %v4298_v39 = vadd.f32 %v4294_v29, %v4218_v12  ;;  %v4312_v61 = vadd.f32 %v4308_v17, %v4232_v2  ;;  %v4313_v40 = vadd.f32 %v4309_v56, %v4233_v31  ;;  %v4319_v17 = vld [vmem:[#allocation4 + $0x1c] sm:$0xff] }
 0x631   : > { %4377 = vst [vmem:[#allocation4 + $0x8] sm:$0xff] %v8515_v54  ;;  %v4350_v44 = vmul.f32 %v9733_v32, %v4345_v38  ;;  %v9734_v24 = vld [vmem:[#allocation75_spill] sm:$0xff]  ;;  %v4327_v55 = vadd.f32 %v4323_v10, %v4271_v37  ;;  %v8701_v33 = vadd.f32 %v4351_v41, %v4299_v63  ;;  %v9739_v15 = vld [vmem:[#allocation76_spill] sm:$0xff]  ;;  %v4164_v41 = vadd.f32 %v4160_v28, %v4084_v62  ;;  %v8729_v28 = vpop.permute.xlu0 %4492  ;;  %v9740_v63 = vld [vmem:[#allocation157_spill] sm:$0xff] }
 0x632   : > { %4376 = vst [vmem:[#allocation4] sm:$0xff] %v9734_v24  ;;  %v8690_v36 = vld [vmem:[#allocation4 + $0x21] sm:$0xff]  ;;  %v8709_v2 = vadd.f32 %v4336_v48, %v4284_v22  ;;  %v8714_v56 = vadd.f32 %v9739_v15, %v4312_v61  ;;  %v8717_v49 = vadd.f32 %v8545_v6, %v4313_v40  ;;  %v4277_v37 = vld [vmem:[#allocation4 + $0x19] sm:$0xff]  ;;  %v4178_v38 = vadd.f32 %v4174_v45, %v4098_v4 }
 0x633   : > { %v8692_v51 = vld [vmem:[#allocation4 + $0x22] sm:$0xff]  ;;  %v8711_v31 = vadd.f32 %v4350_v44, %v4298_v39  ;;  %v4291_v10 = vld [vmem:[#allocation4 + $0x1a] sm:$0xff]  ;;  %v4206_v29 = vadd.f32 %v4202_v47, %v4150_v5  ;;  %v4216_v48 = vmul.f32 %v9719_v50, %v8653_v9  ;;  %v4230_v61 = vmul.f32 %v9720_v57, %v8655_v13 }
 0x634   : > { %v8694_v54 = vld [vmem:[#allocation4 + $0x23] sm:$0xff]  ;;  %v4282_v6 = vmul.f32 %v9728_v14, %v4277_v37  ;;  %v8726_v44 = vmul.f32 %v9729_v30, %v4291_v10  ;;  %v4263_v5 = vld [vmem:[#allocation4 + $0x18] sm:$0xff]  ;;  %v4310_v45 = vmul.f32 %v9730_v21, %v4305_v25  ;;  %v4324_v62 = vmul.f32 %v9731_v8, %v4319_v17  ;;  %v9741_v10 = vld [vmem:[#allocation180_spill] sm:$0xff] }
 0x635   : > { %9735 = vst [vmem:[#allocation163_spill] sm:$0xff] %v8694_v54  ;;  %v8703_v43 = vld [vmem:[#allocation4 + $0x24] sm:$0xff]  ;;  %v4338_v9 = vmul.f32 %v9732_v42, %v4333_v35  ;;  %v4220_v59 = vadd.f32 %v4216_v48, %v4164_v41  ;;  %v4234_v24 = vadd.f32 %v4230_v61, %v4178_v38  ;;  %v4268_v22 = vmul.f32 %v9740_v63, %v4263_v5  ;;  %v9745_v61 = vld [vmem:[#allocation184_spill] sm:$0xff] }
 0x636   : > { %9736 = vst [vmem:[#allocation80_spill] sm:$0xff] %v8703_v43  ;;  %v8705_v7 = vld [vmem:[#allocation4 + $0x25] sm:$0xff]  ;;  %v4286_v39 = vadd.f32 %v4282_v6, %v4206_v29  ;;  %v9746_v6 = vld [vmem:[#allocation185_spill] sm:$0xff] }
 0x637   : > { %9737 = vst [vmem:[#allocation83_spill] sm:$0xff] %v8705_v7  ;;  %v8707_v12 = vld [vmem:[#allocation4 + $0x26] sm:$0xff]  ;;  %v4347_v3 = vld [vmem:[#allocation4 + $0x1e] sm:$0xff]  ;;  %v4272_v8 = vadd.f32 %v4268_v22, %v4192_v46  ;;  %v4497_v22 = vpop.permute.xlu0 %4496 }
 0x638   : > { %9738 = vst [vmem:[#allocation86_spill] sm:$0xff] %v8707_v12  ;;  %4381 = vst [vmem:[#allocation4 + $0x28] sm:$0xff] %v8601_v11  ;;  %v4491_v11 = vpop.permute.xlu1 %4490  ;;  %v8735_v4 = vmul.f32 %v9733_v32, %v4347_v3  ;;  %v4398_v13 = vld [vmem:[#allocation4 + $0x9] sm:$0xff]  ;;  %v9742_v17 = vld [vmem:[#allocation182_spill] sm:$0xff] }
 0x639   : > { %4380 = vst [vmem:[#allocation4 + $0x20] sm:$0xff] %v8553_v16  ;;  %v4412_v53 = vld [vmem:[#allocation4 + $0xa] sm:$0xff]  ;;  %4379 = vst [vmem:[#allocation4 + $0x18] sm:$0xff] %v8570_v52  ;;  %v4403_v25 = vmul.f32 %v9741_v10, %v4398_v13  ;;  %v4397_v41 = vld [vmem:[#allocation4 + $0x1] sm:$0xff] }
 0x63a   : > { %v4426_v47 = vld [vmem:[#allocation4 + $0xb] sm:$0xff]  ;;  %v4417_v35 = vmul.f32 %v9742_v17, %v4412_v53  ;;  %v4411_v38 = vld [vmem:[#allocation4 + $0x2] sm:$0xff]  ;;  %v4402_v13 = vmul.f32 %v9741_v10, %v4397_v41 }
 0x63b   : > { %v4440_v40 = vld [vmem:[#allocation4 + $0xc] sm:$0xff]  ;;  %v4425_v48 = vld [vmem:[#allocation4 + $0x3] sm:$0xff]  ;;  %v4416_v53 = vmul.f32 %v9742_v17, %v4411_v38 }
 0x63c   : > { %v4454_v15 = vld [vmem:[#allocation4 + $0xd] sm:$0xff]  ;;  %v4445_v29 = vmul.f32 %v9745_v61, %v4440_v40  ;;  %v9747_v42 = vld [vmem:[#allocation186_spill] sm:$0xff]  ;;  %v4421_v46 = vadd.f32 %v4417_v35, %v8699_v60 }
 0x63d   : > { %v4468_v37 = vld [vmem:[#allocation4 + $0xe] sm:$0xff]  ;;  %v4459_v5 = vmul.f32 %v9746_v6, %v4454_v15  ;;  %v4439_v43 = vld [vmem:[#allocation4 + $0x4] sm:$0xff]  ;;  %v4420_v41 = vadd.f32 %v4416_v53, %v8709_v2 }
 0x63e   : > { %v9743_v16 = vld [vmem:[#allocation183_spill] sm:$0xff]  ;;  %v9744_v32 = vld [vmem:[#allocation172_spill] sm:$0xff]  ;;  %4500 = vst [vmem:[#allocation4 + $0x10] sm:$0xff] %v4491_v11  ;;  %v4473_v7 = vmul.f32 %v9747_v42, %v4468_v37  ;;  %v4407_v11 = vadd.f32 %v4403_v25, %v4327_v55  ;;  %v4406_v37 = vadd.f32 %v4402_v13, %v8697_v34  ;;  %v9753_v13 = vld [vmem:[#allocation166_spill] sm:$0xff] }
 0x63f   : > { %v4431_v3 = vmul.f32 %v9743_v16, %v4426_v47  ;;  %v4390_v12 = vmul.f32 %v9744_v32, %v8570_v52  ;;  %v4430_v47 = vmul.f32 %v9743_v16, %v4425_v48  ;;  %v4453_v21 = vld [vmem:[#allocation4 + $0x5] sm:$0xff]  ;;  %v4444_v32 = vmul.f32 %v9745_v61, %v4439_v43  ;;  %v9748_v15 = vld [vmem:[#allocation156_spill] sm:$0xff] }
 0x640   : > { %v4467_v52 = vld [vmem:[#allocation4 + $0x6] sm:$0xff]  ;;  %v4458_v54 = vmul.f32 %v9746_v6, %v4453_v21  ;;  %v8770_v60 = vadd.f32 %v4459_v5, %v4407_v11  ;;  %v8772_v34 = vadd.f32 %v4473_v7, %v4421_v46  ;;  %v4399_v7 = vld [vmem:[#allocation4 + $0x19] sm:$0xff]  ;;  %v8783_v11 = vpop.permute.xlu1 %4494 }
 0x641   : > { %v4472_v40 = vmul.f32 %v9747_v42, %v4467_v52  ;;  %4498 = vst [vmem:[#allocation4] sm:$0xff] %v9748_v15  ;;  %4499 = vst [vmem:[#allocation4 + $0x8] sm:$0xff] %v8639_v1  ;;  %v4434_v38 = vadd.f32 %v4430_v47, %v8711_v31  ;;  %v4435_v55 = vadd.f32 %v4431_v3, %v8701_v33  ;;  %v8760_v43 = vld [vmem:[#allocation4 + $0x21] sm:$0xff] }
 0x642   : > { %v8762_v21 = vld [vmem:[#allocation4 + $0x22] sm:$0xff]  ;;  %v4448_v48 = vadd.f32 %v4444_v32, %v8714_v56  ;;  %v8768_v1 = vadd.f32 %v4445_v29, %v8717_v49  ;;  %v4462_v35 = vadd.f32 %v4458_v54, %v4406_v37  ;;  %v4300_v32 = vadd.f32 %v8726_v44, %v4220_v59  ;;  %v4413_v5 = vld [vmem:[#allocation4 + $0x1a] sm:$0xff]  ;;  %9754 = vst [vmem:[#allocation165_spill] sm:$0xff] %v8783_v11 }
 0x643   : > { %v8764_v25 = vld [vmem:[#allocation4 + $0x23] sm:$0xff]  ;;  %v4476_v3 = vadd.f32 %v4472_v40, %v4420_v41  ;;  %v4514_v53 = vadd.f32 %v9753_v13, %v4434_v38  ;;  %v4515_v47 = vadd.f32 %v8648_v26, %v4435_v55  ;;  %v4314_v56 = vadd.f32 %v4310_v45, %v4234_v24  ;;  %v4427_v52 = vld [vmem:[#allocation4 + $0x1b] sm:$0xff] }
 0x644   : > { %9749 = vst [vmem:[#allocation87_spill] sm:$0xff] %v8764_v25  ;;  %v8774_v2 = vld [vmem:[#allocation4 + $0x24] sm:$0xff]  ;;  %v4328_v49 = vadd.f32 %v4324_v62, %v4272_v8  ;;  %v4342_v29 = vadd.f32 %v4338_v9, %v4286_v39  ;;  %v4404_v15 = vmul.f32 %v9741_v10, %v4399_v7  ;;  %v4418_v54 = vmul.f32 %v9742_v17, %v4413_v5  ;;  %v4441_v46 = vld [vmem:[#allocation4 + $0x1c] sm:$0xff] }
 0x645   : > { %9750 = vst [vmem:[#allocation101_spill] sm:$0xff] %v8774_v2  ;;  %v8776_v31 = vld [vmem:[#allocation4 + $0x25] sm:$0xff]  ;;  %v4432_v40 = vmul.f32 %v9743_v16, %v4427_v52  ;;  %v4455_v37 = vld [vmem:[#allocation4 + $0x1d] sm:$0xff]  ;;  %v4512_v44 = vmul.f32 %v9721_v23, %v8729_v28  ;;  %v4356_v8 = vadd.f32 %v8735_v4, %v4300_v32  ;;  %v4394_v45 = vadd.f32 %v4390_v12, %v4314_v56 }
 0x646   : > { %9751 = vst [vmem:[#allocation149_spill] sm:$0xff] %v8776_v31  ;;  %v8778_v33 = vld [vmem:[#allocation4 + $0x26] sm:$0xff]  ;;  %v4469_v26 = vld [vmem:[#allocation4 + $0x1e] sm:$0xff]  ;;  %v4446_v62 = vmul.f32 %v9745_v61, %v4441_v46  ;;  %v4460_v9 = vmul.f32 %v9746_v6, %v4455_v37  ;;  %v4422_v41 = vadd.f32 %v4418_v54, %v4342_v29 }
 0x647   : > { %9752 = vst [vmem:[#allocation164_spill] sm:$0xff] %v8778_v33  ;;  %4503 = vst [vmem:[#allocation4 + $0x28] sm:$0xff] %v4497_v22  ;;  %v4408_v22 = vadd.f32 %v4404_v15, %v4328_v49  ;;  %v4474_v38 = vmul.f32 %v9747_v42, %v4469_v26  ;;  %v9755_v55 = vld [vmem:[#allocation191_spill] sm:$0xff]  ;;  %v9758_v32 = vld [vmem:[#allocation189_spill] sm:$0xff]  ;;  %v4436_v23 = vadd.f32 %v4432_v40, %v4356_v8 }
 0x648   : > { %4501 = vst [vmem:[#allocation4 + $0x18] sm:$0xff] %v8729_v28  ;;  %4502 = vst [vmem:[#allocation4 + $0x20] sm:$0xff] %v8783_v11  ;;  %v4519_v59 = vld [vmem:[#allocation4 + $0x1] sm:$0xff]  ;;  %v9760_v11 = vld [vmem:[#allocation192_spill] sm:$0xff] }
 0x649   : > { %v4533_v24 = vld [vmem:[#allocation4 + $0x2] sm:$0xff]  ;;  %v9761_v49 = vld [vmem:[#allocation193_spill] sm:$0xff]  ;;  %v4534_v42 = vld [vmem:[#allocation4 + $0xa] sm:$0xff] }
 0x64a   : > { %v4547_v39 = vld [vmem:[#allocation4 + $0x3] sm:$0xff]  ;;  %v4538_v56 = vmul.f32 %v9758_v32, %v4533_v24  ;;  %v4576_v61 = vld [vmem:[#allocation4 + $0xd] sm:$0xff]  ;;  %v4539_v40 = vmul.f32 %v9758_v32, %v4534_v42 }
 0x64b   : > { %v9756_v13 = vld [vmem:[#allocation215_spill] sm:$0xff]  ;;  %v9759_v5 = vld [vmem:[#allocation190_spill] sm:$0xff] }
 0x64c   : > { %v8798_v7 = vadd.f32 %v9756_v13, %v9755_v55  ;;  %v9757_v12 = vld [vmem:[#allocation187_spill] sm:$0xff]  ;;  %v4552_v52 = vmul.f32 %v9759_v5, %v4547_v39  ;;  %v4450_v13 = vadd.f32 %v4446_v62, %v4394_v45 }
 0x64d   : > { %v4524_v4 = vmul.f32 %v9757_v12, %v4519_v59  ;;  %v4561_v28 = vld [vmem:[#allocation4 + $0x4] sm:$0xff]  ;;  %v4542_v59 = vadd.f32 %v4538_v56, %v4462_v35  ;;  %v4562_v39 = vld [vmem:[#allocation4 + $0xc] sm:$0xff] }
 0x64e   : > { %v4575_v46 = vld [vmem:[#allocation4 + $0x5] sm:$0xff]  ;;  %v4566_v33 = vmul.f32 %v9760_v11, %v4561_v28  ;;  %v4556_v31 = vadd.f32 %v4552_v52, %v4476_v3  ;;  %v4567_v28 = vmul.f32 %v9760_v11, %v4562_v39  ;;  %v4543_v3 = vadd.f32 %v4539_v40, %v8770_v60 }
 0x64f   : > { %v4589_v37 = vld [vmem:[#allocation4 + $0x6] sm:$0xff]  ;;  %v4580_v29 = vmul.f32 %v9761_v49, %v4575_v46  ;;  %v4528_v6 = vadd.f32 %v4524_v4, %v4448_v48  ;;  %v4590_v46 = vld [vmem:[#allocation4 + $0xe] sm:$0xff]  ;;  %v4581_v48 = vmul.f32 %v9761_v49, %v4576_v61  ;;  %v4549_v42 = vld [vmem:[#allocation4 + $0x1b] sm:$0xff]  ;;  %v4516_v61 = vadd.f32 %v4512_v44, %v4436_v23 }
 0x650   : > { %v9762_v15 = vld [vmem:[#allocation195_spill] sm:$0xff]  ;;  %v4570_v2 = vadd.f32 %v4566_v33, %v4514_v53  ;;  %v4571_v62 = vadd.f32 %v4567_v28, %v4515_v47  ;;  %v4521_v33 = vld [vmem:[#allocation4 + $0x19] sm:$0xff]  ;;  %v4554_v47 = vmul.f32 %v9759_v5, %v4549_v42  ;;  %v9764_v44 = vld [vmem:[#allocation112_spill] sm:$0xff] }
 0x651   : > { %v4594_v54 = vmul.f32 %v9762_v15, %v4589_v37  ;;  %v4520_v26 = vld [vmem:[#allocation4 + $0x9] sm:$0xff]  ;;  %v4584_v37 = vadd.f32 %v4580_v29, %v4528_v6  ;;  %v4535_v53 = vld [vmem:[#allocation4 + $0x1a] sm:$0xff]  ;;  %v4595_v52 = vmul.f32 %v9762_v15, %v4590_v46 }
 0x652   : > { %v4548_v55 = vld [vmem:[#allocation4 + $0xb] sm:$0xff]  ;;  %v4525_v24 = vmul.f32 %v9757_v12, %v4520_v26  ;;  %v4606_v35 = vadd.f32 %v4570_v2, %v4556_v31  ;;  %v4464_v26 = vadd.f32 %v4460_v9, %v4408_v22  ;;  %v4563_v6 = vld [vmem:[#allocation4 + $0x1c] sm:$0xff]  ;;  %v4526_v2 = vmul.f32 %v9757_v12, %v4521_v33 }
 0x653   : > { %v4553_v8 = vmul.f32 %v9759_v5, %v4548_v55  ;;  %v4598_v16 = vadd.f32 %v4594_v54, %v4542_v59  ;;  %v4577_v29 = vld [vmem:[#allocation4 + $0x1d] sm:$0xff]  ;;  %v4478_v55 = vadd.f32 %v4474_v38, %v4422_v41  ;;  %v4599_v31 = vadd.f32 %v4595_v52, %v4543_v3  ;;  %v9770_v33 = vld [vmem:[#allocation200_spill] sm:$0xff] }
 0x654   : > { %v4529_v25 = vadd.f32 %v4525_v24, %v8768_v1  ;;  %v4591_v54 = vld [vmem:[#allocation4 + $0x1e] sm:$0xff]  ;;  %v4530_v59 = vadd.f32 %v4526_v2, %v4450_v13 }
 0x655   : > { %v4557_v45 = vadd.f32 %v4553_v8, %v8772_v34  ;;  %v4602_v4 = vadd.f32 %v4598_v16, %v4584_v37  ;;  %v4540_v34 = vmul.f32 %v9758_v32, %v4535_v53  ;;  %v4568_v16 = vmul.f32 %v9760_v11, %v4563_v6  ;;  %v9763_v23 = vld [vmem:[#allocation197_spill] sm:$0xff]  ;;  %v9765_v8 = vld [vmem:[#allocation198_spill] sm:$0xff]  ;;  %v9767_v37 = vld [vmem:[#allocation196_spill] sm:$0xff] }
 0x656   : > { %v4585_v56 = vadd.f32 %v4581_v48, %v4529_v25  ;;  %v4582_v25 = vmul.f32 %v9761_v49, %v4577_v29  ;;  %v4596_v9 = vmul.f32 %v9762_v15, %v4591_v54  ;;  %v4558_v41 = vadd.f32 %v4554_v47, %v4478_v55  ;;  %v9766_v28 = vld [vmem:[#allocation113_spill] sm:$0xff]  ;;  %v9768_v13 = vld [vmem:[#allocation114_spill] sm:$0xff]  ;;  %v9771_v53 = vld [vmem:[#allocation116_spill] sm:$0xff] }
 0x657   : > { %v4607_v1 = vadd.f32 %v4571_v62, %v4557_v45  ;;  %v4610_v60 = vadd.f32 %v4606_v35, %v4602_v4  ;;  %v4544_v24 = vadd.f32 %v4540_v34, %v4464_v26  ;;  %v3265_v38 = vmul.f32 %v9764_v44, %v9763_v23  ;;  %v9769_v45 = vld [vmem:[#allocation214_spill] sm:$0xff]  ;;  %v9773_v26 = vld [vmem:[#allocation68_spill] sm:$0xff]  ;;  %v9774_v29 = vld [vmem:[#allocation201_spill] sm:$0xff] }
 0x658   : > { %v4603_v22 = vadd.f32 %v4599_v31, %v4585_v56  ;;  %v4572_v39 = vadd.f32 %v4568_v16, %v4516_v61  ;;  %v4586_v40 = vadd.f32 %v4582_v25, %v4530_v59  ;;  %v3279_v46 = vmul.f32 %v9766_v28, %v9765_v8  ;;  %v9772_v56 = vld [vmem:[#allocation148_spill] sm:$0xff]  ;;  %v9775_v54 = vld [vmem:[#allocation117_spill] sm:$0xff]  ;;  %v9778_v34 = vld [vmem:[#allocation203_spill] sm:$0xff] }
 0x659   : > { %4614 = vst [vmem:[#allocation5] sm:$0xff] %v4610_v60  ;;  %v3317_v48 = vmul.f32 %v9768_v13, %v9767_v37  ;;  %v4600_v3 = vadd.f32 %v4596_v9, %v4544_v24  ;;  %v3269_v62 = vadd.f32 %v3265_v38, %v9769_v45  ;;  %v3331_v42 = vmul.f32 %v9771_v53, %v9770_v33  ;;  %v9776_v60 = vld [vmem:[#allocation202_spill] sm:$0xff]  ;;  %v9779_v47 = vld [vmem:[#allocation119_spill] sm:$0xff]  ;;  %v9780_v25 = vld [vmem:[#allocation204_spill] sm:$0xff] }
 0x65a   : > { %v4611_v35 = vadd.f32 %v4607_v1, %v4603_v22  ;;  %v4608_v4 = vadd.f32 %v4572_v39, %v4558_v41  ;;  %v3283_v52 = vadd.f32 %v3279_v46, %v9772_v56  ;;  %v3345_v55 = vmul.f32 %v9775_v54, %v9774_v29  ;;  %v9777_v1 = vld [vmem:[#allocation118_spill] sm:$0xff]  ;;  %v9781_v9 = vld [vmem:[#allocation121_spill] sm:$0xff]  ;;  %v9784_v44 = vld [vmem:[#allocation199_spill] sm:$0xff] }
 0x65b   : > { %v3321_v6 = vadd.f32 %v3317_v48, %v9773_v26  ;;  %v4604_v61 = vadd.f32 %v4600_v3, %v4586_v40  ;;  %v3335_v2 = vadd.f32 %v3331_v42, %v8798_v7  ;;  %v3359_v31 = vmul.f32 %v9777_v1, %v9776_v60  ;;  %v9782_v24 = vld [vmem:[#allocation205_spill] sm:$0xff]  ;;  %v9783_v41 = vld [vmem:[#allocation122_spill] sm:$0xff]  ;;  %v9785_v38 = vld [vmem:[#allocation123_spill] sm:$0xff] }
 0x65c   : > { %4615 = vst [vmem:[#allocation5 + $0x8] sm:$0xff] %v4611_v35  ;;  %v3373_v59 = vmul.f32 %v9779_v47, %v9778_v34  ;;  %v3349_v16 = vadd.f32 %v3345_v55, %v3269_v62  ;;  %v3387_v22 = vmul.f32 %v9781_v9, %v9780_v25  ;;  %v3401_v23 = vmul.f32 %v9783_v41, %v9782_v24  ;;  %v9786_v7 = vld [vmem:[#allocation100_spill] sm:$0xff]  ;;  %v9787_v46 = vld [vmem:[#allocation124_spill] sm:$0xff]  ;;  %v9789_v45 = vld [vmem:[#allocation126_spill] sm:$0xff] }
 0x65d   : > { %v3439_v39 = vmul.f32 %v9785_v38, %v9784_v44  ;;  %v4612_v8 = vadd.f32 %v4608_v4, %v4604_v61  ;;  %v3363_v40 = vadd.f32 %v3359_v31, %v3283_v52  ;;  %v3453_v37 = vmul.f32 %v9787_v46, %v9786_v7  ;;  %v9788_v3 = vld [vmem:[#allocation176_spill] sm:$0xff]  ;;  %v9790_v33 = vld [vmem:[#allocation206_spill] sm:$0xff]  ;;  %v9791_v53 = vld [vmem:[#allocation127_spill] sm:$0xff] }
 0x65e   : > { %v3377_v28 = vadd.f32 %v3373_v59, %v3321_v6  ;;  %v3391_v48 = vadd.f32 %v3387_v22, %v3335_v2  ;;  %v3405_v35 = vadd.f32 %v3401_v23, %v3349_v16  ;;  %v3467_v62 = vmul.f32 %v9789_v45, %v9788_v3  ;;  %v9792_v52 = vld [vmem:[#allocation207_spill] sm:$0xff]  ;;  %v9793_v26 = vld [vmem:[#allocation128_spill] sm:$0xff]  ;;  %v9795_v54 = vld [vmem:[#allocation130_spill] sm:$0xff] }
 0x65f   : > { %v3481_v42 = vmul.f32 %v9791_v53, %v9790_v33  ;;  %4616 = vst [vmem:[#allocation5 + $0x10] sm:$0xff] %v4612_v8  ;;  %v3443_v56 = vadd.f32 %v3439_v39, %v3363_v40  ;;  %v3495_v6 = vmul.f32 %v9793_v26, %v9792_v52  ;;  %v9794_v29 = vld [vmem:[#allocation208_spill] sm:$0xff]  ;;  %v9796_v60 = vld [vmem:[#allocation209_spill] sm:$0xff]  ;;  %v9797_v1 = vld [vmem:[#allocation131_spill] sm:$0xff] }
 0x660   : > { %v5380_v13 = vld.sshfl [vmem:[#allocation5 + $0x1] sm:$0x1 pattern:$0x76325410]  ;;  %v3457_v4 = vadd.f32 %v3453_v37, %v3377_v28  ;;  %v3509_v55 = vmul.f32 %v9795_v54, %v9794_v29  ;;  %v3471_v61 = vadd.f32 %v3467_v62, %v3391_v48  ;;  %v3523_v31 = vmul.f32 %v9797_v1, %v9796_v60  ;;  %v9798_v34 = vld [vmem:[#allocation109_spill] sm:$0xff]  ;;  %v9800_v9 = vld [vmem:[#allocation107_spill] sm:$0xff] }
 0x661   : > { %4630 = vrot.lane.b32.xlu1 %v5380_v13, %s5693_s15  ;;  %v3485_v2 = vadd.f32 %v3481_v42, %v3405_v35  ;;  %v9799_v47 = vld [vmem:[#allocation132_spill] sm:$0xff]  ;;  %v3499_v16 = vadd.f32 %v3495_v6, %v3443_v56  ;;  %v9801_v22 = vld [vmem:[#allocation133_spill] sm:$0xff]  ;;  %v9802_v41 = vld [vmem:[#allocation194_spill] sm:$0xff] }
 0x662   : > { %v3561_v59 = vmul.f32 %v9799_v47, %v9798_v34  ;;  %v3513_v25 = vadd.f32 %v3509_v55, %v3457_v4  ;;  %v3575_v24 = vmul.f32 %v9801_v22, %v9800_v9  ;;  %v9803_v23 = vld [vmem:[#allocation134_spill] sm:$0xff]  ;;  %v3527_v39 = vadd.f32 %v3523_v31, %v3471_v61  ;;  %v9805_v28 = vld [vmem:[#allocation135_spill] sm:$0xff]  ;;  %v9807_v37 = vld [vmem:[#allocation136_spill] sm:$0xff] }
 0x663   : > { %v3589_v44 = vmul.f32 %v9803_v23, %v9802_v41  ;;  %v5387_v38 = vld.sshfl [vmem:[#allocation5 + $0x9] sm:$0x1 pattern:$0x76325410]  ;;  %v9804_v40 = vld [vmem:[#allocation210_spill] sm:$0xff]  ;;  %v9806_v46 = vld [vmem:[#allocation211_spill] sm:$0xff] }
 0x664   : > { %v3565_v8 = vadd.f32 %v3561_v59, %v3485_v2  ;;  %v3603_v7 = vmul.f32 %v9805_v28, %v9804_v40  ;;  %v3617_v13 = vmul.f32 %v9807_v37, %v9806_v46  ;;  %4730 = vrot.lane.b32.xlu0 %v5387_v38, %s5693_s15  ;;  %v3579_v48 = vadd.f32 %v3575_v24, %v3499_v16  ;;  %v9808_v3 = vld [vmem:[#allocation212_spill] sm:$0xff]  ;;  %v9809_v45 = vld [vmem:[#allocation138_spill] sm:$0xff]  ;;  %v9810_v33 = vld [vmem:[#allocation213_spill] sm:$0xff] }
 0x665   : > { %v3593_v35 = vadd.f32 %v3589_v44, %v3513_v25  ;;  %v3631_v62 = vmul.f32 %v9809_v45, %v9808_v3  ;;  %v9811_v53 = vld [vmem:[#allocation139_spill] sm:$0xff]  ;;  %v9812_v26 = vld [vmem:[#allocation188_spill] sm:$0xff]  ;;  %v9815_v55 = vld [vmem:[#allocation141_spill] sm:$0xff] }
 0x666   : > { %v3645_v42 = vmul.f32 %v9811_v53, %v9810_v33  ;;  %v3846_v56 = vld [vmem:[#allocation2 + $0x55] sm:$0xff]  ;;  %v3607_v4 = vadd.f32 %v3603_v7, %v3527_v39  ;;  %v3621_v52 = vadd.f32 %v3617_v13, %v3565_v8  ;;  %v9816_v31 = vld [vmem:[#allocation39_spill] sm:$0xff]  ;;  %v9817_v34 = vld [vmem:[#allocation142_spill] sm:$0xff] }
 0x667   : > { %v9813_v6 = vld [vmem:[#allocation140_spill] sm:$0xff]  ;;  %v3635_v60 = vadd.f32 %v3631_v62, %v3579_v48  ;;  %v3711_v47 = vmul.f32 %v9817_v34, %v9816_v31  ;;  %v9818_v59 = vld [vmem:[#allocation40_spill] sm:$0xff]  ;;  %v9819_v16 = vld [vmem:[#allocation143_spill] sm:$0xff] }
 0x668   : > { %v3683_v29 = vmul.f32 %v9813_v6, %v9812_v26  ;;  %v9814_v54 = vld [vmem:[#allocation81_spill] sm:$0xff]  ;;  %v3649_v1 = vadd.f32 %v3645_v42, %v3593_v35  ;;  %v3725_v25 = vmul.f32 %v9819_v16, %v9818_v59  ;;  %v5394_v9 = vld.sshfl [vmem:[#allocation5 + $0x11] sm:$0x1 pattern:$0x76325410]  ;;  %v9822_v38 = vld [vmem:[#allocation41_spill] sm:$0xff] }
 0x669   : > { %v3697_v61 = vmul.f32 %v9815_v55, %v9814_v54  ;;  %v3860_v2 = vld [vmem:[#allocation2 + $0x56] sm:$0xff]  ;;  %v9820_v41 = vld [vmem:[#allocation92_spill] sm:$0xff]  ;;  %4824 = vrot.lane.b32.xlu1 %v5394_v9, %s5693_s15  ;;  %v3715_v7 = vadd.f32 %v3711_v47, %v3635_v60  ;;  %v9827_v35 = vld [vmem:[#allocation35_spill] sm:$0xff] }
 0x66a   : > { %v3687_v22 = vadd.f32 %v3683_v29, %v3607_v4  ;;  %v9821_v23 = vld [vmem:[#allocation144_spill] sm:$0xff]  ;;  %v9823_v39 = vld [vmem:[#allocation146_spill] sm:$0xff]  ;;  %v3729_v46 = vadd.f32 %v3725_v25, %v3649_v1  ;;  %v9826_v13 = vld [vmem:[#allocation147_spill] sm:$0xff]  ;;  %v3865_v3 = vmul.f32 %v9827_v35, %v3860_v2 }
 0x66b   : > { %v3701_v24 = vadd.f32 %v3697_v61, %v3621_v52  ;;  %v3739_v44 = vmul.f32 %v9821_v23, %v9820_v41  ;;  %v3753_v8 = vmul.f32 %v9823_v39, %v9822_v38  ;;  %v9824_v40 = vld [vmem:[#allocation38_spill] sm:$0xff]  ;;  %v9828_v33 = vld [vmem:[#allocation90_spill] sm:$0xff]  ;;  %v9829_v53 = vld [vmem:[#allocation72_spill] sm:$0xff] }
 0x66c   : > { %v3851_v28 = vmul.f32 %v9824_v40, %v3846_v56  ;;  %v9825_v37 = vld [vmem:[#allocation26_spill] sm:$0xff]  ;;  %v3903_v42 = vmul.f32 %v9829_v53, %v9828_v33  ;;  %v9830_v52 = vld [vmem:[#allocation103_spill] sm:$0xff]  ;;  %v9831_v6 = vld [vmem:[#allocation66_spill] sm:$0xff] }
 0x66d   : > { %v3767_v48 = vmul.f32 %v9826_v13, %v9825_v37  ;;  %v3743_v45 = vadd.f32 %v3739_v44, %v3687_v22  ;;  %v3757_v62 = vadd.f32 %v3753_v8, %v3701_v24  ;;  %v3785_v26 = vadd.f32 %v9830_v52, %v3729_v46  ;;  %v9832_v29 = vld [vmem:[#allocation150_spill] sm:$0xff]  ;;  %v9833_v54 = vld [vmem:[#allocation115_spill] sm:$0xff]  ;;  %v9834_v55 = vld [vmem:[#allocation105_spill] sm:$0xff] }
 0x66e   : > { %v3917_v56 = vmul.f32 %v9832_v29, %v9831_v6  ;;  %v4025_v61 = vmul.f32 %v9834_v55, %v9833_v54  ;;  %v9835_v60 = vld [vmem:[#allocation104_spill] sm:$0xff]  ;;  %v9836_v31 = vld [vmem:[#allocation111_spill] sm:$0xff]  ;;  %v9837_v47 = vld [vmem:[#allocation67_spill] sm:$0xff] }
 0x66f   : > { %v3771_v4 = vadd.f32 %v3767_v48, %v3715_v7  ;;  %v3799_v1 = vadd.f32 %v9835_v60, %v3743_v45  ;;  %v3813_v34 = vadd.f32 %v9836_v31, %v3757_v62  ;;  %v9838_v2 = vld [vmem:[#allocation151_spill] sm:$0xff]  ;;  %v9839_v16 = vld [vmem:[#allocation70_spill] sm:$0xff]  ;;  %v9840_v25 = vld [vmem:[#allocation152_spill] sm:$0xff] }
 0x670   : > { %v3931_v59 = vmul.f32 %v9838_v2, %v9837_v47  ;;  %v3945_v9 = vmul.f32 %v9840_v25, %v9839_v16  ;;  %v5381_v22 = vld.sshfl [vmem:[#allocation5 + $0x2] sm:$0x1 pattern:$0x76325410]  ;;  %v9841_v24 = vld [vmem:[#allocation125_spill] sm:$0xff]  ;;  %v9843_v38 = vld [vmem:[#allocation71_spill] sm:$0xff] }
 0x671   : > { %v3827_v41 = vadd.f32 %v9841_v24, %v3771_v4  ;;  %v9842_v23 = vld [vmem:[#allocation129_spill] sm:$0xff]  ;;  %v9845_v40 = vld [vmem:[#allocation110_spill] sm:$0xff]  ;;  %4644 = vrot.lane.b32.xlu1 %v5381_v22, %s5694_s0  ;;  %v3855_v37 = vadd.f32 %v3851_v28, %v3799_v1  ;;  %v3869_v13 = vadd.f32 %v3865_v3, %v3813_v34  ;;  %v9847_v48 = vld [vmem:[#allocation98_spill] sm:$0xff] }
 0x672   : > { %v3841_v44 = vadd.f32 %v9842_v23, %v3785_v26  ;;  %v9844_v39 = vld [vmem:[#allocation153_spill] sm:$0xff]  ;;  %v9846_v7 = vld [vmem:[#allocation154_spill] sm:$0xff]  ;;  %v9848_v35 = vld [vmem:[#allocation155_spill] sm:$0xff] }
 0x673   : > { %v3959_v8 = vmul.f32 %v9844_v39, %v9843_v38  ;;  %v3973_v46 = vmul.f32 %v9846_v7, %v9845_v40  ;;  %v3987_v45 = vmul.f32 %v9848_v35, %v9847_v48  ;;  %v9849_v62 = vld [vmem:[#allocation73_spill] sm:$0xff]  ;;  %v9850_v33 = vld [vmem:[#allocation158_spill] sm:$0xff]  ;;  %v3907_v4 = vadd.f32 %v3903_v42, %v3827_v41  ;;  %v9851_v26 = vld [vmem:[#allocation74_spill] sm:$0xff] }
 0x674   : > { %v4039_v53 = vmul.f32 %v9850_v33, %v9849_v62  ;;  %v3921_v52 = vadd.f32 %v3917_v56, %v3841_v44  ;;  %v9852_v6 = vld [vmem:[#allocation159_spill] sm:$0xff]  ;;  %v9853_v54 = vld [vmem:[#allocation77_spill] sm:$0xff]  ;;  %v3935_v31 = vadd.f32 %v3931_v59, %v3855_v37  ;;  %v3949_v47 = vadd.f32 %v3945_v9, %v3869_v13  ;;  %v9856_v16 = vld [vmem:[#allocation161_spill] sm:$0xff] }
 0x675   : > { %v4053_v29 = vmul.f32 %v9852_v6, %v9851_v26  ;;  %v9854_v55 = vld [vmem:[#allocation160_spill] sm:$0xff]  ;;  %v9857_v3 = vld [vmem:[#allocation106_spill] sm:$0xff]  ;;  %v3963_v22 = vadd.f32 %v3959_v8, %v3907_v4  ;;  %v9859_v23 = vld [vmem:[#allocation96_spill] sm:$0xff]  ;;  %v4161_v9 = vmul.f32 %v9714_v19, %v8620_v27  ;;  %v4175_v38 = vmul.f32 %v9715_v58, %v8622_v18 }
 0x676   : > { %v4067_v60 = vmul.f32 %v9854_v55, %v9853_v54  ;;  %v9855_v2 = vld [vmem:[#allocation108_spill] sm:$0xff]  ;;  %v9858_v1 = vld [vmem:[#allocation162_spill] sm:$0xff]  ;;  %v3977_v24 = vadd.f32 %v3973_v46, %v3921_v52  ;;  %v4109_v42 = vmul.f32 %v9700_v0, %v9859_v23  ;;  %v3991_v44 = vadd.f32 %v3987_v45, %v3935_v31  ;;  %v9861_v8 = vld [vmem:[#allocation137_spill] sm:$0xff] }
 0x677   : > { %v4081_v28 = vmul.f32 %v9856_v16, %v9855_v2  ;;  %v4095_v34 = vmul.f32 %v9858_v1, %v9857_v3  ;;  %v5395_v25 = vld.sshfl [vmem:[#allocation5 + $0x12] sm:$0x1 pattern:$0x76325410]  ;;  %v4029_v59 = vadd.f32 %v4025_v61, %v3949_v47  ;;  %v4043_v39 = vadd.f32 %v4039_v53, %v3963_v22  ;;  %v9862_v7 = vld [vmem:[#allocation168_spill] sm:$0xff]  ;;  %v9864_v0 = vld [vmem:[#allocation169_spill] sm:$0xff] }
 0x678   : > { %v9860_v56 = vld [vmem:[#allocation84_spill] sm:$0xff]  ;;  %4837 = vrot.lane.b32.xlu1 %v5395_v25, %s5694_s0  ;;  %v4057_v40 = vadd.f32 %v4053_v29, %v3977_v24  ;;  %v4189_v46 = vmul.f32 %v9862_v7, %v9861_v8  ;;  %v9863_v37 = vld [vmem:[#allocation120_spill] sm:$0xff]  ;;  %v4071_v48 = vadd.f32 %v4067_v60, %v3991_v44  ;;  %v9865_v35 = vld [vmem:[#allocation78_spill] sm:$0xff]  ;;  %v4283_v53 = vmul.f32 %v9728_v14, %v8690_v36 }
 0x679   : > { %v4147_v41 = vmul.f32 %v9630_v20, %v9860_v56  ;;  %v4203_v13 = vmul.f32 %v9864_v0, %v9863_v37  ;;  %v4085_v20 = vadd.f32 %v4081_v28, %v4029_v59  ;;  %v4217_v45 = vmul.f32 %v9719_v50, %v9865_v35  ;;  %v9866_v61 = vld [vmem:[#allocation79_spill] sm:$0xff]  ;;  %v5382_v19 = vld.sshfl [vmem:[#allocation5 + $0x3] sm:$0x1 pattern:$0x76325410]  ;;  %v9868_v26 = vld [vmem:[#allocation163_spill] sm:$0xff] }
 0x67a   : > { %v4231_v62 = vmul.f32 %v9720_v57, %v9866_v61  ;;  %v4099_v27 = vadd.f32 %v4095_v34, %v4043_v39  ;;  %v4113_v33 = vadd.f32 %v4109_v42, %v4057_v40  ;;  %v9867_v58 = vld [vmem:[#allocation69_spill] sm:$0xff]  ;;  %v4297_v50 = vmul.f32 %v9729_v30, %v8692_v51  ;;  %v9869_v6 = vld [vmem:[#allocation175_spill] sm:$0xff]  ;;  %v9871_v60 = vld [vmem:[#allocation177_spill] sm:$0xff] }
 0x67b   : > { %v4269_v18 = vmul.f32 %v9740_v63, %v9867_v58  ;;  %v4151_v4 = vadd.f32 %v4147_v41, %v4071_v48  ;;  %v4165_v52 = vadd.f32 %v4161_v9, %v4085_v20  ;;  %v4311_v57 = vmul.f32 %v9869_v6, %v9868_v26  ;;  %v9870_v55 = vld [vmem:[#allocation80_spill] sm:$0xff]  ;;  %v9872_v63 = vld [vmem:[#allocation83_spill] sm:$0xff]  ;;  %v9873_v47 = vld [vmem:[#allocation178_spill] sm:$0xff] }
 0x67c   : > { %4658 = vrot.lane.b32.xlu1 %v5382_v19, %s5695_s20  ;;  %v4179_v29 = vadd.f32 %v4175_v38, %v4099_v27  ;;  %v4193_v54 = vadd.f32 %v4189_v46, %v4113_v33  ;;  %v4325_v31 = vmul.f32 %v9871_v60, %v9870_v55  ;;  %v4339_v2 = vmul.f32 %v9873_v47, %v9872_v63  ;;  %v9874_v16 = vld [vmem:[#allocation86_spill] sm:$0xff]  ;;  %v9876_v1 = vld [vmem:[#allocation145_spill] sm:$0xff]  ;;  %v9877_v34 = vld [vmem:[#allocation172_spill] sm:$0xff] }
 0x67d   : > { %v4207_v36 = vadd.f32 %v4203_v13, %v4151_v4  ;;  %v4221_v14 = vadd.f32 %v4217_v45, %v4165_v52  ;;  %v9875_v28 = vld [vmem:[#allocation179_spill] sm:$0xff]  ;;  %v4391_v25 = vmul.f32 %v9877_v34, %v9876_v1  ;;  %v5396_v30 = vld.sshfl [vmem:[#allocation5 + $0x13] sm:$0x1 pattern:$0x76325410]  ;;  %v4405_v24 = vmul.f32 %v9741_v10, %v8760_v43  ;;  %v9878_v44 = vld [vmem:[#allocation87_spill] sm:$0xff] }
 0x67e   : > { %v4353_v3 = vmul.f32 %v9875_v28, %v9874_v16  ;;  %v4235_v51 = vadd.f32 %v4231_v62, %v4179_v29  ;;  %v4273_v22 = vadd.f32 %v4269_v18, %v4193_v54  ;;  %v4419_v23 = vmul.f32 %v9742_v17, %v8762_v21  ;;  %v4522_v42 = vld [vmem:[#allocation4 + $0x21] sm:$0xff]  ;;  %v9881_v39 = vld [vmem:[#allocation184_spill] sm:$0xff]  ;;  %v4719_v0 = vld [vmem:[#allocation5 + $0x8] sm:$0x1] }
 0x67f   : > { %v4287_v56 = vadd.f32 %v4283_v53, %v4207_v36  ;;  %v4301_v41 = vadd.f32 %v4297_v50, %v4221_v14  ;;  %v9879_v59 = vld [vmem:[#allocation183_spill] sm:$0xff]  ;;  %v9880_v38 = vld [vmem:[#allocation101_spill] sm:$0xff]  ;;  %v4618_v37 = vld [vmem:[#allocation5] sm:$0x1]  ;;  %v4527_v58 = vmul.f32 %v9757_v12, %v4522_v42  ;;  %4720 = vst.msk [vmem:[#allocation3 + $0x2] sm:$0x1] %vm4619_vm14, %v4719_v0 }
 0x680   : > { %4850 = vrot.lane.b32.xlu1 %v5396_v30, %s5695_s20  ;;  %v4433_v9 = vmul.f32 %v9879_v59, %v9878_v44  ;;  %v4447_v40 = vmul.f32 %v9881_v39, %v9880_v38  ;;  %v4536_v8 = vld [vmem:[#allocation4 + $0x22] sm:$0xff]  ;;  %v4813_v10 = vld [vmem:[#allocation5 + $0x10] sm:$0x1]  ;;  %v4315_v43 = vadd.f32 %v4311_v57, %v4235_v51  ;;  %v4329_v13 = vadd.f32 %v4325_v31, %v4273_v22  ;;  %v9882_v17 = vld [vmem:[#allocation149_spill] sm:$0xff] }
 0x681   : > { %v4550_v7 = vld [vmem:[#allocation4 + $0x23] sm:$0xff]  ;;  %v9883_v21 = vld [vmem:[#allocation185_spill] sm:$0xff]  ;;  %v9884_v20 = vld [vmem:[#allocation164_spill] sm:$0xff]  ;;  %v4343_v61 = vadd.f32 %v4339_v2, %v4287_v56  ;;  %v4357_v62 = vadd.f32 %v4353_v3, %v4301_v41  ;;  %v4541_v52 = vmul.f32 %v9758_v32, %v4536_v8  ;;  %4620 = vst.msk [vmem:[#allocation3] sm:$0x1] %vm4619_vm14, %v4618_v37 }
 0x682   : > { %v4564_v46 = vld [vmem:[#allocation4 + $0x24] sm:$0xff]  ;;  %v4461_v48 = vmul.f32 %v9883_v21, %v9882_v17  ;;  %v9886_v19 = vld [vmem:[#allocation165_spill] sm:$0xff]  ;;  %v5383_v18 = vld.sshfl [vmem:[#allocation5 + $0x4] sm:$0x1 pattern:$0x76325410]  ;;  %v4395_v53 = vadd.f32 %v4391_v25, %v4315_v43  ;;  %v4409_v4 = vadd.f32 %v4405_v24, %v4329_v13  ;;  %v4555_v6 = vmul.f32 %v9759_v5, %v4550_v7 }
 0x683   : > { %v9885_v35 = vld [vmem:[#allocation186_spill] sm:$0xff]  ;;  %v9887_v27 = vld [vmem:[#allocation181_spill] sm:$0xff]  ;;  %v4423_v50 = vadd.f32 %v4419_v23, %v4343_v61  ;;  %v4437_v26 = vadd.f32 %v4433_v9, %v4357_v62  ;;  %v4569_v57 = vmul.f32 %v9760_v11, %v4564_v46  ;;  %4814 = vst.msk [vmem:[#allocation3 + $0x1] sm:$0x1] %vm4619_vm14, %v4813_v10 }
 0x684   : > { %v4475_v45 = vmul.f32 %v9885_v35, %v9884_v20  ;;  %v4513_v33 = vmul.f32 %v9887_v27, %v9886_v19  ;;  %4672 = vrot.lane.b32.xlu1 %v5383_v18, %s5696_s4  ;;  %v4578_v29 = vld [vmem:[#allocation4 + $0x25] sm:$0xff]  ;;  %v4451_v12 = vadd.f32 %v4447_v40, %v4395_v53  ;;  %v4465_v32 = vadd.f32 %v4461_v48, %v4409_v4  ;;  %v5397_v31 = vld.sshfl [vmem:[#allocation5 + $0x14] sm:$0x1 pattern:$0x76325410] }
 0x685   : > { %v4592_v54 = vld [vmem:[#allocation4 + $0x26] sm:$0xff]  ;;  %v4583_v2 = vmul.f32 %v9761_v49, %v4578_v29  ;;  %v5384_v3 = vld.sshfl [vmem:[#allocation5 + $0x5] sm:$0x1 pattern:$0x76325410] }
 0x686   : > { %v4479_v55 = vadd.f32 %v4475_v45, %v4423_v50  ;;  %v4517_v60 = vadd.f32 %v4513_v33, %v4437_v26  ;;  %v4531_v63 = vadd.f32 %v4527_v58, %v4451_v12  ;;  %v4545_v47 = vadd.f32 %v4541_v52, %v4465_v32  ;;  %v5398_v25 = vld.sshfl [vmem:[#allocation5 + $0x15] sm:$0x1 pattern:$0x76325410] }
 0x687   : > { %v4597_v5 = vmul.f32 %v9762_v15, %v4592_v54  ;;  %v5385_v49 = vld.sshfl [vmem:[#allocation5 + $0x6] sm:$0x1 pattern:$0x76325410] }
 0x688   : > { %4863 = vrot.lane.b32.xlu1 %v5397_v31, %s5696_s4  ;;  %v4559_v11 = vadd.f32 %v4555_v6, %v4479_v55  ;;  %v4573_v36 = vadd.f32 %v4569_v57, %v4517_v60  ;;  %v4587_v14 = vadd.f32 %v4583_v2, %v4531_v63  ;;  %v5399_v15 = vld.sshfl [vmem:[#allocation5 + $0x16] sm:$0x1 pattern:$0x76325410]  ;;  %v5006_v31 = vld [vmem:[%s9888_s8] sm:$0xff]  ;;  %v5009_v2 = vld [vmem:[%s9888_s8 + $0x18] sm:$0xff] }
 0x689   : > { %v4601_v16 = vadd.f32 %v4597_v5, %v4545_v47  ;;  %v5388_v22 = vld.sshfl [vmem:[#allocation5 + $0xa] sm:$0x1 pattern:$0x76325410]  ;;  %v5007_v63 = vld [vmem:[%s9888_s8 + $0x8] sm:$0xff]  ;;  %v5008_v47 = vld [vmem:[%s9888_s8 + $0x10] sm:$0xff] }
 0x68a   : > { %v4609_v28 = vadd.f32 %v4573_v36, %v4559_v11  ;;  %v5386_v24 = vld.sshfl [vmem:[#allocation5 + $0x7] sm:$0x1 pattern:$0x76325410]  ;;  %v5010_v5 = vld [vmem:[%s9888_s8 + $0x20] sm:$0xff]  ;;  %v5011_v11 = vld [vmem:[%s9888_s8 + $0x28] sm:$0xff] }
 0x68b   : > { %v4605_v1 = vadd.f32 %v4601_v16, %v4587_v14  ;;  %v5400_v23 = vld.sshfl [vmem:[#allocation5 + $0x17] sm:$0x1 pattern:$0x76325410]  ;;  %v5012_v36 = vld [vmem:[%s9888_s8 + $0x30] sm:$0xff]  ;;  %v5013_v14 = vld [vmem:[%s9888_s8 + $0x38] sm:$0xff] }
 0x68c   : > { %4686 = vrot.lane.b32.xlu1 %v5384_v3, %s5697_s28  ;;  %v5389_v56 = vld.sshfl [vmem:[#allocation5 + $0xb] sm:$0x1 pattern:$0x76325410]  ;;  %v5016_v3 = vld [vmem:[%s9888_s8 + $0x50] sm:$0xff] }
 0x68d   : > { %v4613_v34 = vadd.f32 %v4609_v28, %v4605_v1  ;;  %v5390_v44 = vld.sshfl [vmem:[#allocation5 + $0xc] sm:$0x1 pattern:$0x76325410]  ;;  %v5015_v28 = vld [vmem:[%s9888_s8 + $0x48] sm:$0xff] }
 0x68e   : > { %v5391_v9 = vld.sshfl [vmem:[#allocation5 + $0xd] sm:$0x1 pattern:$0x76325410] }
 0x68f   : > { %4617 = vst [vmem:[#allocation5 + $0x18] sm:$0xff] %v4613_v34  ;;  %v5392_v39 = vld.sshfl [vmem:[#allocation5 + $0xe] sm:$0x1 pattern:$0x76325410]  ;;  %v9889_v34 = vld [vmem:[#allocation32_spill] sm:$0xff] }
 0x690   : > { %4876 = vrot.lane.b32.xlu1 %v5398_v25, %s5697_s28  ;;  %v5393_v8 = vld.sshfl [vmem:[#allocation5 + $0xf] sm:$0x1 pattern:$0x76325410]  ;;  %v5022_v25 = vmul.f32 %v9889_v34, %v5006_v31 }
 0x691   : > { %v5014_v16 = vld [vmem:[%s9888_s8 + $0x40] sm:$0xff] }
 0x694   : > { %4700 = vrot.lane.b32.xlu1 %v5385_v49, %s5698_s27  ;;  %v5023_v49 = vmul.f32 %v9889_v34, %v5007_v63 }
 0x696   : > { %v5401_v30 = vld.sshfl [vmem:[#allocation5 + $0x19] sm:$0x1 pattern:$0x76325410]  ;;  %v4906_v51 = vld [vmem:[#allocation5 + $0x18] sm:$0x1] }
 0x697   : > { %4917 = vrot.lane.b32.xlu0 %v5401_v30, %s5693_s15  ;;  %4907 = vst.msk [vmem:[#allocation3 + $0x3] sm:$0x1] %vm4619_vm14, %v4906_v51  ;;  %v5402_v42 = vld.sshfl [vmem:[#allocation5 + $0x1a] sm:$0x1 pattern:$0x76325410] }
 0x698   : > { %4889 = vrot.lane.b32.xlu1 %v5399_v15, %s5698_s27  ;;  %v5403_v41 = vld.sshfl [vmem:[#allocation5 + $0x1b] sm:$0x1 pattern:$0x76325410]  ;;  %v9890_v15 = vld [vmem:[#allocation31_spill] sm:$0xff] }
 0x699   : > { %v5404_v59 = vld.sshfl [vmem:[#allocation5 + $0x1c] sm:$0x1 pattern:$0x76325410]  ;;  %v5024_v30 = vmul.f32 %v9890_v15, %v5008_v47  ;;  %v5025_v51 = vmul.f32 %v9890_v15, %v5009_v2 }
 0x69a   : > { %v5405_v38 = vld.sshfl [vmem:[#allocation5 + $0x1d] sm:$0x1 pattern:$0x76325410] }
 0x69b   : > { %4743 = vrot.lane.b32.xlu0 %v5388_v22, %s5694_s0  ;;  %v5406_v40 = vld.sshfl [vmem:[#allocation5 + $0x1e] sm:$0x1 pattern:$0x76325410]  ;;  %v5017_v22 = vld [vmem:[%s9888_s8 + $0x58] sm:$0xff] }
 0x69c   : > { %4714 = vrot.lane.b32.xlu1 %v5386_v24, %s5699_s6  ;;  %v5407_v7 = vld.sshfl [vmem:[#allocation5 + $0x1f] sm:$0x1 pattern:$0x76325410]  ;;  %v5018_v24 = vld [vmem:[%s9888_s8 + $0x60] sm:$0xff] }
 0x69f   : > { %4930 = vrot.lane.b32.xlu0 %v5402_v42, %s5694_s0 }
 0x6a0   : > { %4902 = vrot.lane.b32.xlu1 %v5400_v23, %s5699_s6  ;;  %v9891_v23 = vld [vmem:[#allocation36_spill] sm:$0xff] }
 0x6a1   : > { %v5026_v42 = vmul.f32 %v9891_v23, %v5010_v5 }
 0x6a3   : > { %4756 = vrot.lane.b32.xlu0 %v5389_v56, %s5695_s20  ;;  %v5027_v56 = vmul.f32 %v9891_v23, %v5011_v11 }
 0x6a7   : > { %4943 = vrot.lane.b32.xlu0 %v5403_v41, %s5695_s20  ;;  %v9892_v41 = vld [vmem:[#allocation30_spill] sm:$0xff] }
 0x6ab   : > { %4769 = vrot.lane.b32.xlu0 %v5390_v44, %s5696_s4  ;;  %v5028_v44 = vmul.f32 %v9892_v41, %v5012_v36 }
 0x6af   : > { %4956 = vrot.lane.b32.xlu0 %v5404_v59, %s5696_s4  ;;  %v5019_v59 = vld [vmem:[%s9888_s8 + $0x68] sm:$0xff] }
 0x6b3   : > { %4782 = vrot.lane.b32.xlu0 %v5391_v9, %s5697_s28  ;;  %v5020_v9 = vld [vmem:[%s9888_s8 + $0x70] sm:$0xff] }
 0x6b7   : > { %4969 = vrot.lane.b32.xlu0 %v5405_v38, %s5697_s28  ;;  %v5021_v38 = vld [vmem:[%s9888_s8 + $0x78] sm:$0xff] }
 0x6bb   : > { %4795 = vrot.lane.b32.xlu0 %v5392_v39, %s5698_s27  ;;  %v9893_v39 = vld [vmem:[#allocation29_spill] sm:$0xff] }
 0x6bf   : > { %4982 = vrot.lane.b32.xlu0 %v5406_v40, %s5698_s27 }
 0x6c3   : > { %4808 = vrot.lane.b32.xlu0 %v5393_v8, %s5699_s6  ;;  %v5029_v8 = vmul.f32 %v9892_v41, %v5013_v14 }
 0x6c7   : > { %4995 = vrot.lane.b32.xlu0 %v5407_v7, %s5699_s6  ;;  %v9894_v7 = vld [vmem:[#allocation34_spill] sm:$0xff] }
 0x6d3   : > { %v4631_v46 = vpop.permute.xlu1 %4630 }
 0x6d4   : > { %4634 = vst.msk [vmem:[#allocation3] sm:$0x1] %vm4633_vm15, %v4631_v46  ;;  %v5030_v46 = vmul.f32 %v9894_v7, %v5014_v16 }
 0x6d6   : > { %v4731_v37 = vpop.permute.xlu0 %4730 }
 0x6d7   : > { %4733 = vst.msk [vmem:[#allocation3 + $0x2] sm:$0x1] %vm4633_vm15, %v4731_v37  ;;  %v5031_v37 = vmul.f32 %v9894_v7, %v5015_v28 }
 0x6db   : > { %v4825_v0 = vpop.permute.xlu1 %4824 }
 0x6dc   : > { %4827 = vst.msk [vmem:[#allocation3 + $0x1] sm:$0x1] %vm4633_vm15, %v4825_v0  ;;  %v9896_v0 = vld [vmem:[#allocation33_spill] sm:$0xff] }
 0x6e3   : > { %v4645_v10 = vpop.permute.xlu1 %4644 }
 0x6e4   : > { %4648 = vst.msk [vmem:[#allocation3] sm:$0x1] %vm4647_vm0, %v4645_v10  ;;  %v5032_v10 = vmul.f32 %v9896_v0, %v5016_v3 }
 0x6ea   : > { %v4838_v43 = vpop.permute.xlu1 %4837 }
 0x6eb   : > { %4840 = vst.msk [vmem:[#allocation3 + $0x1] sm:$0x1] %vm4647_vm0, %v4838_v43  ;;  %v5033_v43 = vmul.f32 %v9896_v0, %v5017_v22 }
 0x6ee   : > { %v4659_v13 = vpop.permute.xlu1 %4658 }
 0x6ef   : > { %4662 = vst.msk [vmem:[#allocation3] sm:$0x1] %vm4661_vm1, %v4659_v13 }
 0x6f2   : > { %v4851_v17 = vpop.permute.xlu1 %4850 }
 0x6f3   : > { %4853 = vst.msk [vmem:[#allocation3 + $0x1] sm:$0x1] %vm4661_vm1, %v4851_v17  ;;  %v9897_v17 = vld [vmem:[#allocation28_spill] sm:$0xff] }
 0x6f6   : > { %v4673_v21 = vpop.permute.xlu1 %4672 }
 0x6f7   : > { %4676 = vst.msk [vmem:[#allocation3] sm:$0x1] %vm4675_vm2, %v4673_v21 }
 0x6fa   : > { %v4864_v48 = vpop.permute.xlu1 %4863 }
 0x6fb   : > { %4866 = vst.msk [vmem:[#allocation3 + $0x1] sm:$0x1] %vm4675_vm2, %v4864_v48  ;;  %v9899_v48 = vld [vmem:[#allocation27_spill] sm:$0xff] }
 0x6fe   : > { %v4687_v20 = vpop.permute.xlu1 %4686 }
 0x6ff   : > { %4690 = vst.msk [vmem:[#allocation3] sm:$0x1] %vm4689_vm3, %v4687_v20 }
 0x702   : > { %v4877_v35 = vpop.permute.xlu1 %4876 }
 0x703   : > { %4879 = vst.msk [vmem:[#allocation3 + $0x1] sm:$0x1] %vm4689_vm3, %v4877_v35  ;;  %v9900_v35 = vld [vmem:[#allocation42_spill] sm:$0xff] }
 0x706   : > { %v4701_v45 = vpop.permute.xlu1 %4700 }
 0x707   : > { %4704 = vst.msk [vmem:[#allocation3] sm:$0x1] %vm4703_vm4, %v4701_v45  ;;  %v5034_v45 = vmul.f32 %v9900_v35, %v5018_v24 }
 0x709   : > { %v4918_v61 = vpop.permute.xlu0 %4917 }
 0x70a   : > { %v4890_v62 = vpop.permute.xlu1 %4889  ;;  %4920 = vst.msk [vmem:[#allocation3 + $0x3] sm:$0x1] %vm4633_vm15, %v4918_v61  ;;  %v5035_v61 = vmul.f32 %v9900_v35, %v5019_v59 }
 0x70b   : > { %4892 = vst.msk [vmem:[#allocation3 + $0x1] sm:$0x1] %vm4703_vm4, %v4890_v62  ;;  %v9901_v62 = vld [vmem:[#allocation37_spill] sm:$0xff] }
 0x70d   : > { %v4744_v19 = vpop.permute.xlu0 %4743 }
 0x70e   : > { %v4715_v27 = vpop.permute.xlu1 %4714  ;;  %4746 = vst.msk [vmem:[#allocation3 + $0x2] sm:$0x1] %vm4647_vm0, %v4744_v19  ;;  %v5036_v19 = vmul.f32 %v9901_v62, %v5020_v9 }
 0x70f   : > { %4718 = vst.msk [vmem:[#allocation3] sm:$0x1] %vm4717_vm5, %v4715_v27  ;;  %v5037_v27 = vmul.f32 %v9901_v62, %v5021_v38 }
 0x711   : > { %v4931_v33 = vpop.permute.xlu0 %4930 }
 0x712   : > { %v4903_v58 = vpop.permute.xlu1 %4902  ;;  %4933 = vst.msk [vmem:[#allocation3 + $0x3] sm:$0x1] %vm4647_vm0, %v4931_v33 }
 0x713   : > { %4905 = vst.msk [vmem:[#allocation3 + $0x1] sm:$0x1] %vm4717_vm5, %v4903_v58 }
 0x715   : > { %v4757_v18 = vpop.permute.xlu0 %4756 }
 0x716   : > { %4759 = vst.msk [vmem:[#allocation3 + $0x2] sm:$0x1] %vm4661_vm1, %v4757_v18 }
 0x719   : > { %v4944_v53 = vpop.permute.xlu0 %4943 }
 0x71a   : > { %4946 = vst.msk [vmem:[#allocation3 + $0x3] sm:$0x1] %vm4661_vm1, %v4944_v53 }
 0x71d   : > { %v4770_v4 = vpop.permute.xlu0 %4769 }
 0x71e   : > { %4772 = vst.msk [vmem:[#allocation3 + $0x2] sm:$0x1] %vm4675_vm2, %v4770_v4 }
 0x721   : > { %v4957_v52 = vpop.permute.xlu0 %4956 }
 0x722   : > { %4959 = vst.msk [vmem:[#allocation3 + $0x3] sm:$0x1] %vm4675_vm2, %v4957_v52 }
 0x725   : > { %v4783_v50 = vpop.permute.xlu0 %4782 }
 0x726   : > { %4785 = vst.msk [vmem:[#allocation3 + $0x2] sm:$0x1] %vm4689_vm3, %v4783_v50 }
 0x729   : > { %v4970_v26 = vpop.permute.xlu0 %4969 }
 0x72a   : > { %4972 = vst.msk [vmem:[#allocation3 + $0x3] sm:$0x1] %vm4689_vm3, %v4970_v26 }
 0x72d   : > { %v4796_v6 = vpop.permute.xlu0 %4795 }
 0x72e   : > { %4798 = vst.msk [vmem:[#allocation3 + $0x2] sm:$0x1] %vm4703_vm4, %v4796_v6 }
 0x731   : > { %v4983_v57 = vpop.permute.xlu0 %4982 }
 0x732   : > { %4985 = vst.msk [vmem:[#allocation3 + $0x3] sm:$0x1] %vm4703_vm4, %v4983_v57 }
 0x735   : > { %v4809_v29 = vpop.permute.xlu0 %4808 }
 0x736   : > { %4811 = vst.msk [vmem:[#allocation3 + $0x2] sm:$0x1] %vm4717_vm5, %v4809_v29 }
 0x739   : > { %v4996_v54 = vpop.permute.xlu0 %4995 }
 0x73a   : > { %4998 = vst.msk [vmem:[#allocation3 + $0x3] sm:$0x1] %vm4717_vm5, %v4996_v54 }
 0x741   : > { %v4999_v12 = vld [vmem:[#allocation3] sm:$0xf] }
 0x742   : > { %v5408_v32 = vmul.f32 -1.442695, %v4999_v12 }
 0x744   : > { %5538 = vpow2.f32 %v5408_v32 }
 0x751   : > { %v5539_v55 = vpop.eup %5538 }
 0x752   : > { %v5003_v60 = vadd.f32 1.0, %v5539_v55 }
 0x754   : > { %5540 = vrcp.f32 %v5003_v60 }
 0x761   : > { %v5541_v1 = vpop.eup %5540 }
 0x762   : > { %v5045_v40 = vrot.slane %v5541_v1, %v9893_v39 }
 0x764   : > { %v5046_v13 = vcombine.high %v5045_v40, %v5045_v40  ;;  %v5050_v21 = vrot.slane %v5045_v40, %v9897_v17  ;;  %v5054_v20 = vrot.slane %v5045_v40, %v9899_v48 }
 0x766   : > { %v5058_v33 = vrot.slane %v5046_v13, %v9897_v17  ;;  %v5062_v58 = vrot.slane %v5046_v13, %v9899_v48  ;;  %v5067_v18 = vmul.f32 %v5050_v21, %v5022_v25  ;;  %v5068_v53 = vmul.f32 %v5054_v20, %v5023_v49 }
 0x767   : > { %v5069_v4 = vmul.f32 %v5050_v21, %v5024_v30  ;;  %v5070_v52 = vmul.f32 %v5054_v20, %v5025_v51  ;;  %v5071_v50 = vmul.f32 %v5050_v21, %v5026_v42  ;;  %v5072_v26 = vmul.f32 %v5054_v20, %v5027_v56 }
 0x768   : > { %v5073_v6 = vmul.f32 %v5050_v21, %v5028_v44  ;;  %v5074_v57 = vmul.f32 %v5054_v20, %v5029_v8  ;;  %v5075_v29 = vmul.f32 %v5058_v33, %v5030_v46  ;;  %v5076_v54 = vmul.f32 %v5062_v58, %v5031_v37  ;;  %5083 = vst [vmem:[%s230_s7] sm:$0xff] %v5067_v18 }
 0x769   : > { %5084 = vst [vmem:[%s230_s7 + $0x8] sm:$0xff] %v5068_v53  ;;  %v5077_v12 = vmul.f32 %v5058_v33, %v5032_v10  ;;  %v5078_v32 = vmul.f32 %v5062_v58, %v5033_v43  ;;  %v5079_v55 = vmul.f32 %v5058_v33, %v5034_v45  ;;  %v5080_v60 = vmul.f32 %v5062_v58, %v5035_v61 }
 0x76a   : > { %5085 = vst [vmem:[%s230_s7 + $0x10] sm:$0xff] %v5069_v4  ;;  %5086 = vst [vmem:[%s230_s7 + $0x18] sm:$0xff] %v5070_v52  ;;  %v5081_v31 = vmul.f32 %v5058_v33, %v5036_v19  ;;  %v5082_v63 = vmul.f32 %v5062_v58, %v5037_v27 }
 0x76b   : > { %5087 = vst [vmem:[%s230_s7 + $0x20] sm:$0xff] %v5071_v50  ;;  %5088 = vst [vmem:[%s230_s7 + $0x28] sm:$0xff] %v5072_v26 }
 0x76c   : > { %5089 = vst [vmem:[%s230_s7 + $0x30] sm:$0xff] %v5073_v6  ;;  %5090 = vst [vmem:[%s230_s7 + $0x38] sm:$0xff] %v5074_v57 }
 0x76d   : > { %5091 = vst [vmem:[%s230_s7 + $0x40] sm:$0xff] %v5075_v29  ;;  %5092 = vst [vmem:[%s230_s7 + $0x48] sm:$0xff] %v5076_v54 }
 0x76e   : > { %5093 = vst [vmem:[%s230_s7 + $0x50] sm:$0xff] %v5077_v12  ;;  %5094 = vst [vmem:[%s230_s7 + $0x58] sm:$0xff] %v5078_v32 }
 0x76f   : > { %5095 = vst [vmem:[%s230_s7 + $0x60] sm:$0xff] %v5079_v55  ;;  %5096 = vst [vmem:[%s230_s7 + $0x68] sm:$0xff] %v5080_v60 }
 0x770   : > { %5097 = vst [vmem:[%s230_s7 + $0x70] sm:$0xff] %v5081_v31  ;;  %5098 = vst [vmem:[%s230_s7 + $0x78] sm:$0xff] %v5082_v63 }
 0x771   : > { %5614 = shalt.err (!%p5611_p1)
}
 0x772   : > { %s5615_s26 = scalar_lea.hbm %s9069_s30, 2048  ;;  %s5619_s24 = scalar_lea.hbm %s9903_s1, 4096 }
 0x773   : > { %p5616_p4 = scmp.ne.s32.totalorder %s9069_s30, %s5615_s26  ;;  %p5620_p6 = scmp.lt.s32.totalorder %s9069_s30, %s9903_s1 }
 0x774   : > { %p5621_p13 = scmp.lt.s32.totalorder %s5619_s24, %s5615_s26 }
 0x775   : > { %p5617_p11 = pnand %p5616_p4, %p9905_p0 }
 0x776   : > { %p5622_p3 = por %p5621_p13, %p5620_p6 }
 0x777   : > { %p5618_p5 = pneg %p5617_p11 }
 0x779   : > { %p5623_p12 = pnand %p5622_p3, %p5618_p5 }
 0x77b   : > { %5626 = shalt.err (!%p5623_p12)
}
 0x77c   : > { %s5701_s18 = smov 256  }
 0x77d   : > { %5425 = dma.vmem_to_hbm [thread:$0]  (%p9905_p0), %s9071_s12, 2048, %s9069_s30, %s5100_s29, %s5701_s18, %s5701_s18, %s5693_s15  }
 0x77e PF: > { %s9906_s0 = sld [smem:[#allocation15_spill]] }
 0x77f   : > { %s9907_s20 = sld [smem:[#allocation23_spill]] }
 0x780   : > { %s9908_s4 = sld [smem:[#allocation18_spill]] }
 0x784   : > { %s5129_s28 = sand.u32 1, %s9906_s0  }
 0x785   : > { %p9909_p2 = scmp.ne.s32.totalorder %s9907_s20, 0  ;;  %s5130_s27 = scalar_lea.sflag [#allocation8], %s5129_s28 }
 0x786   : > { %p9910_p7 = scmp.ge.s32.totalorder %s9908_s4, 2 }
 0x788   : > { %p5436_p8 = pnand %p9910_p7, %p9909_p2 }
 0x78a   : > { %p5437_p9 = pneg %p5436_p8 }
 0x78c   : > { %5652 = dma.done.wait (%p5437_p9), %s5130_s27, 2048  }
 0x78d   : > { %5654 = vsyncadd (%p5437_p9), %s5130_s27, 4294965248  ;;  %s9911_s18 = sld [smem:[#allocation20_spill]] }
 0x78e   : > { %s9912_s15 = sld [smem:[#allocation16_spill]] }
 0x78f   : > { %s9913_s16 = sld [smem:[#allocation17_spill]] }
 0x790   : > { %s9914_s17 = sld [smem:[#allocation21_spill]] }
 0x793   : > { %p18_p10 = scmp.ge.s32.totalorder %s9911_s18, 4  }
 0x795   :  { %20 = sbr.rel (!%p18_p10) target bundleno = 12 (0xc), region = 91 }
 0x79a   :  { %5135 = vsyncpa [#allocation7], 1 }
 0x79b   :  { %5137 = vsyncpa [#allocation7 + $0x1], 1 }
 0x79c   :  { %5138 = vsyncpa [#allocation8], 1 }
 0x79d   :  { %5140 = vsyncpa [#allocation8 + $0x1], 1 }
 0x79e   :  { %5141 = vsyncpa [#allocation9], 1 }
 0x79f   :  { %5143 = vsyncpa [#allocation9 + $0x1], 1 }

</bundles_post_ra>
